<compile_context>
chip_gen: v7x
topology: tpu7x:2x2x1
jax: 0.10.0
libtpu: 0.0.40
codegen_flags: <defaults>
</compile_context>

<pallas_src>
import functools

import jax
import jax.numpy as jnp
from jax.experimental import pallas as pl
from jax.experimental.pallas import tpu as pltpu


def _dncnn_fused_kernel(x_ref, wh_ref, sh_ref, wl_ref, o_ref, act_ref, *,
                        H, W, F, n_hidden, co_pad):
    """Whole DnCNN forward for one image (one grid step).

    x_ref:   (1, H, W, F)          bf16 input, channels zero-padded C -> F
    wh_ref:  (n_hidden, 3, 3F, F)  bf16 hidden conv weights (BN scale folded),
                                   laid out [layer, dx, dy*F + cin, cout]
    sh_ref:  (n_hidden, 1, F)      f32 per-channel shift (zeros for layer 0)
    wl_ref:  (3, 3F, co_pad)       bf16 last conv weights (cout zero-padded)
    o_ref:   (1, co_pad, H*W)      f32 output, channel-major (lane-dense store)
    act_ref: (2, H+2, W+2, F)      bf16 ping-pong zero-padded activations (VMEM)
    """
    HW = H * W

    # Zero both padded buffers once (borders must stay zero), then place the input.
    act_ref[...] = jnp.zeros_like(act_ref)
    act_ref[0, 1:H + 1, 1:W + 1, :] = x_ref[0]

    def make_lhs(cur, dx):
        # Column slab for horizontal tap dx (only dx=1,2 cost a sublane shift).
        col = act_ref[cur, :, dx:dx + W, :]                       # (H+2, W, F)
        # Fold the 3 vertical taps into K: leading-dim slices are free.
        lhs = jnp.concatenate([col[0:H], col[1:H + 1], col[2:H + 2]], axis=-1)
        return lhs.reshape(HW, 3 * F)                             # (H*W, 3F) bf16

    # Hidden layers: conv3x3(pad=1, no bias) [+ folded-BN shift] + ReLU.
    for l in range(n_hidden):
        cur, nxt = l % 2, (l + 1) % 2
        acc = jnp.zeros((HW, F), jnp.float32)
        for dx in range(3):
            acc += jnp.dot(make_lhs(cur, dx), wh_ref[l, dx],
                           preferred_element_type=jnp.float32)
        y = jnp.maximum(acc + sh_ref[l], 0.0)                     # f32 affine + ReLU
        act_ref[nxt, 1:H + 1, 1:W + 1, :] = (
            y.reshape(H, W, F).astype(jnp.bfloat16))

    # Last layer: conv3x3(F -> co_pad), no BN, no ReLU.
    cur = n_hidden % 2
    acc = jnp.zeros((HW, co_pad), jnp.float32)
    for dx in range(3):
        acc += jnp.dot(make_lhs(cur, dx), wl_ref[dx],
                       preferred_element_type=jnp.float32)
    # Transpose so the single HBM store is lane-dense (last dim = H*W) and the
    # result is already channel-major (NCHW) for the wrapper.
    o_ref[0] = jnp.transpose(acc)


@jax.jit
def dncnn_forward(x_nchw, packed):
    """DnCNN forward. Input NCHW, output NCHW (PyTorch convention)."""
    w_hidden, shift, w_last = packed
    N, C, H, W = x_nchw.shape
    n_hidden, _, _, F = w_hidden.shape
    co_pad = w_last.shape[-1]

    # One-time preprocessing of the (tiny) network input: NCHW -> NHWC,
    # zero-pad channels C -> F, cast to bf16.  No per-layer host-side padding.
    x = jnp.transpose(x_nchw, (0, 2, 3, 1))
    x = jnp.pad(x, ((0, 0), (0, 0), (0, 0), (0, F - C))).astype(jnp.bfloat16)

    kern = functools.partial(_dncnn_fused_kernel, H=H, W=W, F=F,
                             n_hidden=n_hidden, co_pad=co_pad)
    out = pl.pallas_call(
        kern,
        out_shape=jax.ShapeDtypeStruct((N, co_pad, H * W), jnp.float32),
        grid=(N,),
        in_specs=[
            pl.BlockSpec((1, H, W, F), lambda n: (n, 0, 0, 0)),
            pl.BlockSpec(w_hidden.shape, lambda n: (0, 0, 0, 0)),
            pl.BlockSpec(shift.shape, lambda n: (0, 0, 0)),
            pl.BlockSpec(w_last.shape, lambda n: (0, 0, 0)),
        ],
        out_specs=pl.BlockSpec((1, co_pad, H * W), lambda n: (n, 0, 0)),
        scratch_shapes=[pltpu.VMEM((2, H + 2, W + 2, F), jnp.bfloat16)],
        compiler_params=pltpu.CompilerParams(
            dimension_semantics=("parallel",)),
    )(x, w_hidden, shift, w_last)

    return out[:, :C, :].reshape(N, C, H, W)          # already channel-major


def init_dncnn_params(key, num_of_channel=1, features=32, num_of_layers=6,
                      eps=1e-5):
    """Deterministic synthetic parameters matching DnCNN.__init__ shapes.

    Conv weights are HWIO (3, 3, cin, cout); BN (inference) is a per-channel
    (scale, shift). Returns a list of per-layer dicts {w, scale, shift, relu}.
    """
    def conv_w(k, cin, cout):
        std = 1.0 / jnp.sqrt(9.0 * cin)
        return std * jax.random.normal(k, (3, 3, cin, cout), jnp.float32)

    keys = jax.random.split(key, 3 * num_of_layers)

    params = [dict(w=conv_w(keys[0], num_of_channel, features),
                   scale=jnp.ones((features,), jnp.float32),
                   shift=jnp.zeros((features,), jnp.float32),
                   relu=True)]
    for i in range(num_of_layers - 2):
        kw, kg, kb = keys[3 * i + 1], keys[3 * i + 2], keys[3 * i + 3]
        gamma = 1.0 + 0.1 * jax.random.normal(kg, (features,), jnp.float32)
        beta = 0.1 * jax.random.normal(kb, (features,), jnp.float32)
        running_mean = jnp.zeros((features,), jnp.float32)
        running_var = jnp.ones((features,), jnp.float32)
        scale = gamma / jnp.sqrt(running_var + eps)
        shift = beta - running_mean * scale
        params.append(dict(w=conv_w(kw, features, features),
                           scale=scale, shift=shift, relu=True))
    params.append(dict(w=conv_w(keys[-1], features, num_of_channel),
                       scale=jnp.ones((num_of_channel,), jnp.float32),
                       shift=jnp.zeros((num_of_channel,), jnp.float32),
                       relu=False))
    return params


def pack_dncnn_params(raw_params, features, co_pad):
    """Fold BN scale into weights and reorder to the fused-kernel layout.

    Hidden layers: weight -> (3, 3F, F) indexed [dx, dy*F + cin, cout], stacked
    over layers, cast to bf16; per-channel f32 shift kept separately.
    Last layer: weight -> (3, 3F, co_pad) with cout zero-padded, bf16.
    """
    F = features
    hidden, last = raw_params[:-1], raw_params[-1]
    w_blocks, shifts = [], []
    for p in hidden:
        w = p["w"]                                        # (3, 3, cin, F) HWIO
        cin = w.shape[2]
        if cin < F:                                       # first layer: pad cin -> F
            w = jnp.pad(w, ((0, 0), (0, 0), (0, F - cin), (0, 0)))
        w = w * p["scale"][None, None, None, :]           # fold BN scale
        w_blocks.append(jnp.transpose(w, (1, 0, 2, 3)).reshape(3, 3 * F, F))
        shifts.append(p["shift"].reshape(1, F))
    w_hidden = jnp.stack(w_blocks).astype(jnp.bfloat16)   # (L-1, 3, 3F, F)
    shift = jnp.stack(shifts).astype(jnp.float32)         # (L-1, 1, F)

    wl = jnp.transpose(last["w"], (1, 0, 2, 3)).reshape(3, 3 * F, -1)
    c_out = wl.shape[-1]
    w_last = jnp.pad(wl, ((0, 0), (0, 0), (0, co_pad - c_out))).astype(jnp.bfloat16)
    return w_hidden, shift, w_last


def dncnn_reference(x_nchw, raw_params):
    """Pure-JAX f32 reference (lax.conv) used only for validation."""
    x = jnp.transpose(x_nchw, (0, 2, 3, 1))
    for p in raw_params:
        y = jax.lax.conv_general_dilated(
            x, p["w"], window_strides=(1, 1), padding="SAME",
            dimension_numbers=("NHWC", "HWIO", "NHWC"))
        y = y * p["scale"] + p["shift"]
        if p["relu"]:
            y = jnp.maximum(y, 0.0)
        x = y
    return jnp.transpose(x, (0, 3, 1, 2))


if __name__ == "__main__":
    key = jax.random.PRNGKey(0)
    k_x, k_p = jax.random.split(key)

    # Small shapes consistent with DnCNN(num_of_channel=1): N=2, C=1, H=W=16.
    N, C, H, W = 2, 1, 16, 16
    FEATURES, NUM_LAYERS = 32, 6
    CO_PAD = max(8, -(-C // 8) * 8)       # pad last-layer cout up (lane/sublane friendly)

    x = jax.random.normal(k_x, (N, C, H, W), jnp.float32)
    raw_params = init_dncnn_params(k_p, num_of_channel=C, features=FEATURES,
                                   num_of_layers=NUM_LAYERS)
    packed = pack_dncnn_params(raw_params, FEATURES, CO_PAD)

    out = jax.block_until_ready(dncnn_forward(x, packed))
    assert out.shape == (N, C, H, W), out.shape
    assert bool(jnp.all(jnp.isfinite(out)))

    # Validate against an f32 reference; tolerance is loose because the fused
    # kernel runs activations/weights through the MXU in bf16.
    ref = dncnn_reference(x, raw_params)
    max_err = float(jnp.max(jnp.abs(out - ref)))
    assert max_err < 0.2, f"max abs err vs f32 reference: {max_err}"
    print("KERNEL_OK")
</pallas_src>

<mosaic_0001>
module attributes {stable_mosaic.version = 11 : i64} {
  func.func @_dncnn_fused_kernel(%arg0: i32, %arg1: memref<1x16x16x32xbf16, #tpu.memory_space<vmem>>, %arg2: memref<5x3x96x32xbf16, #tpu.memory_space<vmem>>, %arg3: memref<5x1x32xf32, #tpu.memory_space<vmem>>, %arg4: memref<3x96x8xbf16, #tpu.memory_space<vmem>>, %arg5: memref<1x8x256xf32, #tpu.memory_space<vmem>>, %arg6: memref<2x18x18x32xbf16, #tpu.memory_space<vmem>>) attributes {dimension_semantics = [#tpu.dimension_semantics<parallel>], iteration_bounds = array<i64: 2>, scalar_prefetch = 0 : i64, scratch_operands = 1 : i64, tpu.core_type = #tpu.core_type<tc>, window_params = [{transform_indices = @transform_0, window_bounds = array<i64: 1, 16, 16, 32>}, {pipeline_mode = #tpu.pipeline_mode<synchronous>, transform_indices = @transform_1, window_bounds = array<i64: 5, 3, 96, 32>}, {pipeline_mode = #tpu.pipeline_mode<synchronous>, transform_indices = @transform_2, window_bounds = array<i64: 5, 1, 32>}, {pipeline_mode = #tpu.pipeline_mode<synchronous>, transform_indices = @transform_3, window_bounds = array<i64: 3, 96, 8>}, {transform_indices = @transform_4, window_bounds = array<i64: 1, 8, 256>}]} {
    %cst = arith.constant 0.000000e+00 : bf16
    %0 = vector.broadcast %cst : bf16 to vector<2x18x18x32xbf16>
    %c0 = arith.constant 0 : index
    %c0_0 = arith.constant 0 : index
    %c0_1 = arith.constant 0 : index
    %c0_2 = arith.constant 0 : index
    %1 = vector.load %arg6[%c0, %c0_0, %c0_1, %c0_2] : memref<2x18x18x32xbf16, #tpu.memory_space<vmem>>, vector<2x18x18x32xbf16>
    tpu.vector_store %arg6[%c0, %c0_0, %c0_1, %c0_2], %0 {strides = array<i32>} : memref<2x18x18x32xbf16, #tpu.memory_space<vmem>>, vector<2x18x18x32xbf16>,
    %c0_3 = arith.constant 0 : index
    %c0_4 = arith.constant 0 : index
    %c0_5 = arith.constant 0 : index
    %c0_6 = arith.constant 0 : index
    %2 = vector.load %arg1[%c0_3, %c0_4, %c0_5, %c0_6] : memref<1x16x16x32xbf16, #tpu.memory_space<vmem>>, vector<1x16x16x32xbf16>
    %3 = vector.shape_cast %2 : vector<1x16x16x32xbf16> to vector<16x16x32xbf16>
    %c0_7 = arith.constant 0 : index
    %c1 = arith.constant 1 : index
    %c1_8 = arith.constant 1 : index
    %c0_9 = arith.constant 0 : index
    %4 = vector.load %arg6[%c0_7, %c1, %c1_8, %c0_9] : memref<2x18x18x32xbf16, #tpu.memory_space<vmem>>, vector<1x16x16x32xbf16>
    %5 = vector.shape_cast %4 : vector<1x16x16x32xbf16> to vector<16x16x32xbf16>
    %6 = vector.shape_cast %3 : vector<16x16x32xbf16> to vector<1x16x16x32xbf16>
    tpu.vector_store %arg6[%c0_7, %c1, %c1_8, %c0_9], %6 {strides = array<i32>} : memref<2x18x18x32xbf16, #tpu.memory_space<vmem>>, vector<1x16x16x32xbf16>,
    %cst_10 = arith.constant 0.000000e+00 : f32
    %7 = vector.broadcast %cst_10 : f32 to vector<256x32xf32>
    %c0_11 = arith.constant 0 : index
    %c0_12 = arith.constant 0 : index
    %c0_13 = arith.constant 0 : index
    %c0_14 = arith.constant 0 : index
    %8 = vector.load %arg6[%c0_11, %c0_12, %c0_13, %c0_14] : memref<2x18x18x32xbf16, #tpu.memory_space<vmem>>, vector<1x18x16x32xbf16>
    %9 = vector.shape_cast %8 : vector<1x18x16x32xbf16> to vector<18x16x32xbf16>
    %10 = vector.extract_strided_slice %9 {offsets = [0, 0, 0], sizes = [16, 16, 32], strides = [1, 1, 1]} : vector<18x16x32xbf16> to vector<16x16x32xbf16>
    %11 = vector.extract_strided_slice %9 {offsets = [1, 0, 0], sizes = [16, 16, 32], strides = [1, 1, 1]} : vector<18x16x32xbf16> to vector<16x16x32xbf16>
    %12 = vector.extract_strided_slice %9 {offsets = [2, 0, 0], sizes = [16, 16, 32], strides = [1, 1, 1]} : vector<18x16x32xbf16> to vector<16x16x32xbf16>
    %13 = tpu.concatenate %10, %11, %12 in 2 : vector<16x16x32xbf16>, vector<16x16x32xbf16>, vector<16x16x32xbf16> -> vector<16x16x96xbf16>
    %14 = vector.shape_cast %13 : vector<16x16x96xbf16> to vector<256x96xbf16>
    %c0_15 = arith.constant 0 : index
    %c0_16 = arith.constant 0 : index
    %c0_17 = arith.constant 0 : index
    %c0_18 = arith.constant 0 : index
    %15 = vector.load %arg2[%c0_15, %c0_16, %c0_17, %c0_18] : memref<5x3x96x32xbf16, #tpu.memory_space<vmem>>, vector<1x1x96x32xbf16>
    %16 = vector.shape_cast %15 : vector<1x1x96x32xbf16> to vector<96x32xbf16>
    %cst_19 = arith.constant dense<0.000000e+00> : vector<256x32xf32>
    %17 = tpu.matmul %14, %16, %cst_19 {dimension_numbers = #tpu.dot_dimension_numbers<[1], [0], [0], [1], [0, 0, 1, 1], [], []>} : vector<256x96xbf16>, vector<96x32xbf16>, vector<256x32xf32> -> vector<256x32xf32>
    %18 = arith.addf %7, %17 : vector<256x32xf32>
    %c0_20 = arith.constant 0 : index
    %c0_21 = arith.constant 0 : index
    %c1_22 = arith.constant 1 : index
    %c0_23 = arith.constant 0 : index
    %19 = vector.load %arg6[%c0_20, %c0_21, %c1_22, %c0_23] : memref<2x18x18x32xbf16, #tpu.memory_space<vmem>>, vector<1x18x16x32xbf16>
    %20 = vector.shape_cast %19 : vector<1x18x16x32xbf16> to vector<18x16x32xbf16>
    %21 = vector.extract_strided_slice %20 {offsets = [0, 0, 0], sizes = [16, 16, 32], strides = [1, 1, 1]} : vector<18x16x32xbf16> to vector<16x16x32xbf16>
    %22 = vector.extract_strided_slice %20 {offsets = [1, 0, 0], sizes = [16, 16, 32], strides = [1, 1, 1]} : vector<18x16x32xbf16> to vector<16x16x32xbf16>
    %23 = vector.extract_strided_slice %20 {offsets = [2, 0, 0], sizes = [16, 16, 32], strides = [1, 1, 1]} : vector<18x16x32xbf16> to vector<16x16x32xbf16>
    %24 = tpu.concatenate %21, %22, %23 in 2 : vector<16x16x32xbf16>, vector<16x16x32xbf16>, vector<16x16x32xbf16> -> vector<16x16x96xbf16>
    %25 = vector.shape_cast %24 : vector<16x16x96xbf16> to vector<256x96xbf16>
    %c0_24 = arith.constant 0 : index
    %c1_25 = arith.constant 1 : index
    %c0_26 = arith.constant 0 : index
    %c0_27 = arith.constant 0 : index
    %26 = vector.load %arg2[%c0_24, %c1_25, %c0_26, %c0_27] : memref<5x3x96x32xbf16, #tpu.memory_space<vmem>>, vector<1x1x96x32xbf16>
    %27 = vector.shape_cast %26 : vector<1x1x96x32xbf16> to vector<96x32xbf16>
    %cst_28 = arith.constant dense<0.000000e+00> : vector<256x32xf32>
    %28 = tpu.matmul %25, %27, %cst_28 {dimension_numbers = #tpu.dot_dimension_numbers<[1], [0], [0], [1], [0, 0, 1, 1], [], []>} : vector<256x96xbf16>, vector<96x32xbf16>, vector<256x32xf32> -> vector<256x32xf32>
    %29 = arith.addf %18, %28 : vector<256x32xf32>
    %c0_29 = arith.constant 0 : index
    %c0_30 = arith.constant 0 : index
    %c2 = arith.constant 2 : index
    %c0_31 = arith.constant 0 : index
    %30 = vector.load %arg6[%c0_29, %c0_30, %c2, %c0_31] : memref<2x18x18x32xbf16, #tpu.memory_space<vmem>>, vector<1x18x16x32xbf16>
    %31 = vector.shape_cast %30 : vector<1x18x16x32xbf16> to vector<18x16x32xbf16>
    %32 = vector.extract_strided_slice %31 {offsets = [0, 0, 0], sizes = [16, 16, 32], strides = [1, 1, 1]} : vector<18x16x32xbf16> to vector<16x16x32xbf16>
    %33 = vector.extract_strided_slice %31 {offsets = [1, 0, 0], sizes = [16, 16, 32], strides = [1, 1, 1]} : vector<18x16x32xbf16> to vector<16x16x32xbf16>
    %34 = vector.extract_strided_slice %31 {offsets = [2, 0, 0], sizes = [16, 16, 32], strides = [1, 1, 1]} : vector<18x16x32xbf16> to vector<16x16x32xbf16>
    %35 = tpu.concatenate %32, %33, %34 in 2 : vector<16x16x32xbf16>, vector<16x16x32xbf16>, vector<16x16x32xbf16> -> vector<16x16x96xbf16>
    %36 = vector.shape_cast %35 : vector<16x16x96xbf16> to vector<256x96xbf16>
    %c0_32 = arith.constant 0 : index
    %c2_33 = arith.constant 2 : index
    %c0_34 = arith.constant 0 : index
    %c0_35 = arith.constant 0 : index
    %37 = vector.load %arg2[%c0_32, %c2_33, %c0_34, %c0_35] : memref<5x3x96x32xbf16, #tpu.memory_space<vmem>>, vector<1x1x96x32xbf16>
    %38 = vector.shape_cast %37 : vector<1x1x96x32xbf16> to vector<96x32xbf16>
    %cst_36 = arith.constant dense<0.000000e+00> : vector<256x32xf32>
    %39 = tpu.matmul %36, %38, %cst_36 {dimension_numbers = #tpu.dot_dimension_numbers<[1], [0], [0], [1], [0, 0, 1, 1], [], []>} : vector<256x96xbf16>, vector<96x32xbf16>, vector<256x32xf32> -> vector<256x32xf32>
    %40 = arith.addf %29, %39 : vector<256x32xf32>
    %c0_37 = arith.constant 0 : index
    %c0_38 = arith.constant 0 : index
    %c0_39 = arith.constant 0 : index
    %41 = vector.load %arg3[%c0_37, %c0_38, %c0_39] : memref<5x1x32xf32, #tpu.memory_space<vmem>>, vector<1x1x32xf32>
    %42 = vector.shape_cast %41 : vector<1x1x32xf32> to vector<1x32xf32>
    %43 = vector.broadcast %42 : vector<1x32xf32> to vector<256x32xf32>
    %44 = arith.addf %40, %43 : vector<256x32xf32>
    %cst_40 = arith.constant 0.000000e+00 : f32
    %45 = vector.broadcast %cst_40 : f32 to vector<256x32xf32>
    %46 = arith.maximumf %44, %45 : vector<256x32xf32>
    %47 = vector.shape_cast %46 : vector<256x32xf32> to vector<16x16x32xf32>
    %48 = arith.truncf %47 : vector<16x16x32xf32> to vector<16x16x32xbf16>
    %c1_41 = arith.constant 1 : index
    %c1_42 = arith.constant 1 : index
    %c1_43 = arith.constant 1 : index
    %c0_44 = arith.constant 0 : index
    %49 = vector.load %arg6[%c1_41, %c1_42, %c1_43, %c0_44] : memref<2x18x18x32xbf16, #tpu.memory_space<vmem>>, vector<1x16x16x32xbf16>
    %50 = vector.shape_cast %49 : vector<1x16x16x32xbf16> to vector<16x16x32xbf16>
    %51 = vector.shape_cast %48 : vector<16x16x32xbf16> to vector<1x16x16x32xbf16>
    tpu.vector_store %arg6[%c1_41, %c1_42, %c1_43, %c0_44], %51 {strides = array<i32>} : memref<2x18x18x32xbf16, #tpu.memory_space<vmem>>, vector<1x16x16x32xbf16>,
    %cst_45 = arith.constant 0.000000e+00 : f32
    %52 = vector.broadcast %cst_45 : f32 to vector<256x32xf32>
    %c1_46 = arith.constant 1 : index
    %c0_47 = arith.constant 0 : index
    %c0_48 = arith.constant 0 : index
    %c0_49 = arith.constant 0 : index
    %53 = vector.load %arg6[%c1_46, %c0_47, %c0_48, %c0_49] : memref<2x18x18x32xbf16, #tpu.memory_space<vmem>>, vector<1x18x16x32xbf16>
    %54 = vector.shape_cast %53 : vector<1x18x16x32xbf16> to vector<18x16x32xbf16>
    %55 = vector.extract_strided_slice %54 {offsets = [0, 0, 0], sizes = [16, 16, 32], strides = [1, 1, 1]} : vector<18x16x32xbf16> to vector<16x16x32xbf16>
    %56 = vector.extract_strided_slice %54 {offsets = [1, 0, 0], sizes = [16, 16, 32], strides = [1, 1, 1]} : vector<18x16x32xbf16> to vector<16x16x32xbf16>
    %57 = vector.extract_strided_slice %54 {offsets = [2, 0, 0], sizes = [16, 16, 32], strides = [1, 1, 1]} : vector<18x16x32xbf16> to vector<16x16x32xbf16>
    %58 = tpu.concatenate %55, %56, %57 in 2 : vector<16x16x32xbf16>, vector<16x16x32xbf16>, vector<16x16x32xbf16> -> vector<16x16x96xbf16>
    %59 = vector.shape_cast %58 : vector<16x16x96xbf16> to vector<256x96xbf16>
    %c1_50 = arith.constant 1 : index
    %c0_51 = arith.constant 0 : index
    %c0_52 = arith.constant 0 : index
    %c0_53 = arith.constant 0 : index
    %60 = vector.load %arg2[%c1_50, %c0_51, %c0_52, %c0_53] : memref<5x3x96x32xbf16, #tpu.memory_space<vmem>>, vector<1x1x96x32xbf16>
    %61 = vector.shape_cast %60 : vector<1x1x96x32xbf16> to vector<96x32xbf16>
    %cst_54 = arith.constant dense<0.000000e+00> : vector<256x32xf32>
    %62 = tpu.matmul %59, %61, %cst_54 {dimension_numbers = #tpu.dot_dimension_numbers<[1], [0], [0], [1], [0, 0, 1, 1], [], []>} : vector<256x96xbf16>, vector<96x32xbf16>, vector<256x32xf32> -> vector<256x32xf32>
    %63 = arith.addf %52, %62 : vector<256x32xf32>
    %c1_55 = arith.constant 1 : index
    %c0_56 = arith.constant 0 : index
    %c1_57 = arith.constant 1 : index
    %c0_58 = arith.constant 0 : index
    %64 = vector.load %arg6[%c1_55, %c0_56, %c1_57, %c0_58] : memref<2x18x18x32xbf16, #tpu.memory_space<vmem>>, vector<1x18x16x32xbf16>
    %65 = vector.shape_cast %64 : vector<1x18x16x32xbf16> to vector<18x16x32xbf16>
    %66 = vector.extract_strided_slice %65 {offsets = [0, 0, 0], sizes = [16, 16, 32], strides = [1, 1, 1]} : vector<18x16x32xbf16> to vector<16x16x32xbf16>
    %67 = vector.extract_strided_slice %65 {offsets = [1, 0, 0], sizes = [16, 16, 32], strides = [1, 1, 1]} : vector<18x16x32xbf16> to vector<16x16x32xbf16>
    %68 = vector.extract_strided_slice %65 {offsets = [2, 0, 0], sizes = [16, 16, 32], strides = [1, 1, 1]} : vector<18x16x32xbf16> to vector<16x16x32xbf16>
    %69 = tpu.concatenate %66, %67, %68 in 2 : vector<16x16x32xbf16>, vector<16x16x32xbf16>, vector<16x16x32xbf16> -> vector<16x16x96xbf16>
    %70 = vector.shape_cast %69 : vector<16x16x96xbf16> to vector<256x96xbf16>
    %c1_59 = arith.constant 1 : index
    %c1_60 = arith.constant 1 : index
    %c0_61 = arith.constant 0 : index
    %c0_62 = arith.constant 0 : index
    %71 = vector.load %arg2[%c1_59, %c1_60, %c0_61, %c0_62] : memref<5x3x96x32xbf16, #tpu.memory_space<vmem>>, vector<1x1x96x32xbf16>
    %72 = vector.shape_cast %71 : vector<1x1x96x32xbf16> to vector<96x32xbf16>
    %cst_63 = arith.constant dense<0.000000e+00> : vector<256x32xf32>
    %73 = tpu.matmul %70, %72, %cst_63 {dimension_numbers = #tpu.dot_dimension_numbers<[1], [0], [0], [1], [0, 0, 1, 1], [], []>} : vector<256x96xbf16>, vector<96x32xbf16>, vector<256x32xf32> -> vector<256x32xf32>
    %74 = arith.addf %63, %73 : vector<256x32xf32>
    %c1_64 = arith.constant 1 : index
    %c0_65 = arith.constant 0 : index
    %c2_66 = arith.constant 2 : index
    %c0_67 = arith.constant 0 : index
    %75 = vector.load %arg6[%c1_64, %c0_65, %c2_66, %c0_67] : memref<2x18x18x32xbf16, #tpu.memory_space<vmem>>, vector<1x18x16x32xbf16>
    %76 = vector.shape_cast %75 : vector<1x18x16x32xbf16> to vector<18x16x32xbf16>
    %77 = vector.extract_strided_slice %76 {offsets = [0, 0, 0], sizes = [16, 16, 32], strides = [1, 1, 1]} : vector<18x16x32xbf16> to vector<16x16x32xbf16>
    %78 = vector.extract_strided_slice %76 {offsets = [1, 0, 0], sizes = [16, 16, 32], strides = [1, 1, 1]} : vector<18x16x32xbf16> to vector<16x16x32xbf16>
    %79 = vector.extract_strided_slice %76 {offsets = [2, 0, 0], sizes = [16, 16, 32], strides = [1, 1, 1]} : vector<18x16x32xbf16> to vector<16x16x32xbf16>
    %80 = tpu.concatenate %77, %78, %79 in 2 : vector<16x16x32xbf16>, vector<16x16x32xbf16>, vector<16x16x32xbf16> -> vector<16x16x96xbf16>
    %81 = vector.shape_cast %80 : vector<16x16x96xbf16> to vector<256x96xbf16>
    %c1_68 = arith.constant 1 : index
    %c2_69 = arith.constant 2 : index
    %c0_70 = arith.constant 0 : index
    %c0_71 = arith.constant 0 : index
    %82 = vector.load %arg2[%c1_68, %c2_69, %c0_70, %c0_71] : memref<5x3x96x32xbf16, #tpu.memory_space<vmem>>, vector<1x1x96x32xbf16>
    %83 = vector.shape_cast %82 : vector<1x1x96x32xbf16> to vector<96x32xbf16>
    %cst_72 = arith.constant dense<0.000000e+00> : vector<256x32xf32>
    %84 = tpu.matmul %81, %83, %cst_72 {dimension_numbers = #tpu.dot_dimension_numbers<[1], [0], [0], [1], [0, 0, 1, 1], [], []>} : vector<256x96xbf16>, vector<96x32xbf16>, vector<256x32xf32> -> vector<256x32xf32>
    %85 = arith.addf %74, %84 : vector<256x32xf32>
    %c1_73 = arith.constant 1 : index
    %c0_74 = arith.constant 0 : index
    %c0_75 = arith.constant 0 : index
    %86 = vector.load %arg3[%c1_73, %c0_74, %c0_75] : memref<5x1x32xf32, #tpu.memory_space<vmem>>, vector<1x1x32xf32>
    %87 = vector.shape_cast %86 : vector<1x1x32xf32> to vector<1x32xf32>
    %88 = vector.broadcast %87 : vector<1x32xf32> to vector<256x32xf32>
    %89 = arith.addf %85, %88 : vector<256x32xf32>
    %cst_76 = arith.constant 0.000000e+00 : f32
    %90 = vector.broadcast %cst_76 : f32 to vector<256x32xf32>
    %91 = arith.maximumf %89, %90 : vector<256x32xf32>
    %92 = vector.shape_cast %91 : vector<256x32xf32> to vector<16x16x32xf32>
    %93 = arith.truncf %92 : vector<16x16x32xf32> to vector<16x16x32xbf16>
    %c0_77 = arith.constant 0 : index
    %c1_78 = arith.constant 1 : index
    %c1_79 = arith.constant 1 : index
    %c0_80 = arith.constant 0 : index
    %94 = vector.load %arg6[%c0_77, %c1_78, %c1_79, %c0_80] : memref<2x18x18x32xbf16, #tpu.memory_space<vmem>>, vector<1x16x16x32xbf16>
    %95 = vector.shape_cast %94 : vector<1x16x16x32xbf16> to vector<16x16x32xbf16>
    %96 = vector.shape_cast %93 : vector<16x16x32xbf16> to vector<1x16x16x32xbf16>
    tpu.vector_store %arg6[%c0_77, %c1_78, %c1_79, %c0_80], %96 {strides = array<i32>} : memref<2x18x18x32xbf16, #tpu.memory_space<vmem>>, vector<1x16x16x32xbf16>,
    %cst_81 = arith.constant 0.000000e+00 : f32
    %97 = vector.broadcast %cst_81 : f32 to vector<256x32xf32>
    %c0_82 = arith.constant 0 : index
    %c0_83 = arith.constant 0 : index
    %c0_84 = arith.constant 0 : index
    %c0_85 = arith.constant 0 : index
    %98 = vector.load %arg6[%c0_82, %c0_83, %c0_84, %c0_85] : memref<2x18x18x32xbf16, #tpu.memory_space<vmem>>, vector<1x18x16x32xbf16>
    %99 = vector.shape_cast %98 : vector<1x18x16x32xbf16> to vector<18x16x32xbf16>
    %100 = vector.extract_strided_slice %99 {offsets = [0, 0, 0], sizes = [16, 16, 32], strides = [1, 1, 1]} : vector<18x16x32xbf16> to vector<16x16x32xbf16>
    %101 = vector.extract_strided_slice %99 {offsets = [1, 0, 0], sizes = [16, 16, 32], strides = [1, 1, 1]} : vector<18x16x32xbf16> to vector<16x16x32xbf16>
    %102 = vector.extract_strided_slice %99 {offsets = [2, 0, 0], sizes = [16, 16, 32], strides = [1, 1, 1]} : vector<18x16x32xbf16> to vector<16x16x32xbf16>
    %103 = tpu.concatenate %100, %101, %102 in 2 : vector<16x16x32xbf16>, vector<16x16x32xbf16>, vector<16x16x32xbf16> -> vector<16x16x96xbf16>
    %104 = vector.shape_cast %103 : vector<16x16x96xbf16> to vector<256x96xbf16>
    %c2_86 = arith.constant 2 : index
    %c0_87 = arith.constant 0 : index
    %c0_88 = arith.constant 0 : index
    %c0_89 = arith.constant 0 : index
    %105 = vector.load %arg2[%c2_86, %c0_87, %c0_88, %c0_89] : memref<5x3x96x32xbf16, #tpu.memory_space<vmem>>, vector<1x1x96x32xbf16>
    %106 = vector.shape_cast %105 : vector<1x1x96x32xbf16> to vector<96x32xbf16>
    %cst_90 = arith.constant dense<0.000000e+00> : vector<256x32xf32>
    %107 = tpu.matmul %104, %106, %cst_90 {dimension_numbers = #tpu.dot_dimension_numbers<[1], [0], [0], [1], [0, 0, 1, 1], [], []>} : vector<256x96xbf16>, vector<96x32xbf16>, vector<256x32xf32> -> vector<256x32xf32>
    %108 = arith.addf %97, %107 : vector<256x32xf32>
    %c0_91 = arith.constant 0 : index
    %c0_92 = arith.constant 0 : index
    %c1_93 = arith.constant 1 : index
    %c0_94 = arith.constant 0 : index
    %109 = vector.load %arg6[%c0_91, %c0_92, %c1_93, %c0_94] : memref<2x18x18x32xbf16, #tpu.memory_space<vmem>>, vector<1x18x16x32xbf16>
    %110 = vector.shape_cast %109 : vector<1x18x16x32xbf16> to vector<18x16x32xbf16>
    %111 = vector.extract_strided_slice %110 {offsets = [0, 0, 0], sizes = [16, 16, 32], strides = [1, 1, 1]} : vector<18x16x32xbf16> to vector<16x16x32xbf16>
    %112 = vector.extract_strided_slice %110 {offsets = [1, 0, 0], sizes = [16, 16, 32], strides = [1, 1, 1]} : vector<18x16x32xbf16> to vector<16x16x32xbf16>
    %113 = vector.extract_strided_slice %110 {offsets = [2, 0, 0], sizes = [16, 16, 32], strides = [1, 1, 1]} : vector<18x16x32xbf16> to vector<16x16x32xbf16>
    %114 = tpu.concatenate %111, %112, %113 in 2 : vector<16x16x32xbf16>, vector<16x16x32xbf16>, vector<16x16x32xbf16> -> vector<16x16x96xbf16>
    %115 = vector.shape_cast %114 : vector<16x16x96xbf16> to vector<256x96xbf16>
    %c2_95 = arith.constant 2 : index
    %c1_96 = arith.constant 1 : index
    %c0_97 = arith.constant 0 : index
    %c0_98 = arith.constant 0 : index
    %116 = vector.load %arg2[%c2_95, %c1_96, %c0_97, %c0_98] : memref<5x3x96x32xbf16, #tpu.memory_space<vmem>>, vector<1x1x96x32xbf16>
    %117 = vector.shape_cast %116 : vector<1x1x96x32xbf16> to vector<96x32xbf16>
    %cst_99 = arith.constant dense<0.000000e+00> : vector<256x32xf32>
    %118 = tpu.matmul %115, %117, %cst_99 {dimension_numbers = #tpu.dot_dimension_numbers<[1], [0], [0], [1], [0, 0, 1, 1], [], []>} : vector<256x96xbf16>, vector<96x32xbf16>, vector<256x32xf32> -> vector<256x32xf32>
    %119 = arith.addf %108, %118 : vector<256x32xf32>
    %c0_100 = arith.constant 0 : index
    %c0_101 = arith.constant 0 : index
    %c2_102 = arith.constant 2 : index
    %c0_103 = arith.constant 0 : index
    %120 = vector.load %arg6[%c0_100, %c0_101, %c2_102, %c0_103] : memref<2x18x18x32xbf16, #tpu.memory_space<vmem>>, vector<1x18x16x32xbf16>
    %121 = vector.shape_cast %120 : vector<1x18x16x32xbf16> to vector<18x16x32xbf16>
    %122 = vector.extract_strided_slice %121 {offsets = [0, 0, 0], sizes = [16, 16, 32], strides = [1, 1, 1]} : vector<18x16x32xbf16> to vector<16x16x32xbf16>
    %123 = vector.extract_strided_slice %121 {offsets = [1, 0, 0], sizes = [16, 16, 32], strides = [1, 1, 1]} : vector<18x16x32xbf16> to vector<16x16x32xbf16>
    %124 = vector.extract_strided_slice %121 {offsets = [2, 0, 0], sizes = [16, 16, 32], strides = [1, 1, 1]} : vector<18x16x32xbf16> to vector<16x16x32xbf16>
    %125 = tpu.concatenate %122, %123, %124 in 2 : vector<16x16x32xbf16>, vector<16x16x32xbf16>, vector<16x16x32xbf16> -> vector<16x16x96xbf16>
    %126 = vector.shape_cast %125 : vector<16x16x96xbf16> to vector<256x96xbf16>
    %c2_104 = arith.constant 2 : index
    %c2_105 = arith.constant 2 : index
    %c0_106 = arith.constant 0 : index
    %c0_107 = arith.constant 0 : index
    %127 = vector.load %arg2[%c2_104, %c2_105, %c0_106, %c0_107] : memref<5x3x96x32xbf16, #tpu.memory_space<vmem>>, vector<1x1x96x32xbf16>
    %128 = vector.shape_cast %127 : vector<1x1x96x32xbf16> to vector<96x32xbf16>
    %cst_108 = arith.constant dense<0.000000e+00> : vector<256x32xf32>
    %129 = tpu.matmul %126, %128, %cst_108 {dimension_numbers = #tpu.dot_dimension_numbers<[1], [0], [0], [1], [0, 0, 1, 1], [], []>} : vector<256x96xbf16>, vector<96x32xbf16>, vector<256x32xf32> -> vector<256x32xf32>
    %130 = arith.addf %119, %129 : vector<256x32xf32>
    %c2_109 = arith.constant 2 : index
    %c0_110 = arith.constant 0 : index
    %c0_111 = arith.constant 0 : index
    %131 = vector.load %arg3[%c2_109, %c0_110, %c0_111] : memref<5x1x32xf32, #tpu.memory_space<vmem>>, vector<1x1x32xf32>
    %132 = vector.shape_cast %131 : vector<1x1x32xf32> to vector<1x32xf32>
    %133 = vector.broadcast %132 : vector<1x32xf32> to vector<256x32xf32>
    %134 = arith.addf %130, %133 : vector<256x32xf32>
    %cst_112 = arith.constant 0.000000e+00 : f32
    %135 = vector.broadcast %cst_112 : f32 to vector<256x32xf32>
    %136 = arith.maximumf %134, %135 : vector<256x32xf32>
    %137 = vector.shape_cast %136 : vector<256x32xf32> to vector<16x16x32xf32>
    %138 = arith.truncf %137 : vector<16x16x32xf32> to vector<16x16x32xbf16>
    %c1_113 = arith.constant 1 : index
    %c1_114 = arith.constant 1 : index
    %c1_115 = arith.constant 1 : index
    %c0_116 = arith.constant 0 : index
    %139 = vector.load %arg6[%c1_113, %c1_114, %c1_115, %c0_116] : memref<2x18x18x32xbf16, #tpu.memory_space<vmem>>, vector<1x16x16x32xbf16>
    %140 = vector.shape_cast %139 : vector<1x16x16x32xbf16> to vector<16x16x32xbf16>
    %141 = vector.shape_cast %138 : vector<16x16x32xbf16> to vector<1x16x16x32xbf16>
    tpu.vector_store %arg6[%c1_113, %c1_114, %c1_115, %c0_116], %141 {strides = array<i32>} : memref<2x18x18x32xbf16, #tpu.memory_space<vmem>>, vector<1x16x16x32xbf16>,
    %cst_117 = arith.constant 0.000000e+00 : f32
    %142 = vector.broadcast %cst_117 : f32 to vector<256x32xf32>
    %c1_118 = arith.constant 1 : index
    %c0_119 = arith.constant 0 : index
    %c0_120 = arith.constant 0 : index
    %c0_121 = arith.constant 0 : index
    %143 = vector.load %arg6[%c1_118, %c0_119, %c0_120, %c0_121] : memref<2x18x18x32xbf16, #tpu.memory_space<vmem>>, vector<1x18x16x32xbf16>
    %144 = vector.shape_cast %143 : vector<1x18x16x32xbf16> to vector<18x16x32xbf16>
    %145 = vector.extract_strided_slice %144 {offsets = [0, 0, 0], sizes = [16, 16, 32], strides = [1, 1, 1]} : vector<18x16x32xbf16> to vector<16x16x32xbf16>
    %146 = vector.extract_strided_slice %144 {offsets = [1, 0, 0], sizes = [16, 16, 32], strides = [1, 1, 1]} : vector<18x16x32xbf16> to vector<16x16x32xbf16>
    %147 = vector.extract_strided_slice %144 {offsets = [2, 0, 0], sizes = [16, 16, 32], strides = [1, 1, 1]} : vector<18x16x32xbf16> to vector<16x16x32xbf16>
    %148 = tpu.concatenate %145, %146, %147 in 2 : vector<16x16x32xbf16>, vector<16x16x32xbf16>, vector<16x16x32xbf16> -> vector<16x16x96xbf16>
    %149 = vector.shape_cast %148 : vector<16x16x96xbf16> to vector<256x96xbf16>
    %c3 = arith.constant 3 : index
    %c0_122 = arith.constant 0 : index
    %c0_123 = arith.constant 0 : index
    %c0_124 = arith.constant 0 : index
    %150 = vector.load %arg2[%c3, %c0_122, %c0_123, %c0_124] : memref<5x3x96x32xbf16, #tpu.memory_space<vmem>>, vector<1x1x96x32xbf16>
    %151 = vector.shape_cast %150 : vector<1x1x96x32xbf16> to vector<96x32xbf16>
    %cst_125 = arith.constant dense<0.000000e+00> : vector<256x32xf32>
    %152 = tpu.matmul %149, %151, %cst_125 {dimension_numbers = #tpu.dot_dimension_numbers<[1], [0], [0], [1], [0, 0, 1, 1], [], []>} : vector<256x96xbf16>, vector<96x32xbf16>, vector<256x32xf32> -> vector<256x32xf32>
    %153 = arith.addf %142, %152 : vector<256x32xf32>
    %c1_126 = arith.constant 1 : index
    %c0_127 = arith.constant 0 : index
    %c1_128 = arith.constant 1 : index
    %c0_129 = arith.constant 0 : index
    %154 = vector.load %arg6[%c1_126, %c0_127, %c1_128, %c0_129] : memref<2x18x18x32xbf16, #tpu.memory_space<vmem>>, vector<1x18x16x32xbf16>
    %155 = vector.shape_cast %154 : vector<1x18x16x32xbf16> to vector<18x16x32xbf16>
    %156 = vector.extract_strided_slice %155 {offsets = [0, 0, 0], sizes = [16, 16, 32], strides = [1, 1, 1]} : vector<18x16x32xbf16> to vector<16x16x32xbf16>
    %157 = vector.extract_strided_slice %155 {offsets = [1, 0, 0], sizes = [16, 16, 32], strides = [1, 1, 1]} : vector<18x16x32xbf16> to vector<16x16x32xbf16>
    %158 = vector.extract_strided_slice %155 {offsets = [2, 0, 0], sizes = [16, 16, 32], strides = [1, 1, 1]} : vector<18x16x32xbf16> to vector<16x16x32xbf16>
    %159 = tpu.concatenate %156, %157, %158 in 2 : vector<16x16x32xbf16>, vector<16x16x32xbf16>, vector<16x16x32xbf16> -> vector<16x16x96xbf16>
    %160 = vector.shape_cast %159 : vector<16x16x96xbf16> to vector<256x96xbf16>
    %c3_130 = arith.constant 3 : index
    %c1_131 = arith.constant 1 : index
    %c0_132 = arith.constant 0 : index
    %c0_133 = arith.constant 0 : index
    %161 = vector.load %arg2[%c3_130, %c1_131, %c0_132, %c0_133] : memref<5x3x96x32xbf16, #tpu.memory_space<vmem>>, vector<1x1x96x32xbf16>
    %162 = vector.shape_cast %161 : vector<1x1x96x32xbf16> to vector<96x32xbf16>
    %cst_134 = arith.constant dense<0.000000e+00> : vector<256x32xf32>
    %163 = tpu.matmul %160, %162, %cst_134 {dimension_numbers = #tpu.dot_dimension_numbers<[1], [0], [0], [1], [0, 0, 1, 1], [], []>} : vector<256x96xbf16>, vector<96x32xbf16>, vector<256x32xf32> -> vector<256x32xf32>
    %164 = arith.addf %153, %163 : vector<256x32xf32>
    %c1_135 = arith.constant 1 : index
    %c0_136 = arith.constant 0 : index
    %c2_137 = arith.constant 2 : index
    %c0_138 = arith.constant 0 : index
    %165 = vector.load %arg6[%c1_135, %c0_136, %c2_137, %c0_138] : memref<2x18x18x32xbf16, #tpu.memory_space<vmem>>, vector<1x18x16x32xbf16>
    %166 = vector.shape_cast %165 : vector<1x18x16x32xbf16> to vector<18x16x32xbf16>
    %167 = vector.extract_strided_slice %166 {offsets = [0, 0, 0], sizes = [16, 16, 32], strides = [1, 1, 1]} : vector<18x16x32xbf16> to vector<16x16x32xbf16>
    %168 = vector.extract_strided_slice %166 {offsets = [1, 0, 0], sizes = [16, 16, 32], strides = [1, 1, 1]} : vector<18x16x32xbf16> to vector<16x16x32xbf16>
    %169 = vector.extract_strided_slice %166 {offsets = [2, 0, 0], sizes = [16, 16, 32], strides = [1, 1, 1]} : vector<18x16x32xbf16> to vector<16x16x32xbf16>
    %170 = tpu.concatenate %167, %168, %169 in 2 : vector<16x16x32xbf16>, vector<16x16x32xbf16>, vector<16x16x32xbf16> -> vector<16x16x96xbf16>
    %171 = vector.shape_cast %170 : vector<16x16x96xbf16> to vector<256x96xbf16>
    %c3_139 = arith.constant 3 : index
    %c2_140 = arith.constant 2 : index
    %c0_141 = arith.constant 0 : index
    %c0_142 = arith.constant 0 : index
    %172 = vector.load %arg2[%c3_139, %c2_140, %c0_141, %c0_142] : memref<5x3x96x32xbf16, #tpu.memory_space<vmem>>, vector<1x1x96x32xbf16>
    %173 = vector.shape_cast %172 : vector<1x1x96x32xbf16> to vector<96x32xbf16>
    %cst_143 = arith.constant dense<0.000000e+00> : vector<256x32xf32>
    %174 = tpu.matmul %171, %173, %cst_143 {dimension_numbers = #tpu.dot_dimension_numbers<[1], [0], [0], [1], [0, 0, 1, 1], [], []>} : vector<256x96xbf16>, vector<96x32xbf16>, vector<256x32xf32> -> vector<256x32xf32>
    %175 = arith.addf %164, %174 : vector<256x32xf32>
    %c3_144 = arith.constant 3 : index
    %c0_145 = arith.constant 0 : index
    %c0_146 = arith.constant 0 : index
    %176 = vector.load %arg3[%c3_144, %c0_145, %c0_146] : memref<5x1x32xf32, #tpu.memory_space<vmem>>, vector<1x1x32xf32>
    %177 = vector.shape_cast %176 : vector<1x1x32xf32> to vector<1x32xf32>
    %178 = vector.broadcast %177 : vector<1x32xf32> to vector<256x32xf32>
    %179 = arith.addf %175, %178 : vector<256x32xf32>
    %cst_147 = arith.constant 0.000000e+00 : f32
    %180 = vector.broadcast %cst_147 : f32 to vector<256x32xf32>
    %181 = arith.maximumf %179, %180 : vector<256x32xf32>
    %182 = vector.shape_cast %181 : vector<256x32xf32> to vector<16x16x32xf32>
    %183 = arith.truncf %182 : vector<16x16x32xf32> to vector<16x16x32xbf16>
    %c0_148 = arith.constant 0 : index
    %c1_149 = arith.constant 1 : index
    %c1_150 = arith.constant 1 : index
    %c0_151 = arith.constant 0 : index
    %184 = vector.load %arg6[%c0_148, %c1_149, %c1_150, %c0_151] : memref<2x18x18x32xbf16, #tpu.memory_space<vmem>>, vector<1x16x16x32xbf16>
    %185 = vector.shape_cast %184 : vector<1x16x16x32xbf16> to vector<16x16x32xbf16>
    %186 = vector.shape_cast %183 : vector<16x16x32xbf16> to vector<1x16x16x32xbf16>
    tpu.vector_store %arg6[%c0_148, %c1_149, %c1_150, %c0_151], %186 {strides = array<i32>} : memref<2x18x18x32xbf16, #tpu.memory_space<vmem>>, vector<1x16x16x32xbf16>,
    %cst_152 = arith.constant 0.000000e+00 : f32
    %187 = vector.broadcast %cst_152 : f32 to vector<256x32xf32>
    %c0_153 = arith.constant 0 : index
    %c0_154 = arith.constant 0 : index
    %c0_155 = arith.constant 0 : index
    %c0_156 = arith.constant 0 : index
    %188 = vector.load %arg6[%c0_153, %c0_154, %c0_155, %c0_156] : memref<2x18x18x32xbf16, #tpu.memory_space<vmem>>, vector<1x18x16x32xbf16>
    %189 = vector.shape_cast %188 : vector<1x18x16x32xbf16> to vector<18x16x32xbf16>
    %190 = vector.extract_strided_slice %189 {offsets = [0, 0, 0], sizes = [16, 16, 32], strides = [1, 1, 1]} : vector<18x16x32xbf16> to vector<16x16x32xbf16>
    %191 = vector.extract_strided_slice %189 {offsets = [1, 0, 0], sizes = [16, 16, 32], strides = [1, 1, 1]} : vector<18x16x32xbf16> to vector<16x16x32xbf16>
    %192 = vector.extract_strided_slice %189 {offsets = [2, 0, 0], sizes = [16, 16, 32], strides = [1, 1, 1]} : vector<18x16x32xbf16> to vector<16x16x32xbf16>
    %193 = tpu.concatenate %190, %191, %192 in 2 : vector<16x16x32xbf16>, vector<16x16x32xbf16>, vector<16x16x32xbf16> -> vector<16x16x96xbf16>
    %194 = vector.shape_cast %193 : vector<16x16x96xbf16> to vector<256x96xbf16>
    %c4 = arith.constant 4 : index
    %c0_157 = arith.constant 0 : index
    %c0_158 = arith.constant 0 : index
    %c0_159 = arith.constant 0 : index
    %195 = vector.load %arg2[%c4, %c0_157, %c0_158, %c0_159] : memref<5x3x96x32xbf16, #tpu.memory_space<vmem>>, vector<1x1x96x32xbf16>
    %196 = vector.shape_cast %195 : vector<1x1x96x32xbf16> to vector<96x32xbf16>
    %cst_160 = arith.constant dense<0.000000e+00> : vector<256x32xf32>
    %197 = tpu.matmul %194, %196, %cst_160 {dimension_numbers = #tpu.dot_dimension_numbers<[1], [0], [0], [1], [0, 0, 1, 1], [], []>} : vector<256x96xbf16>, vector<96x32xbf16>, vector<256x32xf32> -> vector<256x32xf32>
    %198 = arith.addf %187, %197 : vector<256x32xf32>
    %c0_161 = arith.constant 0 : index
    %c0_162 = arith.constant 0 : index
    %c1_163 = arith.constant 1 : index
    %c0_164 = arith.constant 0 : index
    %199 = vector.load %arg6[%c0_161, %c0_162, %c1_163, %c0_164] : memref<2x18x18x32xbf16, #tpu.memory_space<vmem>>, vector<1x18x16x32xbf16>
    %200 = vector.shape_cast %199 : vector<1x18x16x32xbf16> to vector<18x16x32xbf16>
    %201 = vector.extract_strided_slice %200 {offsets = [0, 0, 0], sizes = [16, 16, 32], strides = [1, 1, 1]} : vector<18x16x32xbf16> to vector<16x16x32xbf16>
    %202 = vector.extract_strided_slice %200 {offsets = [1, 0, 0], sizes = [16, 16, 32], strides = [1, 1, 1]} : vector<18x16x32xbf16> to vector<16x16x32xbf16>
    %203 = vector.extract_strided_slice %200 {offsets = [2, 0, 0], sizes = [16, 16, 32], strides = [1, 1, 1]} : vector<18x16x32xbf16> to vector<16x16x32xbf16>
    %204 = tpu.concatenate %201, %202, %203 in 2 : vector<16x16x32xbf16>, vector<16x16x32xbf16>, vector<16x16x32xbf16> -> vector<16x16x96xbf16>
    %205 = vector.shape_cast %204 : vector<16x16x96xbf16> to vector<256x96xbf16>
    %c4_165 = arith.constant 4 : index
    %c1_166 = arith.constant 1 : index
    %c0_167 = arith.constant 0 : index
    %c0_168 = arith.constant 0 : index
    %206 = vector.load %arg2[%c4_165, %c1_166, %c0_167, %c0_168] : memref<5x3x96x32xbf16, #tpu.memory_space<vmem>>, vector<1x1x96x32xbf16>
    %207 = vector.shape_cast %206 : vector<1x1x96x32xbf16> to vector<96x32xbf16>
    %cst_169 = arith.constant dense<0.000000e+00> : vector<256x32xf32>
    %208 = tpu.matmul %205, %207, %cst_169 {dimension_numbers = #tpu.dot_dimension_numbers<[1], [0], [0], [1], [0, 0, 1, 1], [], []>} : vector<256x96xbf16>, vector<96x32xbf16>, vector<256x32xf32> -> vector<256x32xf32>
    %209 = arith.addf %198, %208 : vector<256x32xf32>
    %c0_170 = arith.constant 0 : index
    %c0_171 = arith.constant 0 : index
    %c2_172 = arith.constant 2 : index
    %c0_173 = arith.constant 0 : index
    %210 = vector.load %arg6[%c0_170, %c0_171, %c2_172, %c0_173] : memref<2x18x18x32xbf16, #tpu.memory_space<vmem>>, vector<1x18x16x32xbf16>
    %211 = vector.shape_cast %210 : vector<1x18x16x32xbf16> to vector<18x16x32xbf16>
    %212 = vector.extract_strided_slice %211 {offsets = [0, 0, 0], sizes = [16, 16, 32], strides = [1, 1, 1]} : vector<18x16x32xbf16> to vector<16x16x32xbf16>
    %213 = vector.extract_strided_slice %211 {offsets = [1, 0, 0], sizes = [16, 16, 32], strides = [1, 1, 1]} : vector<18x16x32xbf16> to vector<16x16x32xbf16>
    %214 = vector.extract_strided_slice %211 {offsets = [2, 0, 0], sizes = [16, 16, 32], strides = [1, 1, 1]} : vector<18x16x32xbf16> to vector<16x16x32xbf16>
    %215 = tpu.concatenate %212, %213, %214 in 2 : vector<16x16x32xbf16>, vector<16x16x32xbf16>, vector<16x16x32xbf16> -> vector<16x16x96xbf16>
    %216 = vector.shape_cast %215 : vector<16x16x96xbf16> to vector<256x96xbf16>
    %c4_174 = arith.constant 4 : index
    %c2_175 = arith.constant 2 : index
    %c0_176 = arith.constant 0 : index
    %c0_177 = arith.constant 0 : index
    %217 = vector.load %arg2[%c4_174, %c2_175, %c0_176, %c0_177] : memref<5x3x96x32xbf16, #tpu.memory_space<vmem>>, vector<1x1x96x32xbf16>
    %218 = vector.shape_cast %217 : vector<1x1x96x32xbf16> to vector<96x32xbf16>
    %cst_178 = arith.constant dense<0.000000e+00> : vector<256x32xf32>
    %219 = tpu.matmul %216, %218, %cst_178 {dimension_numbers = #tpu.dot_dimension_numbers<[1], [0], [0], [1], [0, 0, 1, 1], [], []>} : vector<256x96xbf16>, vector<96x32xbf16>, vector<256x32xf32> -> vector<256x32xf32>
    %220 = arith.addf %209, %219 : vector<256x32xf32>
    %c4_179 = arith.constant 4 : index
    %c0_180 = arith.constant 0 : index
    %c0_181 = arith.constant 0 : index
    %221 = vector.load %arg3[%c4_179, %c0_180, %c0_181] : memref<5x1x32xf32, #tpu.memory_space<vmem>>, vector<1x1x32xf32>
    %222 = vector.shape_cast %221 : vector<1x1x32xf32> to vector<1x32xf32>
    %223 = vector.broadcast %222 : vector<1x32xf32> to vector<256x32xf32>
    %224 = arith.addf %220, %223 : vector<256x32xf32>
    %cst_182 = arith.constant 0.000000e+00 : f32
    %225 = vector.broadcast %cst_182 : f32 to vector<256x32xf32>
    %226 = arith.maximumf %224, %225 : vector<256x32xf32>
    %227 = vector.shape_cast %226 : vector<256x32xf32> to vector<16x16x32xf32>
    %228 = arith.truncf %227 : vector<16x16x32xf32> to vector<16x16x32xbf16>
    %c1_183 = arith.constant 1 : index
    %c1_184 = arith.constant 1 : index
    %c1_185 = arith.constant 1 : index
    %c0_186 = arith.constant 0 : index
    %229 = vector.load %arg6[%c1_183, %c1_184, %c1_185, %c0_186] : memref<2x18x18x32xbf16, #tpu.memory_space<vmem>>, vector<1x16x16x32xbf16>
    %230 = vector.shape_cast %229 : vector<1x16x16x32xbf16> to vector<16x16x32xbf16>
    %231 = vector.shape_cast %228 : vector<16x16x32xbf16> to vector<1x16x16x32xbf16>
    tpu.vector_store %arg6[%c1_183, %c1_184, %c1_185, %c0_186], %231 {strides = array<i32>} : memref<2x18x18x32xbf16, #tpu.memory_space<vmem>>, vector<1x16x16x32xbf16>,
    %cst_187 = arith.constant 0.000000e+00 : f32
    %232 = vector.broadcast %cst_187 : f32 to vector<256x8xf32>
    %c1_188 = arith.constant 1 : index
    %c0_189 = arith.constant 0 : index
    %c0_190 = arith.constant 0 : index
    %c0_191 = arith.constant 0 : index
    %233 = vector.load %arg6[%c1_188, %c0_189, %c0_190, %c0_191] : memref<2x18x18x32xbf16, #tpu.memory_space<vmem>>, vector<1x18x16x32xbf16>
    %234 = vector.shape_cast %233 : vector<1x18x16x32xbf16> to vector<18x16x32xbf16>
    %235 = vector.extract_strided_slice %234 {offsets = [0, 0, 0], sizes = [16, 16, 32], strides = [1, 1, 1]} : vector<18x16x32xbf16> to vector<16x16x32xbf16>
    %236 = vector.extract_strided_slice %234 {offsets = [1, 0, 0], sizes = [16, 16, 32], strides = [1, 1, 1]} : vector<18x16x32xbf16> to vector<16x16x32xbf16>
    %237 = vector.extract_strided_slice %234 {offsets = [2, 0, 0], sizes = [16, 16, 32], strides = [1, 1, 1]} : vector<18x16x32xbf16> to vector<16x16x32xbf16>
    %238 = tpu.concatenate %235, %236, %237 in 2 : vector<16x16x32xbf16>, vector<16x16x32xbf16>, vector<16x16x32xbf16> -> vector<16x16x96xbf16>
    %239 = vector.shape_cast %238 : vector<16x16x96xbf16> to vector<256x96xbf16>
    %c0_192 = arith.constant 0 : index
    %c0_193 = arith.constant 0 : index
    %c0_194 = arith.constant 0 : index
    %240 = vector.load %arg4[%c0_192, %c0_193, %c0_194] : memref<3x96x8xbf16, #tpu.memory_space<vmem>>, vector<1x96x8xbf16>
    %241 = vector.shape_cast %240 : vector<1x96x8xbf16> to vector<96x8xbf16>
    %cst_195 = arith.constant dense<0.000000e+00> : vector<256x8xf32>
    %242 = tpu.matmul %239, %241, %cst_195 {dimension_numbers = #tpu.dot_dimension_numbers<[1], [0], [0], [1], [0, 0, 1, 1], [], []>} : vector<256x96xbf16>, vector<96x8xbf16>, vector<256x8xf32> -> vector<256x8xf32>
    %243 = arith.addf %232, %242 : vector<256x8xf32>
    %c1_196 = arith.constant 1 : index
    %c0_197 = arith.constant 0 : index
    %c1_198 = arith.constant 1 : index
    %c0_199 = arith.constant 0 : index
    %244 = vector.load %arg6[%c1_196, %c0_197, %c1_198, %c0_199] : memref<2x18x18x32xbf16, #tpu.memory_space<vmem>>, vector<1x18x16x32xbf16>
    %245 = vector.shape_cast %244 : vector<1x18x16x32xbf16> to vector<18x16x32xbf16>
    %246 = vector.extract_strided_slice %245 {offsets = [0, 0, 0], sizes = [16, 16, 32], strides = [1, 1, 1]} : vector<18x16x32xbf16> to vector<16x16x32xbf16>
    %247 = vector.extract_strided_slice %245 {offsets = [1, 0, 0], sizes = [16, 16, 32], strides = [1, 1, 1]} : vector<18x16x32xbf16> to vector<16x16x32xbf16>
    %248 = vector.extract_strided_slice %245 {offsets = [2, 0, 0], sizes = [16, 16, 32], strides = [1, 1, 1]} : vector<18x16x32xbf16> to vector<16x16x32xbf16>
    %249 = tpu.concatenate %246, %247, %248 in 2 : vector<16x16x32xbf16>, vector<16x16x32xbf16>, vector<16x16x32xbf16> -> vector<16x16x96xbf16>
    %250 = vector.shape_cast %249 : vector<16x16x96xbf16> to vector<256x96xbf16>
    %c1_200 = arith.constant 1 : index
    %c0_201 = arith.constant 0 : index
    %c0_202 = arith.constant 0 : index
    %251 = vector.load %arg4[%c1_200, %c0_201, %c0_202] : memref<3x96x8xbf16, #tpu.memory_space<vmem>>, vector<1x96x8xbf16>
    %252 = vector.shape_cast %251 : vector<1x96x8xbf16> to vector<96x8xbf16>
    %cst_203 = arith.constant dense<0.000000e+00> : vector<256x8xf32>
    %253 = tpu.matmul %250, %252, %cst_203 {dimension_numbers = #tpu.dot_dimension_numbers<[1], [0], [0], [1], [0, 0, 1, 1], [], []>} : vector<256x96xbf16>, vector<96x8xbf16>, vector<256x8xf32> -> vector<256x8xf32>
    %254 = arith.addf %243, %253 : vector<256x8xf32>
    %c1_204 = arith.constant 1 : index
    %c0_205 = arith.constant 0 : index
    %c2_206 = arith.constant 2 : index
    %c0_207 = arith.constant 0 : index
    %255 = vector.load %arg6[%c1_204, %c0_205, %c2_206, %c0_207] : memref<2x18x18x32xbf16, #tpu.memory_space<vmem>>, vector<1x18x16x32xbf16>
    %256 = vector.shape_cast %255 : vector<1x18x16x32xbf16> to vector<18x16x32xbf16>
    %257 = vector.extract_strided_slice %256 {offsets = [0, 0, 0], sizes = [16, 16, 32], strides = [1, 1, 1]} : vector<18x16x32xbf16> to vector<16x16x32xbf16>
    %258 = vector.extract_strided_slice %256 {offsets = [1, 0, 0], sizes = [16, 16, 32], strides = [1, 1, 1]} : vector<18x16x32xbf16> to vector<16x16x32xbf16>
    %259 = vector.extract_strided_slice %256 {offsets = [2, 0, 0], sizes = [16, 16, 32], strides = [1, 1, 1]} : vector<18x16x32xbf16> to vector<16x16x32xbf16>
    %260 = tpu.concatenate %257, %258, %259 in 2 : vector<16x16x32xbf16>, vector<16x16x32xbf16>, vector<16x16x32xbf16> -> vector<16x16x96xbf16>
    %261 = vector.shape_cast %260 : vector<16x16x96xbf16> to vector<256x96xbf16>
    %c2_208 = arith.constant 2 : index
    %c0_209 = arith.constant 0 : index
    %c0_210 = arith.constant 0 : index
    %262 = vector.load %arg4[%c2_208, %c0_209, %c0_210] : memref<3x96x8xbf16, #tpu.memory_space<vmem>>, vector<1x96x8xbf16>
    %263 = vector.shape_cast %262 : vector<1x96x8xbf16> to vector<96x8xbf16>
    %cst_211 = arith.constant dense<0.000000e+00> : vector<256x8xf32>
    %264 = tpu.matmul %261, %263, %cst_211 {dimension_numbers = #tpu.dot_dimension_numbers<[1], [0], [0], [1], [0, 0, 1, 1], [], []>} : vector<256x96xbf16>, vector<96x8xbf16>, vector<256x8xf32> -> vector<256x8xf32>
    %265 = arith.addf %254, %264 : vector<256x8xf32>
    %266 = tpu.transpose %265, [1, 0] : vector<256x8xf32> -> vector<8x256xf32>
    %c0_212 = arith.constant 0 : index
    %c0_213 = arith.constant 0 : index
    %c0_214 = arith.constant 0 : index
    %267 = vector.load %arg5[%c0_212, %c0_213, %c0_214] : memref<1x8x256xf32, #tpu.memory_space<vmem>>, vector<1x8x256xf32>
    %268 = vector.shape_cast %267 : vector<1x8x256xf32> to vector<8x256xf32>
    %269 = vector.shape_cast %266 : vector<8x256xf32> to vector<1x8x256xf32>
    tpu.vector_store %arg5[%c0_212, %c0_213, %c0_214], %269 {strides = array<i32>} : memref<1x8x256xf32, #tpu.memory_space<vmem>>, vector<1x8x256xf32>,
    return
  }
  func.func @transform_0(%arg0: i32) -> (i32, i32, i32, i32) {
    %c0_i32 = arith.constant 0 : i32
    %c0_i32_0 = arith.constant 0 : i32
    %c0_i32_1 = arith.constant 0 : i32
    %c0_i32_2 = arith.constant 0 : i32
    return %arg0, %c0_i32, %c0_i32_0, %c0_i32_1 : i32, i32, i32, i32
  }
  func.func @transform_1(%arg0: i32) -> (i32, i32, i32, i32) {
    %c0_i32 = arith.constant 0 : i32
    %c0_i32_0 = arith.constant 0 : i32
    %c0_i32_1 = arith.constant 0 : i32
    %c0_i32_2 = arith.constant 0 : i32
    %c0_i32_3 = arith.constant 0 : i32
    return %c0_i32, %c0_i32_0, %c0_i32_1, %c0_i32_2 : i32, i32, i32, i32
  }
  func.func @transform_2(%arg0: i32) -> (i32, i32, i32) {
    %c0_i32 = arith.constant 0 : i32
    %c0_i32_0 = arith.constant 0 : i32
    %c0_i32_1 = arith.constant 0 : i32
    %c0_i32_2 = arith.constant 0 : i32
    return %c0_i32, %c0_i32_0, %c0_i32_1 : i32, i32, i32
  }
  func.func @transform_3(%arg0: i32) -> (i32, i32, i32) {
    %c0_i32 = arith.constant 0 : i32
    %c0_i32_0 = arith.constant 0 : i32
    %c0_i32_1 = arith.constant 0 : i32
    %c0_i32_2 = arith.constant 0 : i32
    return %c0_i32, %c0_i32_0, %c0_i32_1 : i32, i32, i32
  }
  func.func @transform_4(%arg0: i32) -> (i32, i32, i32) {
    %c0_i32 = arith.constant 0 : i32
    %c0_i32_0 = arith.constant 0 : i32
    %c0_i32_1 = arith.constant 0 : i32
    return %arg0, %c0_i32, %c0_i32_0 : i32, i32, i32
  }
}

</mosaic_0001>

<bundles_post_ra>
// kernel: dncnn_forward.1
= control target key start
LH: loop header
LB: loop body
LE: loop exit
PB: predicated region body
PF: predicated region fallthrough
CT: control target
= control target key end

     0   :  { %s17576_s15 = smov 0   ;;  %s23692_s0 = inlined_call_operand.vmem [shape: bf16[2,16,16,32], index: 0, kind: input, shape index: {}]   ;;  %s23693_s1 = inlined_call_operand.vmem [shape: bf16[5,3,96,32], index: 1, kind: input, shape index: {}]   ;;  %s23694_s2 = inlined_call_operand.vmem [shape: f32[5,1,32], index: 2, kind: input, shape index: {}]   ;;  %s23695_s3 = inlined_call_operand.vmem [shape: bf16[3,96,8], index: 3, kind: input, shape index: {}]   ;;  %s23696_s4 = inlined_call_operand.vmem [shape: f32[2,8,256], index: 4, kind: output, shape index: {}]  }
   0x1 LB: > { %s14299_s16 = sadd.s32 4294967295, %s17546_s15   ;;  %p14303_p0 = scmp.ge.s32.totalorder %s17546_s15, 1  ;;  %s17546_s15 = sphi %s17576_s15, %s14_s15  }
   0x2   : > { %p162_p1 = scmp.lt.s32.totalorder %s17546_s15, 3 }
   0x4   : > { %p163_p2 = pnand %p14303_p0, %p162_p1 }
   0x6   : > { %166 = sbr.rel (%p163_p2) target bundleno = 3601 (0xe11), region = 36 }
   0xd   : > { %p17586_p3 = scmp.lt.s32.totalorder %s14299_s16, 1  ;;  %vm199_vm0 = vcmask 257024   ;;  %v17548_v0 = vmov 0   ;;  %vm341_vm1 = vsmask.f32 256  ;;  %vm202_vm3 = vcmask 253952  }
   0xe   : > { %207 = vst.msk [vmem:[#allocation2 + $0x18] sm:$0xf] %vm199_vm0, %v17548_v0  ;;  %208 = vst.msk [vmem:[#allocation2 + $0x1c] sm:$0xf] %vm199_vm0, %v17548_v0  ;;  %vm342_vm2 = vsmask.f32 4368 }
   0xf   : > { %200 = vst.msk [vmem:[#allocation2] sm:$0xf] %vm199_vm0, %v17548_v0  ;;  %201 = vst.msk [vmem:[#allocation2 + $0x4] sm:$0xf] %vm199_vm0, %v17548_v0  ;;  %s23837_s16 = smov (!%p17586_p3, %s14299_s16), 1  ;;  %v17166_v1 = vld [vmem:[%s23693_s1 + $0x30] sm:$0xff]  }
  0x10   : > { %204 = vst.msk [vmem:[#allocation2 + $0xc] sm:$0xf] %vm199_vm0, %v17548_v0  ;;  %205 = vst.msk [vmem:[#allocation2 + $0x10] sm:$0xf] %vm199_vm0, %v17548_v0  ;;  %vm666_vm4 = vsmask.f32 7938  ;;  %15949 = vmatprep.subr.bf16.mxu0 %v17166_v1 }
  0x11   : > { %210 = vst.msk [vmem:[#allocation2 + $0x24] sm:$0xf] %vm199_vm0, %v17548_v0  ;;  %211 = vst.msk [vmem:[#allocation2 + $0x28] sm:$0xf] %vm199_vm0, %v17548_v0  ;;  %s15391_s18 = sshll.u32 %s23837_s16, 7  ;;  %15950 = vmatpush3.bf16.msra.mxu0 %v17166_v1  ;;  %v23748_v14 = vmov 0 }
  0x12   : > { %213 = vst.msk [vmem:[#allocation2 + $0x30] sm:$0xf] %vm199_vm0, %v17548_v0  ;;  %214 = vst.msk [vmem:[#allocation2 + $0x34] sm:$0xf] %vm199_vm0, %v17548_v0  ;;  %s17816_s21 = scalar_lea.vmem %s23692_s0, %s15391_s18  ;;  %v23751_v19 = vmov 0  ;;  %v23754_v40 = vmov 0 }
  0x13   : > { %216 = vst.msk [vmem:[#allocation2 + $0x3c] sm:$0xf] %vm199_vm0, %v17548_v0  ;;  %217 = vst.msk [vmem:[#allocation2 + $0x40] sm:$0xf] %vm199_vm0, %v17548_v0  ;;  %v311_v2 = vld [vmem:[%s17816_s21 + $0x8] sm:$0xf] }
  0x14   : > { %219 = vst.msk [vmem:[#allocation2 + $0x48] sm:$0xf] %vm199_vm0, %v17548_v0  ;;  %220 = vst.msk [vmem:[#allocation2 + $0x4c] sm:$0xf] %vm199_vm0, %v17548_v0  ;;  %v312_v3 = vld [vmem:[%s17816_s21 + $0xc] sm:$0xf] }
  0x15   : > { %222 = vst.msk [vmem:[#allocation2 + $0x54] sm:$0xf] %vm199_vm0, %v17548_v0  ;;  %223 = vst.msk [vmem:[#allocation2 + $0x58] sm:$0xf] %vm199_vm0, %v17548_v0  ;;  %v309_v4 = vld [vmem:[%s17816_s21] sm:$0xf] }
  0x16   : > { %225 = vst.msk [vmem:[#allocation2 + $0x60] sm:$0xf] %vm199_vm0, %v17548_v0  ;;  %226 = vst.msk [vmem:[#allocation2 + $0x64] sm:$0xf] %vm199_vm0, %v17548_v0  ;;  %v362_v5 = vshrl.u32 %v311_v2, 16  ;;  %v365_v6 = vshll.u32 %v311_v2, 16 }
  0x17   : > { %228 = vst.msk [vmem:[#allocation2 + $0x6c] sm:$0xf] %vm199_vm0, %v17548_v0  ;;  %229 = vst.msk [vmem:[#allocation2 + $0x70] sm:$0xf] %vm199_vm0, %v17548_v0  ;;  %v370_v7 = vshrl.u32 %v312_v3, 16  ;;  %v373_v8 = vshll.u32 %v312_v3, 16 }
  0x18   : > { %231 = vst.msk [vmem:[#allocation2 + $0x78] sm:$0xf] %vm199_vm0, %v17548_v0  ;;  %232 = vst.msk [vmem:[#allocation2 + $0x7c] sm:$0xf] %vm199_vm0, %v17548_v0  ;;  %v310_v9 = vld [vmem:[%s17816_s21 + $0x4] sm:$0xf] }
  0x19   : > { %234 = vst.msk [vmem:[#allocation2 + $0x84] sm:$0xf] %vm199_vm0, %v17548_v0  ;;  %235 = vst.msk [vmem:[#allocation2 + $0x88] sm:$0xf] %vm199_vm0, %v17548_v0  ;;  %v345_v10 = vshrl.u32 %v309_v4, 16  ;;  %v348_v11 = vshll.u32 %v309_v4, 16 }
  0x1a   : > { %237 = vst.msk [vmem:[#allocation2 + $0x90] sm:$0xf] %vm199_vm0, %v17548_v0  ;;  %238 = vst.msk [vmem:[#allocation2 + $0x94] sm:$0xf] %vm199_vm0, %v17548_v0  ;;  %v353_v12 = vshrl.u32 %v310_v9, 16  ;;  %v356_v13 = vshll.u32 %v310_v9, 16 }
  0x1b   : > { %240 = vst.msk [vmem:[#allocation2 + $0x9c] sm:$0xf] %vm199_vm0, %v17548_v0  ;;  %241 = vst.msk [vmem:[#allocation2 + $0xa0] sm:$0xf] %vm199_vm0, %v17548_v0  ;;  %v364_v15 = vrot.slane %v362_v5, 7  ;;  %v372_v16 = vrot.slane %v370_v7, 7 }
  0x1c   : > { %243 = vst.msk [vmem:[#allocation2 + $0xa8] sm:$0xf] %vm199_vm0, %v17548_v0  ;;  %244 = vst.msk [vmem:[#allocation2 + $0xac] sm:$0xf] %vm199_vm0, %v17548_v0  ;;  %v677_v17 = vld [vmem:[#allocation2 + $0x18] sm:$0xf] }
  0x1d   : > { %246 = vst.msk [vmem:[#allocation2 + $0xb4] sm:$0xf] %vm199_vm0, %v17548_v0  ;;  %247 = vst.msk [vmem:[#allocation2 + $0xb8] sm:$0xf] %vm199_vm0, %v17548_v0  ;;  %v313_v18 = vld [vmem:[%s17816_s21 + $0x10] sm:$0xf]  ;;  %v367_v25 = vor.u32 %v365_v6, %v364_v15  ;;  %v375_v27 = vor.u32 %v373_v8, %v372_v16 }
  0x1e   : > { %249 = vst.msk [vmem:[#allocation2 + $0xc0] sm:$0xf] %vm199_vm0, %v17548_v0  ;;  %250 = vst.msk [vmem:[#allocation2 + $0xc4] sm:$0xf] %vm199_vm0, %v17548_v0  ;;  %v347_v20 = vrot.slane %v345_v10, 7  ;;  %v355_v21 = vrot.slane %v353_v12, 7 }
  0x1f   : > { %252 = vst.msk [vmem:[#allocation2 + $0xcc] sm:$0xf] %vm199_vm0, %v17548_v0  ;;  %253 = vst.msk [vmem:[#allocation2 + $0xd0] sm:$0xf] %vm199_vm0, %v17548_v0  ;;  %v314_v22 = vld [vmem:[%s17816_s21 + $0x14] sm:$0xf] }
  0x20   : > { %255 = vst.msk [vmem:[#allocation2 + $0xd8] sm:$0xf] %vm199_vm0, %v17548_v0  ;;  %256 = vst.msk [vmem:[#allocation2 + $0xdc] sm:$0xf] %vm199_vm0, %v17548_v0  ;;  %v379_v23 = vshrl.u32 %v313_v18, 16  ;;  %v382_v24 = vshll.u32 %v313_v18, 16  ;;  %v350_v30 = vor.u32 %v348_v11, %v347_v20  ;;  %v358_v32 = vor.u32 %v356_v13, %v355_v21 }
  0x21   : > { %258 = vst.msk [vmem:[#allocation2 + $0xe4] sm:$0xf] %vm199_vm0, %v17548_v0  ;;  %259 = vst.msk [vmem:[#allocation2 + $0xe8] sm:$0xf] %vm199_vm0, %v17548_v0  ;;  %v368_v26 = vrot.slane %v364_v15, 4  ;;  %v387_v29 = vshrl.u32 %v314_v22, 16 }
  0x22   : > { %261 = vst.msk [vmem:[#allocation2 + $0xf0] sm:$0xf] %vm199_vm0, %v17548_v0  ;;  %262 = vst.msk [vmem:[#allocation2 + $0xf4] sm:$0xf] %vm199_vm0, %v17548_v0  ;;  %v668_v28 = vld [vmem:[#allocation2 + $0xc] sm:$0xf] }
  0x23   : > { %264 = vst.msk [vmem:[#allocation2 + $0xfc] sm:$0xf] %vm199_vm0, %v17548_v0  ;;  %265 = vst.msk [vmem:[#allocation2 + $0x100] sm:$0xf] %vm199_vm0, %v17548_v0  ;;  %v351_v31 = vrot.slane %v347_v20, 4  ;;  %v381_v33 = vrot.slane %v379_v23, 7 }
  0x24   : > { %267 = vst.msk [vmem:[#allocation2 + $0x108] sm:$0xf] %vm199_vm0, %v17548_v0  ;;  %268 = vst.msk [vmem:[#allocation2 + $0x10c] sm:$0xf] %vm199_vm0, %v17548_v0  ;;  %v684_v34 = vld [vmem:[#allocation2 + $0x24] sm:$0xf] }
  0x25   : > { %270 = vst.msk [vmem:[#allocation2 + $0x114] sm:$0xf] %vm199_vm0, %v17548_v0  ;;  %271 = vst.msk [vmem:[#allocation2 + $0x118] sm:$0xf] %vm199_vm0, %v17548_v0  ;;  %v389_v38 = vrot.slane %v387_v29, 7  ;;  %v390_v39 = vshll.u32 %v314_v22, 16  ;;  %v384_v45 = vor.u32 %v382_v24, %v381_v33 }
  0x26   : > { %273 = vst.msk [vmem:[#allocation2 + $0x120] sm:$0xf] %vm199_vm0, %v17548_v0  ;;  %274 = vst.msk [vmem:[#allocation2 + $0x124] sm:$0xf] %vm199_vm0, %v17548_v0  ;;  %v315_v41 = vld [vmem:[%s17816_s21 + $0x18] sm:$0xf] }
  0x27   : > { %276 = vst.msk [vmem:[#allocation2 + $0x12c] sm:$0xf] %vm199_vm0, %v17548_v0  ;;  %277 = vst.msk [vmem:[#allocation2 + $0x130] sm:$0xf] %vm199_vm0, %v17548_v0  ;;  %v316_v42 = vld [vmem:[%s17816_s21 + $0x1c] sm:$0xf]  ;;  %v392_v50 = vor.u32 %v390_v39, %v389_v38 }
  0x28   : > { %279 = vst.msk [vmem:[#allocation2 + $0x138] sm:$0xf] %vm199_vm0, %v17548_v0  ;;  %280 = vst.msk [vmem:[#allocation2 + $0x13c] sm:$0xf] %vm199_vm0, %v17548_v0  ;;  %v385_v46 = vrot.slane %v381_v33, 4  ;;  %v17168_v49 = vld [vmem:[%s23693_s1 + $0x38] sm:$0xff]  }
  0x29   : > { %282 = vst.msk [vmem:[#allocation2 + $0x144] sm:$0xf] %vm199_vm0, %v17548_v0  ;;  %283 = vst.msk [vmem:[#allocation2 + $0x148] sm:$0xf] %vm199_vm0, %v17548_v0  ;;  %v377_v51 = vrot.slane %v372_v16, 4  ;;  %v360_v52 = vrot.slane %v355_v21, 4  ;;  %15951 = vmatprep.subr.bf16.mxu0 %v17168_v49 }
  0x2a   : > { %285 = vst.msk [vmem:[#allocation2 + $0x150] sm:$0xf] %vm199_vm0, %v17548_v0  ;;  %286 = vst.msk [vmem:[#allocation2 + $0x154] sm:$0xf] %vm199_vm0, %v17548_v0  ;;  %v394_v53 = vrot.slane %v389_v38, 4  ;;  %v17171_v55 = vld [vmem:[%s23693_s1 + $0x40] sm:$0xff]   ;;  %15952 = vmatpush3.bf16.msra.mxu0 %v17168_v49 }
  0x2b   : > { %288 = vst.msk [vmem:[#allocation2 + $0x15c] sm:$0xf] %vm199_vm0, %v17548_v0  ;;  %289 = vst.msk [vmem:[#allocation2 + $0x160] sm:$0xf] %vm199_vm0, %v17548_v0  ;;  %v317_v54 = vld [vmem:[%s17816_s21 + $0x20] sm:$0xf]  ;;  %15953 = vmatprep.subr.bf16.mxu0 %v17171_v55 }
  0x2c   : > { %291 = vst.msk [vmem:[#allocation2 + $0x168] sm:$0xf] %vm199_vm0, %v17548_v0  ;;  %292 = vst.msk [vmem:[#allocation2 + $0x16c] sm:$0xf] %vm199_vm0, %v17548_v0  ;;  %v396_v57 = vshrl.u32 %v315_v41, 16  ;;  %v399_v58 = vshll.u32 %v315_v41, 16 }
  0x2d   : > { %294 = vst.msk [vmem:[#allocation2 + $0x174] sm:$0xf] %vm199_vm0, %v17548_v0  ;;  %295 = vst.msk [vmem:[#allocation2 + $0x178] sm:$0xf] %vm199_vm0, %v17548_v0  ;;  %v404_v59 = vshrl.u32 %v316_v42, 16  ;;  %v407_v4 = vshll.u32 %v316_v42, 16 }
  0x2e   : > { %297 = vst.msk [vmem:[#allocation2 + $0x180] sm:$0xf] %vm199_vm0, %v17548_v0  ;;  %298 = vst.msk [vmem:[#allocation2 + $0x184] sm:$0xf] %vm199_vm0, %v17548_v0  ;;  %v318_v60 = vld [vmem:[%s17816_s21 + $0x24] sm:$0xf]  ;;  %15954 = vmatpush3.bf16.msra.mxu0 %v17171_v55 }
  0x2f   : > { %300 = vst.msk [vmem:[#allocation2 + $0x18c] sm:$0xf] %vm199_vm0, %v17548_v0  ;;  %301 = vst.msk [vmem:[#allocation2 + $0x190] sm:$0xf] %vm199_vm0, %v17548_v0  ;;  %v17876_v1 = vld [vmem:[%s17816_s21 + $0x28] sm:$0xf] }
  0x30   : > { %303 = vst.msk [vmem:[#allocation2 + $0x198] sm:$0xf] %vm199_vm0, %v17548_v0  ;;  %304 = vst.msk [vmem:[#allocation2 + $0x19c] sm:$0xf] %vm199_vm0, %v17548_v0  ;;  %v398_v2 = vrot.slane %v396_v57, 7  ;;  %v406_v3 = vrot.slane %v404_v59, 7 }
  0x31   : > { %306 = vst.msk [vmem:[#allocation2 + $0x1a4] sm:$0xf] %vm199_vm0, %v17548_v0  ;;  %307 = vst.msk [vmem:[#allocation2 + $0x1a8] sm:$0xf] %vm199_vm0, %v17548_v0  ;;  %v413_v5 = vshrl.u32 %v317_v54, 16  ;;  %v416_v7 = vshll.u32 %v317_v54, 16 }
  0x32   : > { %209 = vst.msk [vmem:[#allocation2 + $0x20] sm:$0x1] %vm202_vm3, %v17548_v0  ;;  %203 = vst.msk [vmem:[#allocation2 + $0x8] sm:$0x1] %vm202_vm3, %v17548_v0  ;;  %v691_v6 = vld [vmem:[#allocation2 + $0x30] sm:$0xf]  ;;  %v401_v11 = vor.u32 %v399_v58, %v398_v2  ;;  %v409_v13 = vor.u32 %v407_v4, %v406_v3 }
  0x33   : > { %206 = vst.msk [vmem:[#allocation2 + $0x14] sm:$0x1] %vm202_vm3, %v17548_v0  ;;  %212 = vst.msk [vmem:[#allocation2 + $0x2c] sm:$0x1] %vm202_vm3, %v17548_v0  ;;  %v421_v8 = vshrl.u32 %v318_v60, 16  ;;  %v424_v9 = vshll.u32 %v318_v60, 16 }
  0x34   : > { %215 = vst.msk [vmem:[#allocation2 + $0x38] sm:$0x1] %vm202_vm3, %v17548_v0  ;;  %218 = vst.msk [vmem:[#allocation2 + $0x44] sm:$0x1] %vm202_vm3, %v17548_v0  ;;  %v430_v10 = vshrl.u32 %v17876_v1, 16  ;;  %v402_v12 = vrot.slane %v398_v2, 4 }
  0x35   : > { %221 = vst.msk [vmem:[#allocation2 + $0x50] sm:$0x1] %vm202_vm3, %v17548_v0  ;;  %224 = vst.msk [vmem:[#allocation2 + $0x5c] sm:$0x1] %vm202_vm3, %v17548_v0  ;;  %v415_v15 = vrot.slane %v413_v5, 7  ;;  %v423_v21 = vrot.slane %v421_v8, 7 }
  0x36   : > { %227 = vst.msk [vmem:[#allocation2 + $0x68] sm:$0x1] %vm202_vm3, %v17548_v0  ;;  %230 = vst.msk [vmem:[#allocation2 + $0x74] sm:$0x1] %vm202_vm3, %v17548_v0  ;;  %v698_v16 = vld [vmem:[#allocation2 + $0x3c] sm:$0xf] }
  0x37   : > { %233 = vst.msk [vmem:[#allocation2 + $0x80] sm:$0x1] %vm202_vm3, %v17548_v0  ;;  %236 = vst.msk [vmem:[#allocation2 + $0x8c] sm:$0x1] %vm202_vm3, %v17548_v0  ;;  %v411_v22 = vrot.slane %v406_v3, 4  ;;  %s17549_s30 = smov 64  }
  0x38   : > { %239 = vst.msk [vmem:[#allocation2 + $0x98] sm:$0x1] %vm202_vm3, %v17548_v0  ;;  %242 = vst.msk [vmem:[#allocation2 + $0xa4] sm:$0x1] %vm202_vm3, %v17548_v0  ;;  %v428_v41 = vrot.slane %v423_v21, 4  ;;  %v432_v42 = vrot.slane %v430_v10, 7 }
  0x39   : > { %245 = vst.msk [vmem:[#allocation2 + $0xb0] sm:$0x1] %vm202_vm3, %v17548_v0  ;;  %248 = vst.msk [vmem:[#allocation2 + $0xbc] sm:$0x1] %vm202_vm3, %v17548_v0  ;;  %v681_v35 = vld [vmem:[#allocation2 + $0x20] sm:$0x1] }
  0x3a   : > { %251 = vst.msk [vmem:[#allocation2 + $0xc8] sm:$0x1] %vm202_vm3, %v17548_v0  ;;  %254 = vst.msk [vmem:[#allocation2 + $0xd4] sm:$0x1] %vm202_vm3, %v17548_v0  ;;  %v674_v47 = vld [vmem:[#allocation2 + $0x14] sm:$0x1] }
  0x3b   : > { %257 = vst.msk [vmem:[#allocation2 + $0xe0] sm:$0x1] %vm202_vm3, %v17548_v0  ;;  %260 = vst.msk [vmem:[#allocation2 + $0xec] sm:$0x1] %vm202_vm3, %v17548_v0  ;;  %v688_v48 = vld [vmem:[#allocation2 + $0x2c] sm:$0x1] }
  0x3c   : > { %263 = vst.msk [vmem:[#allocation2 + $0xf8] sm:$0x1] %vm202_vm3, %v17548_v0  ;;  %266 = vst.msk [vmem:[#allocation2 + $0x104] sm:$0x1] %vm202_vm3, %v17548_v0  ;;  %v702_v29 = vld [vmem:[#allocation2 + $0x44] sm:$0x1] }
  0x3d   : > { %269 = vst.msk [vmem:[#allocation2 + $0x110] sm:$0x1] %vm202_vm3, %v17548_v0  ;;  %272 = vst.msk [vmem:[#allocation2 + $0x11c] sm:$0x1] %vm202_vm3, %v17548_v0  ;;  %s17550_s7 = smov 32   ;;  %v17177_v58 = vld [vmem:[%s23693_s1 + $0x58] sm:$0xff]  }
  0x3e   : > { %275 = vst.msk [vmem:[#allocation2 + $0x128] sm:$0x1] %vm202_vm3, %v17548_v0  ;;  %278 = vst.msk [vmem:[#allocation2 + $0x134] sm:$0x1] %vm202_vm3, %v17548_v0  ;;  %v323_v57 = vld [vmem:[%s17816_s21 + $0x38] sm:$0xf] }
  0x3f   : > { %281 = vst.msk [vmem:[#allocation2 + $0x140] sm:$0x1] %vm202_vm3, %v17548_v0  ;;  %284 = vst.msk [vmem:[#allocation2 + $0x14c] sm:$0x1] %vm202_vm3, %v17548_v0  ;;  %v716_v4 = vld [vmem:[#allocation2 + $0x5c] sm:$0x1] }
  0x40   : > { %287 = vst.msk [vmem:[#allocation2 + $0x158] sm:$0x1] %vm202_vm3, %v17548_v0  ;;  %290 = vst.msk [vmem:[#allocation2 + $0x164] sm:$0x1] %vm202_vm3, %v17548_v0  ;;  %vm972_vm8 = vcmask 261120   ;;  %vm1021_vm9 = vcmask 523264  }
  0x41   : > { %293 = vst.msk [vmem:[#allocation2 + $0x170] sm:$0x1] %vm202_vm3, %v17548_v0  ;;  %296 = vst.msk [vmem:[#allocation2 + $0x17c] sm:$0x1] %vm202_vm3, %v17548_v0  ;;  %vm1282_vm10 = vsmask.f32 7424 }
  0x42   : > { %299 = vst.msk [vmem:[#allocation2 + $0x188] sm:$0x1] %vm202_vm3, %v17548_v0  ;;  %302 = vst.msk [vmem:[#allocation2 + $0x194] sm:$0x1] %vm202_vm3, %v17548_v0  ;;  %vm1492_vm11 = vcmask 785408   ;;  %vm2179_vm12 = vcmask 1046528  }
  0x43   : > { %305 = vst.msk [vmem:[#allocation2 + $0x1a0] sm:$0x1] %vm202_vm3, %v17548_v0  ;;  %308 = vst.msk [vmem:[#allocation2 + $0x1ac] sm:$0x1] %vm202_vm3, %v17548_v0  ;;  %s15392_s26 = sshll.u32 %s23837_s16, 4 }
  0x44   : > { %vm17827_vm5 = vmor %vm341_vm1, %vm342_vm2  ;;  %s197_s29 = scalar_lea.vmem %s23696_s4, %s15392_s26 }
  0x45   : > { %v23749_v14 = vsel %vm17827_vm5, 4294967295, %v23748_v14  ;;  %vm17834_vm6 = vmand %vm199_vm0, %vm666_vm4  ;;  %v376_v36 = vsel %vm17827_vm5, %v368_v26, %v375_v27  ;;  %v359_v43 = vsel %vm17827_vm5, %v351_v31, %v358_v32  ;;  %v393_v61 = vsel %vm17827_vm5, %v385_v46, %v392_v50 }
  0x46   : > { %23750 = vst [vmem:[#allocation3_spill] sm:$0xff] %v23749_v14  ;;  %v23752_v19 = vsel %vm17834_vm6, 4294967295, %v23751_v19  ;;  %v678_v37 = vsel %vm17834_vm6, %v367_v25, %v677_v17  ;;  %vm17845_vm7 = vmand %vm202_vm3, %vm341_vm1  ;;  %v669_v44 = vsel %vm17834_vm6, %v350_v30, %v668_v28  ;;  %v685_v56 = vsel %vm17834_vm6, %v384_v45, %v684_v34  ;;  %v695_v17 = vld [vmem:[#allocation2 + $0x38] sm:$0x1]  ;;  %v320_v34 = vld [vmem:[%s17816_s21 + $0x2c] sm:$0xf] }
  0x47   : > { %23753 = vst [vmem:[#allocation4_spill] sm:$0xff] %v23752_v19  ;;  %v23755_v40 = vsel %vm17845_vm7, 4294967295, %v23754_v40  ;;  %679 = vst [vmem:[#allocation2 + $0x18] sm:$0xf] %v678_v37  ;;  %v682_v62 = vsel %vm17845_vm7, %v377_v51, %v681_v35  ;;  %v675_v63 = vsel %vm17845_vm7, %v360_v52, %v674_v47  ;;  %v689_v0 = vsel %vm17845_vm7, %v394_v53, %v688_v48  ;;  %v705_v35 = vld [vmem:[#allocation2 + $0x48] sm:$0xf] }
  0x48   : > { %23756 = vst [vmem:[#allocation5_spill] sm:$0xff] %v23755_v40  ;;  %680 = vst.msk [vmem:[#allocation2 + $0x1c] sm:$0xf] %vm199_vm0, %v376_v36  ;;  %v410_v26 = vsel %vm17827_vm5, %v402_v12, %v409_v13  ;;  %v692_v27 = vsel %vm17834_vm6, %v401_v11, %v691_v6  ;;  %v418_v28 = vor.u32 %v416_v7, %v415_v15  ;;  %v419_v31 = vrot.slane %v415_v15, 4  ;;  %v321_v36 = vld [vmem:[%s17816_s21 + $0x30] sm:$0xf] }
  0x49   : > { %670 = vst [vmem:[#allocation2 + $0xc] sm:$0xf] %v669_v44  ;;  %671 = vst.msk [vmem:[#allocation2 + $0x10] sm:$0xf] %vm199_vm0, %v359_v43  ;;  %v426_v32 = vor.u32 %v424_v9, %v423_v21  ;;  %v696_v33 = vsel %vm17845_vm7, %v411_v22, %v695_v17  ;;  %v17173_v37 = vld [vmem:[%s23693_s1 + $0x48] sm:$0xff]   ;;  %v433_v43 = vshll.u32 %v17876_v1, 16  ;;  %v703_v49 = vsel %vm17845_vm7, %v428_v41, %v702_v29 }
  0x4a   : > { %686 = vst [vmem:[#allocation2 + $0x24] sm:$0xf] %v685_v56  ;;  %687 = vst.msk [vmem:[#allocation2 + $0x28] sm:$0xf] %vm199_vm0, %v393_v61  ;;  %v699_v39 = vsel %vm17834_vm6, %v418_v28, %v698_v16  ;;  %v17176_v44 = vld [vmem:[%s23693_s1 + $0x50] sm:$0xff]   ;;  %15955 = vmatprep.subr.bf16.mxu0 %v17173_v37  ;;  %v438_v53 = vshrl.u32 %v320_v34, 16 }
  0x4b   : > { %683 = vst [vmem:[#allocation2 + $0x20] sm:$0x1] %v682_v62  ;;  %676 = vst [vmem:[#allocation2 + $0x14] sm:$0x1] %v675_v63  ;;  %v427_v46 = vsel %vm17827_vm5, %v419_v31, %v426_v32  ;;  %v435_v50 = vor.u32 %v433_v43, %v432_v42  ;;  %v322_v51 = vld [vmem:[%s17816_s21 + $0x34] sm:$0xf]  ;;  %15956 = vmatpush3.bf16.msra.mxu0 %v17173_v37 }
  0x4c   : > { %690 = vst [vmem:[#allocation2 + $0x2c] sm:$0x1] %v689_v0  ;;  %693 = vst [vmem:[#allocation2 + $0x30] sm:$0xf] %v692_v27  ;;  %15957 = vmatprep.subr.bf16.mxu0 %v17176_v44  ;;  %v441_v54 = vshll.u32 %v320_v34, 16  ;;  %v447_v56 = vshrl.u32 %v321_v36, 16 }
  0x4d   : > { %694 = vst.msk [vmem:[#allocation2 + $0x34] sm:$0xf] %vm199_vm0, %v410_v26  ;;  %697 = vst [vmem:[#allocation2 + $0x38] sm:$0x1] %v696_v33  ;;  %v706_v55 = vsel %vm17834_vm6, %v435_v50, %v705_v35  ;;  %v450_v59 = vshll.u32 %v321_v36, 16  ;;  %v455_v60 = vshrl.u32 %v322_v51, 16 }
  0x4e   : > { %v786_v18 = vld [vmem:[#allocation2 + $0x18] sm:$0xf]  ;;  %700 = vst [vmem:[#allocation2 + $0x3c] sm:$0xf] %v699_v39  ;;  %701 = vst.msk [vmem:[#allocation2 + $0x40] sm:$0xf] %vm199_vm0, %v427_v46 }
  0x4f   : > { %v787_v20 = vld [vmem:[#allocation2 + $0x1c] sm:$0xf]  ;;  %704 = vst [vmem:[#allocation2 + $0x44] sm:$0x1] %v703_v49  ;;  %707 = vst [vmem:[#allocation2 + $0x48] sm:$0xf] %v706_v55  ;;  %15958 = vmatpush3.bf16.msra.mxu0 %v17176_v44 }
  0x50   : > { %v17880_v23 = vcombine.low %v786_v18, %v787_v20  ;;  %v784_v24 = vld [vmem:[#allocation2 + $0xc] sm:$0xf]  ;;  %v785_v25 = vld [vmem:[#allocation2 + $0x10] sm:$0xf]  ;;  %v458_v61 = vshll.u32 %v322_v51, 16  ;;  %v464_v0 = vshrl.u32 %v323_v57, 16  ;;  %15959 = vmatprep.subr.bf16.mxu0 %v17177_v58 }
  0x51   : > { %v17886_v30 = vcombine.low %v784_v24, %v785_v25  ;;  %v788_v38 = vld [vmem:[#allocation2 + $0x24] sm:$0xf]  ;;  %v789_v45 = vld [vmem:[#allocation2 + $0x28] sm:$0xf]  ;;  %v712_v62 = vld [vmem:[#allocation2 + $0x54] sm:$0xf] }
  0x52   : > { %940 = vrot.lane.b32.xlu1 %v17880_v23, %s17549_s30  ;;  %v17908_v47 = vcombine.low %v788_v38, %v789_v45  ;;  %v17910_v48 = vld [vmem:[#allocation2 + $0x20] ss:$0 sps:$4 sm:$0x11]   ;;  %v17140_v52 = vld [vmem:[#allocation2 + $0x14] ss:$0 sps:$4 sm:$0x11]  }
  0x53   : > { %903 = vrot.lane.b32.xlu0 %v17886_v30, %s17550_s7  ;;  %v709_v63 = vld [vmem:[#allocation2 + $0x50] sm:$0x1]  ;;  %v436_v1 = vrot.slane %v432_v42, 4  ;;  %v440_v2 = vrot.slane %v438_v53, 7  ;;  %v449_v3 = vrot.slane %v447_v56, 7  ;;  %v457_v6 = vrot.slane %v455_v60, 7  ;;  %15960 = vmatpush3.bf16.msra.mxu0 %v17177_v58 }
  0x54   : > { %v17926_v5 = vld [vmem:[#allocation2 + $0x2c] ss:$0 sps:$4 sm:$0x11]   ;;  %v790_v7 = vld [vmem:[#allocation2 + $0x30] sm:$0xf]  ;;  %v466_v17 = vrot.slane %v464_v0, 7 }
  0x55   : > { %v791_v8 = vld [vmem:[#allocation2 + $0x34] sm:$0xf]  ;;  %v443_v9 = vor.u32 %v441_v54, %v440_v2  ;;  %v452_v10 = vor.u32 %v450_v59, %v449_v3  ;;  %v453_v11 = vrot.slane %v449_v3, 4  ;;  %v445_v12 = vrot.slane %v440_v2, 4  ;;  %v324_v16 = vld [vmem:[%s17816_s21 + $0x3c] sm:$0xf] }
  0x56   : > { %942 = vrot.lane.b32.xlu1 %v17908_v47, %s17549_s30  ;;  %v460_v13 = vor.u32 %v458_v61, %v457_v6  ;;  %v462_v15 = vrot.slane %v457_v6, 4  ;;  %v467_v18 = vshll.u32 %v323_v57, 16  ;;  %v719_v24 = vld [vmem:[#allocation2 + $0x60] sm:$0xf]  ;;  %v17938_v25 = vcombine.low %v790_v7, %v791_v8  ;;  %v792_v26 = vld [vmem:[#allocation2 + $0x3c] sm:$0xf] }
  0x57   : > { %905 = vrot.lane.b32.xlu0 %v17880_v23, %s17550_s7  ;;  %v444_v20 = vsel %vm17827_vm5, %v436_v1, %v443_v9  ;;  %v713_v21 = vsel %vm17834_vm6, %v452_v10, %v712_v62  ;;  %v710_v22 = vsel %vm17845_vm7, %v445_v12, %v709_v63  ;;  %v325_v31 = vld [vmem:[%s17816_s21 + $0x40] sm:$0xf]  ;;  %v326_v32 = vld [vmem:[%s17816_s21 + $0x44] sm:$0xf]  ;;  %v472_v34 = vshrl.u32 %v324_v16, 16 }
  0x58   : > { %708 = vst.msk [vmem:[#allocation2 + $0x4c] sm:$0xf] %vm199_vm0, %v444_v20  ;;  %v461_v27 = vsel %vm17827_vm5, %v453_v11, %v460_v13  ;;  %714 = vst [vmem:[#allocation2 + $0x54] sm:$0xf] %v713_v21  ;;  %v717_v28 = vsel %vm17845_vm7, %v462_v15, %v716_v4  ;;  %v469_v29 = vor.u32 %v467_v18, %v466_v17  ;;  %v793_v33 = vld [vmem:[#allocation2 + $0x40] sm:$0xf] }
  0x59   : > { %711 = vst [vmem:[#allocation2 + $0x50] sm:$0x1] %v710_v22  ;;  %715 = vst.msk [vmem:[#allocation2 + $0x58] sm:$0xf] %vm199_vm0, %v461_v27  ;;  %v475_v35 = vshll.u32 %v324_v16, 16  ;;  %v481_v36 = vshrl.u32 %v325_v31, 16  ;;  %v17955_v50 = vcombine.low %v792_v26, %v793_v33 }
  0x5a   : > { %1137 = vrot.lane.b32.xlu1 %v17910_v48, %s17550_s7  ;;  %718 = vst [vmem:[#allocation2 + $0x5c] sm:$0x1] %v717_v28  ;;  %v484_v37 = vshll.u32 %v325_v31, 16  ;;  %v470_v38 = vrot.slane %v466_v17, 4  ;;  %v720_v39 = vsel %vm17834_vm6, %v469_v29, %v719_v24  ;;  %v489_v41 = vshrl.u32 %v326_v32, 16 }
  0x5b   : > { %1135 = vrot.lane.b32.xlu0 %v17140_v52, %s17550_s7  ;;  %v492_v42 = vshll.u32 %v326_v32, 16  ;;  %v726_v43 = vld [vmem:[#allocation2 + $0x6c] sm:$0xf]  ;;  %v474_v44 = vrot.slane %v472_v34, 7  ;;  %721 = vst [vmem:[#allocation2 + $0x60] sm:$0xf] %v720_v39 }
  0x5c   : > { %v483_v45 = vrot.slane %v481_v36, 7  ;;  %v723_v46 = vld [vmem:[#allocation2 + $0x68] sm:$0x1]  ;;  %v491_v51 = vrot.slane %v489_v41, 7  ;;  %v328_v52 = vld [vmem:[%s17816_s21 + $0x4c] sm:$0xf] }
  0x5d   : > { %v327_v49 = vld [vmem:[%s17816_s21 + $0x48] sm:$0xf]  ;;  %v479_v57 = vrot.slane %v474_v44, 4  ;;  %v730_v58 = vld [vmem:[#allocation2 + $0x74] sm:$0x1]  ;;  %v506_v62 = vshrl.u32 %v328_v52, 16 }
  0x5e   : > { %1172 = vrot.lane.b32.xlu1 %v17926_v5, %s17549_s30  ;;  %v498_v53 = vshrl.u32 %v327_v49, 16  ;;  %v501_v54 = vshll.u32 %v327_v49, 16  ;;  %v486_v55 = vor.u32 %v484_v37, %v483_v45  ;;  %v487_v56 = vrot.slane %v483_v45, 4  ;;  %v733_v2 = vld [vmem:[#allocation2 + $0x78] sm:$0xf] }
  0x5f   : > { %1170 = vrot.lane.b32.xlu0 %v17910_v48, %s17549_s30  ;;  %v477_v48 = vor.u32 %v475_v35, %v474_v44  ;;  %v494_v59 = vor.u32 %v492_v42, %v491_v51  ;;  %v496_v60 = vrot.slane %v491_v51, 4  ;;  %v724_v1 = vsel %vm17845_vm7, %v479_v57, %v723_v46  ;;  %v329_v3 = vld [vmem:[%s17816_s21 + $0x50] sm:$0xf]  ;;  %v330_v8 = vld [vmem:[%s17816_s21 + $0x54] sm:$0xf] }
  0x60   : > { %v500_v61 = vrot.slane %v498_v53, 7  ;;  %v727_v0 = vsel %vm17834_vm6, %v486_v55, %v726_v43  ;;  %725 = vst [vmem:[#allocation2 + $0x68] sm:$0x1] %v724_v1  ;;  %v17144_v9 = vld [vmem:[#allocation2 + $0x38] ss:$0 sps:$4 sm:$0x11]  }
  0x61   : > { %v478_v63 = vsel %vm17827_vm5, %v470_v38, %v477_v48  ;;  %v495_v4 = vsel %vm17827_vm5, %v487_v56, %v494_v59  ;;  %728 = vst [vmem:[#allocation2 + $0x6c] sm:$0xf] %v727_v0  ;;  %v731_v6 = vsel %vm17845_vm7, %v496_v60, %v730_v58  ;;  %v508_v11 = vrot.slane %v506_v62, 7  ;;  %v17982_v16 = vld [vmem:[#allocation2 + $0x44] ss:$0 sps:$4 sm:$0x11]  }
  0x62   : > { %909 = vrot.lane.b32.xlu1 %v17938_v25, %s17550_s7  ;;  %722 = vst.msk [vmem:[#allocation2 + $0x64] sm:$0xf] %vm199_vm0, %v478_v63  ;;  %v503_v7 = vor.u32 %v501_v54, %v500_v61  ;;  %729 = vst.msk [vmem:[#allocation2 + $0x70] sm:$0xf] %vm199_vm0, %v495_v4  ;;  %v504_v10 = vrot.slane %v500_v61, 4  ;;  %v509_v12 = vshll.u32 %v328_v52, 16 }
  0x63   : > { %907 = vrot.lane.b32.xlu0 %v17908_v47, %s17550_s7  ;;  %732 = vst [vmem:[#allocation2 + $0x74] sm:$0x1] %v731_v6  ;;  %v515_v15 = vshrl.u32 %v329_v3, 16  ;;  %v518_v17 = vshll.u32 %v329_v3, 16  ;;  %v523_v18 = vshrl.u32 %v330_v8, 16  ;;  %v526_v20 = vshll.u32 %v330_v8, 16 }
  0x64   : > { %v734_v13 = vsel %vm17834_vm6, %v503_v7, %v733_v2  ;;  %v511_v21 = vor.u32 %v509_v12, %v508_v11  ;;  %v513_v24 = vrot.slane %v508_v11, 4  ;;  %v737_v26 = vld [vmem:[#allocation2 + $0x80] sm:$0x1]  ;;  %v794_v27 = vld [vmem:[#allocation2 + $0x48] sm:$0xf] }
  0x65   : > { %735 = vst [vmem:[#allocation2 + $0x78] sm:$0xf] %v734_v13  ;;  %v517_v22 = vrot.slane %v515_v15, 7  ;;  %v525_v28 = vrot.slane %v523_v18, 7  ;;  %v740_v29 = vld [vmem:[#allocation2 + $0x84] sm:$0xf] }
  0x66   : > { %946 = vrot.lane.b32.xlu1 %v17955_v50, %s17549_s30  ;;  %v795_v31 = vld [vmem:[#allocation2 + $0x4c] sm:$0xf]  ;;  %v512_v32 = vsel %vm17827_vm5, %v504_v10, %v511_v21  ;;  %v738_v35 = vsel %vm17845_vm7, %v513_v24, %v737_v26  ;;  %v331_v36 = vld [vmem:[%s17816_s21 + $0x58] sm:$0xf]  ;;  %v332_v39 = vld [vmem:[%s17816_s21 + $0x5c] sm:$0xf] }
  0x67   : > { %944 = vrot.lane.b32.xlu0 %v17938_v25, %s17549_s30  ;;  %v520_v33 = vor.u32 %v518_v17, %v517_v22  ;;  %v521_v34 = vrot.slane %v517_v22, 4  ;;  %736 = vst.msk [vmem:[#allocation2 + $0x7c] sm:$0xf] %vm199_vm0, %v512_v32  ;;  %v528_v37 = vor.u32 %v526_v20, %v525_v28  ;;  %739 = vst [vmem:[#allocation2 + $0x80] sm:$0x1] %v738_v35  ;;  %v532_v46 = vshrl.u32 %v331_v36, 16 }
  0x68   : > { %v744_v38 = vld [vmem:[#allocation2 + $0x8c] sm:$0x1]  ;;  %v333_v42 = vld [vmem:[%s17816_s21 + $0x60] sm:$0xf]  ;;  %v17999_v43 = vcombine.low %v794_v27, %v795_v31  ;;  %v796_v44 = vld [vmem:[#allocation2 + $0x54] sm:$0xf] }
  0x69   : > { %v741_v41 = vsel %vm17834_vm6, %v520_v33, %v740_v29  ;;  %v529_v45 = vsel %vm17827_vm5, %v521_v34, %v528_v37  ;;  %v18004_v49 = vld [vmem:[#allocation2 + $0x58] sm:$0xf]  ;;  %v535_v52 = vshll.u32 %v331_v36, 16  ;;  %v540_v53 = vshrl.u32 %v332_v39, 16  ;;  %v334_v55 = vld [vmem:[%s17816_s21 + $0x64] sm:$0xf] }
  0x6a   : > { %1141 = vrot.lane.b32.xlu1 %v17144_v9, %s17550_s7  ;;  %742 = vst [vmem:[#allocation2 + $0x84] sm:$0xf] %v741_v41  ;;  %743 = vst.msk [vmem:[#allocation2 + $0x88] sm:$0xf] %vm199_vm0, %v529_v45  ;;  %v543_v54 = vshll.u32 %v332_v39, 16  ;;  %v534_v48 = vrot.slane %v532_v46, 7  ;;  %v18013_v62 = vcombine.low %v796_v44, %v18004_v49 }
  0x6b   : > { %1139 = vrot.lane.b32.xlu0 %v17926_v5, %s17550_s7  ;;  %v530_v5 = vrot.slane %v525_v28, 4  ;;  %v549_v56 = vshrl.u32 %v333_v42, 16  ;;  %v552_v57 = vshll.u32 %v333_v42, 16  ;;  %v542_v58 = vrot.slane %v540_v53, 7  ;;  %v747_v59 = vld [vmem:[#allocation2 + $0x90] sm:$0xf] }
  0x6c   : > { %v557_v60 = vshrl.u32 %v334_v55, 16  ;;  %v560_v61 = vshll.u32 %v334_v55, 16  ;;  %v537_v63 = vor.u32 %v535_v52, %v534_v48  ;;  %v538_v0 = vrot.slane %v534_v48, 4  ;;  %v751_v2 = vld [vmem:[#allocation2 + $0x98] sm:$0x1] }
  0x6d   : > { %v745_v51 = vsel %vm17845_vm7, %v530_v5, %v744_v38  ;;  %v551_v1 = vrot.slane %v549_v56, 7  ;;  %v545_v3 = vor.u32 %v543_v54, %v542_v58  ;;  %v754_v6 = vld [vmem:[#allocation2 + $0x9c] sm:$0xf]  ;;  %v547_v7 = vrot.slane %v542_v58, 4  ;;  %v758_v11 = vld [vmem:[#allocation2 + $0xa4] sm:$0x1] }
  0x6e   : > { %1176 = vrot.lane.b32.xlu1 %v17982_v16, %s17549_s30  ;;  %746 = vst [vmem:[#allocation2 + $0x8c] sm:$0x1] %v745_v51  ;;  %v559_v4 = vrot.slane %v557_v60, 7  ;;  %v748_v8 = vsel %vm17834_vm6, %v537_v63, %v747_v59  ;;  %v335_v12 = vld [vmem:[%s17816_s21 + $0x68] sm:$0xf] }
  0x6f   : > { %1174 = vrot.lane.b32.xlu0 %v17144_v9, %s17549_s30  ;;  %v554_v9 = vor.u32 %v552_v57, %v551_v1  ;;  %v555_v10 = vrot.slane %v551_v1, 4  ;;  %v546_v13 = vsel %vm17827_vm5, %v538_v0, %v545_v3  ;;  %749 = vst [vmem:[#allocation2 + $0x90] sm:$0xf] %v748_v8  ;;  %v752_v17 = vsel %vm17845_vm7, %v547_v7, %v751_v2  ;;  %v336_v20 = vld [vmem:[%s17816_s21 + $0x6c] sm:$0xf] }
  0x70   : > { %v562_v15 = vor.u32 %v560_v61, %v559_v4  ;;  %v564_v18 = vrot.slane %v559_v4, 4  ;;  %v17148_v21 = vld [vmem:[#allocation2 + $0x50] ss:$0 sps:$4 sm:$0x11]   ;;  %750 = vst.msk [vmem:[#allocation2 + $0x94] sm:$0xf] %vm199_vm0, %v546_v13 }
  0x71   : > { %v755_v22 = vsel %vm17834_vm6, %v554_v9, %v754_v6  ;;  %753 = vst [vmem:[#allocation2 + $0x98] sm:$0x1] %v752_v17  ;;  %v566_v24 = vshrl.u32 %v335_v12, 16  ;;  %v569_v26 = vshll.u32 %v335_v12, 16  ;;  %v574_v27 = vshrl.u32 %v336_v20, 16 }
  0x72   : > { %913 = vrot.lane.b32.xlu1 %v17999_v43, %s17550_s7  ;;  %v563_v28 = vsel %vm17827_vm5, %v555_v10, %v562_v15  ;;  %756 = vst [vmem:[#allocation2 + $0x9c] sm:$0xf] %v755_v22  ;;  %v759_v29 = vsel %vm17845_vm7, %v564_v18, %v758_v11  ;;  %v577_v31 = vshll.u32 %v336_v20, 16  ;;  %v18036_v32 = vld [vmem:[#allocation2 + $0x5c] ss:$0 sps:$4 sm:$0x11]  }
  0x73   : > { %911 = vrot.lane.b32.xlu0 %v17955_v50, %s17550_s7  ;;  %757 = vst.msk [vmem:[#allocation2 + $0xa0] sm:$0xf] %vm199_vm0, %v563_v28  ;;  %760 = vst [vmem:[#allocation2 + $0xa4] sm:$0x1] %v759_v29  ;;  %v568_v33 = vrot.slane %v566_v24, 7  ;;  %v576_v34 = vrot.slane %v574_v27, 7 }
  0x74   : > { %v337_v35 = vld [vmem:[%s17816_s21 + $0x70] sm:$0xf]  ;;  %v798_v36 = vld [vmem:[#allocation2 + $0x60] sm:$0xf]  ;;  %v761_v37 = vld [vmem:[#allocation2 + $0xa8] sm:$0xf] }
  0x75   : > { %v338_v38 = vld [vmem:[%s17816_s21 + $0x74] sm:$0xf]  ;;  %v583_v39 = vshrl.u32 %v337_v35, 16  ;;  %v586_v41 = vshll.u32 %v337_v35, 16  ;;  %v18042_v5 = vld [vmem:[#allocation2 + $0x64] sm:$0xf]  ;;  %v571_v42 = vor.u32 %v569_v26, %v568_v33  ;;  %v579_v45 = vor.u32 %v577_v31, %v576_v34 }
  0x76   : > { %950 = vrot.lane.b32.xlu1 %v18013_v62, %s17549_s30  ;;  %v572_v44 = vrot.slane %v568_v33, 4  ;;  %v591_v46 = vshrl.u32 %v338_v38, 16  ;;  %v765_v51 = vld [vmem:[#allocation2 + $0xb0] sm:$0x1]  ;;  %v594_v53 = vshll.u32 %v338_v38, 16  ;;  %v581_v54 = vrot.slane %v576_v34, 4 }
  0x77   : > { %948 = vrot.lane.b32.xlu0 %v17999_v43, %s17549_s30  ;;  %v585_v52 = vrot.slane %v583_v39, 7  ;;  %v339_v48 = vld [vmem:[%s17816_s21 + $0x78] sm:$0xf]  ;;  %v762_v56 = vsel %vm17834_vm6, %v571_v42, %v761_v37  ;;  %v768_v58 = vld [vmem:[#allocation2 + $0xb4] sm:$0xf]  ;;  %v18058_v2 = vcombine.low %v798_v36, %v18042_v5 }
  0x78   : > { %v580_v55 = vsel %vm17827_vm5, %v572_v44, %v579_v45  ;;  %v593_v57 = vrot.slane %v591_v46, 7  ;;  %v340_v59 = vld [vmem:[%s17816_s21 + $0x7c] sm:$0xf]  ;;  %v600_v60 = vshrl.u32 %v339_v48, 16  ;;  %763 = vst [vmem:[#allocation2 + $0xa8] sm:$0xf] %v762_v56 }
  0x79   : > { %764 = vst.msk [vmem:[#allocation2 + $0xac] sm:$0xf] %vm199_vm0, %v580_v55  ;;  %v588_v61 = vor.u32 %v586_v41, %v585_v52  ;;  %v589_v63 = vrot.slane %v585_v52, 4  ;;  %v772_v0 = vld [vmem:[#allocation2 + $0xbc] sm:$0x1]  ;;  %v603_v1 = vshll.u32 %v339_v48, 16 }
  0x7a   : > { %1145 = vrot.lane.b32.xlu1 %v17148_v21, %s17550_s7  ;;  %v800_v3 = vld [vmem:[#allocation2 + $0x6c] sm:$0xf]  ;;  %v596_v4 = vor.u32 %v594_v53, %v593_v57  ;;  %v598_v6 = vrot.slane %v593_v57, 4  ;;  %v18061_v7 = vld [vmem:[#allocation2 + $0x70] sm:$0xf]  ;;  %v602_v9 = vrot.slane %v600_v60, 7 }
  0x7b   : > { %1143 = vrot.lane.b32.xlu0 %v17982_v16, %s17550_s7  ;;  %v766_v16 = vsel %vm17845_vm7, %v581_v54, %v765_v51  ;;  %v769_v8 = vsel %vm17834_vm6, %v588_v61, %v768_v58  ;;  %v608_v10 = vshrl.u32 %v340_v59, 16  ;;  %v611_v13 = vshll.u32 %v340_v59, 16  ;;  %v775_v15 = vld [vmem:[#allocation2 + $0xc0] sm:$0xf]  ;;  %v779_v22 = vld [vmem:[#allocation2 + $0xc8] sm:$0x1] }
  0x7c   : > { %767 = vst [vmem:[#allocation2 + $0xb0] sm:$0x1] %v766_v16  ;;  %v597_v11 = vsel %vm17827_vm5, %v589_v63, %v596_v4  ;;  %770 = vst [vmem:[#allocation2 + $0xb4] sm:$0xf] %v769_v8  ;;  %v773_v12 = vsel %vm17845_vm7, %v598_v6, %v772_v0  ;;  %v605_v17 = vor.u32 %v603_v1, %v602_v9  ;;  %v606_v18 = vrot.slane %v602_v9, 4 }
  0x7d   : > { %771 = vst.msk [vmem:[#allocation2 + $0xb8] sm:$0xf] %vm199_vm0, %v597_v11  ;;  %774 = vst [vmem:[#allocation2 + $0xbc] sm:$0x1] %v773_v12  ;;  %v610_v20 = vrot.slane %v608_v10, 7 }
  0x7e   : > { %1180 = vrot.lane.b32.xlu1 %v18036_v32, %s17549_s30  ;;  %v776_v26 = vsel %vm17834_vm6, %v605_v17, %v775_v15  ;;  %v17152_v31 = vld [vmem:[#allocation2 + $0x68] ss:$0 sps:$4 sm:$0x11]   ;;  %v17153_v33 = vld [vmem:[#allocation2 + $0x74] ss:$0 sps:$4 sm:$0x11]  }
  0x7f   : > { %1178 = vrot.lane.b32.xlu0 %v17148_v21, %s17549_s30  ;;  %v18073_v21 = vcombine.low %v800_v3, %v18061_v7  ;;  %v613_v24 = vor.u32 %v611_v13, %v610_v20  ;;  %v615_v27 = vrot.slane %v610_v20, 4  ;;  %777 = vst [vmem:[#allocation2 + $0xc0] sm:$0xf] %v776_v26  ;;  %v802_v34 = vld [vmem:[#allocation2 + $0x78] sm:$0xf] }
  0x80   : > { %v18091_v35 = vld [vmem:[#allocation2 + $0x7c] sm:$0xf]  ;;  %v804_v37 = vld [vmem:[#allocation2 + $0x84] sm:$0xf]  ;;  %v18098_v38 = vld [vmem:[#allocation2 + $0x88] sm:$0xf] }
  0x81   : > { %v614_v28 = vsel %vm17827_vm5, %v606_v18, %v613_v24  ;;  %v780_v29 = vsel %vm17845_vm7, %v615_v27, %v779_v22  ;;  %v18095_v36 = vcombine.low %v802_v34, %v18091_v35  ;;  %v18103_v39 = vcombine.low %v804_v37, %v18098_v38  ;;  %v17156_v41 = vld [vmem:[#allocation2 + $0x80] ss:$0 sps:$4 sm:$0x11]   ;;  %v17157_v42 = vld [vmem:[#allocation2 + $0x8c] ss:$0 sps:$4 sm:$0x11]  }
  0x82   : > { %917 = vrot.lane.b32.xlu1 %v18058_v2, %s17550_s7  ;;  %778 = vst.msk [vmem:[#allocation2 + $0xc4] sm:$0xf] %vm199_vm0, %v614_v28  ;;  %781 = vst [vmem:[#allocation2 + $0xc8] sm:$0x1] %v780_v29  ;;  %v806_v44 = vld [vmem:[#allocation2 + $0x90] sm:$0xf] }
  0x83   : > { %915 = vrot.lane.b32.xlu0 %v18013_v62, %s17550_s7  ;;  %v18117_v45 = vld [vmem:[#allocation2 + $0x94] sm:$0xf]  ;;  %v808_v46 = vld [vmem:[#allocation2 + $0x9c] sm:$0xf]  ;;  %v18126_v52 = vld [vmem:[#allocation2 + $0xa0] sm:$0xf] }
  0x84   : > { %v18123_v51 = vcombine.low %v806_v44, %v18117_v45  ;;  %v18131_v53 = vcombine.low %v808_v46, %v18126_v52  ;;  %v18135_v54 = vld [vmem:[#allocation2 + $0x98] ss:$0 sps:$4 sm:$0x11]   ;;  %v18141_v48 = vld [vmem:[#allocation2 + $0xa4] ss:$0 sps:$4 sm:$0x11]  }
  0x85   : > { %v810_v55 = vld [vmem:[#allocation2 + $0xa8] sm:$0xf]  ;;  %v18143_v56 = vld [vmem:[#allocation2 + $0xac] sm:$0xf]  ;;  %v812_v57 = vld [vmem:[#allocation2 + $0xb4] sm:$0xf] }
  0x86   : > { %954 = vrot.lane.b32.xlu1 %v18073_v21, %s17549_s30  ;;  %v18151_v58 = vcombine.low %v810_v55, %v18143_v56  ;;  %v18155_v59 = vld [vmem:[#allocation2 + $0xb8] sm:$0xf]  ;;  %v18164_v61 = vld [vmem:[#allocation2 + $0xb0] ss:$0 sps:$4 sm:$0x11]  }
  0x87   : > { %952 = vrot.lane.b32.xlu0 %v18058_v2, %s17549_s30  ;;  %v18160_v60 = vcombine.low %v812_v57, %v18155_v59  ;;  %v18170_v63 = vld [vmem:[#allocation2 + $0xbc] ss:$0 sps:$4 sm:$0x11]   ;;  %v814_v16 = vld [vmem:[#allocation2 + $0xc0] sm:$0xf] }
  0x88   : > { %v782_v1 = vld [vmem:[#allocation2] sm:$0xf]  ;;  %v18178_v3 = vld [vmem:[#allocation2 + $0x4] sm:$0xf]  ;;  %v816_v4 = vld [vmem:[#allocation2 + $0xcc] sm:$0xf] }
  0x89   : > { %v18172_v0 = vld [vmem:[#allocation2 + $0xc4] sm:$0xf]  ;;  %v18185_v8 = vld [vmem:[#allocation2 + $0xd0] sm:$0xf]  ;;  %v14308_v9 = vcombine.low %v782_v1, %v18178_v3  ;;  %v1933_v24 = vld [vmem:[#allocation2 + $0x18] sm:$0xe] }
  0x8a   : > { %1149 = vrot.lane.b32.xlu1 %v17152_v31, %s17550_s7  ;;  %v14324_v6 = vcombine.low %v814_v16, %v18172_v0  ;;  %v14325_v10 = vcombine.low %v816_v4, %v18185_v8  ;;  %v17172_v12 = vld [vmem:[#allocation2 + $0xc8] ss:$0 sps:$4 sm:$0x11]   ;;  %v17175_v20 = vld [vmem:[#allocation2 + $0xd4] ss:$0 sps:$4 sm:$0x11]  }
  0x8b   : > { %1147 = vrot.lane.b32.xlu0 %v18036_v32, %s17550_s7  ;;  %v18108_v32 = vld [vmem:[%s23693_s1] sm:$0xff]   ;;  %v1932_v28 = vld [vmem:[#allocation2 + $0xc] sm:$0xe]  ;;  %v17519_v55 = vld [vmem:[#allocation2 + $0x10] sm:$0xf] }
  0x8c   : > { %15993 = vmatprep.subr.bf16.mxu0 %v18108_v32  ;;  %v18212_v57 = vcombine.low %v1932_v28, %v17519_v55  ;;  %v17520_v16 = vld [vmem:[#allocation2 + $0x14] ss:$0 sps:$4 sm:$0x11]   ;;  %v1944_v40 = vld [vmem:[#allocation2 + $0x9c] sm:$0xe] }
  0x8d   : > { %v17522_v55 = vld [vmem:[#allocation2 + $0x34] sm:$0xf]  ;;  %v1948_v19 = vld [vmem:[#allocation2 + $0xcc] sm:$0xe] }
  0x8e   : > { %1184 = vrot.lane.b32.xlu1 %v17153_v33, %s17549_s30 }
  0x8f   : > { %1182 = vrot.lane.b32.xlu0 %v17152_v31, %s17549_s30  ;;  %v17174_v31 = vld [vmem:[#allocation2 + $0x8] ss:$0 sps:$4 sm:$0x11]  }
  0x92   : > { %921 = vrot.lane.b32.xlu1 %v18095_v36, %s17550_s7 }
  0x93   : > { %919 = vrot.lane.b32.xlu0 %v18073_v21, %s17550_s7 }
  0x96   : > { %958 = vrot.lane.b32.xlu1 %v18103_v39, %s17549_s30 }
  0x97   : > { %956 = vrot.lane.b32.xlu0 %v18095_v36, %s17549_s30 }
  0x9a   : > { %1153 = vrot.lane.b32.xlu1 %v17156_v41, %s17550_s7 }
  0x9b   : > { %1151 = vrot.lane.b32.xlu0 %v17153_v33, %s17550_s7 }
  0x9e   : > { %1188 = vrot.lane.b32.xlu1 %v17157_v42, %s17549_s30 }
  0x9f   : > { %1186 = vrot.lane.b32.xlu0 %v17156_v41, %s17549_s30  ;;  %v1934_v41 = vld [vmem:[#allocation2 + $0x24] sm:$0xe] }
  0xa2   : > { %925 = vrot.lane.b32.xlu1 %v18123_v51, %s17550_s7 }
  0xa3   : > { %923 = vrot.lane.b32.xlu0 %v18103_v39, %s17550_s7 }
  0xa6   : > { %962 = vrot.lane.b32.xlu1 %v18131_v53, %s17549_s30 }
  0xa7   : > { %960 = vrot.lane.b32.xlu0 %v18123_v51, %s17549_s30 }
  0xaa   : > { %1157 = vrot.lane.b32.xlu1 %v18135_v54, %s17550_s7 }
  0xab   : > { %1155 = vrot.lane.b32.xlu0 %v17157_v42, %s17550_s7 }
  0xae   : > { %1192 = vrot.lane.b32.xlu1 %v18141_v48, %s17549_s30 }
  0xaf   : > { %1190 = vrot.lane.b32.xlu0 %v18135_v54, %s17549_s30 }
  0xb2   : > { %929 = vrot.lane.b32.xlu1 %v18151_v58, %s17550_s7 }
  0xb3   : > { %927 = vrot.lane.b32.xlu0 %v18131_v53, %s17550_s7 }
  0xb6   : > { %966 = vrot.lane.b32.xlu1 %v18160_v60, %s17549_s30 }
  0xb7   : > { %964 = vrot.lane.b32.xlu0 %v18151_v58, %s17549_s30 }
  0xba   : > { %1161 = vrot.lane.b32.xlu1 %v18164_v61, %s17550_s7 }
  0xbb   : > { %1159 = vrot.lane.b32.xlu0 %v18141_v48, %s17550_s7 }
  0xbe   : > { %1196 = vrot.lane.b32.xlu1 %v18170_v63, %s17549_s30 }
  0xbf   : > { %1194 = vrot.lane.b32.xlu0 %v18164_v61, %s17549_s30 }
  0xc2   : > { %933 = vrot.lane.b32.xlu1 %v14324_v6, %s17550_s7 }
  0xc3   : > { %931 = vrot.lane.b32.xlu0 %v18160_v60, %s17550_s7 }
  0xc4   : > { %v941_v11 = vpop.permute.xlu1 %940 }
  0xc5   : > { %v904_v13 = vpop.permute.xlu0 %903 }
  0xc6   : > { %v975_v15 = vsel %vm972_vm8, %v14308_v9, %v904_v13  ;;  %970 = vrot.lane.b32.xlu1 %v14325_v10, %s17549_s30 }
  0xc7   : > { %v18195_v17 = vsel %vm1021_vm9, %v975_v15, %v941_v11  ;;  %968 = vrot.lane.b32.xlu0 %v14324_v6, %s17549_s30  ;;  %v1935_v11 = vld [vmem:[#allocation2 + $0x30] sm:$0xe] }
  0xc8   : > { %v943_v18 = vpop.permute.xlu1 %942  ;;  %v1285_v26 = vshll.u32 %v18195_v17, 16 }
  0xc9   : > { %v906_v22 = vpop.permute.xlu0 %905 }
  0xca   : > { %v978_v27 = vsel %vm972_vm8, %v17886_v30, %v906_v22  ;;  %1165 = vrot.lane.b32.xlu1 %v17172_v12, %s17550_s7  ;;  %v1287_v42 = vrot.slane %v1285_v26, 1  ;;  %v17518_v30 = vld [vmem:[#allocation2 + $0x1c] sm:$0xf]  ;;  %v1283_v22 = vshrl.u32 %v18195_v17, 16 }
  0xcb   : > { %v18203_v29 = vsel %vm1021_vm9, %v978_v27, %v943_v18  ;;  %1163 = vrot.lane.b32.xlu0 %v18170_v63, %s17550_s7  ;;  %v18209_v46 = vcombine.low %v1933_v24, %v17518_v30  ;;  %v17521_v18 = vld [vmem:[#allocation2 + $0x28] sm:$0xf] }
  0xcc   : > { %v1295_v33 = vshll.u32 %v18203_v29, 16  ;;  %v1138_v34 = vpop.permute.xlu1 %1137  ;;  %v1293_v13 = vshrl.u32 %v18203_v29, 16 }
  0xcd   : > { %v1136_v37 = vpop.permute.xlu0 %1135  ;;  %v1207_v1 = vsel %vm972_vm8, %v17520_v16, %v1138_v34  ;;  %v1288_v34 = vor.u32 %v1287_v42, %v1283_v22  ;;  %v18238_v16 = vcombine.low %v1935_v11, %v17522_v55 }
  0xce   : > { %v1297_v44 = vrot.slane %v1295_v33, 1  ;;  %1200 = vrot.lane.b32.xlu1 %v17175_v20, %s17549_s30  ;;  %v1204_v6 = vsel %vm972_vm8, %v17174_v31, %v1136_v37  ;;  %v18226_v20 = vcombine.low %v1934_v41, %v17521_v18  ;;  %v1936_v37 = vld [vmem:[#allocation2 + $0x3c] sm:$0xe]  ;;  %v17180_v41 = vld [vmem:[%s23693_s1 + $0x8] sm:$0xff]  }
  0xcf   : > { %1198 = vrot.lane.b32.xlu0 %v17172_v12, %s17549_s30 }
  0xd0   : > { %v1173_v4 = vpop.permute.xlu1 %1172  ;;  %v1298_v28 = vor.u32 %v1297_v44, %v1293_v13  ;;  %v17523_v13 = vld [vmem:[#allocation2 + $0x40] sm:$0xf] }
  0xd1   : > { %v18217_v9 = vsel %vm1021_vm9, %v1207_v1, %v1173_v4  ;;  %v1171_v10 = vpop.permute.xlu0 %1170 }
  0xd2   : > { %v1299_v15 = vshll.u32 %v18217_v9, 16  ;;  %v18222_v12 = vsel %vm1021_vm9, %v1204_v6, %v1171_v10  ;;  %2002 = vrot.lane.b32.xlu1 %v18209_v46, %s17550_s7 }
  0xd3   : > { %v1289_v24 = vshll.u32 %v18222_v12, 16  ;;  %2000 = vrot.lane.b32.xlu0 %v18212_v57, %s17550_s7 }
  0xd4   : > { %v1301_v26 = vrot.slane %v1299_v15, 1  ;;  %v910_v27 = vpop.permute.xlu1 %909  ;;  %v17181_v15 = vld [vmem:[%s23693_s1 + $0x10] sm:$0xff]  }
  0xd5   : > { %v1291_v31 = vrot.slane %v1289_v24, 1  ;;  %v908_v33 = vpop.permute.xlu0 %907  ;;  %v984_v42 = vsel %vm972_vm8, %v17908_v47, %v910_v27  ;;  %v18257_v47 = vcombine.low %v1936_v37, %v17523_v13  ;;  %v1938_v27 = vld [vmem:[#allocation2 + $0x54] sm:$0xe] }
  0xd6   : > { %2037 = vrot.lane.b32.xlu1 %v18226_v20, %s17549_s30  ;;  %v1302_v30 = vsel %vm1282_vm10, %v1298_v28, %v1301_v26  ;;  %v981_v4 = vsel %vm972_vm8, %v17880_v23, %v908_v33  ;;  %v1937_v23 = vld [vmem:[#allocation2 + $0x48] sm:$0xe] }
  0xd7   : > { %2035 = vrot.lane.b32.xlu0 %v18209_v46, %s17549_s30  ;;  %v1292_v44 = vsel %vm1282_vm10, %v1288_v34, %v1291_v31  ;;  %v17182_v31 = vld [vmem:[%s23693_s1 + $0x18] sm:$0xff]   ;;  %v17525_v34 = vld [vmem:[#allocation2 + $0x2c] ss:$0 sps:$4 sm:$0x11]  }
  0xd8   : > { %15961 = vmatprep.mubr.msk.bf16.mxu0 %vm1492_vm11, %v1292_v44  ;;  %v947_v1 = vpop.permute.xlu1 %946  ;;  %v17526_v44 = vld [vmem:[#allocation2 + $0x20] ss:$0 sps:$4 sm:$0x11]  }
  0xd9   : > { %v18249_v6 = vsel %vm1021_vm9, %v984_v42, %v947_v1  ;;  %15962 = vmatmul.mubr.msk.bf16.vlgmr.msra.gmra.mrb[0].mxu0 %vm1492_vm11, %v1302_v30  ;;  %v945_v10 = vpop.permute.xlu0 %944 }
  0xda   : > { %v18253_v11 = vsel %vm1021_vm9, %v981_v4, %v945_v10  ;;  %2006 = vrot.lane.b32.xlu1 %v18238_v16, %s17550_s7  ;;  %15994 = vmatpush3.bf16.msra.mxu0 %v18108_v32  ;;  %v1315_v18 = vshll.u32 %v18249_v6, 16  ;;  %v17524_v32 = vld [vmem:[#allocation2 + $0x4c] sm:$0xf]  ;;  %v1313_v4 = vshrl.u32 %v18249_v6, 16 }
  0xdb   : > { %2004 = vrot.lane.b32.xlu0 %v18226_v20, %s17550_s7  ;;  %15995 = vmatprep.subr.bf16.mxu0 %v17180_v41  ;;  %v1305_v24 = vshll.u32 %v18253_v11, 16  ;;  %v18269_v28 = vcombine.low %v1937_v23, %v17524_v32  ;;  %v18289_v23 = vcombine.low %v1938_v27, %v18004_v49 }
  0xdc   : > { %v1142_v22 = vpop.permute.xlu1 %1141  ;;  %v1317_v33 = vrot.slane %v1315_v18, 1  ;;  %v1303_v18 = vshrl.u32 %v18253_v11, 16 }
  0xdd   : > { %v1140_v26 = vpop.permute.xlu0 %1139  ;;  %v1213_v37 = vsel %vm972_vm8, %v17525_v34, %v1142_v22  ;;  %v1307_v55 = vrot.slane %v1305_v24, 1  ;;  %v1939_v24 = vld [vmem:[#allocation2 + $0x60] sm:$0xe] }
  0xde   : > { %2041 = vrot.lane.b32.xlu1 %v18257_v47, %s17549_s30  ;;  %15996 = vmatpush3.bf16.msra.mxu0 %v17180_v41  ;;  %v1210_v42 = vsel %vm972_vm8, %v17526_v44, %v1140_v26  ;;  %v17183_v26 = vld [vmem:[%s23693_s1 + $0x20] sm:$0xff]   ;;  %v1318_v32 = vor.u32 %v1317_v33, %v1313_v4  ;;  %v18302_v44 = vcombine.low %v1939_v24, %v18042_v5  ;;  %v1940_v33 = vld [vmem:[#allocation2 + $0x6c] sm:$0xe] }
  0xdf   : > { %2039 = vrot.lane.b32.xlu0 %v18238_v16, %s17549_s30  ;;  %15997 = vmatprep.subr.bf16.mxu0 %v17181_v15 }
  0xe0   : > { %v1177_v30 = vpop.permute.xlu1 %1176 }
  0xe1   : > { %v18279_v1 = vsel %vm1021_vm9, %v1213_v37, %v1177_v30  ;;  %v1175_v41 = vpop.permute.xlu0 %1174  ;;  %v1308_v30 = vor.u32 %v1307_v55, %v1303_v18  ;;  %v17185_v55 = vld [vmem:[%s23693_s1 + $0x28] sm:$0xff]  }
  0xe2   : > { %v1319_v10 = vshll.u32 %v18279_v1, 16  ;;  %v18284_v13 = vsel %vm1021_vm9, %v1210_v42, %v1175_v41  ;;  %2010 = vrot.lane.b32.xlu1 %v18269_v28, %s17550_s7  ;;  %15998 = vmatpush3.bf16.msra.mxu0 %v17181_v15 }
  0xe3   : > { %v1309_v22 = vshll.u32 %v18284_v13, 16  ;;  %2008 = vrot.lane.b32.xlu0 %v18257_v47, %s17550_s7  ;;  %15999 = vmatprep.subr.bf16.mxu0 %v17182_v31 }
  0xe4   : > { %v1321_v34 = vrot.slane %v1319_v10, 1  ;;  %v914_v37 = vpop.permute.xlu1 %913 }
  0xe5   : > { %v1311_v49 = vrot.slane %v1309_v22, 1  ;;  %v912_v27 = vpop.permute.xlu0 %911  ;;  %v990_v41 = vsel %vm972_vm8, %v17955_v50, %v914_v37  ;;  %v18325_v50 = vcombine.low %v1940_v33, %v18061_v7  ;;  %v18332_v22 = vld [vmem:[%s23693_s1 + $0x60] sm:$0xff]   ;;  %v17528_v33 = vld [vmem:[#allocation2 + $0x38] ss:$0 sps:$4 sm:$0x11]  }
  0xe6   : > { %2045 = vrot.lane.b32.xlu1 %v18289_v23, %s17549_s30  ;;  %v1322_v15 = vsel %vm1282_vm10, %v1318_v32, %v1321_v34  ;;  %16000 = vmatpush3.bf16.msra.mxu0 %v17182_v31  ;;  %v987_v5 = vsel %vm972_vm8, %v17938_v25, %v912_v27  ;;  %v1941_v25 = vld [vmem:[#allocation2 + $0x78] sm:$0xe] }
  0xe7   : > { %2043 = vrot.lane.b32.xlu0 %v18269_v28, %s17549_s30  ;;  %v1312_v42 = vsel %vm1282_vm10, %v1308_v30, %v1311_v49  ;;  %16001 = vmatprep.subr.bf16.mxu0 %v17183_v26  ;;  %v18339_v7 = vcombine.low %v1941_v25, %v18091_v35  ;;  %v17527_v49 = vld [vmem:[#allocation2 + $0x44] ss:$0 sps:$4 sm:$0x11]  }
  0xe8   : > { %15965 = vmatprep.mubr.msk.bf16.mxu0 %vm1492_vm11, %v1312_v42  ;;  %v951_v4 = vpop.permute.xlu1 %950 }
  0xe9   : > { %v18316_v31 = vsel %vm1021_vm9, %v990_v41, %v951_v4  ;;  %15966 = vmatmul.mubr.msk.bf16.gmra.mrb[4].mxu0 %vm1492_vm11, %v1322_v15  ;;  %v949_v10 = vpop.permute.xlu0 %948 }
  0xea   : > { %v18320_v18 = vsel %vm1021_vm9, %v987_v5, %v949_v10  ;;  %2014 = vrot.lane.b32.xlu1 %v18302_v44, %s17550_s7  ;;  %16002 = vmatpush3.bf16.msra.mxu0 %v17183_v26  ;;  %v1335_v24 = vshll.u32 %v18316_v31, 16  ;;  %v1942_v26 = vld [vmem:[#allocation2 + $0x84] sm:$0xe] }
  0xeb   : > { %2012 = vrot.lane.b32.xlu0 %v18289_v23, %s17550_s7  ;;  %16003 = vmatprep.subr.bf16.mxu0 %v17185_v55  ;;  %v1325_v34 = vshll.u32 %v18320_v18, 16  ;;  %v18357_v25 = vcombine.low %v1942_v26, %v18098_v38 }
  0xec   : > { %v1146_v32 = vpop.permute.xlu1 %1145  ;;  %v1337_v30 = vrot.slane %v1335_v24, 1  ;;  %v1323_v24 = vshrl.u32 %v18320_v18, 16 }
  0xed   : > { %v1144_v37 = vpop.permute.xlu0 %1143  ;;  %v1219_v27 = vsel %vm972_vm8, %v17527_v49, %v1146_v32  ;;  %v1327_v42 = vrot.slane %v1325_v34, 1  ;;  %v1943_v34 = vld [vmem:[#allocation2 + $0x90] sm:$0xe] }
  0xee   : > { %2049 = vrot.lane.b32.xlu1 %v18325_v50, %s17549_s30  ;;  %16004 = vmatpush3.bf16.msra.mxu0 %v17185_v55  ;;  %v1216_v41 = vsel %vm972_vm8, %v17528_v33, %v1144_v37  ;;  %v1333_v55 = vshrl.u32 %v18316_v31, 16  ;;  %v18367_v26 = vcombine.low %v1943_v34, %v18117_v45 }
  0xef   : > { %2047 = vrot.lane.b32.xlu0 %v18302_v44, %s17549_s30  ;;  %16037 = vmatprep.subr.bf16.mxu0 %v18332_v22 }
  0xf0   : > { %v1181_v15 = vpop.permute.xlu1 %1180  ;;  %v1338_v37 = vor.u32 %v1337_v30, %v1333_v55 }
  0xf1   : > { %v18347_v4 = vsel %vm1021_vm9, %v1219_v27, %v1181_v15  ;;  %v1179_v35 = vpop.permute.xlu0 %1178  ;;  %v1328_v15 = vor.u32 %v1327_v42, %v1323_v24 }
  0xf2   : > { %v1339_v5 = vshll.u32 %v18347_v4, 16  ;;  %v18352_v10 = vsel %vm1021_vm9, %v1216_v41, %v1179_v35  ;;  %2018 = vrot.lane.b32.xlu1 %v18339_v7, %s17550_s7 }
  0xf3   : > { %v1329_v32 = vshll.u32 %v18352_v10, 16  ;;  %2016 = vrot.lane.b32.xlu0 %v18325_v50, %s17550_s7 }
  0xf4   : > { %v1341_v49 = vrot.slane %v1339_v5, 1  ;;  %v918_v27 = vpop.permute.xlu1 %917 }
  0xf5   : > { %v1331_v33 = vrot.slane %v1329_v32, 1  ;;  %v916_v41 = vpop.permute.xlu0 %915  ;;  %v996_v30 = vsel %vm972_vm8, %v18013_v62, %v918_v27  ;;  %v18387_v62 = vcombine.low %v1944_v40, %v18126_v52  ;;  %v1945_v32 = vld [vmem:[#allocation2 + $0xa8] sm:$0xe]  ;;  %v1946_v40 = vld [vmem:[#allocation2 + $0xb4] sm:$0xe] }
  0xf6   : > { %2053 = vrot.lane.b32.xlu1 %v18357_v25, %s17549_s30  ;;  %v1342_v38 = vsel %vm1282_vm10, %v1338_v37, %v1341_v49  ;;  %v993_v55 = vsel %vm972_vm8, %v17999_v43, %v916_v41  ;;  %v18396_v27 = vcombine.low %v1945_v32, %v18143_v56 }
  0xf7   : > { %2051 = vrot.lane.b32.xlu0 %v18339_v7, %s17549_s30  ;;  %v1332_v35 = vsel %vm1282_vm10, %v1328_v15, %v1331_v33  ;;  %v17529_v15 = vld [vmem:[#allocation2 + $0x5c] ss:$0 sps:$4 sm:$0x11]  }
  0xf8   : > { %15969 = vmatprep.mubr.msk.bf16.mxu0 %vm1492_vm11, %v1332_v35  ;;  %v955_v42 = vpop.permute.xlu1 %954  ;;  %23757 = vst [vmem:[#allocation6_spill] sm:$0xff] %v18396_v27  ;;  %v17530_v35 = vld [vmem:[#allocation2 + $0x50] ss:$0 sps:$4 sm:$0x11]  }
  0xf9   : > { %v18378_v5 = vsel %vm1021_vm9, %v996_v30, %v955_v42  ;;  %15970 = vmatmul.mubr.msk.bf16.gmra.mrb[8].mxu0 %vm1492_vm11, %v1342_v38  ;;  %v953_v45 = vpop.permute.xlu0 %952 }
  0xfa   : > { %v18382_v24 = vsel %vm1021_vm9, %v993_v55, %v953_v45  ;;  %2022 = vrot.lane.b32.xlu1 %v18367_v26, %s17550_s7  ;;  %v1355_v43 = vshll.u32 %v18378_v5, 16  ;;  %v1353_v56 = vshrl.u32 %v18378_v5, 16 }
  0xfb   : > { %2020 = vrot.lane.b32.xlu0 %v18357_v25, %s17550_s7  ;;  %v1345_v37 = vshll.u32 %v18382_v24, 16 }
  0xfc   : > { %v1150_v34 = vpop.permute.xlu1 %1149  ;;  %v1357_v52 = vrot.slane %v1355_v43, 1  ;;  %v18413_v43 = vcombine.low %v1946_v40, %v18155_v59 }
  0xfd   : > { %v1148_v49 = vpop.permute.xlu0 %1147  ;;  %v1225_v33 = vsel %vm972_vm8, %v17529_v15, %v1150_v34  ;;  %v1347_v38 = vrot.slane %v1345_v37, 1  ;;  %v1343_v34 = vshrl.u32 %v18382_v24, 16 }
  0xfe   : > { %2057 = vrot.lane.b32.xlu1 %v18387_v62, %s17549_s30  ;;  %v1222_v30 = vsel %vm972_vm8, %v17530_v35, %v1148_v49  ;;  %23758 = vst [vmem:[#allocation7_spill] sm:$0xff] %v18413_v43  ;;  %v1947_v49 = vld [vmem:[#allocation2 + $0xc0] sm:$0xe]  ;;  %v1358_v15 = vor.u32 %v1357_v52, %v1353_v56 }
  0xff   : > { %2055 = vrot.lane.b32.xlu0 %v18367_v26, %s17549_s30  ;;  %v1348_v35 = vor.u32 %v1347_v38, %v1343_v34  ;;  %v14416_v40 = vcombine.low %v1947_v49, %v18172_v0 }
 0x100   : > { %v1185_v41 = vpop.permute.xlu1 %1184 }
 0x101   : > { %v18403_v42 = vsel %vm1021_vm9, %v1225_v33, %v1185_v41  ;;  %v1183_v55 = vpop.permute.xlu0 %1182 }
 0x102   : > { %v1359_v45 = vshll.u32 %v18403_v42, 16  ;;  %v18408_v32 = vsel %vm1021_vm9, %v1222_v30, %v1183_v55  ;;  %2026 = vrot.lane.b32.xlu1 %v18396_v27, %s17550_s7 }
 0x103   : > { %v1349_v37 = vshll.u32 %v18408_v32, 16  ;;  %2024 = vrot.lane.b32.xlu0 %v18387_v62, %s17550_s7 }
 0x104   : > { %v1361_v33 = vrot.slane %v1359_v45, 1  ;;  %v922_v41 = vpop.permute.xlu1 %921 }
 0x105   : > { %v1351_v30 = vrot.slane %v1349_v37, 1  ;;  %v920_v55 = vpop.permute.xlu0 %919  ;;  %v1002_v52 = vsel %vm972_vm8, %v18073_v21, %v922_v41  ;;  %v14417_v37 = vcombine.low %v1948_v19, %v18185_v8  ;;  %v17532_v19 = vld [vmem:[#allocation2 + $0x68] ss:$0 sps:$4 sm:$0x11]  }
 0x106   : > { %2061 = vrot.lane.b32.xlu1 %v18413_v43, %s17549_s30  ;;  %v1362_v59 = vsel %vm1282_vm10, %v1358_v15, %v1361_v33  ;;  %v999_v56 = vsel %vm972_vm8, %v18058_v2, %v920_v55  ;;  %v17531_v33 = vld [vmem:[#allocation2 + $0x74] ss:$0 sps:$4 sm:$0x11]  }
 0x107   : > { %2059 = vrot.lane.b32.xlu0 %v18396_v27, %s17549_s30  ;;  %v1352_v14 = vsel %vm1282_vm10, %v1348_v35, %v1351_v30 }
 0x108   : > { %15973 = vmatprep.mubr.msk.bf16.mxu0 %vm1492_vm11, %v1352_v14  ;;  %v959_v38 = vpop.permute.xlu1 %958 }
 0x109   : > { %v18432_v45 = vsel %vm1021_vm9, %v1002_v52, %v959_v38  ;;  %15974 = vmatmul.mubr.msk.bf16.gmra.mrb[12].mxu0 %vm1492_vm11, %v1362_v59  ;;  %v957_v0 = vpop.permute.xlu0 %956 }
 0x10a   : > { %v18436_v34 = vsel %vm1021_vm9, %v999_v56, %v957_v0  ;;  %2030 = vrot.lane.b32.xlu1 %v14416_v40, %s17550_s7  ;;  %v1375_v14 = vshll.u32 %v18432_v45, 16  ;;  %v1373_v52 = vshrl.u32 %v18432_v45, 16 }
 0x10b   : > { %2028 = vrot.lane.b32.xlu0 %v18413_v43, %s17550_s7  ;;  %v1365_v2 = vshll.u32 %v18436_v34, 16 }
 0x10c   : > { %v1154_v21 = vpop.permute.xlu1 %1153  ;;  %v1377_v15 = vrot.slane %v1375_v14, 1 }
 0x10d   : > { %v1152_v49 = vpop.permute.xlu0 %1151  ;;  %v1231_v41 = vsel %vm972_vm8, %v17531_v33, %v1154_v21  ;;  %v1367_v30 = vrot.slane %v1365_v2, 1 }
 0x10e   : > { %2065 = vrot.lane.b32.xlu1 %v14417_v37, %s17549_s30  ;;  %v1228_v8 = vsel %vm972_vm8, %v17532_v19, %v1152_v49  ;;  %v1378_v37 = vor.u32 %v1377_v15, %v1373_v52 }
 0x10f   : > { %2063 = vrot.lane.b32.xlu0 %v14416_v40, %s17549_s30  ;;  %v1363_v40 = vshrl.u32 %v18436_v34, 16 }
 0x110   : > { %v1189_v35 = vpop.permute.xlu1 %1188 }
 0x111   : > { %v18449_v55 = vsel %vm1021_vm9, %v1231_v41, %v1189_v35  ;;  %v1187_v59 = vpop.permute.xlu0 %1186  ;;  %v1368_v2 = vor.u32 %v1367_v30, %v1363_v40 }
 0x112   : > { %v1379_v38 = vshll.u32 %v18449_v55, 16  ;;  %v18454_v56 = vsel %vm1021_vm9, %v1228_v8, %v1187_v59 }
 0x113   : > { %v1369_v0 = vshll.u32 %v18454_v56, 16 }
 0x114   : > { %v1381_v14 = vrot.slane %v1379_v38, 1  ;;  %v926_v21 = vpop.permute.xlu1 %925 }
 0x115   : > { %v1371_v49 = vrot.slane %v1369_v0, 1  ;;  %v924_v33 = vpop.permute.xlu0 %923  ;;  %v1008_v19 = vsel %vm972_vm8, %v18103_v39, %v926_v21 }
 0x116   : > { %v1382_v41 = vsel %vm1282_vm10, %v1378_v37, %v1381_v14  ;;  %v1005_v59 = vsel %vm972_vm8, %v18095_v36, %v924_v33  ;;  %v17533_v14 = vld [vmem:[#allocation2 + $0x8c] ss:$0 sps:$4 sm:$0x11]  }
 0x117   : > { %v1372_v35 = vsel %vm1282_vm10, %v1368_v2, %v1371_v49  ;;  %v17534_v49 = vld [vmem:[#allocation2 + $0x80] ss:$0 sps:$4 sm:$0x11]  }
 0x118   : > { %15977 = vmatprep.mubr.msk.bf16.mxu0 %vm1492_vm11, %v1372_v35  ;;  %v963_v8 = vpop.permute.xlu1 %962 }
 0x119   : > { %v18466_v15 = vsel %vm1021_vm9, %v1008_v19, %v963_v8  ;;  %15978 = vmatmul.mubr.msk.bf16.gmra.mrb[16].mxu0 %vm1492_vm11, %v1382_v41  ;;  %v961_v30 = vpop.permute.xlu0 %960 }
 0x11a   : > { %v18470_v52 = vsel %vm1021_vm9, %v1005_v59, %v961_v30  ;;  %v1395_v38 = vshll.u32 %v18466_v15, 16  ;;  %v1393_v19 = vshrl.u32 %v18466_v15, 16 }
 0x11b   : > { %v1385_v39 = vshll.u32 %v18470_v52, 16  ;;  %v1383_v30 = vshrl.u32 %v18470_v52, 16 }
 0x11c   : > { %v1158_v40 = vpop.permute.xlu1 %1157  ;;  %v1397_v37 = vrot.slane %v1395_v38, 1 }
 0x11d   : > { %v1156_v0 = vpop.permute.xlu0 %1155  ;;  %v1237_v21 = vsel %vm972_vm8, %v17533_v14, %v1158_v40  ;;  %v1387_v2 = vrot.slane %v1385_v39, 1 }
 0x11e   : > { %v1234_v33 = vsel %vm972_vm8, %v17534_v49, %v1156_v0  ;;  %v1398_v40 = vor.u32 %v1397_v37, %v1393_v19 }
 0x11f   : > { %v1388_v43 = vor.u32 %v1387_v2, %v1383_v30 }
 0x120   : > { %v1193_v36 = vpop.permute.xlu1 %1192 }
 0x121   : > { %v18477_v41 = vsel %vm1021_vm9, %v1237_v21, %v1193_v36  ;;  %v1191_v35 = vpop.permute.xlu0 %1190 }
 0x122   : > { %v1399_v8 = vshll.u32 %v18477_v41, 16  ;;  %v18482_v59 = vsel %vm1021_vm9, %v1234_v33, %v1191_v35 }
 0x123   : > { %v1389_v38 = vshll.u32 %v18482_v59, 16 }
 0x124   : > { %v1401_v39 = vrot.slane %v1399_v8, 1  ;;  %v930_v14 = vpop.permute.xlu1 %929 }
 0x125   : > { %v1391_v0 = vrot.slane %v1389_v38, 1  ;;  %v928_v49 = vpop.permute.xlu0 %927  ;;  %v1014_v27 = vsel %vm972_vm8, %v18131_v53, %v930_v14 }
 0x126   : > { %v1402_v21 = vsel %vm1282_vm10, %v1398_v40, %v1401_v39  ;;  %v1011_v35 = vsel %vm972_vm8, %v18123_v51, %v928_v49 }
 0x127   : > { %v1392_v36 = vsel %vm1282_vm10, %v1388_v43, %v1391_v0 }
 0x128   : > { %15981 = vmatprep.mubr.msk.bf16.mxu0 %vm1492_vm11, %v1392_v36  ;;  %v967_v33 = vpop.permute.xlu1 %966 }
 0x129   : > { %v18494_v37 = vsel %vm1021_vm9, %v1014_v27, %v967_v33  ;;  %15982 = vmatmul.mubr.msk.bf16.gmra.mrb[20].mxu0 %vm1492_vm11, %v1402_v21  ;;  %v965_v2 = vpop.permute.xlu0 %964 }
 0x12a   : > { %v18498_v19 = vsel %vm1021_vm9, %v1011_v35, %v965_v2  ;;  %v1415_v43 = vshll.u32 %v18494_v37, 16  ;;  %v1413_v49 = vshrl.u32 %v18494_v37, 16 }
 0x12b   : > { %v1405_v53 = vshll.u32 %v18498_v19, 16  ;;  %v1403_v33 = vshrl.u32 %v18498_v19, 16 }
 0x12c   : > { %v1162_v8 = vpop.permute.xlu1 %1161  ;;  %v1417_v38 = vrot.slane %v1415_v43, 1 }
 0x12d   : > { %v1160_v30 = vpop.permute.xlu0 %1159  ;;  %v1243_v40 = vsel %vm972_vm8, %v18141_v48, %v1162_v8  ;;  %v1407_v39 = vrot.slane %v1405_v53, 1 }
 0x12e   : > { %v1240_v27 = vsel %vm972_vm8, %v18135_v54, %v1160_v30  ;;  %v1418_v35 = vor.u32 %v1417_v38, %v1413_v49 }
 0x12f   : > { %v1408_v8 = vor.u32 %v1407_v39, %v1403_v33 }
 0x130   : > { %v1197_v51 = vpop.permute.xlu1 %1196 }
 0x131   : > { %v18507_v14 = vsel %vm1021_vm9, %v1243_v40, %v1197_v51  ;;  %v1195_v0 = vpop.permute.xlu0 %1194 }
 0x132   : > { %v1419_v21 = vshll.u32 %v18507_v14, 16  ;;  %v18512_v36 = vsel %vm1021_vm9, %v1240_v27, %v1195_v0 }
 0x133   : > { %v1409_v48 = vshll.u32 %v18512_v36, 16 }
 0x134   : > { %v1421_v2 = vrot.slane %v1419_v21, 1  ;;  %v934_v43 = vpop.permute.xlu1 %933 }
 0x135   : > { %v1411_v54 = vrot.slane %v1409_v48, 1  ;;  %v932_v53 = vpop.permute.xlu0 %931  ;;  %v1020_v51 = vsel %vm972_vm8, %v18160_v60, %v934_v43 }
 0x136   : > { %v1422_v30 = vsel %vm1282_vm10, %v1418_v35, %v1421_v2  ;;  %v1017_v0 = vsel %vm972_vm8, %v18151_v58, %v932_v53 }
 0x137   : > { %v1412_v40 = vsel %vm1282_vm10, %v1408_v8, %v1411_v54 }
 0x138   : > { %15985 = vmatprep.mubr.msk.bf16.mxu0 %vm1492_vm11, %v1412_v40  ;;  %v971_v27 = vpop.permute.xlu1 %970 }
 0x139   : > { %v18524_v38 = vsel %vm1021_vm9, %v1020_v51, %v971_v27  ;;  %15986 = vmatmul.mubr.msk.bf16.gmra.mrb[24].mxu0 %vm1492_vm11, %v1422_v30  ;;  %v969_v39 = vpop.permute.xlu0 %968 }
 0x13a   : > { %v18528_v49 = vsel %vm1021_vm9, %v1017_v0, %v969_v39  ;;  %v1435_v21 = vshll.u32 %v18524_v38, 16  ;;  %v1433_v30 = vshrl.u32 %v18524_v38, 16 }
 0x13b   : > { %v1425_v60 = vshll.u32 %v18528_v49, 16  ;;  %v1423_v27 = vshrl.u32 %v18528_v49, 16 }
 0x13c   : > { %v1166_v33 = vpop.permute.xlu1 %1165  ;;  %v1437_v35 = vrot.slane %v1435_v21, 1 }
 0x13d   : > { %v1164_v48 = vpop.permute.xlu0 %1163  ;;  %v1249_v2 = vsel %vm972_vm8, %v18170_v63, %v1166_v33  ;;  %v1427_v43 = vrot.slane %v1425_v60, 1 }
 0x13e   : > { %v1246_v8 = vsel %vm972_vm8, %v18164_v61, %v1164_v48  ;;  %v1438_v0 = vor.u32 %v1437_v35, %v1433_v30  ;;  %v17187_v48 = vld [vmem:[%s23693_s1 + $0x68] sm:$0xff]   ;;  %v17188_v35 = vld [vmem:[%s23693_s1 + $0x70] sm:$0xff]  }
 0x13f   : > { %v1428_v21 = vor.u32 %v1427_v43, %v1423_v27 }
 0x140   : > { %v1201_v58 = vpop.permute.xlu1 %1200 }
 0x141   : > { %v18537_v54 = vsel %vm1021_vm9, %v1249_v2, %v1201_v58  ;;  %v1199_v53 = vpop.permute.xlu0 %1198 }
 0x142   : > { %v1439_v40 = vshll.u32 %v18537_v54, 16  ;;  %v18542_v51 = vsel %vm1021_vm9, %v1246_v8, %v1199_v53  ;;  %v1931_v53 = vld [vmem:[#allocation2] sm:$0xe] }
 0x143   : > { %v1429_v63 = vshll.u32 %v18542_v51, 16 }
 0x144   : > { %v1441_v39 = vrot.slane %v1439_v40, 1 }
 0x145   : > { %v1431_v33 = vrot.slane %v1429_v63, 1 }
 0x146   : > { %v1442_v61 = vsel %vm1282_vm10, %v1438_v0, %v1441_v39 }
 0x147   : > { %v1432_v60 = vsel %vm1282_vm10, %v1428_v21, %v1431_v33 }
 0x148   : > { %15989 = vmatprep.mubr.msk.bf16.mxu0 %vm1492_vm11, %v1432_v60 }
 0x149   : > { %15990 = vmatmul.mubr.msk.bf16.gmra.mrb[28].mxu0 %vm1492_vm11, %v1442_v61 }
 0x14a   : > { %16005 = vmatprep.mubr.msk.bf16.mxu0 %vm1492_vm11, %v18195_v17  ;;  %v17189_v17 = vld [vmem:[%s23693_s1 + $0x78] sm:$0xff]  }
 0x151   : > { %16006 = vmatmul.mubr.msk.bf16.vlgmr.msra.gmra.mrb[0].mxu0 %vm1492_vm11, %v18203_v29  ;;  %v17190_v29 = vld [vmem:[%s23693_s1 + $0x80] sm:$0xff]  }
 0x152   : > { %16038 = vmatpush3.bf16.msra.mxu0 %v18332_v22  ;;  %16009 = vmatprep.mubr.msk.bf16.mxu0 %vm1492_vm11, %v18253_v11  ;;  %v2001_v11 = vpop.permute.xlu0 %2000  ;;  %v17191_v22 = vld [vmem:[%s23693_s1 + $0x88] sm:$0xff]  }
 0x153   : > { %16039 = vmatprep.subr.bf16.mxu0 %v17187_v48 }
 0x156   : > { %16040 = vmatpush3.bf16.msra.mxu0 %v17187_v48  ;;  %v2187_v48 = vrot.slane %v18284_v13, 1  ;;  %v2190_v13 = vrot.slane %v18279_v1, 1 }
 0x157   : > { %16041 = vmatprep.subr.bf16.mxu0 %v17188_v35 }
 0x159   : > { %16010 = vmatmul.mubr.msk.bf16.gmra.mrb[4].mxu0 %vm1492_vm11, %v18249_v6  ;;  %v2036_v6 = vpop.permute.xlu0 %2035 }
 0x15a   : > { %16013 = vmatprep.mubr.msk.bf16.mxu0 %vm1492_vm11, %v18320_v18  ;;  %16042 = vmatpush3.bf16.msra.mxu0 %v17188_v35  ;;  %v2003_v18 = vpop.permute.xlu1 %2002 }
 0x15b   : > { %16043 = vmatprep.subr.bf16.mxu0 %v17189_v17 }
 0x15d   : > { %v2005_v2 = vpop.permute.xlu0 %2004 }
 0x15e   : > { %16044 = vmatpush3.bf16.msra.mxu0 %v17189_v17  ;;  %v2038_v58 = vpop.permute.xlu1 %2037  ;;  %v2075_v63 = vsel %vm972_vm8, %v18209_v46, %v2005_v2 }
 0x15f   : > { %16045 = vmatprep.subr.bf16.mxu0 %v17190_v29 }
 0x161   : > { %16014 = vmatmul.mubr.msk.bf16.gmra.mrb[8].mxu0 %vm1492_vm11, %v18316_v31  ;;  %v2040_v43 = vpop.permute.xlu0 %2039 }
 0x162   : > { %16017 = vmatprep.mubr.msk.bf16.mxu0 %vm1492_vm11, %v18382_v24  ;;  %16046 = vmatpush3.bf16.msra.mxu0 %v17190_v29  ;;  %v2007_v8 = vpop.permute.xlu1 %2006 }
 0x163   : > { %16047 = vmatprep.subr.bf16.mxu0 %v17191_v22  ;;  %v2078_v46 = vsel %vm972_vm8, %v18226_v20, %v2007_v8 }
 0x165   : > { %v2009_v31 = vpop.permute.xlu0 %2008 }
 0x166   : > { %16048 = vmatpush3.bf16.msra.mxu0 %v17191_v22  ;;  %v2042_v24 = vpop.permute.xlu1 %2041 }
 0x167   : > { %v2122_v17 = vsel %vm1021_vm9, %v2078_v46, %v2042_v24 }
 0x168   : > { %v2189_v20 = vrot.slane %v2122_v17, 1 }
 0x169   : > { %16018 = vmatmul.mubr.msk.bf16.gmra.mrb[12].mxu0 %vm1492_vm11, %v18378_v5  ;;  %v14400_v5 = vcombine.low %v1931_v53, %v18178_v3  ;;  %v2181_v3 = vrot.slane %v18222_v12, 1  ;;  %v2184_v12 = vrot.slane %v18217_v9, 1 }
 0x16a   : > { %16021 = vmatprep.mubr.msk.bf16.mxu0 %vm1492_vm11, %v18436_v34  ;;  %v2044_v34 = vpop.permute.xlu0 %2043  ;;  %v2011_v30 = vpop.permute.xlu1 %2010 }
 0x16b   : > { %v2069_v40 = vsel %vm972_vm8, %v14400_v5, %v2001_v11  ;;  %v2199_v5 = vrot.slane %v18408_v32, 1 }
 0x16e   : > { %v2013_v27 = vpop.permute.xlu0 %2012 }
 0x16f   : > { %v2087_v2 = vsel %vm972_vm8, %v18269_v28, %v2013_v27 }
 0x171   : > { %16022 = vmatmul.mubr.msk.bf16.gmra.mrb[16].mxu0 %vm1492_vm11, %v18432_v45  ;;  %v2116_v45 = vsel %vm1021_vm9, %v2069_v40, %v2036_v6 }
 0x172   : > { %16025 = vmatprep.mubr.msk.bf16.mxu0 %vm1492_vm11, %v18470_v52  ;;  %v2046_v52 = vpop.permute.xlu1 %2045  ;;  %v2048_v0 = vpop.permute.xlu0 %2047 }
 0x173   : > { %v2128_v24 = vsel %vm1021_vm9, %v2087_v2, %v2048_v0  ;;  %v23760_v2 = vld [vmem:[#allocation7_spill] sm:$0xff] }
 0x174   : > { %v2198_v53 = vrot.slane %v2128_v24, 1 }
 0x176   : > { %v2015_v39 = vpop.permute.xlu1 %2014  ;;  %v2017_v61 = vpop.permute.xlu0 %2016 }
 0x177   : > { %v2090_v28 = vsel %vm972_vm8, %v18289_v23, %v2015_v39 }
 0x179   : > { %16026 = vmatmul.mubr.msk.bf16.gmra.mrb[20].mxu0 %vm1492_vm11, %v18466_v15  ;;  %v2180_v15 = vrot.slane %v2116_v45, 1 }
 0x17a   : > { %16029 = vmatprep.mubr.msk.bf16.mxu0 %vm1492_vm11, %v18498_v19  ;;  %v2072_v19 = vsel %vm972_vm8, %v18212_v57, %v2003_v18  ;;  %v2050_v60 = vpop.permute.xlu1 %2049  ;;  %v2052_v9 = vpop.permute.xlu0 %2051  ;;  %v2193_v18 = vrot.slane %v18352_v10, 1  ;;  %v2196_v10 = vrot.slane %v18347_v4, 1 }
 0x17b   : > { %v2182_v21 = vsel %vm2179_vm12, %v2180_v15, %v2181_v3  ;;  %v2130_v45 = vsel %vm1021_vm9, %v2090_v28, %v2050_v60  ;;  %v3154_v28 = vld [vmem:[#allocation2 + $0x1a8] sm:$0xf] }
 0x17c   : > { %v2201_v23 = vrot.slane %v2130_v45, 1 }
 0x17e   : > { %v2019_v22 = vpop.permute.xlu1 %2018  ;;  %v2021_v8 = vpop.permute.xlu0 %2020 }
 0x17f   : > { %v2099_v0 = vsel %vm972_vm8, %v18339_v7, %v2021_v8  ;;  %v2223_v8 = vrot.slane %v18542_v51, 1 }
 0x181   : > { %16030 = vmatmul.mubr.msk.bf16.gmra.mrb[24].mxu0 %vm1492_vm11, %v18494_v37  ;;  %v2118_v37 = vsel %vm1021_vm9, %v2072_v19, %v2038_v58  ;;  %v2191_v58 = vsel %vm2179_vm12, %v2189_v20, %v2190_v13  ;;  %v2202_v19 = vrot.slane %v18403_v42, 1 }
 0x182   : > { %16033 = vmatprep.mubr.msk.bf16.mxu0 %vm1492_vm11, %v18528_v49  ;;  %v2120_v49 = vsel %vm1021_vm9, %v2075_v63, %v2040_v43  ;;  %v2183_v57 = vrot.slane %v2118_v37, 1  ;;  %v2054_v1 = vpop.permute.xlu1 %2053  ;;  %v2205_v63 = vrot.slane %v18454_v56, 1  ;;  %v2208_v56 = vrot.slane %v18449_v55, 1 }
 0x183   : > { %v2186_v33 = vrot.slane %v2120_v49, 1  ;;  %v2203_v39 = vsel %vm2179_vm12, %v2201_v23, %v2202_v19 }
 0x184   : > { %v2185_v35 = vsel %vm2179_vm12, %v2183_v57, %v2184_v12 }
 0x185   : > { %v2188_v29 = vsel %vm2179_vm12, %v2186_v33, %v2187_v48 }
 0x186   : > { %v2023_v40 = vpop.permute.xlu1 %2022 }
 0x187   : > { %v2102_v7 = vsel %vm972_vm8, %v18357_v25, %v2023_v40 }
 0x189   : > { %16034 = vmatmul.mubr.msk.bf16.gmra.mrb[28].mxu0 %vm1492_vm11, %v18524_v38  ;;  %v2081_v38 = vsel %vm972_vm8, %v18238_v16, %v2009_v31  ;;  %v2084_v16 = vsel %vm972_vm8, %v18257_v47, %v2011_v30  ;;  %v2056_v30 = vpop.permute.xlu0 %2055 }
 0x18a   : > { %16049 = vmatprep.mubr.msk.bf16.mxu0 %vm1492_vm11, %v2182_v21  ;;  %v2124_v11 = vsel %vm1021_vm9, %v2081_v38, %v2044_v34  ;;  %v2126_v43 = vsel %vm1021_vm9, %v2084_v16, %v2046_v52  ;;  %v2093_v34 = vsel %vm972_vm8, %v18302_v44, %v2017_v61  ;;  %v2200_v52 = vsel %vm2179_vm12, %v2198_v53, %v2199_v5  ;;  %v2058_v3 = vpop.permute.xlu1 %2057  ;;  %v18698_v5 = vld [vmem:[%s23694_s2] ss:$0 sm:$0xff] }
 0x18b   : > { %v2192_v6 = vrot.slane %v2124_v11, 1  ;;  %v2195_v47 = vrot.slane %v2126_v43, 1  ;;  %v2132_v4 = vsel %vm1021_vm9, %v2093_v34, %v2052_v9  ;;  %v2096_v44 = vsel %vm972_vm8, %v18325_v50, %v2019_v22  ;;  %v23759_v11 = vld [vmem:[#allocation6_spill] sm:$0xff] }
 0x18c   : > { %v2204_v15 = vrot.slane %v2132_v4, 1  ;;  %v2134_v37 = vsel %vm1021_vm9, %v2096_v44, %v2054_v1  ;;  %v2136_v49 = vsel %vm1021_vm9, %v2099_v0, %v2056_v30  ;;  %v2211_v61 = vrot.slane %v18482_v59, 1 }
 0x18d   : > { %v2194_v31 = vsel %vm2179_vm12, %v2192_v6, %v2193_v18  ;;  %v2197_v27 = vsel %vm2179_vm12, %v2195_v47, %v2196_v10  ;;  %v2025_v32 = vpop.permute.xlu0 %2024  ;;  %v2207_v50 = vrot.slane %v2134_v37, 1  ;;  %v2210_v33 = vrot.slane %v2136_v49, 1  ;;  %v3153_v10 = vld [vmem:[#allocation2 + $0x1a4] sm:$0xf] }
 0x18e   : > { %v2206_v21 = vsel %vm2179_vm12, %v2204_v15, %v2205_v63  ;;  %v2027_v57 = vpop.permute.xlu1 %2026  ;;  %v2105_v12 = vsel %vm972_vm8, %v18367_v26, %v2025_v32  ;;  %v2138_v60 = vsel %vm1021_vm9, %v2102_v7, %v2058_v3  ;;  %v2214_v59 = vrot.slane %v18477_v41, 1 }
 0x18f   : > { %v2209_v46 = vsel %vm2179_vm12, %v2207_v50, %v2208_v56  ;;  %v2212_v38 = vsel %vm2179_vm12, %v2210_v33, %v2211_v61  ;;  %v2213_v25 = vrot.slane %v2138_v60, 1  ;;  %v2108_v26 = vsel %vm972_vm8, %v18387_v62, %v2027_v57  ;;  %v3013_v61 = vld [vmem:[#allocation2 + $0xf0] sm:$0xf] }
 0x190   : > { %v2226_v53 = vrot.slane %v18537_v54, 1  ;;  %v14502_v51 = vcombine.low %v3153_v10, %v3154_v28 }
 0x191   : > { %16050 = vmatmul.mubr.msk.bf16.vlgmr.msra.gmra.mrb[0].mxu0 %vm1492_vm11, %v2185_v35  ;;  %v2060_v42 = vpop.permute.xlu0 %2059  ;;  %v2215_v6 = vsel %vm2179_vm12, %v2213_v25, %v2214_v59  ;;  %v3006_v25 = vld [vmem:[#allocation2 + $0xe4] sm:$0xf] }
 0x192   : > { %16053 = vmatprep.mubr.msk.bf16.mxu0 %vm1492_vm11, %v2188_v29  ;;  %v2062_v35 = vpop.permute.xlu1 %2061  ;;  %v2140_v55 = vsel %vm1021_vm9, %v2105_v12, %v2060_v42  ;;  %v2217_v29 = vrot.slane %v18512_v36, 1  ;;  %v2220_v36 = vrot.slane %v18507_v14, 1  ;;  %3307 = vrot.lane.b32.xlu1 %v14502_v51, %s17549_s30 }
 0x193   : > { %v2216_v17 = vrot.slane %v2140_v55, 1  ;;  %v2142_v13 = vsel %vm1021_vm9, %v2108_v26, %v2062_v35 }
 0x194   : > { %v2219_v62 = vrot.slane %v2142_v13, 1 }
 0x195   : > { %v2029_v48 = vpop.permute.xlu0 %2028  ;;  %v2218_v16 = vsel %vm2179_vm12, %v2216_v17, %v2217_v29 }
 0x196   : > { %v2111_v9 = vsel %vm972_vm8, %v23759_v11, %v2029_v48  ;;  %v2031_v22 = vpop.permute.xlu1 %2030 }
 0x199   : > { %16054 = vmatmul.mubr.msk.bf16.gmra.mrb[4].mxu0 %vm1492_vm11, %v2191_v58  ;;  %v2064_v20 = vpop.permute.xlu0 %2063  ;;  %v2114_v58 = vsel %vm972_vm8, %v23760_v2, %v2031_v22 }
 0x19a   : > { %16057 = vmatprep.mubr.msk.bf16.mxu0 %vm1492_vm11, %v2194_v31  ;;  %v2144_v41 = vsel %vm1021_vm9, %v2111_v9, %v2064_v20  ;;  %v2066_v43 = vpop.permute.xlu1 %2065  ;;  %v2221_v31 = vsel %vm2179_vm12, %v2219_v62, %v2220_v36  ;;  %v3017_v9 = vld [vmem:[#allocation2 + $0xf8] sm:$0x1]  ;;  %v3010_v62 = vld [vmem:[#allocation2 + $0xec] sm:$0x1] }
 0x19b   : > { %v2222_v18 = vrot.slane %v2144_v41, 1  ;;  %v2146_v24 = vsel %vm1021_vm9, %v2114_v58, %v2066_v43 }
 0x19c   : > { %v2225_v47 = vrot.slane %v2146_v24, 1 }
 0x19d   : > { %v2224_v1 = vsel %vm2179_vm12, %v2222_v18, %v2223_v8 }
 0x19e   : > { %v2227_v14 = vsel %vm2179_vm12, %v2225_v47, %v2226_v53 }
 0x1a1   : > { %16058 = vmatmul.mubr.msk.bf16.gmra.mrb[8].mxu0 %vm1492_vm11, %v2197_v27 }
 0x1a2   : > { %16061 = vmatprep.mubr.msk.bf16.mxu0 %vm1492_vm11, %v2200_v52 }
 0x1a9   : > { %16062 = vmatmul.mubr.msk.bf16.gmra.mrb[12].mxu0 %vm1492_vm11, %v2203_v39 }
 0x1aa   : > { %16065 = vmatprep.mubr.msk.bf16.mxu0 %vm1492_vm11, %v2206_v21 }
 0x1b1   : > { %16066 = vmatmul.mubr.msk.bf16.gmra.mrb[16].mxu0 %vm1492_vm11, %v2209_v46 }
 0x1b2   : > { %16069 = vmatprep.mubr.msk.bf16.mxu0 %vm1492_vm11, %v2212_v38 }
 0x1b9   : > { %16070 = vmatmul.mubr.msk.bf16.gmra.mrb[20].mxu0 %vm1492_vm11, %v2215_v6 }
 0x1ba   : > { %16073 = vmatprep.mubr.msk.bf16.mxu0 %vm1492_vm11, %v2218_v16 }
 0x1c1   : > { %16074 = vmatmul.mubr.msk.bf16.gmra.mrb[24].mxu0 %vm1492_vm11, %v2221_v31 }
 0x1c2   : > { %16077 = vmatprep.mubr.msk.bf16.mxu0 %vm1492_vm11, %v2224_v1 }
 0x1c9   : > { %16078 = vmatmul.mubr.msk.bf16.gmra.mrb[28].mxu0 %vm1492_vm11, %v2227_v14 }
 0x264   : > { %v16051_v34 = vpop.f32.mrb[0].mxu0 }
 0x265   : > { %v2527_v30 = vadd.f32 %v16051_v34, %v18698_v5  ;;  %v2359_v40 = vpop.f32.mrb[1].mxu0 }
 0x266   : > { %v2525_v54 = vadd.f32 %v18698_v5, %v2359_v40  ;;  %v16052_v27 = vpop.f32.mrb[2].mxu0 }
 0x267   : > { %v2559_v45 = vmax.f32 %v2527_v30, 0.0  ;;  %v2528_v52 = vadd.f32 %v16052_v27, %v18698_v5  ;;  %v2362_v4 = vpop.f32.mrb[3].mxu0 }
 0x268   : > { %v2557_v23 = vmax.f32 %v2525_v54, 0.0  ;;  %v2526_v15 = vadd.f32 %v18698_v5, %v2362_v4 }
 0x269   : > { %v15395_v32 = vpack.c.bf16 %v2559_v45, %v2559_v45  ;;  %v2560_v19 = vmax.f32 %v2528_v52, 0.0  ;;  %v3027_v45 = vld [vmem:[#allocation2 + $0x108] sm:$0xf] }
 0x26a   : > { %v15393_v44 = vpack.c.bf16 %v2557_v23, %v2557_v23  ;;  %v2558_v3 = vmax.f32 %v2526_v15, 0.0 }
 0x26b   : > { %v2703_v63 = vshrl.u32 %v15395_v32, 16  ;;  %v15396_v0 = vpack.c.bf16 %v2560_v19, %v2560_v19  ;;  %v2706_v39 = vshll.u32 %v15395_v32, 16 }
 0x26c   : > { %v2686_v37 = vshrl.u32 %v15393_v44, 16  ;;  %v2689_v21 = vshll.u32 %v15393_v44, 16  ;;  %v15394_v49 = vpack.c.bf16 %v2558_v3, %v2558_v3  ;;  %v16055_v42 = vpop.f32.mrb[4].mxu0  ;;  %v3020_v44 = vld [vmem:[#allocation2 + $0xfc] sm:$0xf] }
 0x26d   : > { %v2705_v50 = vrot.slane %v2703_v63, 7  ;;  %v2711_v57 = vshrl.u32 %v15396_v0, 16  ;;  %v2714_v33 = vshll.u32 %v15396_v0, 16  ;;  %v2531_v56 = vadd.f32 %v16055_v42, %v18698_v5  ;;  %v2375_v7 = vpop.f32.mrb[5].mxu0 }
 0x26e   : > { %v2688_v12 = vrot.slane %v2686_v37, 7  ;;  %v2694_v46 = vshrl.u32 %v15394_v49, 16  ;;  %v2697_v60 = vshll.u32 %v15394_v49, 16  ;;  %v2529_v48 = vadd.f32 %v18698_v5, %v2375_v7  ;;  %v16056_v38 = vpop.f32.mrb[6].mxu0 }
 0x26f   : > { %v2708_v35 = vor.u32 %v2706_v39, %v2705_v50  ;;  %v2709_v55 = vrot.slane %v2705_v50, 4  ;;  %v2713_v17 = vrot.slane %v2711_v57, 7  ;;  %v2563_v59 = vmax.f32 %v2531_v56, 0.0  ;;  %v2378_v26 = vpop.f32.mrb[7].mxu0 }
 0x270   : > { %v2691_v29 = vor.u32 %v2689_v21, %v2688_v12  ;;  %v2692_v11 = vrot.slane %v2688_v12, 4  ;;  %v2696_v20 = vrot.slane %v2694_v46, 7  ;;  %v2561_v22 = vmax.f32 %v2529_v48, 0.0 }
 0x271   : > { %v3014_v13 = vsel %vm17834_vm6, %v2708_v35, %v3013_v61  ;;  %v2716_v16 = vor.u32 %v2714_v33, %v2713_v17  ;;  %v2718_v41 = vrot.slane %v2713_v17, 4  ;;  %v15399_v18 = vpack.c.bf16 %v2563_v59, %v2563_v59  ;;  %v3031_v35 = vld [vmem:[#allocation2 + $0x110] sm:$0x1] }
 0x272   : > { %3015 = vst [vmem:[#allocation2 + $0xf0] sm:$0xf] %v3014_v13  ;;  %v3007_v36 = vsel %vm17834_vm6, %v2691_v29, %v3006_v25  ;;  %v2699_v2 = vor.u32 %v2697_v60, %v2696_v20  ;;  %v2701_v58 = vrot.slane %v2696_v20, 4  ;;  %v15397_v43 = vpack.c.bf16 %v2561_v22, %v2561_v22  ;;  %v3041_v20 = vld [vmem:[#allocation2 + $0x120] sm:$0xf] }
 0x273   : > { %3008 = vst [vmem:[#allocation2 + $0xe4] sm:$0xf] %v3007_v36  ;;  %v2717_v31 = vsel %vm17827_vm5, %v2709_v55, %v2716_v16  ;;  %v3018_v1 = vsel %vm17845_vm7, %v2718_v41, %v3017_v9  ;;  %v2737_v47 = vshrl.u32 %v15399_v18, 16  ;;  %v2740_v10 = vshll.u32 %v15399_v18, 16  ;;  %v3024_v55 = vld [vmem:[#allocation2 + $0x104] sm:$0x1] }
 0x274   : > { %3016 = vst.msk [vmem:[#allocation2 + $0xf4] sm:$0xf] %vm199_vm0, %v2717_v31  ;;  %3019 = vst [vmem:[#allocation2 + $0xf8] sm:$0x1] %v3018_v1  ;;  %v2700_v53 = vsel %vm17827_vm5, %v2692_v11, %v2699_v2  ;;  %v3011_v14 = vsel %vm17845_vm7, %v2701_v58, %v3010_v62  ;;  %v2720_v28 = vshrl.u32 %v15397_v43, 16  ;;  %v16059_v51 = vpop.f32.mrb[8].mxu0  ;;  %v2532_v30 = vadd.f32 %v16056_v38, %v18698_v5 }
 0x275   : > { %3009 = vst.msk [vmem:[#allocation2 + $0xe8] sm:$0xf] %vm199_vm0, %v2700_v53  ;;  %3012 = vst [vmem:[#allocation2 + $0xec] sm:$0x1] %v3011_v14  ;;  %v18720_v34 = vrot.slane %v2737_v47, 7  ;;  %v2530_v40 = vadd.f32 %v18698_v5, %v2378_v26  ;;  %v2535_v54 = vadd.f32 %v16059_v51, %v18698_v5  ;;  %v2391_v27 = vpop.f32.mrb[9].mxu0 }
 0x276   : > { %v2722_v52 = vrot.slane %v2720_v28, 7  ;;  %v2723_v4 = vshll.u32 %v15397_v43, 16  ;;  %v2533_v23 = vadd.f32 %v18698_v5, %v2391_v27  ;;  %v16060_v15 = vpop.f32.mrb[10].mxu0  ;;  %v2564_v3 = vmax.f32 %v2532_v30, 0.0  ;;  %v3034_v47 = vld [vmem:[#allocation2 + $0x114] sm:$0xf] }
 0x277   : > { %v2742_v32 = vor.u32 %v2740_v10, %v18720_v34  ;;  %v2743_v19 = vrot.slane %v18720_v34, 4  ;;  %v2562_v63 = vmax.f32 %v2530_v40, 0.0  ;;  %v2394_v0 = vpop.f32.mrb[11].mxu0  ;;  %v2567_v21 = vmax.f32 %v2535_v54, 0.0 }
 0x278   : > { %v2725_v39 = vor.u32 %v2723_v4, %v2722_v52  ;;  %v2726_v37 = vrot.slane %v2722_v52, 4  ;;  %v2565_v49 = vmax.f32 %v2533_v23, 0.0  ;;  %v15400_v50 = vpack.c.bf16 %v2564_v3, %v2564_v3 }
 0x279   : > { %v3028_v42 = vsel %vm17834_vm6, %v2742_v32, %v3027_v45  ;;  %v15398_v57 = vpack.c.bf16 %v2562_v63, %v2562_v63  ;;  %v2536_v33 = vadd.f32 %v16060_v15, %v18698_v5  ;;  %v15403_v7 = vpack.c.bf16 %v2567_v21, %v2567_v21  ;;  %v17226_v45 = vld [vmem:[%s23693_s1 + $0xc0] sm:$0xff]   ;;  %v3123_v32 = vld [vmem:[#allocation2 + $0xf0] sm:$0xf] }
 0x27a   : > { %3029 = vst [vmem:[#allocation2 + $0x108] sm:$0xf] %v3028_v42  ;;  %v3021_v56 = vsel %vm17834_vm6, %v2725_v39, %v3020_v44  ;;  %v15401_v61 = vpack.c.bf16 %v2565_v49, %v2565_v49  ;;  %v2534_v12 = vadd.f32 %v18698_v5, %v2394_v0  ;;  %v2745_v46 = vshrl.u32 %v15400_v50, 16  ;;  %16081 = vmatprep.subr.bf16.mxu1 %v17226_v45  ;;  %v3045_v42 = vld [vmem:[#allocation2 + $0x128] sm:$0x1] }
 0x27b   : > { %3022 = vst [vmem:[#allocation2 + $0xfc] sm:$0xf] %v3021_v56  ;;  %v2748_v60 = vshll.u32 %v15400_v50, 16  ;;  %v2728_v48 = vshrl.u32 %v15398_v57, 16  ;;  %v2731_v38 = vshll.u32 %v15398_v57, 16  ;;  %v2771_v25 = vshrl.u32 %v15403_v7, 16  ;;  %16082 = vmatpush3.bf16.msra.mxu1 %v17226_v45 }
 0x27c   : > { %v2774_v17 = vshll.u32 %v15403_v7, 16  ;;  %v2754_v59 = vshrl.u32 %v15401_v61, 16  ;;  %v2757_v26 = vshll.u32 %v15401_v61, 16  ;;  %v16063_v29 = vpop.f32.mrb[12].mxu0  ;;  %v2747_v11 = vrot.slane %v2745_v46, 7 }
 0x27d   : > { %v2730_v9 = vrot.slane %v2728_v48, 7  ;;  %v2568_v22 = vmax.f32 %v2536_v33, 0.0  ;;  %v2566_v13 = vmax.f32 %v2534_v12, 0.0  ;;  %v2407_v16 = vpop.f32.mrb[13].mxu0  ;;  %v18734_v41 = vrot.slane %v2771_v25, 7  ;;  %v17228_v12 = vld [vmem:[%s23693_s1 + $0xc8] sm:$0xff]  }
 0x27e   : > { %v18736_v62 = vrot.slane %v2754_v59, 7  ;;  %v2539_v18 = vadd.f32 %v16063_v29, %v18698_v5  ;;  %v2537_v36 = vadd.f32 %v18698_v5, %v2407_v16  ;;  %v16064_v2 = vpop.f32.mrb[14].mxu0  ;;  %v2750_v58 = vor.u32 %v2748_v60, %v2747_v11  ;;  %v18744_v34 = vld [vmem:[#allocation2 + $0xf4] sm:$0xf]  ;;  %v3038_v50 = vld [vmem:[#allocation2 + $0x11c] sm:$0x1]  ;;  %16083 = vmatprep.subr.bf16.mxu1 %v17228_v12 }
 0x27f   : > { %v2752_v43 = vrot.slane %v2747_v11, 4  ;;  %v2733_v31 = vor.u32 %v2731_v38, %v2730_v9  ;;  %v2735_v1 = vrot.slane %v2730_v9, 4  ;;  %v2410_v53 = vpop.f32.mrb[15].mxu0  ;;  %v2776_v14 = vor.u32 %v2774_v17, %v18734_v41  ;;  %v18775_v48 = vld [vmem:[#allocation2 + $0xf8] ss:$0 sps:$4 sm:$0x11]   ;;  %16084 = vmatpush3.bf16.msra.mxu1 %v17228_v12 }
 0x280   : > { %v2777_v10 = vrot.slane %v18734_v41, 4  ;;  %v2759_v28 = vor.u32 %v2757_v26, %v18736_v62  ;;  %v2760_v51 = vrot.slane %v18736_v62, 4  ;;  %v2751_v30 = vsel %vm17827_vm5, %v2743_v19, %v2750_v58  ;;  %v3055_v16 = vld [vmem:[#allocation2 + $0x138] sm:$0xf]  ;;  %v17230_v58 = vld [vmem:[%s23693_s1 + $0xd0] sm:$0xff]  }
 0x281   : > { %v3032_v40 = vsel %vm17845_vm7, %v2752_v43, %v3031_v35  ;;  %v2734_v54 = vsel %vm17827_vm5, %v2726_v37, %v2733_v31  ;;  %v3025_v27 = vsel %vm17845_vm7, %v2735_v1, %v3024_v55  ;;  %3030 = vst.msk [vmem:[#allocation2 + $0x10c] sm:$0xf] %vm199_vm0, %v2751_v30  ;;  %v3042_v52 = vsel %vm17834_vm6, %v2776_v14, %v3041_v20  ;;  %v18802_v14 = vld [vmem:[#allocation2 + $0xe8] sm:$0xf]  ;;  %v4266_v8 = vld [vmem:[#allocation2 + $0xe4] sm:$0xe] }
 0x282   : > { %3033 = vst [vmem:[#allocation2 + $0x110] sm:$0x1] %v3032_v40  ;;  %3023 = vst.msk [vmem:[#allocation2 + $0x100] sm:$0xf] %vm199_vm0, %v2734_v54  ;;  %v3035_v4 = vsel %vm17834_vm6, %v2759_v28, %v3034_v47  ;;  %v15404_v23 = vpack.c.bf16 %v2568_v22, %v2568_v22  ;;  %v15402_v15 = vpack.c.bf16 %v2566_v13, %v2566_v13  ;;  %v2571_v19 = vmax.f32 %v2539_v18, 0.0 }
 0x283   : > { %3026 = vst [vmem:[#allocation2 + $0x104] sm:$0x1] %v3025_v27  ;;  %3043 = vst [vmem:[#allocation2 + $0x120] sm:$0xf] %v3042_v52  ;;  %v2569_v44 = vmax.f32 %v2537_v36, 0.0  ;;  %v18764_v3 = vcombine.low %v3123_v32, %v18744_v34  ;;  %v2540_v63 = vadd.f32 %v16064_v2, %v18698_v5  ;;  %v2538_v7 = vadd.f32 %v18698_v5, %v2410_v53 }
 0x284   : > { %3036 = vst [vmem:[#allocation2 + $0x114] sm:$0xf] %v3035_v4  ;;  %v2779_v0 = vshrl.u32 %v15404_v23, 16  ;;  %v2782_v39 = vshll.u32 %v15404_v23, 16  ;;  %v2762_v37 = vshrl.u32 %v15402_v15, 16  ;;  %v2765_v21 = vshll.u32 %v15402_v15, 16  ;;  %16085 = vmatprep.subr.bf16.mxu1 %v17230_v58 }
 0x285   : > { %v16067_v49 = vpop.f32.mrb[16].mxu0  ;;  %v15407_v57 = vpack.c.bf16 %v2571_v19, %v2571_v19  ;;  %v15405_v33 = vpack.c.bf16 %v2569_v44, %v2569_v44  ;;  %3277 = vrot.lane.b32.xlu0 %v18764_v3, %s17549_s30  ;;  %3242 = vrot.lane.b32.xlu1 %v18764_v3, %s17550_s7  ;;  %v2572_v56 = vmax.f32 %v2540_v63, 0.0  ;;  %v2570_v2 = vmax.f32 %v2538_v7, 0.0  ;;  %v3048_v53 = vld [vmem:[#allocation2 + $0x12c] sm:$0xf]  ;;  %v17232_v44 = vld [vmem:[%s23693_s1 + $0xd8] sm:$0xff]  }
 0x286   : > { %v2423_v61 = vpop.f32.mrb[17].mxu0  ;;  %v2781_v46 = vrot.slane %v2779_v0, 7  ;;  %v2764_v60 = vrot.slane %v2762_v37, 7  ;;  %v2543_v38 = vadd.f32 %v16067_v49, %v18698_v5  ;;  %16086 = vmatpush3.bf16.msra.mxu1 %v17230_v58 }
 0x287   : > { %v2541_v35 = vadd.f32 %v18698_v5, %v2423_v61  ;;  %v16068_v55 = vpop.f32.mrb[18].mxu0  ;;  %v2805_v25 = vshrl.u32 %v15407_v57, 16  ;;  %v2808_v17 = vshll.u32 %v15407_v57, 16  ;;  %v2788_v59 = vshrl.u32 %v15405_v33, 16  ;;  %16087 = vmatprep.subr.bf16.mxu1 %v17232_v44 }
 0x288   : > { %v2791_v26 = vshll.u32 %v15405_v33, 16  ;;  %v2426_v29 = vpop.f32.mrb[19].mxu0  ;;  %v2784_v11 = vor.u32 %v2782_v39, %v2781_v46  ;;  %v2786_v9 = vrot.slane %v2781_v46, 4  ;;  %v2767_v20 = vor.u32 %v2765_v21, %v2764_v60  ;;  %v18810_v45 = vld [vmem:[#allocation2 + $0x10c] sm:$0xf] }
 0x289   : > { %v2769_v22 = vrot.slane %v2764_v60, 4  ;;  %v18779_v13 = vrot.slane %v2805_v25, 7  ;;  %v18781_v18 = vrot.slane %v2788_v59, 7  ;;  %v15408_v36 = vpack.c.bf16 %v2572_v56, %v2572_v56  ;;  %3506 = vrot.lane.b32.xlu0 %v18775_v48, %s17549_s30  ;;  %3473 = vrot.lane.b32.xlu1 %v18775_v48, %s17550_s7  ;;  %v3127_v21 = vld [vmem:[#allocation2 + $0x108] sm:$0xf] }
 0x28a   : > { %v2785_v43 = vsel %vm17827_vm5, %v2777_v10, %v2784_v11  ;;  %v3046_v31 = vsel %vm17845_vm7, %v2786_v9, %v3045_v42  ;;  %v2768_v1 = vsel %vm17827_vm5, %v2760_v51, %v2767_v20  ;;  %v3121_v51 = vld [vmem:[#allocation2 + $0xe4] sm:$0xf]  ;;  %v15406_v54 = vpack.c.bf16 %v2570_v2, %v2570_v2  ;;  %v3059_v42 = vld [vmem:[#allocation2 + $0x140] sm:$0x1]  ;;  %16088 = vmatpush3.bf16.msra.mxu1 %v17232_v44 }
 0x28b   : > { %v3039_v47 = vsel %vm17845_vm7, %v2769_v22, %v3038_v50  ;;  %3044 = vst.msk [vmem:[#allocation2 + $0x124] sm:$0xf] %vm199_vm0, %v2785_v43  ;;  %3047 = vst [vmem:[#allocation2 + $0x128] sm:$0x1] %v3046_v31  ;;  %v2810_v41 = vor.u32 %v2808_v17, %v18779_v13  ;;  %v2811_v10 = vrot.slane %v18779_v13, 4  ;;  %v2793_v62 = vor.u32 %v2791_v26, %v18781_v18 }
 0x28c   : > { %3037 = vst.msk [vmem:[#allocation2 + $0x118] sm:$0xf] %vm199_vm0, %v2768_v1  ;;  %3040 = vst [vmem:[#allocation2 + $0x11c] sm:$0x1] %v3039_v47  ;;  %v2794_v28 = vrot.slane %v18781_v18, 4  ;;  %v2813_v30 = vshrl.u32 %v15408_v36, 16  ;;  %v18817_v32 = vcombine.low %v3121_v51, %v18802_v14  ;;  %v18827_v33 = vcombine.low %v3127_v21, %v18810_v45 }
 0x28d   : > { %v2816_v40 = vshll.u32 %v15408_v36, 16  ;;  %v2575_v27 = vmax.f32 %v2543_v38, 0.0  ;;  %v16071_v52 = vpop.f32.mrb[20].mxu0  ;;  %v3056_v4 = vsel %vm17834_vm6, %v2810_v41, %v3055_v16  ;;  %v3049_v23 = vsel %vm17834_vm6, %v2793_v62, %v3048_v53  ;;  %v3052_v50 = vld [vmem:[#allocation2 + $0x134] sm:$0x1] }
 0x28e   : > { %v2573_v15 = vmax.f32 %v2541_v35, 0.0  ;;  %v2439_v19 = vpop.f32.mrb[21].mxu0  ;;  %3057 = vst [vmem:[#allocation2 + $0x138] sm:$0xf] %v3056_v4  ;;  %3050 = vst [vmem:[#allocation2 + $0x12c] sm:$0xf] %v3049_v23  ;;  %3240 = vrot.lane.b32.xlu0 %v18817_v32, %s17550_s7  ;;  %v2544_v56 = vadd.f32 %v16068_v55, %v18698_v5  ;;  %v2542_v7 = vadd.f32 %v18698_v5, %v2426_v29  ;;  %3246 = vrot.lane.b32.xlu1 %v18827_v33, %s17550_s7 }
 0x28f   : > { %v2815_v63 = vrot.slane %v2813_v30, 7  ;;  %v2796_v0 = vshrl.u32 %v15406_v54, 16  ;;  %v2799_v39 = vshll.u32 %v15406_v54, 16  ;;  %v15411_v37 = vpack.c.bf16 %v2575_v27, %v2575_v27  ;;  %v18822_v49 = vpop.f32.mrb[22].mxu0  ;;  %v17233_v55 = vld [vmem:[%s23693_s1 + $0xe0] sm:$0xff]  }
 0x290   : > { %v15409_v57 = vpack.c.bf16 %v2573_v15, %v2573_v15  ;;  %v18831_v61 = vpop.f32.mrb[23].mxu0  ;;  %v18833_v35 = vld [vmem:[#allocation2 + $0xec] ss:$0 sps:$4 sm:$0x11]   ;;  %v2576_v26 = vmax.f32 %v2544_v56, 0.0  ;;  %v2574_v2 = vmax.f32 %v2542_v7, 0.0  ;;  %16089 = vmatprep.subr.bf16.mxu1 %v17233_v55  ;;  %v2547_v1 = vadd.f32 %v16071_v52, %v18698_v5 }
 0x291   : > { %v2818_v12 = vor.u32 %v2816_v40, %v2815_v63  ;;  %v2820_v46 = vrot.slane %v2815_v63, 4  ;;  %v2798_v60 = vrot.slane %v2796_v0, 7  ;;  %v2839_v38 = vshrl.u32 %v15411_v37, 16  ;;  %v3069_v22 = vld [vmem:[#allocation2 + $0x150] sm:$0xf]  ;;  %16090 = vmatpush3.bf16.msra.mxu1 %v17233_v55 }
 0x292   : > { %v2842_v25 = vshll.u32 %v15411_v37, 16  ;;  %v2822_v17 = vshrl.u32 %v15409_v57, 16  ;;  %v2825_v59 = vshll.u32 %v15409_v57, 16  ;;  %v3062_v13 = vld [vmem:[#allocation2 + $0x144] sm:$0xf]  ;;  %v15412_v36 = vpack.c.bf16 %v2576_v26, %v2576_v26  ;;  %3471 = vrot.lane.b32.xlu0 %v18833_v35, %s17550_s7 }
 0x293   : > { %v2819_v29 = vsel %vm17827_vm5, %v2811_v10, %v2818_v12  ;;  %v3060_v11 = vsel %vm17845_vm7, %v2820_v46, %v3059_v42  ;;  %v2801_v9 = vor.u32 %v2799_v39, %v2798_v60  ;;  %v2803_v20 = vrot.slane %v2798_v60, 4  ;;  %v18849_v58 = vld [vmem:[#allocation2 + $0x110] ss:$0 sps:$4 sm:$0x11]   ;;  %v18857_v53 = vld [vmem:[#allocation2 + $0x100] sm:$0xf] }
 0x294   : > { %3058 = vst.msk [vmem:[#allocation2 + $0x13c] sm:$0xf] %vm199_vm0, %v2819_v29  ;;  %3061 = vst [vmem:[#allocation2 + $0x140] sm:$0x1] %v3060_v11  ;;  %v2841_v16 = vrot.slane %v2839_v38, 7  ;;  %v18845_v18 = vrot.slane %v2822_v17, 7  ;;  %v2545_v47 = vadd.f32 %v18698_v5, %v2439_v19  ;;  %3477 = vrot.lane.b32.xlu1 %v18849_v58, %s17550_s7  ;;  %v15410_v27 = vpack.c.bf16 %v2574_v2, %v2574_v2 }
 0x295   : > { %v2802_v43 = vsel %vm17827_vm5, %v2794_v28, %v2801_v9  ;;  %v3053_v31 = vsel %vm17845_vm7, %v2803_v20, %v3052_v50  ;;  %v16075_v41 = vpop.f32.mrb[24].mxu0  ;;  %v2847_v40 = vshrl.u32 %v15412_v36, 16  ;;  %v2850_v54 = vshll.u32 %v15412_v36, 16  ;;  %v3125_v4 = vld [vmem:[#allocation2 + $0xfc] sm:$0xf]  ;;  %v17234_v39 = vld [vmem:[%s23693_s1 + $0xe8] sm:$0xff]  }
 0x296   : > { %3051 = vst.msk [vmem:[#allocation2 + $0x130] sm:$0xf] %vm199_vm0, %v2802_v43  ;;  %3054 = vst [vmem:[#allocation2 + $0x134] sm:$0x1] %v3053_v31  ;;  %v2844_v10 = vor.u32 %v2842_v25, %v2841_v16  ;;  %v2845_v62 = vrot.slane %v2841_v16, 4  ;;  %v2827_v51 = vor.u32 %v2825_v59, %v18845_v18  ;;  %v2828_v30 = vrot.slane %v18845_v18, 4  ;;  %3281 = vrot.lane.b32.xlu0 %v18827_v33, %s17549_s30 }
 0x297   : > { %v2455_v28 = vpop.f32.mrb[25].mxu0  ;;  %v2579_v52 = vmax.f32 %v2547_v1, 0.0  ;;  %v2577_v44 = vmax.f32 %v2545_v47, 0.0  ;;  %v18873_v63 = vcombine.low %v3125_v4, %v18857_v53  ;;  %v2849_v37 = vrot.slane %v2847_v40, 7  ;;  %v3073_v57 = vld [vmem:[#allocation2 + $0x158] sm:$0x1]  ;;  %16091 = vmatprep.subr.bf16.mxu1 %v17234_v39 }
 0x298   : > { %v18864_v23 = vpop.f32.mrb[26].mxu0  ;;  %v3070_v15 = vsel %vm17834_vm6, %v2844_v10, %v3069_v22  ;;  %v3063_v19 = vsel %vm17834_vm6, %v2827_v51, %v3062_v13  ;;  %v2830_v21 = vshrl.u32 %v15410_v27, 16  ;;  %v2833_v42 = vshll.u32 %v15410_v27, 16  ;;  %v3066_v56 = vld [vmem:[#allocation2 + $0x14c] sm:$0x1]  ;;  %16092 = vmatpush3.bf16.msra.mxu1 %v17234_v39 }
 0x299   : > { %v18875_v0 = vpop.f32.mrb[27].mxu0  ;;  %3071 = vst [vmem:[#allocation2 + $0x150] sm:$0xf] %v3070_v15  ;;  %3064 = vst [vmem:[#allocation2 + $0x144] sm:$0xf] %v3063_v19  ;;  %v15415_v50 = vpack.c.bf16 %v2579_v52, %v2579_v52  ;;  %v15413_v7 = vpack.c.bf16 %v2577_v44, %v2577_v44  ;;  %3279 = vrot.lane.b32.xlu1 %v18873_v63, %s17549_s30  ;;  %v2548_v12 = vadd.f32 %v18822_v49, %v18698_v5 }
 0x29a   : > { %v2546_v46 = vadd.f32 %v18698_v5, %v18831_v61  ;;  %v2551_v60 = vadd.f32 %v16075_v41, %v18698_v5  ;;  %v2852_v38 = vor.u32 %v2850_v54, %v2849_v37  ;;  %v2854_v25 = vrot.slane %v2849_v37, 4  ;;  %v18887_v26 = vld [vmem:[#allocation2 + $0x104] ss:$0 sps:$4 sm:$0x11]   ;;  %3510 = vrot.lane.b32.xlu0 %v18849_v58, %s17549_s30  ;;  %v3083_v13 = vld [vmem:[#allocation2 + $0x168] sm:$0xf] }
 0x29b   : > { %v2832_v17 = vrot.slane %v2830_v21, 7  ;;  %v2873_v59 = vshrl.u32 %v15415_v50, 16  ;;  %v2876_v55 = vshll.u32 %v15415_v50, 16  ;;  %v2856_v29 = vshrl.u32 %v15413_v7, 16  ;;  %v3076_v2 = vld [vmem:[#allocation2 + $0x15c] sm:$0xf] }
 0x29c   : > { %v2859_v11 = vshll.u32 %v15413_v7, 16  ;;  %v2580_v9 = vmax.f32 %v2548_v12, 0.0  ;;  %v2853_v49 = vsel %vm17827_vm5, %v2845_v62, %v2852_v38  ;;  %v3074_v61 = vsel %vm17845_vm7, %v2854_v25, %v3073_v57  ;;  %v18895_v16 = vpop.f32.mrb[28].mxu0  ;;  %v18909_v51 = vld [vmem:[#allocation2 + $0x124] sm:$0xf] }
 0x29d   : > { %v2835_v20 = vor.u32 %v2833_v42, %v2832_v17  ;;  %v2837_v22 = vrot.slane %v2832_v17, 4  ;;  %3072 = vst.msk [vmem:[#allocation2 + $0x154] sm:$0xf] %vm199_vm0, %v2853_v49  ;;  %3075 = vst [vmem:[#allocation2 + $0x158] sm:$0x1] %v3074_v61  ;;  %v2875_v18 = vrot.slane %v2873_v59, 7  ;;  %3508 = vrot.lane.b32.xlu1 %v18887_v26, %s17549_s30  ;;  %v2549_v62 = vadd.f32 %v18698_v5, %v2455_v28 }
 0x29e   : > { %v18898_v36 = vrot.slane %v2856_v29, 7  ;;  %v15416_v43 = vpack.c.bf16 %v2580_v9, %v2580_v9  ;;  %v2578_v31 = vmax.f32 %v2546_v46, 0.0  ;;  %v18902_v1 = vpop.f32.mrb[29].mxu0  ;;  %v2583_v10 = vmax.f32 %v2551_v60, 0.0  ;;  %3244 = vrot.lane.b32.xlu0 %v18873_v63, %s17550_s7  ;;  %v3131_v44 = vld [vmem:[#allocation2 + $0x120] sm:$0xf] }
 0x29f   : > { %v2836_v47 = vsel %vm17827_vm5, %v2828_v30, %v2835_v20  ;;  %v3067_v41 = vsel %vm17845_vm7, %v2837_v22, %v3066_v56  ;;  %v18911_v40 = vpop.f32.mrb[30].mxu0  ;;  %v2878_v54 = vor.u32 %v2876_v55, %v2875_v18  ;;  %v2879_v27 = vrot.slane %v2875_v18, 4  ;;  %v3087_v12 = vld [vmem:[#allocation2 + $0x170] sm:$0x1]  ;;  %v3080_v60 = vld [vmem:[#allocation2 + $0x164] sm:$0x1] }
 0x2a0   : > { %3065 = vst.msk [vmem:[#allocation2 + $0x148] sm:$0xf] %vm199_vm0, %v2836_v47  ;;  %3068 = vst [vmem:[#allocation2 + $0x14c] sm:$0x1] %v3067_v41  ;;  %v2861_v52 = vor.u32 %v2859_v11, %v18898_v36  ;;  %v18917_v30 = vpop.f32.mrb[31].mxu0  ;;  %v2862_v4 = vrot.slane %v18898_v36, 4  ;;  %v15414_v28 = vpack.c.bf16 %v2578_v31, %v2578_v31  ;;  %v15419_v19 = vpack.c.bf16 %v2583_v10, %v2583_v10 }
 0x2a1   : > { %v2881_v15 = vshrl.u32 %v15416_v43, 16  ;;  %v3084_v39 = vsel %vm17834_vm6, %v2878_v54, %v3083_v13  ;;  %v2581_v21 = vmax.f32 %v2549_v62, 0.0  ;;  %v18925_v42 = vcombine.low %v3131_v44, %v18909_v51  ;;  %v18935_v9 = vld [vmem:[#allocation2 + $0x128] ss:$0 sps:$4 sm:$0x11]  }
 0x2a2   : > { %v3077_v37 = vsel %vm17834_vm6, %v2861_v52, %v3076_v2  ;;  %3085 = vst [vmem:[#allocation2 + $0x168] sm:$0xf] %v3084_v39  ;;  %v2884_v57 = vshll.u32 %v15416_v43, 16  ;;  %v2864_v56 = vshrl.u32 %v15414_v28, 16  ;;  %v2907_v7 = vshrl.u32 %v15419_v19, 16  ;;  %3475 = vrot.lane.b32.xlu0 %v18887_v26, %s17550_s7 }
 0x2a3   : > { %3078 = vst [vmem:[#allocation2 + $0x15c] sm:$0xf] %v3077_v37  ;;  %v2883_v50 = vrot.slane %v2881_v15, 7  ;;  %v2867_v46 = vshll.u32 %v15414_v28, 16  ;;  %v15417_v38 = vpack.c.bf16 %v2581_v21, %v2581_v21  ;;  %3250 = vrot.lane.b32.xlu1 %v18925_v42, %s17550_s7  ;;  %v2552_v25 = vadd.f32 %v18864_v23, %v18698_v5  ;;  %v3097_v36 = vld [vmem:[#allocation2 + $0x180] sm:$0xf] }
 0x2a4   : > { %v2550_v17 = vadd.f32 %v18698_v5, %v18875_v0  ;;  %v2866_v29 = vrot.slane %v2864_v56, 7  ;;  %v2909_v11 = vrot.slane %v2907_v7, 7  ;;  %v2910_v49 = vshll.u32 %v15419_v19, 16  ;;  %v3090_v62 = vld [vmem:[#allocation2 + $0x174] sm:$0xf] }
 0x2a5   : > { %v2886_v59 = vor.u32 %v2884_v57, %v2883_v50  ;;  %v2888_v55 = vrot.slane %v2883_v50, 4  ;;  %v2890_v61 = vshrl.u32 %v15417_v38, 16  ;;  %v2584_v20 = vmax.f32 %v2552_v25, 0.0  ;;  %v18952_v52 = vld [vmem:[#allocation2 + $0x118] sm:$0xf] }
 0x2a6   : > { %v2582_v22 = vmax.f32 %v2550_v17, 0.0  ;;  %v2869_v0 = vor.u32 %v2867_v46, %v2866_v29  ;;  %v2871_v18 = vrot.slane %v2866_v29, 4  ;;  %v2912_v2 = vor.u32 %v2910_v49, %v2909_v11  ;;  %3285 = vrot.lane.b32.xlu0 %v18925_v42, %s17549_s30  ;;  %v3129_v50 = vld [vmem:[#allocation2 + $0x114] sm:$0xf] }
 0x2a7   : > { %v2887_v13 = vsel %vm17827_vm5, %v2879_v27, %v2886_v59  ;;  %v3088_v23 = vsel %vm17845_vm7, %v2888_v55, %v3087_v12  ;;  %v2892_v43 = vrot.slane %v2890_v61, 7  ;;  %v2893_v31 = vshll.u32 %v15417_v38, 16  ;;  %3481 = vrot.lane.b32.xlu1 %v18935_v9, %s17550_s7  ;;  %v3101_v12 = vld [vmem:[#allocation2 + $0x188] sm:$0x1] }
 0x2a8   : > { %3086 = vst.msk [vmem:[#allocation2 + $0x16c] sm:$0xf] %vm199_vm0, %v2887_v13  ;;  %3089 = vst [vmem:[#allocation2 + $0x170] sm:$0x1] %v3088_v23  ;;  %v15420_v47 = vpack.c.bf16 %v2584_v20, %v2584_v20  ;;  %v2870_v41 = vsel %vm17827_vm5, %v2862_v4, %v2869_v0  ;;  %v3081_v10 = vsel %vm17845_vm7, %v2871_v18, %v3080_v60  ;;  %v2913_v15 = vrot.slane %v2909_v11, 4 }
 0x2a9   : > { %v15418_v54 = vpack.c.bf16 %v2582_v22, %v2582_v22  ;;  %v2555_v27 = vadd.f32 %v18895_v16, %v18698_v5  ;;  %3079 = vst.msk [vmem:[#allocation2 + $0x160] sm:$0xf] %vm199_vm0, %v2870_v41  ;;  %3082 = vst [vmem:[#allocation2 + $0x164] sm:$0x1] %v3081_v10  ;;  %v3098_v28 = vsel %vm17834_vm6, %v2912_v2, %v3097_v36  ;;  %v2896_v17 = vrot.slane %v2892_v43, 4 }
 0x2aa   : > { %v2895_v19 = vor.u32 %v2893_v31, %v2892_v43  ;;  %v2915_v44 = vshrl.u32 %v15420_v47, 16  ;;  %3099 = vst [vmem:[#allocation2 + $0x180] sm:$0xf] %v3098_v28  ;;  %v2918_v4 = vshll.u32 %v15420_v47, 16  ;;  %v2553_v56 = vadd.f32 %v18698_v5, %v18902_v1  ;;  %3514 = vrot.lane.b32.xlu0 %v18935_v9, %s17549_s30  ;;  %v3094_v1 = vld [vmem:[#allocation2 + $0x17c] sm:$0x1] }
 0x2ab   : > { %v2898_v39 = vshrl.u32 %v15418_v54, 16  ;;  %v2901_v37 = vshll.u32 %v15418_v54, 16  ;;  %v2587_v21 = vmax.f32 %v2555_v27, 0.0  ;;  %v18962_v7 = vcombine.low %v3129_v50, %v18952_v52  ;;  %v18985_v2 = vld [vmem:[#allocation2 + $0x13c] sm:$0xf] }
 0x2ac   : > { %v3091_v16 = vsel %vm17834_vm6, %v2895_v19, %v3090_v62  ;;  %v2917_v57 = vrot.slane %v2915_v44, 7  ;;  %v2556_v38 = vadd.f32 %v18911_v40, %v18698_v5  ;;  %v2554_v25 = vadd.f32 %v18698_v5, %v18917_v30  ;;  %v18976_v30 = vld [vmem:[#allocation2 + $0x11c] ss:$0 sps:$4 sm:$0x11]   ;;  %v3111_v43 = vld [vmem:[#allocation2 + $0x198] sm:$0xf] }
 0x2ad   : > { %3092 = vst [vmem:[#allocation2 + $0x174] sm:$0xf] %v3091_v16  ;;  %v2900_v46 = vrot.slane %v2898_v39, 7  ;;  %v15423_v60 = vpack.c.bf16 %v2587_v21, %v2587_v21  ;;  %v2585_v29 = vmax.f32 %v2553_v56, 0.0  ;;  %3283 = vrot.lane.b32.xlu1 %v18962_v7, %s17549_s30  ;;  %v3135_v62 = vld [vmem:[#allocation2 + $0x138] sm:$0xf] }
 0x2ae   : > { %v2920_v59 = vor.u32 %v2918_v4, %v2917_v57  ;;  %v2922_v55 = vrot.slane %v2917_v57, 4  ;;  %v2588_v5 = vmax.f32 %v2556_v38, 0.0  ;;  %3248 = vrot.lane.b32.xlu0 %v18962_v7, %s17550_s7  ;;  %v2586_v36 = vmax.f32 %v2554_v25, 0.0  ;;  %v3104_v44 = vld [vmem:[#allocation2 + $0x18c] sm:$0xf] }
 0x2af   : > { %v2903_v11 = vor.u32 %v2901_v37, %v2900_v46  ;;  %v2905_v49 = vrot.slane %v2900_v46, 4  ;;  %v2941_v61 = vshrl.u32 %v15423_v60, 16  ;;  %v2944_v20 = vshll.u32 %v15423_v60, 16  ;;  %v3115_v50 = vld [vmem:[#allocation2 + $0x1a0] sm:$0x1] }
 0x2b0   : > { %v2921_v22 = vsel %vm17827_vm5, %v2913_v15, %v2920_v59  ;;  %v3102_v40 = vsel %vm17845_vm7, %v2922_v55, %v3101_v12  ;;  %v15421_v13 = vpack.c.bf16 %v2585_v29, %v2585_v29  ;;  %v15424_v47 = vpack.c.bf16 %v2588_v5, %v2588_v5  ;;  %v18999_v56 = vld [vmem:[#allocation2 + $0x140] ss:$0 sps:$4 sm:$0x11]   ;;  %v3108_v25 = vld [vmem:[#allocation2 + $0x194] sm:$0x1] }
 0x2b1   : > { %3100 = vst.msk [vmem:[#allocation2 + $0x184] sm:$0xf] %vm199_vm0, %v2921_v22  ;;  %3103 = vst [vmem:[#allocation2 + $0x188] sm:$0x1] %v3102_v40  ;;  %v2904_v23 = vsel %vm17827_vm5, %v2896_v17, %v2903_v11  ;;  %v3095_v0 = vsel %vm17845_vm7, %v2905_v49, %v3094_v1  ;;  %v2943_v18 = vrot.slane %v2941_v61, 7  ;;  %3512 = vrot.lane.b32.xlu1 %v18976_v30, %s17549_s30 }
 0x2b2   : > { %3093 = vst.msk [vmem:[#allocation2 + $0x178] sm:$0xf] %vm199_vm0, %v2904_v23  ;;  %3096 = vst [vmem:[#allocation2 + $0x17c] sm:$0x1] %v3095_v0  ;;  %v2924_v31 = vshrl.u32 %v15421_v13, 16  ;;  %v15422_v10 = vpack.c.bf16 %v2586_v36, %v2586_v36  ;;  %v2927_v27 = vshll.u32 %v15421_v13, 16  ;;  %v18991_v28 = vcombine.low %v3135_v62, %v18985_v2  ;;  %3479 = vrot.lane.b32.xlu0 %v18976_v30, %s17550_s7 }
 0x2b3   : > { %v2946_v41 = vor.u32 %v2944_v20, %v2943_v18  ;;  %v2949_v15 = vshrl.u32 %v15424_v47, 16  ;;  %v2952_v21 = vshll.u32 %v15424_v47, 16  ;;  %v2947_v12 = vrot.slane %v2943_v18, 4  ;;  %v19005_v1 = vld [vmem:[#allocation2 + $0x130] sm:$0xf] }
 0x2b4   : > { %v2926_v54 = vrot.slane %v2924_v31, 7  ;;  %v2932_v4 = vshrl.u32 %v15422_v10, 16  ;;  %v2935_v57 = vshll.u32 %v15422_v10, 16  ;;  %v3133_v20 = vld [vmem:[#allocation2 + $0x12c] sm:$0xf] }
 0x2b5   : > { %v3112_v19 = vsel %vm17834_vm6, %v2946_v41, %v3111_v43  ;;  %v2951_v37 = vrot.slane %v2949_v15, 7  ;;  %3254 = vrot.lane.b32.xlu1 %v18991_v28, %s17550_s7  ;;  %v19020_v22 = vcombine.low %v3133_v20, %v19005_v1  ;;  %v19026_v40 = vld [vmem:[#allocation2 + $0x134] ss:$0 sps:$4 sm:$0x11]   ;;  %v3139_v5 = vld [vmem:[#allocation2 + $0x150] sm:$0xf] }
 0x2b6   : > { %3113 = vst [vmem:[#allocation2 + $0x198] sm:$0xf] %v3112_v19  ;;  %v2929_v39 = vor.u32 %v2927_v27, %v2926_v54  ;;  %v2934_v16 = vrot.slane %v2932_v4, 7  ;;  %3289 = vrot.lane.b32.xlu0 %v18991_v28, %s17549_s30  ;;  %v2930_v17 = vrot.slane %v2926_v54, 4  ;;  %v19030_v13 = vld [vmem:[#allocation2 + $0x154] sm:$0xf] }
 0x2b7   : > { %v2954_v60 = vor.u32 %v2952_v21, %v2951_v37  ;;  %v2956_v38 = vrot.slane %v2951_v37, 4  ;;  %v19035_v23 = vcombine.low %v3139_v5, %v19030_v13  ;;  %v19041_v0 = vld [vmem:[#allocation2 + $0x158] ss:$0 sps:$4 sm:$0x11]   ;;  %v19045_v18 = vld [vmem:[#allocation2 + $0x148] sm:$0xf] }
 0x2b8   : > { %v3105_v46 = vsel %vm17834_vm6, %v2929_v39, %v3104_v44  ;;  %v2937_v59 = vor.u32 %v2935_v57, %v2934_v16  ;;  %v2939_v55 = vrot.slane %v2934_v16, 4  ;;  %v3137_v36 = vld [vmem:[#allocation2 + $0x144] sm:$0xf]  ;;  %v19052_v43 = vld [vmem:[%s23693_s1 + $0x90] sm:$0xff]   ;;  %v19066_v41 = vld [vmem:[#allocation2 + $0x16c] sm:$0xf] }
 0x2b9   : > { %3106 = vst [vmem:[#allocation2 + $0x18c] sm:$0xf] %v3105_v46  ;;  %v2955_v29 = vsel %vm17827_vm5, %v2947_v12, %v2954_v60  ;;  %v3116_v11 = vsel %vm17845_vm7, %v2956_v38, %v3115_v50  ;;  %3485 = vrot.lane.b32.xlu1 %v18999_v56, %s17550_s7  ;;  %v19055_v31 = vcombine.low %v3137_v36, %v19045_v18  ;;  %v19062_v47 = vld [vmem:[#allocation2 + $0x14c] ss:$0 sps:$4 sm:$0x11]   ;;  %v19130_v60 = vpop.permute.xlu1 %3307 }
 0x2ba   : > { %3114 = vst.msk [vmem:[#allocation2 + $0x19c] sm:$0xf] %vm199_vm0, %v2955_v29  ;;  %3117 = vst [vmem:[#allocation2 + $0x1a0] sm:$0x1] %v3116_v11  ;;  %v2938_v49 = vsel %vm17827_vm5, %v2930_v17, %v2937_v59  ;;  %v3109_v61 = vsel %vm17845_vm7, %v2939_v55, %v3108_v25  ;;  %3518 = vrot.lane.b32.xlu0 %v18999_v56, %s17549_s30  ;;  %16125 = vmatprep.subr.bf16.mxu1 %v19052_v43  ;;  %v3143_v10 = vld [vmem:[#allocation2 + $0x168] sm:$0xf] }
 0x2bb   : > { %3107 = vst.msk [vmem:[#allocation2 + $0x190] sm:$0xf] %vm199_vm0, %v2938_v49  ;;  %3110 = vst [vmem:[#allocation2 + $0x194] sm:$0x1] %v3109_v61  ;;  %v19071_v62 = vcombine.low %v3143_v10, %v19066_v41  ;;  %v19081_v27 = vld [vmem:[#allocation2 + $0x160] sm:$0xf] }
 0x2bc   : > { %v19077_v54 = vld [vmem:[#allocation2 + $0x170] ss:$0 sps:$4 sm:$0x11]   ;;  %v3141_v15 = vld [vmem:[#allocation2 + $0x15c] sm:$0xf] }
 0x2bd   : > { %3287 = vrot.lane.b32.xlu1 %v19020_v22, %s17549_s30  ;;  %v19086_v19 = vcombine.low %v3141_v15, %v19081_v27  ;;  %v19092_v44 = vld [vmem:[#allocation2 + $0x164] ss:$0 sps:$4 sm:$0x11]   ;;  %v3147_v39 = vld [vmem:[#allocation2 + $0x180] sm:$0xf] }
 0x2be   : > { %3252 = vrot.lane.b32.xlu0 %v19020_v22, %s17550_s7  ;;  %v19096_v4 = vld [vmem:[#allocation2 + $0x184] sm:$0xf]  ;;  %v19107_v21 = vld [vmem:[#allocation2 + $0x188] ss:$0 sps:$4 sm:$0x11]  }
 0x2bf   : > { %v19101_v37 = vcombine.low %v3147_v39, %v19096_v4  ;;  %23764 = vst [vmem:[#allocation6_spill] sm:$0xff] %v19107_v21  ;;  %v19111_v50 = vld [vmem:[#allocation2 + $0x178] sm:$0xf]  ;;  %v3145_v16 = vld [vmem:[#allocation2 + $0x174] sm:$0xf] }
 0x2c0   : > { %v19116_v57 = vcombine.low %v3145_v16, %v19111_v50  ;;  %v19122_v12 = vld [vmem:[#allocation2 + $0x17c] ss:$0 sps:$4 sm:$0x11]   ;;  %v3151_v38 = vld [vmem:[#allocation2 + $0x198] sm:$0xf] }
 0x2c1   : > { %3516 = vrot.lane.b32.xlu1 %v19026_v40, %s17549_s30  ;;  %v19126_v46 = vld [vmem:[#allocation2 + $0x19c] sm:$0xf]  ;;  %v3149_v59 = vld [vmem:[#allocation2 + $0x18c] sm:$0xf]  ;;  %v3119_v49 = vld [vmem:[#allocation2 + $0xd8] sm:$0xf] }
 0x2c2   : > { %3483 = vrot.lane.b32.xlu0 %v19026_v40, %s17550_s7  ;;  %v14501_v25 = vcombine.low %v3151_v38, %v19126_v46  ;;  %v19135_v17 = vld [vmem:[#allocation2 + $0x190] sm:$0xf]  ;;  %v19144_v61 = vld [vmem:[#allocation2 + $0x194] ss:$0 sps:$4 sm:$0x11]  }
 0x2c3   : > { %v19139_v55 = vcombine.low %v3149_v59, %v19135_v17  ;;  %23765 = vst [vmem:[#allocation7_spill] sm:$0xff] %v19144_v61  ;;  %v19148_v5 = vld [vmem:[#allocation2 + $0xdc] sm:$0xf]  ;;  %v17225_v15 = vld [vmem:[#allocation2 + $0x1a0] ss:$0 sps:$4 sm:$0x11]  }
 0x2c4   : > { %23766 = vst [vmem:[#allocation8_spill] sm:$0xff] %v19148_v5  ;;  %v14485_v10 = vcombine.low %v3119_v49, %v19148_v5  ;;  %v17227_v39 = vld [vmem:[#allocation2 + $0x1ac] ss:$0 sps:$4 sm:$0x11]   ;;  %v19166_v5 = vcombine.low %v4266_v8, %v18802_v14 }
 0x2c5   : > { %3258 = vrot.lane.b32.xlu1 %v19035_v23, %s17550_s7 }
 0x2c6   : > { %3293 = vrot.lane.b32.xlu0 %v19035_v23, %s17549_s30 }
 0x2c9   : > { %3489 = vrot.lane.b32.xlu1 %v19041_v0, %s17550_s7 }
 0x2ca   : > { %3522 = vrot.lane.b32.xlu0 %v19041_v0, %s17549_s30 }
 0x2cd   : > { %3291 = vrot.lane.b32.xlu1 %v19055_v31, %s17549_s30 }
 0x2ce   : > { %3256 = vrot.lane.b32.xlu0 %v19055_v31, %s17550_s7 }
 0x2d1   : > { %3520 = vrot.lane.b32.xlu1 %v19062_v47, %s17549_s30 }
 0x2d2   : > { %3487 = vrot.lane.b32.xlu0 %v19062_v47, %s17550_s7 }
 0x2d5   : > { %3262 = vrot.lane.b32.xlu1 %v19071_v62, %s17550_s7 }
 0x2d6   : > { %3297 = vrot.lane.b32.xlu0 %v19071_v62, %s17549_s30 }
 0x2d9   : > { %3493 = vrot.lane.b32.xlu1 %v19077_v54, %s17550_s7 }
 0x2da   : > { %3526 = vrot.lane.b32.xlu0 %v19077_v54, %s17549_s30 }
 0x2dd   : > { %3295 = vrot.lane.b32.xlu1 %v19086_v19, %s17549_s30 }
 0x2de   : > { %3260 = vrot.lane.b32.xlu0 %v19086_v19, %s17550_s7 }
 0x2e1   : > { %3524 = vrot.lane.b32.xlu1 %v19092_v44, %s17549_s30 }
 0x2e2   : > { %3491 = vrot.lane.b32.xlu0 %v19092_v44, %s17550_s7 }
 0x2e5   : > { %3266 = vrot.lane.b32.xlu1 %v19101_v37, %s17550_s7 }
 0x2e6   : > { %3301 = vrot.lane.b32.xlu0 %v19101_v37, %s17549_s30 }
 0x2e9   : > { %3497 = vrot.lane.b32.xlu1 %v19107_v21, %s17550_s7 }
 0x2ea   : > { %3530 = vrot.lane.b32.xlu0 %v19107_v21, %s17549_s30  ;;  %v4267_v21 = vld [vmem:[#allocation2 + $0xf0] sm:$0xe] }
 0x2ed   : > { %3299 = vrot.lane.b32.xlu1 %v19116_v57, %s17549_s30 }
 0x2ee   : > { %3264 = vrot.lane.b32.xlu0 %v19116_v57, %s17550_s7 }
 0x2f1   : > { %3528 = vrot.lane.b32.xlu1 %v19122_v12, %s17549_s30 }
 0x2f2   : > { %3495 = vrot.lane.b32.xlu0 %v19122_v12, %s17550_s7 }
 0x2f5   : > { %3270 = vrot.lane.b32.xlu1 %v14501_v25, %s17550_s7 }
 0x2f6   : > { %3305 = vrot.lane.b32.xlu0 %v14501_v25, %s17549_s30  ;;  %v17231_v25 = vld [vmem:[#allocation2 + $0xe0] ss:$0 sps:$4 sm:$0x11]  }
 0x2f7   : > { %v3243_v29 = vpop.permute.xlu1 %3242  ;;  %v3278_v11 = vpop.permute.xlu0 %3277 }
 0x2f9   : > { %3303 = vrot.lane.b32.xlu1 %v19139_v55, %s17549_s30 }
 0x2fa   : > { %3268 = vrot.lane.b32.xlu0 %v19139_v55, %s17550_s7 }
 0x2fb   : > { %v3507_v20 = vpop.permute.xlu0 %3506  ;;  %v3474_v36 = vpop.permute.xlu1 %3473 }
 0x2fd   : > { %3532 = vrot.lane.b32.xlu1 %v19144_v61, %s17549_s30 }
 0x2fe   : > { %3499 = vrot.lane.b32.xlu0 %v19144_v61, %s17550_s7 }
 0x300   : > { %v3241_v16 = vpop.permute.xlu0 %3240  ;;  %v19157_v59 = vpop.permute.xlu1 %3246 }
 0x301   : > { %3501 = vrot.lane.b32.xlu1 %v17225_v15, %s17550_s7  ;;  %v3311_v38 = vsel %vm972_vm8, %v14485_v10, %v3241_v16  ;;  %v19170_v16 = vcombine.low %v4267_v21, %v18744_v34  ;;  %v3314_v21 = vsel %vm972_vm8, %v18817_v32, %v3243_v29  ;;  %v4269_v29 = vld [vmem:[#allocation2 + $0x108] sm:$0xe] }
 0x302   : > { %v19160_v24 = vsel %vm1021_vm9, %v3311_v38, %v3278_v11  ;;  %3534 = vrot.lane.b32.xlu0 %v17225_v15, %s17549_s30 }
 0x303   : > { %v3620_v49 = vshll.u32 %v19160_v24, 16 }
 0x304   : > { %v3472_v6 = vpop.permute.xlu0 %3471 }
 0x305   : > { %3536 = vrot.lane.b32.xlu1 %v17227_v39, %s17549_s30  ;;  %v3622_v61 = vrot.slane %v3620_v49, 1  ;;  %v3540_v10 = vsel %vm972_vm8, %v17231_v25, %v3472_v6  ;;  %v3618_v39 = vshrl.u32 %v19160_v24, 16  ;;  %v4268_v6 = vld [vmem:[#allocation2 + $0xfc] sm:$0xe] }
 0x306   : > { %v19172_v11 = vpop.permute.xlu1 %3477  ;;  %v19175_v15 = vsel %vm1021_vm9, %v3540_v10, %v3507_v20  ;;  %4334 = vrot.lane.b32.xlu0 %v19166_v5, %s17550_s7  ;;  %v19186_v20 = vcombine.low %v4268_v6, %v18857_v53  ;;  %v3543_v53 = vsel %vm972_vm8, %v18833_v35, %v3474_v36  ;;  %v4270_v35 = vld [vmem:[#allocation2 + $0x114] sm:$0xe] }
 0x307   : > { %v3624_v8 = vshll.u32 %v19175_v15, 16  ;;  %v3623_v38 = vor.u32 %v3622_v61, %v3618_v39 }
 0x308   : > { %v3282_v14 = vpop.permute.xlu0 %3281 }
 0x309   : > { %4336 = vrot.lane.b32.xlu1 %v19170_v16, %s17550_s7  ;;  %v3626_v34 = vrot.slane %v3624_v8, 1  ;;  %v19201_v8 = vcombine.low %v4269_v29, %v18810_v45 }
 0x30a   : > { %4369 = vrot.lane.b32.xlu0 %v19170_v16, %s17549_s30 }
 0x30b   : > { %v3280_v25 = vpop.permute.xlu1 %3279  ;;  %v3627_v10 = vsel %vm1282_vm10, %v3623_v38, %v3626_v34 }
 0x30c   : > { %v19191_v49 = vsel %vm1021_vm9, %v3314_v21, %v3280_v25  ;;  %16093 = vmatprep.mubr.msk.bf16.mxu1 %vm1492_vm11, %v3627_v10  ;;  %v3511_v32 = vpop.permute.xlu0 %3510 }
 0x30d   : > { %4371 = vrot.lane.b32.xlu1 %v19186_v20, %s17549_s30  ;;  %v3630_v61 = vshll.u32 %v19191_v49, 16  ;;  %v3628_v34 = vshrl.u32 %v19191_v49, 16 }
 0x30e   : > { %4338 = vrot.lane.b32.xlu0 %v19186_v20, %s17550_s7 }
 0x30f   : > { %v3632_v39 = vrot.slane %v3630_v61, 1  ;;  %v3509_v6 = vpop.permute.xlu1 %3508  ;;  %v19215_v61 = vcombine.low %v4270_v35, %v18952_v52 }
 0x310   : > { %v19206_v38 = vsel %vm1021_vm9, %v3543_v53, %v3509_v6  ;;  %v3245_v25 = vpop.permute.xlu0 %3244  ;;  %v17246_v6 = vld [vmem:[%s23693_s1 + $0x98] sm:$0xff]  }
 0x311   : > { %4340 = vrot.lane.b32.xlu1 %v19201_v8, %s17550_s7  ;;  %v3634_v21 = vshll.u32 %v19206_v38, 16  ;;  %v3317_v45 = vsel %vm972_vm8, %v18764_v3, %v3245_v25  ;;  %v3633_v36 = vor.u32 %v3632_v39, %v3628_v34 }
 0x312   : > { %v19218_v29 = vsel %vm1021_vm9, %v3317_v45, %v3282_v14  ;;  %4373 = vrot.lane.b32.xlu0 %v19201_v8, %s17549_s30  ;;  %v4271_v14 = vld [vmem:[#allocation2 + $0x120] sm:$0xe] }
 0x313   : > { %v3636_v10 = vrot.slane %v3634_v21, 1  ;;  %v3640_v53 = vshll.u32 %v19218_v29, 16  ;;  %v19235_v25 = vcombine.low %v4271_v14, %v18909_v51  ;;  %v3638_v45 = vshrl.u32 %v19218_v29, 16  ;;  %v17248_v14 = vld [vmem:[%s23693_s1 + $0xa8] sm:$0xff]  }
 0x314   : > { %v3476_v39 = vpop.permute.xlu0 %3475 }
 0x315   : > { %4375 = vrot.lane.b32.xlu1 %v19215_v61, %s17549_s30  ;;  %v19228_v3 = vpop.permute.xlu1 %3250  ;;  %v3637_v52 = vsel %vm1282_vm10, %v3633_v36, %v3636_v10  ;;  %v3642_v34 = vrot.slane %v3640_v53, 1  ;;  %v3546_v21 = vsel %vm972_vm8, %v18775_v48, %v3476_v39  ;;  %v17247_v48 = vld [vmem:[%s23693_s1 + $0xa0] sm:$0xff]   ;;  %v4272_v53 = vld [vmem:[#allocation2 + $0x12c] sm:$0xe] }
 0x316   : > { %16094 = vmatmul.mubr.msk.bf16.vlgmr.msra.gmra.mrb[0].mxu1 %vm1492_vm11, %v3637_v52  ;;  %v19238_v35 = vsel %vm1021_vm9, %v3546_v21, %v3511_v32  ;;  %4342 = vrot.lane.b32.xlu0 %v19215_v61, %s17550_s7  ;;  %v4273_v21 = vld [vmem:[#allocation2 + $0x138] sm:$0xe] }
 0x317   : > { %16126 = vmatpush3.bf16.msra.mxu1 %v19052_v43  ;;  %v3644_v36 = vshll.u32 %v19238_v35, 16  ;;  %v3643_v52 = vor.u32 %v3642_v34, %v3638_v45  ;;  %v19253_v43 = vcombine.low %v4272_v53, %v19005_v1  ;;  %v3320_v1 = vsel %vm972_vm8, %v18873_v63, %v19157_v59 }
 0x318   : > { %16127 = vmatprep.subr.bf16.mxu1 %v17246_v6  ;;  %v3286_v32 = vpop.permute.xlu0 %3285 }
 0x319   : > { %4344 = vrot.lane.b32.xlu1 %v19235_v25, %s17550_s7  ;;  %v19250_v51 = vpop.permute.xlu1 %3481  ;;  %v3646_v10 = vrot.slane %v3644_v36, 1  ;;  %23767 = vst [vmem:[#allocation9_spill] sm:$0xff] %v19253_v43 }
 0x31a   : > { %4377 = vrot.lane.b32.xlu0 %v19235_v25, %s17549_s30 }
 0x31b   : > { %16128 = vmatpush3.bf16.msra.mxu1 %v17246_v6  ;;  %v3647_v39 = vsel %vm1282_vm10, %v3643_v52, %v3646_v10  ;;  %v19268_v6 = vcombine.low %v4273_v21, %v18985_v2  ;;  %v17249_v10 = vld [vmem:[%s23693_s1 + $0xb0] sm:$0xff]   ;;  %v4274_v2 = vld [vmem:[#allocation2 + $0x144] sm:$0xe] }
 0x31c   : > { %16129 = vmatprep.subr.bf16.mxu1 %v17247_v48  ;;  %16097 = vmatprep.mubr.msk.bf16.mxu1 %vm1492_vm11, %v3647_v39  ;;  %v3515_v34 = vpop.permute.xlu0 %3514  ;;  %v19287_v21 = vcombine.low %v4274_v2, %v19045_v18 }
 0x31d   : > { %4379 = vrot.lane.b32.xlu1 %v19253_v43, %s17549_s30  ;;  %23768 = vst [vmem:[#allocation10_spill] sm:$0xff] %v19268_v6 }
 0x31e   : > { %4346 = vrot.lane.b32.xlu0 %v19253_v43, %s17550_s7 }
 0x31f   : > { %v3284_v45 = vpop.permute.xlu1 %3283  ;;  %16130 = vmatpush3.bf16.msra.mxu1 %v17247_v48  ;;  %v3549_v48 = vsel %vm972_vm8, %v18887_v26, %v19172_v11  ;;  %v17251_v26 = vld [vmem:[%s23693_s1 + $0xb8] sm:$0xff]  }
 0x320   : > { %v19273_v36 = vsel %vm1021_vm9, %v3320_v1, %v3284_v45  ;;  %16131 = vmatprep.subr.bf16.mxu1 %v17248_v14  ;;  %v3249_v63 = vpop.permute.xlu0 %3248 }
 0x321   : > { %v3650_v53 = vshll.u32 %v19273_v36, 16  ;;  %4348 = vrot.lane.b32.xlu1 %v19268_v6, %s17550_s7  ;;  %v3323_v59 = vsel %vm972_vm8, %v18827_v33, %v3249_v63  ;;  %v3648_v18 = vshrl.u32 %v19273_v36, 16 }
 0x322   : > { %v19290_v1 = vsel %vm1021_vm9, %v3323_v59, %v3286_v32  ;;  %4381 = vrot.lane.b32.xlu0 %v19268_v6, %s17549_s30 }
 0x323   : > { %v3652_v52 = vrot.slane %v3650_v53, 1  ;;  %v3513_v39 = vpop.permute.xlu1 %3512  ;;  %16132 = vmatpush3.bf16.msra.mxu1 %v17248_v14  ;;  %v3660_v33 = vshll.u32 %v19290_v1, 16  ;;  %v4275_v14 = vld [vmem:[#allocation2 + $0x150] sm:$0xe] }
 0x324   : > { %v19295_v45 = vsel %vm1021_vm9, %v3549_v48, %v3513_v39  ;;  %16133 = vmatprep.subr.bf16.mxu1 %v17249_v10  ;;  %v3480_v32 = vpop.permute.xlu0 %3479  ;;  %v19310_v39 = vcombine.low %v4275_v14, %v19030_v13 }
 0x325   : > { %v3654_v11 = vshll.u32 %v19295_v45, 16  ;;  %4383 = vrot.lane.b32.xlu1 %v19287_v21, %s17549_s30  ;;  %v3662_v53 = vrot.slane %v3660_v33, 1  ;;  %v3552_v63 = vsel %vm972_vm8, %v18849_v58, %v3480_v32  ;;  %v3653_v2 = vor.u32 %v3652_v52, %v3648_v18  ;;  %v19322_v58 = vld [vmem:[%s23693_s1 + $0xf0] sm:$0xff]  }
 0x326   : > { %v19313_v6 = vsel %vm1021_vm9, %v3552_v63, %v3515_v34  ;;  %4350 = vrot.lane.b32.xlu0 %v19287_v21, %s17550_s7  ;;  %v3658_v33 = vshrl.u32 %v19290_v1, 16 }
 0x327   : > { %v3656_v59 = vrot.slane %v3654_v11, 1  ;;  %v19307_v48 = vpop.permute.xlu1 %3254  ;;  %16134 = vmatpush3.bf16.msra.mxu1 %v17249_v10  ;;  %v3664_v43 = vshll.u32 %v19313_v6, 16  ;;  %v4276_v10 = vld [vmem:[#allocation2 + $0x15c] sm:$0xe] }
 0x328   : > { %16135 = vmatprep.subr.bf16.mxu1 %v17251_v26  ;;  %v3290_v34 = vpop.permute.xlu0 %3289  ;;  %v3663_v18 = vor.u32 %v3662_v53, %v3658_v33  ;;  %v19331_v32 = vcombine.low %v4276_v10, %v19081_v27  ;;  %v4277_v53 = vld [vmem:[#allocation2 + $0x168] sm:$0xe]  ;;  %v3326_v27 = vsel %vm972_vm8, %v18962_v7, %v19228_v3 }
 0x329   : > { %4352 = vrot.lane.b32.xlu1 %v19310_v39, %s17550_s7  ;;  %v3657_v13 = vsel %vm1282_vm10, %v3653_v2, %v3656_v59  ;;  %v3666_v52 = vrot.slane %v3664_v43, 1  ;;  %v19344_v2 = vcombine.low %v4277_v53, %v19066_v41  ;;  %v3555_v41 = vsel %vm972_vm8, %v18976_v30, %v19250_v51 }
 0x32a   : > { %16098 = vmatmul.mubr.msk.bf16.gmra.mrb[4].mxu1 %vm1492_vm11, %v3657_v13  ;;  %4385 = vrot.lane.b32.xlu0 %v19310_v39, %s17549_s30  ;;  %v4278_v13 = vld [vmem:[#allocation2 + $0x174] sm:$0xe] }
 0x32b   : > { %v19328_v11 = vpop.permute.xlu1 %3485  ;;  %16136 = vmatpush3.bf16.msra.mxu1 %v17251_v26  ;;  %v3667_v14 = vsel %vm1282_vm10, %v3663_v18, %v3666_v52  ;;  %v19360_v10 = vcombine.low %v4278_v13, %v19111_v50 }
 0x32c   : > { %16169 = vmatprep.subr.bf16.mxu1 %v19322_v58  ;;  %16101 = vmatprep.mubr.msk.bf16.mxu1 %vm1492_vm11, %v3667_v14  ;;  %v3519_v43 = vpop.permute.xlu0 %3518 }
 0x32d   : > { %4387 = vrot.lane.b32.xlu1 %v19331_v32, %s17549_s30 }
 0x32e   : > { %4354 = vrot.lane.b32.xlu0 %v19331_v32, %s17550_s7 }
 0x32f   : > { %v3288_v63 = vpop.permute.xlu1 %3287 }
 0x330   : > { %v19349_v26 = vsel %vm1021_vm9, %v3326_v27, %v3288_v63  ;;  %v3253_v33 = vpop.permute.xlu0 %3252  ;;  %v4279_v27 = vld [vmem:[#allocation2 + $0x180] sm:$0xe] }
 0x331   : > { %v3670_v59 = vshll.u32 %v19349_v26, 16  ;;  %4356 = vrot.lane.b32.xlu1 %v19344_v2, %s17550_s7  ;;  %v3329_v7 = vsel %vm972_vm8, %v18925_v42, %v3253_v33  ;;  %v3668_v53 = vshrl.u32 %v19349_v26, 16  ;;  %v19378_v13 = vcombine.low %v4279_v27, %v19096_v4 }
 0x332   : > { %v19363_v18 = vsel %vm1021_vm9, %v3329_v7, %v3290_v34  ;;  %4389 = vrot.lane.b32.xlu0 %v19344_v2, %s17549_s30 }
 0x333   : > { %v3672_v3 = vrot.slane %v3670_v59, 1  ;;  %v3517_v52 = vpop.permute.xlu1 %3516  ;;  %v3680_v42 = vshll.u32 %v19363_v18, 16 }
 0x334   : > { %v19368_v14 = vsel %vm1021_vm9, %v3555_v41, %v3517_v52  ;;  %v3484_v50 = vpop.permute.xlu0 %3483  ;;  %v3678_v41 = vshrl.u32 %v19363_v18, 16 }
 0x335   : > { %v3674_v30 = vshll.u32 %v19368_v14, 16  ;;  %4391 = vrot.lane.b32.xlu1 %v19360_v10, %s17549_s30  ;;  %v3682_v51 = vrot.slane %v3680_v42, 1  ;;  %v3558_v34 = vsel %vm972_vm8, %v18935_v9, %v3484_v50  ;;  %v3673_v63 = vor.u32 %v3672_v3, %v3668_v53  ;;  %v4280_v42 = vld [vmem:[#allocation2 + $0x18c] sm:$0xe] }
 0x336   : > { %v19381_v7 = vsel %vm1021_vm9, %v3558_v34, %v3519_v43  ;;  %4358 = vrot.lane.b32.xlu0 %v19360_v10, %s17550_s7  ;;  %v4282_v34 = vld [vmem:[#allocation2 + $0x1a4] sm:$0xe] }
 0x337   : > { %v3676_v59 = vrot.slane %v3674_v30, 1  ;;  %v3259_v33 = vpop.permute.xlu1 %3258  ;;  %v3684_v52 = vshll.u32 %v19381_v7, 16  ;;  %v3683_v53 = vor.u32 %v3682_v51, %v3678_v41  ;;  %v19392_v30 = vcombine.low %v4280_v42, %v19135_v17 }
 0x338   : > { %v3294_v3 = vpop.permute.xlu0 %3293  ;;  %v3332_v51 = vsel %vm972_vm8, %v19020_v22, %v19307_v48  ;;  %v3561_v22 = vsel %vm972_vm8, %v19026_v40, %v19328_v11 }
 0x339   : > { %4360 = vrot.lane.b32.xlu1 %v19378_v13, %s17550_s7  ;;  %v3677_v9 = vsel %vm1282_vm10, %v3673_v63, %v3676_v59  ;;  %v3686_v4 = vrot.slane %v3684_v52, 1  ;;  %23769 = vst [vmem:[#allocation11_spill] sm:$0xff] %v19392_v30  ;;  %v4281_v63 = vld [vmem:[#allocation2 + $0x198] sm:$0xe]  ;;  %v17535_v52 = vld [vmem:[#allocation2 + $0x1a8] sm:$0xf] }
 0x33a   : > { %16102 = vmatmul.mubr.msk.bf16.gmra.mrb[8].mxu1 %vm1492_vm11, %v3677_v9  ;;  %4393 = vrot.lane.b32.xlu0 %v19378_v13, %s17549_s30  ;;  %v14605_v17 = vcombine.low %v4281_v63, %v19126_v46  ;;  %v14606_v9 = vcombine.low %v4282_v34, %v17535_v52 }
 0x33b   : > { %v3490_v43 = vpop.permute.xlu1 %3489  ;;  %v3687_v50 = vsel %vm1282_vm10, %v3683_v53, %v3686_v4 }
 0x33c   : > { %16105 = vmatprep.mubr.msk.bf16.mxu1 %vm1492_vm11, %v3687_v50  ;;  %v3523_v27 = vpop.permute.xlu0 %3522 }
 0x33d   : > { %4395 = vrot.lane.b32.xlu1 %v19392_v30, %s17549_s30 }
 0x33e   : > { %4362 = vrot.lane.b32.xlu0 %v19392_v30, %s17550_s7 }
 0x33f   : > { %v3292_v59 = vpop.permute.xlu1 %3291 }
 0x340   : > { %v19407_v41 = vsel %vm1021_vm9, %v3332_v51, %v3292_v59  ;;  %v3257_v42 = vpop.permute.xlu0 %3256 }
 0x341   : > { %v3690_v4 = vshll.u32 %v19407_v41, 16  ;;  %4364 = vrot.lane.b32.xlu1 %v14605_v17, %s17550_s7  ;;  %v3335_v53 = vsel %vm972_vm8, %v18991_v28, %v3257_v42  ;;  %v3688_v51 = vshrl.u32 %v19407_v41, 16 }
 0x342   : > { %v19417_v50 = vsel %vm1021_vm9, %v3335_v53, %v3294_v3  ;;  %4397 = vrot.lane.b32.xlu0 %v14605_v17, %s17549_s30 }
 0x343   : > { %v3692_v46 = vrot.slane %v3690_v4, 1  ;;  %v3521_v48 = vpop.permute.xlu1 %3520  ;;  %v3700_v63 = vshll.u32 %v19417_v50, 16  ;;  %v3698_v42 = vshrl.u32 %v19417_v50, 16 }
 0x344   : > { %v19421_v34 = vsel %vm1021_vm9, %v3561_v22, %v3521_v48  ;;  %v3488_v59 = vpop.permute.xlu0 %3487 }
 0x345   : > { %v3694_v28 = vshll.u32 %v19421_v34, 16  ;;  %4399 = vrot.lane.b32.xlu1 %v14606_v9, %s17549_s30  ;;  %v3702_v40 = vrot.slane %v3700_v63, 1  ;;  %v3564_v11 = vsel %vm972_vm8, %v18999_v56, %v3488_v59  ;;  %v3693_v3 = vor.u32 %v3692_v46, %v3688_v51 }
 0x346   : > { %v19430_v17 = vsel %vm1021_vm9, %v3564_v11, %v3523_v27  ;;  %v3338_v27 = vsel %vm972_vm8, %v19055_v31, %v3259_v33 }
 0x347   : > { %v3696_v52 = vrot.slane %v3694_v28, 1  ;;  %v3263_v4 = vpop.permute.xlu1 %3262  ;;  %v3704_v53 = vshll.u32 %v19430_v17, 16  ;;  %v3703_v63 = vor.u32 %v3702_v40, %v3698_v42  ;;  %v3567_v40 = vsel %vm972_vm8, %v19062_v47, %v3490_v43 }
 0x348   : > { %v3298_v48 = vpop.permute.xlu0 %3297 }
 0x349   : > { %v3697_v22 = vsel %vm1282_vm10, %v3693_v3, %v3696_v52  ;;  %v3706_v9 = vrot.slane %v3704_v53, 1 }
 0x34a   : > { %16106 = vmatmul.mubr.msk.bf16.gmra.mrb[12].mxu1 %vm1492_vm11, %v3697_v22 }
 0x34b   : > { %v3494_v30 = vpop.permute.xlu1 %3493  ;;  %v3707_v56 = vsel %vm1282_vm10, %v3703_v63, %v3706_v9 }
 0x34c   : > { %16109 = vmatprep.mubr.msk.bf16.mxu1 %vm1492_vm11, %v3707_v56  ;;  %v3527_v46 = vpop.permute.xlu0 %3526 }
 0x34f   : > { %v3296_v51 = vpop.permute.xlu1 %3295 }
 0x350   : > { %v19441_v28 = vsel %vm1021_vm9, %v3338_v27, %v3296_v51  ;;  %v3261_v11 = vpop.permute.xlu0 %3260 }
 0x351   : > { %v3710_v59 = vshll.u32 %v19441_v28, 16  ;;  %v3341_v3 = vsel %vm972_vm8, %v19035_v23, %v3261_v11  ;;  %v3708_v22 = vshrl.u32 %v19441_v28, 16 }
 0x352   : > { %v19449_v53 = vsel %vm1021_vm9, %v3341_v3, %v3298_v48 }
 0x353   : > { %v3712_v52 = vrot.slane %v3710_v59, 1  ;;  %v3525_v42 = vpop.permute.xlu1 %3524  ;;  %v3720_v33 = vshll.u32 %v19449_v53, 16  ;;  %v3718_v51 = vshrl.u32 %v19449_v53, 16 }
 0x354   : > { %v19452_v31 = vsel %vm1021_vm9, %v3567_v40, %v3525_v42  ;;  %v3492_v63 = vpop.permute.xlu0 %3491 }
 0x355   : > { %v3714_v9 = vshll.u32 %v19452_v31, 16  ;;  %v3722_v56 = vrot.slane %v3720_v33, 1  ;;  %v3570_v23 = vsel %vm972_vm8, %v19041_v0, %v3492_v63  ;;  %v3713_v47 = vor.u32 %v3712_v52, %v3708_v22 }
 0x356   : > { %v19460_v48 = vsel %vm1021_vm9, %v3570_v23, %v3527_v46  ;;  %v3344_v46 = vsel %vm972_vm8, %v19086_v19, %v3263_v4 }
 0x357   : > { %v3716_v43 = vrot.slane %v3714_v9, 1  ;;  %v3267_v27 = vpop.permute.xlu1 %3266  ;;  %v3724_v59 = vshll.u32 %v19460_v48, 16  ;;  %v3723_v42 = vor.u32 %v3722_v56, %v3718_v51  ;;  %v3573_v56 = vsel %vm972_vm8, %v19092_v44, %v3494_v30 }
 0x358   : > { %v3302_v3 = vpop.permute.xlu0 %3301 }
 0x359   : > { %v3717_v11 = vsel %vm1282_vm10, %v3713_v47, %v3716_v43  ;;  %v3726_v40 = vrot.slane %v3724_v59, 1 }
 0x35a   : > { %16110 = vmatmul.mubr.msk.bf16.gmra.mrb[16].mxu1 %vm1492_vm11, %v3717_v11 }
 0x35b   : > { %v3498_v33 = vpop.permute.xlu1 %3497  ;;  %v3727_v0 = vsel %vm1282_vm10, %v3723_v42, %v3726_v40 }
 0x35c   : > { %16113 = vmatprep.mubr.msk.bf16.mxu1 %vm1492_vm11, %v3727_v0  ;;  %v3531_v52 = vpop.permute.xlu0 %3530 }
 0x35f   : > { %v3300_v22 = vpop.permute.xlu1 %3299 }
 0x360   : > { %v19471_v9 = vsel %vm1021_vm9, %v3344_v46, %v3300_v22  ;;  %v3265_v23 = vpop.permute.xlu0 %3264 }
 0x361   : > { %v3730_v63 = vshll.u32 %v19471_v9, 16  ;;  %v3347_v47 = vsel %vm972_vm8, %v19071_v62, %v3265_v23  ;;  %v3728_v11 = vshrl.u32 %v19471_v9, 16 }
 0x362   : > { %v19479_v59 = vsel %vm1021_vm9, %v3347_v47, %v3302_v3 }
 0x363   : > { %v3732_v43 = vrot.slane %v3730_v63, 1  ;;  %v3529_v51 = vpop.permute.xlu1 %3528  ;;  %v3740_v4 = vshll.u32 %v19479_v59, 16  ;;  %v3738_v22 = vshrl.u32 %v19479_v59, 16 }
 0x364   : > { %v19482_v19 = vsel %vm1021_vm9, %v3573_v56, %v3529_v51  ;;  %v3496_v42 = vpop.permute.xlu0 %3495 }
 0x365   : > { %v3734_v40 = vshll.u32 %v19482_v19, 16  ;;  %v3742_v0 = vrot.slane %v3740_v4, 1  ;;  %v3576_v62 = vsel %vm972_vm8, %v19077_v54, %v3496_v42  ;;  %v3733_v44 = vor.u32 %v3732_v43, %v3728_v11 }
 0x366   : > { %v19490_v3 = vsel %vm1021_vm9, %v3576_v62, %v3531_v52  ;;  %v3350_v54 = vsel %vm972_vm8, %v19116_v57, %v3267_v27  ;;  %v3579_v57 = vsel %vm972_vm8, %v19122_v12, %v3498_v33 }
 0x367   : > { %v3736_v30 = vrot.slane %v3734_v40, 1  ;;  %v3271_v46 = vpop.permute.xlu1 %3270  ;;  %v3744_v63 = vshll.u32 %v19490_v3, 16  ;;  %v3743_v51 = vor.u32 %v3742_v0, %v3738_v22 }
 0x368   : > { %v3306_v47 = vpop.permute.xlu0 %3305  ;;  %v3356_v11 = vsel %vm972_vm8, %v19139_v55, %v3271_v46 }
 0x369   : > { %v3737_v23 = vsel %vm1282_vm10, %v3733_v44, %v3736_v30  ;;  %v3746_v56 = vrot.slane %v3744_v63, 1  ;;  %v19515_v30 = vsel %vm1021_vm9, %v3356_v11, %v19130_v60  ;;  %v23770_v60 = vld [vmem:[#allocation6_spill] sm:$0xff] }
 0x36a   : > { %16114 = vmatmul.mubr.msk.bf16.gmra.mrb[20].mxu1 %vm1492_vm11, %v3737_v23  ;;  %v3770_v12 = vshll.u32 %v19515_v30, 16 }
 0x36b   : > { %v3304_v43 = vpop.permute.xlu1 %3303  ;;  %v3747_v52 = vsel %vm1282_vm10, %v3743_v51, %v3746_v56 }
 0x36c   : > { %v19499_v4 = vsel %vm1021_vm9, %v3350_v54, %v3304_v43  ;;  %16117 = vmatprep.mubr.msk.bf16.mxu1 %vm1492_vm11, %v3747_v52  ;;  %v3269_v42 = vpop.permute.xlu0 %3268  ;;  %v3772_v11 = vrot.slane %v3770_v12, 1 }
 0x36d   : > { %v3750_v40 = vshll.u32 %v19499_v4, 16  ;;  %v3353_v0 = vsel %vm972_vm8, %v19101_v37, %v3269_v42  ;;  %v3748_v46 = vshrl.u32 %v19499_v4, 16 }
 0x36e   : > { %v19511_v44 = vsel %vm1021_vm9, %v3353_v0, %v3306_v47 }
 0x36f   : > { %v3752_v27 = vrot.slane %v3750_v40, 1  ;;  %v3533_v62 = vpop.permute.xlu1 %3532  ;;  %v3760_v37 = vshll.u32 %v19511_v44, 16  ;;  %v23771_v40 = vld [vmem:[#allocation7_spill] sm:$0xff]  ;;  %v3758_v0 = vshrl.u32 %v19511_v44, 16 }
 0x370   : > { %v19518_v55 = vsel %vm1021_vm9, %v3579_v57, %v3533_v62  ;;  %v3500_v63 = vpop.permute.xlu0 %3499 }
 0x371   : > { %v3754_v22 = vshll.u32 %v19518_v55, 16  ;;  %v3753_v33 = vor.u32 %v3752_v27, %v3748_v46  ;;  %v3762_v56 = vrot.slane %v3760_v37, 1  ;;  %v3582_v54 = vsel %vm972_vm8, %v23770_v60, %v3500_v63 }
 0x372   : > { %v3768_v46 = vshrl.u32 %v19515_v30, 16 }
 0x373   : > { %v3756_v23 = vrot.slane %v3754_v22, 1  ;;  %v3502_v47 = vpop.permute.xlu1 %3501  ;;  %v3763_v63 = vor.u32 %v3762_v56, %v3758_v0  ;;  %v17254_v56 = vld [vmem:[%s23693_s1 + $0x100] sm:$0xff]  }
 0x374   : > { %v3535_v43 = vpop.permute.xlu0 %3534  ;;  %v3585_v42 = vsel %vm972_vm8, %v23771_v40, %v3502_v47  ;;  %v4265_v40 = vld [vmem:[#allocation2 + $0xd8] sm:$0xe] }
 0x375   : > { %v3757_v51 = vsel %vm1282_vm10, %v3753_v33, %v3756_v23  ;;  %v19529_v52 = vsel %vm1021_vm9, %v3582_v54, %v3535_v43  ;;  %v3773_v23 = vor.u32 %v3772_v11, %v3768_v46  ;;  %v4514_v46 = vrot.slane %v19175_v15, 1 }
 0x376   : > { %16118 = vmatmul.mubr.msk.bf16.gmra.mrb[24].mxu1 %vm1492_vm11, %v3757_v51  ;;  %v3764_v27 = vshll.u32 %v19529_v52, 16  ;;  %v17253_v51 = vld [vmem:[%s23693_s1 + $0xf8] sm:$0xff]  }
 0x377   : > { %v3537_v57 = vpop.permute.xlu1 %3536 }
 0x378   : > { %v19536_v62 = vsel %vm1021_vm9, %v3585_v42, %v3537_v57  ;;  %v3766_v37 = vrot.slane %v3764_v27, 1 }
 0x379   : > { %v3774_v22 = vshll.u32 %v19536_v62, 16 }
 0x37a   : > { %v3767_v12 = vsel %vm1282_vm10, %v3763_v63, %v3766_v37 }
 0x37b   : > { %v3776_v33 = vrot.slane %v3774_v22, 1  ;;  %16121 = vmatprep.mubr.msk.bf16.mxu1 %vm1492_vm11, %v3767_v12 }
 0x37d   : > { %v3777_v47 = vsel %vm1282_vm10, %v3773_v23, %v3776_v33 }
 0x37e   : > { %16122 = vmatmul.mubr.msk.bf16.gmra.mrb[28].mxu1 %vm1492_vm11, %v3777_v47 }
 0x37f   : > { %16137 = vmatprep.mubr.msk.bf16.mxu1 %vm1492_vm11, %v19160_v24  ;;  %v17255_v24 = vld [vmem:[%s23693_s1 + $0x108] sm:$0xff]  }
 0x386   : > { %16138 = vmatmul.mubr.msk.bf16.vlgmr.msra.gmra.mrb[0].mxu1 %vm1492_vm11, %v19191_v49  ;;  %v17256_v49 = vld [vmem:[%s23693_s1 + $0x110] sm:$0xff]  }
 0x387   : > { %16170 = vmatpush3.bf16.msra.mxu1 %v19322_v58  ;;  %16141 = vmatprep.mubr.msk.bf16.mxu1 %vm1492_vm11, %v19218_v29  ;;  %v4335_v29 = vpop.permute.xlu0 %4334  ;;  %v17257_v58 = vld [vmem:[%s23693_s1 + $0x118] sm:$0xff]  }
 0x388   : > { %16171 = vmatprep.subr.bf16.mxu1 %v17253_v51 }
 0x38b   : > { %16172 = vmatpush3.bf16.msra.mxu1 %v17253_v51  ;;  %v4520_v51 = vrot.slane %v19238_v35, 1 }
 0x38c   : > { %16173 = vmatprep.subr.bf16.mxu1 %v17254_v56 }
 0x38e   : > { %16142 = vmatmul.mubr.msk.bf16.gmra.mrb[4].mxu1 %vm1492_vm11, %v19273_v36  ;;  %v4370_v36 = vpop.permute.xlu0 %4369 }
 0x38f   : > { %16145 = vmatprep.mubr.msk.bf16.mxu1 %vm1492_vm11, %v19290_v1  ;;  %16174 = vmatpush3.bf16.msra.mxu1 %v17254_v56  ;;  %v4337_v1 = vpop.permute.xlu1 %4336 }
 0x390   : > { %16175 = vmatprep.subr.bf16.mxu1 %v17255_v24  ;;  %v4406_v22 = vsel %vm972_vm8, %v19166_v5, %v4337_v1  ;;  %v4517_v5 = vrot.slane %v19206_v38, 1  ;;  %v4523_v1 = vrot.slane %v19295_v45, 1 }
 0x392   : > { %v4339_v60 = vpop.permute.xlu0 %4338 }
 0x393   : > { %16176 = vmatpush3.bf16.msra.mxu1 %v17255_v24  ;;  %v4372_v54 = vpop.permute.xlu1 %4371  ;;  %v4409_v33 = vsel %vm972_vm8, %v19170_v16, %v4339_v60 }
 0x394   : > { %16177 = vmatprep.subr.bf16.mxu1 %v17256_v49  ;;  %v4452_v63 = vsel %vm1021_vm9, %v4406_v22, %v4372_v54  ;;  %v4535_v22 = vrot.slane %v19421_v34, 1 }
 0x395   : > { %v4516_v15 = vrot.slane %v4452_v63, 1  ;;  %v4538_v63 = vrot.slane %v19430_v17, 1 }
 0x396   : > { %16146 = vmatmul.mubr.msk.bf16.gmra.mrb[8].mxu1 %vm1492_vm11, %v19349_v26  ;;  %v4374_v43 = vpop.permute.xlu0 %4373 }
 0x397   : > { %16149 = vmatprep.mubr.msk.bf16.mxu1 %vm1492_vm11, %v19363_v18  ;;  %16178 = vmatpush3.bf16.msra.mxu1 %v17256_v49  ;;  %v4341_v11 = vpop.permute.xlu1 %4340  ;;  %v4518_v56 = vsel %vm2179_vm12, %v4516_v15, %v4517_v5 }
 0x398   : > { %16179 = vmatprep.subr.bf16.mxu1 %v17257_v58  ;;  %v4412_v16 = vsel %vm972_vm8, %v19186_v20, %v4341_v11  ;;  %v4526_v20 = vrot.slane %v19313_v6, 1 }
 0x39a   : > { %v4343_v26 = vpop.permute.xlu0 %4342 }
 0x39b   : > { %16180 = vmatpush3.bf16.msra.mxu1 %v17257_v58  ;;  %v4376_v18 = vpop.permute.xlu1 %4375  ;;  %v4415_v24 = vsel %vm972_vm8, %v19201_v8, %v4343_v26 }
 0x39e   : > { %16150 = vmatmul.mubr.msk.bf16.gmra.mrb[12].mxu1 %vm1492_vm11, %v19407_v41  ;;  %v4378_v41 = vpop.permute.xlu0 %4377 }
 0x39f   : > { %16153 = vmatprep.mubr.msk.bf16.mxu1 %vm1492_vm11, %v19417_v50  ;;  %v4345_v42 = vpop.permute.xlu1 %4344  ;;  %v23772_v50 = vld [vmem:[#allocation8_spill] sm:$0xff] }
 0x3a0   : > { %v14589_v0 = vcombine.low %v4265_v40, %v23772_v50  ;;  %v4418_v60 = vsel %vm972_vm8, %v19215_v61, %v4345_v42  ;;  %v4529_v61 = vrot.slane %v19368_v14, 1  ;;  %v23773_v50 = vld [vmem:[#allocation9_spill] sm:$0xff] }
 0x3a2   : > { %v4403_v57 = vsel %vm972_vm8, %v14589_v0, %v4335_v29  ;;  %v4347_v27 = vpop.permute.xlu0 %4346  ;;  %v4458_v29 = vsel %vm1021_vm9, %v4415_v24, %v4378_v41  ;;  %v4532_v41 = vrot.slane %v19381_v7, 1 }
 0x3a6   : > { %16154 = vmatmul.mubr.msk.bf16.gmra.mrb[16].mxu1 %vm1492_vm11, %v19441_v28  ;;  %v4450_v28 = vsel %vm1021_vm9, %v4403_v57, %v4370_v36  ;;  %v4525_v36 = vrot.slane %v4458_v29, 1 }
 0x3a7   : > { %16157 = vmatprep.mubr.msk.bf16.mxu1 %vm1492_vm11, %v19449_v53  ;;  %v4380_v53 = vpop.permute.xlu1 %4379 }
 0x3a8   : > { %v4460_v54 = vsel %vm1021_vm9, %v4418_v60, %v4380_v53  ;;  %v4527_v26 = vsel %vm2179_vm12, %v4525_v36, %v4526_v20 }
 0x3a9   : > { %v4528_v6 = vrot.slane %v4460_v54, 1 }
 0x3ab   : > { %v4349_v37 = vpop.permute.xlu1 %4348  ;;  %v4530_v57 = vsel %vm2179_vm12, %v4528_v6, %v4529_v61  ;;  %v4559_v61 = vrot.slane %v19536_v62, 1 }
 0x3ae   : > { %16158 = vmatmul.mubr.msk.bf16.gmra.mrb[20].mxu1 %vm1492_vm11, %v19471_v9  ;;  %v4513_v9 = vrot.slane %v4450_v28, 1  ;;  %v23774_v28 = vld [vmem:[#allocation10_spill] sm:$0xff] }
 0x3af   : > { %16161 = vmatprep.mubr.msk.bf16.mxu1 %vm1492_vm11, %v19479_v59  ;;  %v4382_v59 = vpop.permute.xlu0 %4381  ;;  %v4384_v47 = vpop.permute.xlu1 %4383 }
 0x3b3   : > { %v4351_v23 = vpop.permute.xlu0 %4350  ;;  %v4353_v58 = vpop.permute.xlu1 %4352 }
 0x3b4   : > { %v4427_v53 = vsel %vm972_vm8, %v23774_v28, %v4351_v23 }
 0x3b6   : > { %16162 = vmatmul.mubr.msk.bf16.gmra.mrb[24].mxu1 %vm1492_vm11, %v19499_v4  ;;  %v4515_v4 = vsel %vm2179_vm12, %v4513_v9, %v4514_v46 }
 0x3b7   : > { %16165 = vmatprep.mubr.msk.bf16.mxu1 %vm1492_vm11, %v19511_v44  ;;  %v4454_v44 = vsel %vm1021_vm9, %v4409_v33, %v4374_v43  ;;  %v4386_v38 = vpop.permute.xlu0 %4385  ;;  %v4421_v43 = vsel %vm972_vm8, %v19235_v25, %v4347_v27  ;;  %v4388_v45 = vpop.permute.xlu1 %4387  ;;  %v4424_v25 = vsel %vm972_vm8, %v23773_v50, %v4349_v37  ;;  %v4430_v33 = vsel %vm972_vm8, %v19287_v21, %v4353_v58  ;;  %v19692_v50 = vld [vmem:[%s23694_s2 + $0x1] ss:$0 sm:$0xff] }
 0x3b8   : > { %v4519_v12 = vrot.slane %v4454_v44, 1  ;;  %v4464_v27 = vsel %vm1021_vm9, %v4424_v25, %v4384_v47  ;;  %v4466_v14 = vsel %vm1021_vm9, %v4427_v53, %v4386_v38  ;;  %v4468_v44 = vsel %vm1021_vm9, %v4430_v33, %v4388_v45 }
 0x3b9   : > { %v4534_v7 = vrot.slane %v4464_v27, 1  ;;  %v4537_v46 = vrot.slane %v4466_v14, 1  ;;  %v4540_v17 = vrot.slane %v4468_v44, 1  ;;  %v4541_v21 = vrot.slane %v19452_v31, 1 }
 0x3ba   : > { %v4521_v49 = vsel %vm2179_vm12, %v4519_v12, %v4520_v51  ;;  %v4544_v51 = vrot.slane %v19460_v48, 1 }
 0x3bb   : > { %v4355_v11 = vpop.permute.xlu0 %4354  ;;  %v4357_v0 = vpop.permute.xlu1 %4356  ;;  %v4539_v12 = vsel %vm2179_vm12, %v4537_v46, %v4538_v63 }
 0x3bc   : > { %v4433_v15 = vsel %vm972_vm8, %v19310_v39, %v4355_v11  ;;  %v4542_v39 = vsel %vm2179_vm12, %v4540_v17, %v4541_v21  ;;  %v4556_v11 = vrot.slane %v19529_v52, 1  ;;  %v5485_v52 = vld [vmem:[#allocation2 + $0xcc] sm:$0xf] }
 0x3be   : > { %16166 = vmatmul.mubr.msk.bf16.gmra.mrb[28].mxu1 %vm1492_vm11, %v19515_v30  ;;  %v4456_v30 = vsel %vm1021_vm9, %v4412_v16, %v4376_v18  ;;  %v4462_v18 = vsel %vm1021_vm9, %v4421_v43, %v4382_v59 }
 0x3bf   : > { %16181 = vmatprep.mubr.msk.bf16.mxu1 %vm1492_vm11, %v4515_v4  ;;  %v4522_v35 = vrot.slane %v4456_v30, 1  ;;  %v4531_v40 = vrot.slane %v4462_v18, 1  ;;  %v4390_v42 = vpop.permute.xlu0 %4389  ;;  %v4392_v37 = vpop.permute.xlu1 %4391  ;;  %v4536_v4 = vsel %vm2179_vm12, %v4534_v7, %v4535_v22 }
 0x3c0   : > { %v4470_v23 = vsel %vm1021_vm9, %v4433_v15, %v4390_v42 }
 0x3c1   : > { %v4524_v8 = vsel %vm2179_vm12, %v4522_v35, %v4523_v1  ;;  %v4533_v9 = vsel %vm2179_vm12, %v4531_v40, %v4532_v41  ;;  %v4543_v47 = vrot.slane %v4470_v23, 1  ;;  %v4550_v35 = vrot.slane %v19490_v3, 1  ;;  %v5486_v41 = vld [vmem:[#allocation2 + $0xd0] sm:$0xf] }
 0x3c2   : > { %v14692_v42 = vcombine.low %v5485_v52, %v5486_v41 }
 0x3c3   : > { %v4359_v59 = vpop.permute.xlu0 %4358  ;;  %v4361_v5 = vpop.permute.xlu1 %4360 }
 0x3c4   : > { %v4439_v30 = vsel %vm972_vm8, %v19344_v2, %v4359_v59  ;;  %v4442_v2 = vsel %vm972_vm8, %v19360_v10, %v4361_v5  ;;  %v4553_v10 = vrot.slane %v19518_v55, 1  ;;  %5639 = vrot.lane.b32.xlu1 %v14692_v42, %s17549_s30 }
 0x3c6   : > { %16182 = vmatmul.mubr.msk.bf16.vlgmr.msra.gmra.mrb[0].mxu1 %vm1492_vm11, %v4518_v56  ;;  %v4436_v56 = vsel %vm972_vm8, %v19331_v32, %v4357_v0  ;;  %v4547_v32 = vrot.slane %v19482_v19, 1 }
 0x3c7   : > { %16185 = vmatprep.mubr.msk.bf16.mxu1 %vm1492_vm11, %v4521_v49  ;;  %v4394_v34 = vpop.permute.xlu0 %4393  ;;  %v4472_v16 = vsel %vm1021_vm9, %v4436_v56, %v4392_v37  ;;  %v4545_v49 = vsel %vm2179_vm12, %v4543_v47, %v4544_v51  ;;  %v4396_v29 = vpop.permute.xlu1 %4395  ;;  %v5346_v51 = vld [vmem:[#allocation2 + $0x18] sm:$0xf] }
 0x3c8   : > { %v4474_v31 = vsel %vm1021_vm9, %v4439_v30, %v4394_v34  ;;  %v4546_v48 = vrot.slane %v4472_v16, 1  ;;  %v4476_v20 = vsel %vm1021_vm9, %v4442_v2, %v4396_v29  ;;  %v5350_v2 = vld [vmem:[#allocation2 + $0x20] sm:$0x1] }
 0x3c9   : > { %v4549_v38 = vrot.slane %v4474_v31, 1  ;;  %v4552_v3 = vrot.slane %v4476_v20, 1  ;;  %v5339_v31 = vld [vmem:[#allocation2 + $0xc] sm:$0xf] }
 0x3ca   : > { %v4548_v1 = vsel %vm2179_vm12, %v4546_v48, %v4547_v32 }
 0x3cb   : > { %v4363_v24 = vpop.permute.xlu0 %4362  ;;  %v4365_v36 = vpop.permute.xlu1 %4364 }
 0x3cc   : > { %v4445_v60 = vsel %vm972_vm8, %v19378_v13, %v4363_v24  ;;  %v4554_v13 = vsel %vm2179_vm12, %v4552_v3, %v4553_v10  ;;  %v5343_v3 = vld [vmem:[#allocation2 + $0x14] sm:$0x1] }
 0x3ce   : > { %16186 = vmatmul.mubr.msk.bf16.gmra.mrb[4].mxu1 %vm1492_vm11, %v4524_v8  ;;  %v4551_v8 = vsel %vm2179_vm12, %v4549_v38, %v4550_v35 }
 0x3cf   : > { %16189 = vmatprep.mubr.msk.bf16.mxu1 %vm1492_vm11, %v4527_v26  ;;  %v4398_v58 = vpop.permute.xlu0 %4397  ;;  %v4400_v43 = vpop.permute.xlu1 %4399  ;;  %v23775_v26 = vld [vmem:[#allocation11_spill] sm:$0xff] }
 0x3d0   : > { %v4478_v19 = vsel %vm1021_vm9, %v4445_v60, %v4398_v58  ;;  %v4448_v18 = vsel %vm972_vm8, %v23775_v26, %v4365_v36 }
 0x3d1   : > { %v4555_v54 = vrot.slane %v4478_v19, 1  ;;  %v4480_v45 = vsel %vm1021_vm9, %v4448_v18, %v4400_v43 }
 0x3d2   : > { %v4558_v40 = vrot.slane %v4480_v45, 1 }
 0x3d3   : > { %v4557_v6 = vsel %vm2179_vm12, %v4555_v54, %v4556_v11 }
 0x3d4   : > { %v4560_v55 = vsel %vm2179_vm12, %v4558_v40, %v4559_v61 }
 0x3d6   : > { %16190 = vmatmul.mubr.msk.bf16.gmra.mrb[8].mxu1 %vm1492_vm11, %v4530_v57 }
 0x3d7   : > { %16193 = vmatprep.mubr.msk.bf16.mxu1 %vm1492_vm11, %v4533_v9 }
 0x3de   : > { %16194 = vmatmul.mubr.msk.bf16.gmra.mrb[12].mxu1 %vm1492_vm11, %v4536_v4 }
 0x3df   : > { %16197 = vmatprep.mubr.msk.bf16.mxu1 %vm1492_vm11, %v4539_v12 }
 0x3e6   : > { %16198 = vmatmul.mubr.msk.bf16.gmra.mrb[16].mxu1 %vm1492_vm11, %v4542_v39 }
 0x3e7   : > { %16201 = vmatprep.mubr.msk.bf16.mxu1 %vm1492_vm11, %v4545_v49 }
 0x3ee   : > { %16202 = vmatmul.mubr.msk.bf16.gmra.mrb[20].mxu1 %vm1492_vm11, %v4548_v1 }
 0x3ef   : > { %16205 = vmatprep.mubr.msk.bf16.mxu1 %vm1492_vm11, %v4551_v8 }
 0x3f6   : > { %16206 = vmatmul.mubr.msk.bf16.gmra.mrb[24].mxu1 %vm1492_vm11, %v4554_v13 }
 0x3f7   : > { %16209 = vmatprep.mubr.msk.bf16.mxu1 %vm1492_vm11, %v4557_v6 }
 0x3fe   : > { %16210 = vmatmul.mubr.msk.bf16.gmra.mrb[28].mxu1 %vm1492_vm11, %v4560_v55 }
 0x499   : > { %v16183_v25 = vpop.f32.mrb[0].mxu1 }
 0x49a   : > { %v4861_v0 = vadd.f32 %v16183_v25, %v19692_v50  ;;  %v4692_v57 = vpop.f32.mrb[1].mxu1 }
 0x49b   : > { %v4859_v62 = vadd.f32 %v19692_v50, %v4692_v57  ;;  %v16184_v27 = vpop.f32.mrb[2].mxu1 }
 0x49c   : > { %v4893_v28 = vmax.f32 %v4861_v0, 0.0  ;;  %v4862_v53 = vadd.f32 %v16184_v27, %v19692_v50  ;;  %v4695_v9 = vpop.f32.mrb[3].mxu1 }
 0x49d   : > { %v4891_v14 = vmax.f32 %v4859_v62, 0.0  ;;  %v4860_v7 = vadd.f32 %v19692_v50, %v4695_v9 }
 0x49e   : > { %v15427_v46 = vpack.c.bf16 %v4893_v28, %v4893_v28  ;;  %v4894_v59 = vmax.f32 %v4862_v53, 0.0  ;;  %v5360_v28 = vld [vmem:[#allocation2 + $0x30] sm:$0xf] }
 0x49f   : > { %v15425_v22 = vpack.c.bf16 %v4891_v14, %v4891_v14  ;;  %v4892_v37 = vmax.f32 %v4860_v7, 0.0 }
 0x4a0   : > { %v5037_v63 = vshrl.u32 %v15427_v46, 16  ;;  %v15428_v33 = vpack.c.bf16 %v4894_v59, %v4894_v59  ;;  %v5040_v4 = vshll.u32 %v15427_v46, 16 }
 0x4a1   : > { %v5020_v44 = vshrl.u32 %v15425_v22, 16  ;;  %v5023_v15 = vshll.u32 %v15425_v22, 16  ;;  %v15426_v12 = vpack.c.bf16 %v4892_v37, %v4892_v37  ;;  %v16187_v23 = vpop.f32.mrb[4].mxu1  ;;  %v5353_v22 = vld [vmem:[#allocation2 + $0x24] sm:$0xf] }
 0x4a2   : > { %v5039_v34 = vrot.slane %v5037_v63, 7  ;;  %v5045_v17 = vshrl.u32 %v15428_v33, 16  ;;  %v5048_v5 = vshll.u32 %v15428_v33, 16  ;;  %v4865_v47 = vadd.f32 %v16187_v23, %v19692_v50  ;;  %v4708_v21 = vpop.f32.mrb[5].mxu1 }
 0x4a3   : > { %v5022_v56 = vrot.slane %v5020_v44, 7  ;;  %v5028_v39 = vshrl.u32 %v15426_v12, 16  ;;  %v5031_v16 = vshll.u32 %v15426_v12, 16  ;;  %v4863_v30 = vadd.f32 %v19692_v50, %v4708_v21  ;;  %v16188_v24 = vpop.f32.mrb[6].mxu1 }
 0x4a4   : > { %v5042_v49 = vor.u32 %v5040_v4, %v5039_v34  ;;  %v5043_v29 = vrot.slane %v5039_v34, 4  ;;  %v5047_v48 = vrot.slane %v5045_v17, 7  ;;  %v4897_v38 = vmax.f32 %v4865_v47, 0.0  ;;  %v4711_v32 = vpop.f32.mrb[7].mxu1 }
 0x4a5   : > { %v5025_v35 = vor.u32 %v5023_v15, %v5022_v56  ;;  %v5026_v58 = vrot.slane %v5022_v56, 4  ;;  %v5030_v36 = vrot.slane %v5028_v39, 7  ;;  %v4895_v1 = vmax.f32 %v4863_v30, 0.0 }
 0x4a6   : > { %v5347_v60 = vsel %vm17834_vm6, %v5042_v49, %v5346_v51  ;;  %v5050_v8 = vor.u32 %v5048_v5, %v5047_v48  ;;  %v5052_v19 = vrot.slane %v5047_v48, 4  ;;  %v15431_v54 = vpack.c.bf16 %v4897_v38, %v4897_v38  ;;  %v5364_v49 = vld [vmem:[#allocation2 + $0x38] sm:$0x1] }
 0x4a7   : > { %5348 = vst [vmem:[#allocation2 + $0x18] sm:$0xf] %v5347_v60  ;;  %v5340_v10 = vsel %vm17834_vm6, %v5025_v35, %v5339_v31  ;;  %v5033_v43 = vor.u32 %v5031_v16, %v5030_v36  ;;  %v5035_v11 = vrot.slane %v5030_v36, 4  ;;  %v15429_v26 = vpack.c.bf16 %v4895_v1, %v4895_v1  ;;  %v5374_v36 = vld [vmem:[#allocation2 + $0x48] sm:$0xf] }
 0x4a8   : > { %5341 = vst [vmem:[#allocation2 + $0xc] sm:$0xf] %v5340_v10  ;;  %v5051_v13 = vsel %vm17827_vm5, %v5043_v29, %v5050_v8  ;;  %v5351_v6 = vsel %vm17845_vm7, %v5052_v19, %v5350_v2  ;;  %v5071_v40 = vshrl.u32 %v15431_v54, 16  ;;  %v5074_v52 = vshll.u32 %v15431_v54, 16  ;;  %v5357_v29 = vld [vmem:[#allocation2 + $0x2c] sm:$0x1] }
 0x4a9   : > { %5349 = vst.msk [vmem:[#allocation2 + $0x1c] sm:$0xf] %vm199_vm0, %v5051_v13  ;;  %5352 = vst [vmem:[#allocation2 + $0x20] sm:$0x1] %v5351_v6  ;;  %v5034_v61 = vsel %vm17827_vm5, %v5026_v58, %v5033_v43  ;;  %v5344_v55 = vsel %vm17845_vm7, %v5035_v11, %v5343_v3  ;;  %v5054_v41 = vshrl.u32 %v15429_v26, 16  ;;  %v16191_v42 = vpop.f32.mrb[8].mxu1  ;;  %v4866_v0 = vadd.f32 %v16188_v24, %v19692_v50 }
 0x4aa   : > { %5342 = vst.msk [vmem:[#allocation2 + $0x10] sm:$0xf] %vm199_vm0, %v5034_v61  ;;  %5345 = vst [vmem:[#allocation2 + $0x14] sm:$0x1] %v5344_v55  ;;  %v19714_v25 = vrot.slane %v5071_v40, 7  ;;  %v4864_v57 = vadd.f32 %v19692_v50, %v4711_v32  ;;  %v4869_v62 = vadd.f32 %v16191_v42, %v19692_v50  ;;  %v4724_v27 = vpop.f32.mrb[9].mxu1 }
 0x4ab   : > { %v5056_v53 = vrot.slane %v5054_v41, 7  ;;  %v5057_v9 = vshll.u32 %v15429_v26, 16  ;;  %v4867_v14 = vadd.f32 %v19692_v50, %v4724_v27  ;;  %v16192_v7 = vpop.f32.mrb[10].mxu1  ;;  %v4898_v37 = vmax.f32 %v4866_v0, 0.0  ;;  %v5367_v40 = vld [vmem:[#allocation2 + $0x3c] sm:$0xf] }
 0x4ac   : > { %v5076_v46 = vor.u32 %v5074_v52, %v19714_v25  ;;  %v5077_v59 = vrot.slane %v19714_v25, 4  ;;  %v4896_v63 = vmax.f32 %v4864_v57, 0.0  ;;  %v4727_v33 = vpop.f32.mrb[11].mxu1  ;;  %v4901_v15 = vmax.f32 %v4869_v62, 0.0 }
 0x4ad   : > { %v5059_v4 = vor.u32 %v5057_v9, %v5056_v53  ;;  %v5060_v44 = vrot.slane %v5056_v53, 4  ;;  %v4899_v12 = vmax.f32 %v4867_v14, 0.0  ;;  %v15432_v34 = vpack.c.bf16 %v4898_v37, %v4898_v37 }
 0x4ae   : > { %v5361_v23 = vsel %vm17834_vm6, %v5076_v46, %v5360_v28  ;;  %v15430_v17 = vpack.c.bf16 %v4896_v63, %v4896_v63  ;;  %v4870_v5 = vadd.f32 %v16192_v7, %v19692_v50  ;;  %v15435_v21 = vpack.c.bf16 %v4901_v15, %v4901_v15  ;;  %v17291_v28 = vld [vmem:[%s23693_s1 + $0x150] sm:$0xff]   ;;  %v5455_v46 = vld [vmem:[#allocation2 + $0x18] sm:$0xf] }
 0x4af   : > { %5362 = vst [vmem:[#allocation2 + $0x30] sm:$0xf] %v5361_v23  ;;  %v5354_v47 = vsel %vm17834_vm6, %v5059_v4, %v5353_v22  ;;  %v15433_v51 = vpack.c.bf16 %v4899_v12, %v4899_v12  ;;  %v4868_v56 = vadd.f32 %v19692_v50, %v4727_v33  ;;  %v5079_v39 = vshrl.u32 %v15432_v34, 16  ;;  %16213 = vmatprep.subr.bf16.mxu0 %v17291_v28  ;;  %v5378_v23 = vld [vmem:[#allocation2 + $0x50] sm:$0x1] }
 0x4b0   : > { %5355 = vst [vmem:[#allocation2 + $0x24] sm:$0xf] %v5354_v47  ;;  %v5082_v16 = vshll.u32 %v15432_v34, 16  ;;  %v5062_v30 = vshrl.u32 %v15430_v17, 16  ;;  %v5065_v24 = vshll.u32 %v15430_v17, 16  ;;  %v5105_v31 = vshrl.u32 %v15435_v21, 16  ;;  %16214 = vmatpush3.bf16.msra.mxu0 %v17291_v28 }
 0x4b1   : > { %v5108_v48 = vshll.u32 %v15435_v21, 16  ;;  %v5088_v38 = vshrl.u32 %v15433_v51, 16  ;;  %v5091_v32 = vshll.u32 %v15433_v51, 16  ;;  %v16195_v35 = vpop.f32.mrb[12].mxu1  ;;  %v5081_v58 = vrot.slane %v5079_v39, 7 }
 0x4b2   : > { %v5064_v2 = vrot.slane %v5062_v30, 7  ;;  %v4902_v1 = vmax.f32 %v4870_v5, 0.0  ;;  %v4900_v60 = vmax.f32 %v4868_v56, 0.0  ;;  %v4740_v8 = vpop.f32.mrb[13].mxu1  ;;  %v19728_v19 = vrot.slane %v5105_v31, 7  ;;  %v17293_v56 = vld [vmem:[%s23693_s1 + $0x158] sm:$0xff]  }
 0x4b3   : > { %v19730_v3 = vrot.slane %v5088_v38, 7  ;;  %v4873_v54 = vadd.f32 %v16195_v35, %v19692_v50  ;;  %v4871_v10 = vadd.f32 %v19692_v50, %v4740_v8  ;;  %v16196_v43 = vpop.f32.mrb[14].mxu1  ;;  %v5084_v11 = vor.u32 %v5082_v16, %v5081_v58  ;;  %v19738_v25 = vld [vmem:[#allocation2 + $0x1c] sm:$0xf]  ;;  %v5371_v34 = vld [vmem:[#allocation2 + $0x44] sm:$0x1]  ;;  %16215 = vmatprep.subr.bf16.mxu0 %v17293_v56 }
 0x4b4   : > { %v5086_v26 = vrot.slane %v5081_v58, 4  ;;  %v5067_v13 = vor.u32 %v5065_v24, %v5064_v2  ;;  %v5069_v6 = vrot.slane %v5064_v2, 4  ;;  %v4743_v61 = vpop.f32.mrb[15].mxu1  ;;  %v5110_v55 = vor.u32 %v5108_v48, %v19728_v19  ;;  %v19769_v30 = vld [vmem:[#allocation2 + $0x20] ss:$0 sps:$4 sm:$0x11]   ;;  %16216 = vmatpush3.bf16.msra.mxu0 %v17293_v56 }
 0x4b5   : > { %v5111_v52 = vrot.slane %v19728_v19, 4  ;;  %v5093_v41 = vor.u32 %v5091_v32, %v19730_v3  ;;  %v5094_v42 = vrot.slane %v19730_v3, 4  ;;  %v5085_v0 = vsel %vm17827_vm5, %v5077_v59, %v5084_v11  ;;  %v5388_v8 = vld [vmem:[#allocation2 + $0x60] sm:$0xf]  ;;  %v6598_v18 = vld [vmem:[#allocation2 + $0xc] sm:$0xe] }
 0x4b6   : > { %v5365_v57 = vsel %vm17845_vm7, %v5086_v26, %v5364_v49  ;;  %v5068_v62 = vsel %vm17827_vm5, %v5060_v44, %v5067_v13  ;;  %v5358_v27 = vsel %vm17845_vm7, %v5069_v6, %v5357_v29  ;;  %5363 = vst.msk [vmem:[#allocation2 + $0x34] sm:$0xf] %vm199_vm0, %v5085_v0  ;;  %v5375_v53 = vsel %vm17834_vm6, %v5110_v55, %v5374_v36  ;;  %v17295_v11 = vld [vmem:[%s23693_s1 + $0x160] sm:$0xff]   ;;  %v19796_v55 = vld [vmem:[#allocation2 + $0x10] sm:$0xf] }
 0x4b7   : > { %5366 = vst [vmem:[#allocation2 + $0x38] sm:$0x1] %v5365_v57  ;;  %5356 = vst.msk [vmem:[#allocation2 + $0x28] sm:$0xf] %vm199_vm0, %v5068_v62  ;;  %v5368_v9 = vsel %vm17834_vm6, %v5093_v41, %v5367_v40  ;;  %v15436_v14 = vpack.c.bf16 %v4902_v1, %v4902_v1  ;;  %v15434_v7 = vpack.c.bf16 %v4900_v60, %v4900_v60  ;;  %v4905_v59 = vmax.f32 %v4873_v54, 0.0 }
 0x4b8   : > { %5359 = vst [vmem:[#allocation2 + $0x2c] sm:$0x1] %v5358_v27  ;;  %5376 = vst [vmem:[#allocation2 + $0x48] sm:$0xf] %v5375_v53  ;;  %v4903_v22 = vmax.f32 %v4871_v10, 0.0  ;;  %v19758_v37 = vcombine.low %v5455_v46, %v19738_v25  ;;  %v4874_v63 = vadd.f32 %v16196_v43, %v19692_v50  ;;  %v4872_v21 = vadd.f32 %v19692_v50, %v4743_v61 }
 0x4b9   : > { %5369 = vst [vmem:[#allocation2 + $0x3c] sm:$0xf] %v5368_v9  ;;  %v5113_v33 = vshrl.u32 %v15436_v14, 16  ;;  %v5116_v4 = vshll.u32 %v15436_v14, 16  ;;  %v5096_v44 = vshrl.u32 %v15434_v7, 16  ;;  %v5099_v15 = vshll.u32 %v15434_v7, 16  ;;  %16217 = vmatprep.subr.bf16.mxu0 %v17295_v11 }
 0x4ba   : > { %v16199_v12 = vpop.f32.mrb[16].mxu1  ;;  %v15439_v17 = vpack.c.bf16 %v4905_v59, %v4905_v59  ;;  %v15437_v5 = vpack.c.bf16 %v4903_v22, %v4903_v22  ;;  %5609 = vrot.lane.b32.xlu0 %v19758_v37, %s17549_s30  ;;  %5574 = vrot.lane.b32.xlu1 %v19758_v37, %s17550_s7  ;;  %v4906_v47 = vmax.f32 %v4874_v63, 0.0  ;;  %v4904_v43 = vmax.f32 %v4872_v21, 0.0  ;;  %v5381_v61 = vld [vmem:[#allocation2 + $0x54] sm:$0xf]  ;;  %v17297_v22 = vld [vmem:[%s23693_s1 + $0x168] sm:$0xff]  }
 0x4bb   : > { %v4756_v51 = vpop.f32.mrb[17].mxu1  ;;  %v5115_v39 = vrot.slane %v5113_v33, 7  ;;  %v5098_v16 = vrot.slane %v5096_v44, 7  ;;  %v4877_v24 = vadd.f32 %v16199_v12, %v19692_v50  ;;  %16218 = vmatpush3.bf16.msra.mxu0 %v17295_v11 }
 0x4bc   : > { %v4875_v49 = vadd.f32 %v19692_v50, %v4756_v51  ;;  %v16200_v29 = vpop.f32.mrb[18].mxu1  ;;  %v5139_v31 = vshrl.u32 %v15439_v17, 16  ;;  %v5142_v48 = vshll.u32 %v15439_v17, 16  ;;  %v5122_v38 = vshrl.u32 %v15437_v5, 16  ;;  %16219 = vmatprep.subr.bf16.mxu0 %v17297_v22 }
 0x4bd   : > { %v5125_v32 = vshll.u32 %v15437_v5, 16  ;;  %v4759_v35 = vpop.f32.mrb[19].mxu1  ;;  %v5118_v58 = vor.u32 %v5116_v4, %v5115_v39  ;;  %v5120_v2 = vrot.slane %v5115_v39, 4  ;;  %v5101_v36 = vor.u32 %v5099_v15, %v5098_v16  ;;  %v19804_v28 = vld [vmem:[#allocation2 + $0x34] sm:$0xf] }
 0x4be   : > { %v5103_v1 = vrot.slane %v5098_v16, 4  ;;  %v19773_v60 = vrot.slane %v5139_v31, 7  ;;  %v19775_v54 = vrot.slane %v5122_v38, 7  ;;  %v15440_v10 = vpack.c.bf16 %v4906_v47, %v4906_v47  ;;  %5838 = vrot.lane.b32.xlu0 %v19769_v30, %s17549_s30  ;;  %5805 = vrot.lane.b32.xlu1 %v19769_v30, %s17550_s7  ;;  %v5459_v15 = vld [vmem:[#allocation2 + $0x30] sm:$0xf] }
 0x4bf   : > { %v5119_v26 = vsel %vm17827_vm5, %v5111_v52, %v5118_v58  ;;  %v5379_v13 = vsel %vm17845_vm7, %v5120_v2, %v5378_v23  ;;  %v5102_v6 = vsel %vm17827_vm5, %v5094_v42, %v5101_v36  ;;  %v5453_v42 = vld [vmem:[#allocation2 + $0xc] sm:$0xf]  ;;  %v15438_v62 = vpack.c.bf16 %v4904_v43, %v4904_v43  ;;  %v5392_v23 = vld [vmem:[#allocation2 + $0x68] sm:$0x1]  ;;  %16220 = vmatpush3.bf16.msra.mxu0 %v17297_v22 }
 0x4c0   : > { %v5372_v40 = vsel %vm17845_vm7, %v5103_v1, %v5371_v34  ;;  %5377 = vst.msk [vmem:[#allocation2 + $0x4c] sm:$0xf] %vm199_vm0, %v5119_v26  ;;  %5380 = vst [vmem:[#allocation2 + $0x50] sm:$0x1] %v5379_v13  ;;  %v5144_v19 = vor.u32 %v5142_v48, %v19773_v60  ;;  %v5145_v52 = vrot.slane %v19773_v60, 4  ;;  %v5127_v3 = vor.u32 %v5125_v32, %v19775_v54 }
 0x4c1   : > { %5370 = vst.msk [vmem:[#allocation2 + $0x40] sm:$0xf] %vm199_vm0, %v5102_v6  ;;  %5373 = vst [vmem:[#allocation2 + $0x44] sm:$0x1] %v5372_v40  ;;  %v5128_v41 = vrot.slane %v19775_v54, 4  ;;  %v5147_v0 = vshrl.u32 %v15440_v10, 16  ;;  %v19811_v46 = vcombine.low %v5453_v42, %v19796_v55  ;;  %v19821_v5 = vcombine.low %v5459_v15, %v19804_v28 }
 0x4c2   : > { %v5150_v57 = vshll.u32 %v15440_v10, 16  ;;  %v4909_v27 = vmax.f32 %v4877_v24, 0.0  ;;  %v16203_v53 = vpop.f32.mrb[20].mxu1  ;;  %v5389_v9 = vsel %vm17834_vm6, %v5144_v19, %v5388_v8  ;;  %v5382_v14 = vsel %vm17834_vm6, %v5127_v3, %v5381_v61  ;;  %v5385_v34 = vld [vmem:[#allocation2 + $0x5c] sm:$0x1] }
 0x4c3   : > { %v4907_v7 = vmax.f32 %v4875_v49, 0.0  ;;  %v4772_v59 = vpop.f32.mrb[21].mxu1  ;;  %5390 = vst [vmem:[#allocation2 + $0x60] sm:$0xf] %v5389_v9  ;;  %5383 = vst [vmem:[#allocation2 + $0x54] sm:$0xf] %v5382_v14  ;;  %5572 = vrot.lane.b32.xlu0 %v19811_v46, %s17550_s7  ;;  %v4878_v47 = vadd.f32 %v16200_v29, %v19692_v50  ;;  %v4876_v21 = vadd.f32 %v19692_v50, %v4759_v35  ;;  %5578 = vrot.lane.b32.xlu1 %v19821_v5, %s17550_s7 }
 0x4c4   : > { %v5149_v63 = vrot.slane %v5147_v0, 7  ;;  %v5130_v33 = vshrl.u32 %v15438_v62, 16  ;;  %v5133_v4 = vshll.u32 %v15438_v62, 16  ;;  %v15443_v44 = vpack.c.bf16 %v4909_v27, %v4909_v27  ;;  %v19816_v12 = vpop.f32.mrb[22].mxu1  ;;  %v17298_v29 = vld [vmem:[%s23693_s1 + $0x170] sm:$0xff]  }
 0x4c5   : > { %v15441_v17 = vpack.c.bf16 %v4907_v7, %v4907_v7  ;;  %v19825_v51 = vpop.f32.mrb[23].mxu1  ;;  %v19827_v49 = vld [vmem:[#allocation2 + $0x14] ss:$0 sps:$4 sm:$0x11]   ;;  %v4910_v32 = vmax.f32 %v4878_v47, 0.0  ;;  %v4908_v43 = vmax.f32 %v4876_v21, 0.0  ;;  %16221 = vmatprep.subr.bf16.mxu0 %v17298_v29  ;;  %v4881_v6 = vadd.f32 %v16203_v53, %v19692_v50 }
 0x4c6   : > { %v5152_v56 = vor.u32 %v5150_v57, %v5149_v63  ;;  %v5154_v39 = vrot.slane %v5149_v63, 4  ;;  %v5132_v16 = vrot.slane %v5130_v33, 7  ;;  %v5173_v24 = vshrl.u32 %v15443_v44, 16  ;;  %v5402_v1 = vld [vmem:[#allocation2 + $0x78] sm:$0xf]  ;;  %16222 = vmatpush3.bf16.msra.mxu0 %v17298_v29 }
 0x4c7   : > { %v5176_v31 = vshll.u32 %v15443_v44, 16  ;;  %v5156_v48 = vshrl.u32 %v15441_v17, 16  ;;  %v5159_v38 = vshll.u32 %v15441_v17, 16  ;;  %v5395_v60 = vld [vmem:[#allocation2 + $0x6c] sm:$0xf]  ;;  %v15444_v10 = vpack.c.bf16 %v4910_v32, %v4910_v32  ;;  %5803 = vrot.lane.b32.xlu0 %v19827_v49, %s17550_s7 }
 0x4c8   : > { %v5153_v35 = vsel %vm17827_vm5, %v5145_v52, %v5152_v56  ;;  %v5393_v58 = vsel %vm17845_vm7, %v5154_v39, %v5392_v23  ;;  %v5135_v2 = vor.u32 %v5133_v4, %v5132_v16  ;;  %v5137_v36 = vrot.slane %v5132_v16, 4  ;;  %v19843_v11 = vld [vmem:[#allocation2 + $0x38] ss:$0 sps:$4 sm:$0x11]   ;;  %v19851_v61 = vld [vmem:[#allocation2 + $0x28] sm:$0xf] }
 0x4c9   : > { %5391 = vst.msk [vmem:[#allocation2 + $0x64] sm:$0xf] %vm199_vm0, %v5153_v35  ;;  %5394 = vst [vmem:[#allocation2 + $0x68] sm:$0x1] %v5393_v58  ;;  %v5175_v8 = vrot.slane %v5173_v24, 7  ;;  %v19839_v54 = vrot.slane %v5156_v48, 7  ;;  %v4879_v40 = vadd.f32 %v19692_v50, %v4772_v59  ;;  %5809 = vrot.lane.b32.xlu1 %v19843_v11, %s17550_s7  ;;  %v15442_v27 = vpack.c.bf16 %v4908_v43, %v4908_v43 }
 0x4ca   : > { %v5136_v26 = vsel %vm17827_vm5, %v5128_v41, %v5135_v2  ;;  %v5386_v13 = vsel %vm17845_vm7, %v5137_v36, %v5385_v34  ;;  %v16207_v19 = vpop.f32.mrb[24].mxu1  ;;  %v5181_v57 = vshrl.u32 %v15444_v10, 16  ;;  %v5184_v62 = vshll.u32 %v15444_v10, 16  ;;  %v5457_v9 = vld [vmem:[#allocation2 + $0x24] sm:$0xf]  ;;  %v17299_v4 = vld [vmem:[%s23693_s1 + $0x178] sm:$0xff]  }
 0x4cb   : > { %5384 = vst.msk [vmem:[#allocation2 + $0x58] sm:$0xf] %vm199_vm0, %v5136_v26  ;;  %5387 = vst [vmem:[#allocation2 + $0x5c] sm:$0x1] %v5386_v13  ;;  %v5178_v52 = vor.u32 %v5176_v31, %v5175_v8  ;;  %v5179_v3 = vrot.slane %v5175_v8, 4  ;;  %v5161_v42 = vor.u32 %v5159_v38, %v19839_v54  ;;  %v5162_v0 = vrot.slane %v19839_v54, 4  ;;  %5613 = vrot.lane.b32.xlu0 %v19821_v5, %s17549_s30 }
 0x4cc   : > { %v4788_v41 = vpop.f32.mrb[25].mxu1  ;;  %v4913_v53 = vmax.f32 %v4881_v6, 0.0  ;;  %v4911_v22 = vmax.f32 %v4879_v40, 0.0  ;;  %v19867_v63 = vcombine.low %v5457_v9, %v19851_v61  ;;  %v5183_v44 = vrot.slane %v5181_v57, 7  ;;  %v5406_v17 = vld [vmem:[#allocation2 + $0x80] sm:$0x1]  ;;  %16223 = vmatprep.subr.bf16.mxu0 %v17299_v4 }
 0x4cd   : > { %v19858_v14 = vpop.f32.mrb[26].mxu1  ;;  %v5403_v7 = vsel %vm17834_vm6, %v5178_v52, %v5402_v1  ;;  %v5396_v59 = vsel %vm17834_vm6, %v5161_v42, %v5395_v60  ;;  %v5164_v15 = vshrl.u32 %v15442_v27, 16  ;;  %v5167_v23 = vshll.u32 %v15442_v27, 16  ;;  %v5399_v47 = vld [vmem:[#allocation2 + $0x74] sm:$0x1]  ;;  %16224 = vmatpush3.bf16.msra.mxu0 %v17299_v4 }
 0x4ce   : > { %v19869_v33 = vpop.f32.mrb[27].mxu1  ;;  %5404 = vst [vmem:[#allocation2 + $0x78] sm:$0xf] %v5403_v7  ;;  %5397 = vst [vmem:[#allocation2 + $0x6c] sm:$0xf] %v5396_v59  ;;  %v15447_v34 = vpack.c.bf16 %v4913_v53, %v4913_v53  ;;  %v15445_v21 = vpack.c.bf16 %v4911_v22, %v4911_v22  ;;  %5611 = vrot.lane.b32.xlu1 %v19867_v63, %s17549_s30  ;;  %v4882_v56 = vadd.f32 %v19816_v12, %v19692_v50 }
 0x4cf   : > { %v4880_v39 = vadd.f32 %v19692_v50, %v19825_v51  ;;  %v4885_v16 = vadd.f32 %v16207_v19, %v19692_v50  ;;  %v5186_v24 = vor.u32 %v5184_v62, %v5183_v44  ;;  %v5188_v31 = vrot.slane %v5183_v44, 4  ;;  %v19881_v32 = vld [vmem:[#allocation2 + $0x2c] ss:$0 sps:$4 sm:$0x11]   ;;  %5842 = vrot.lane.b32.xlu0 %v19843_v11, %s17549_s30  ;;  %v5416_v60 = vld [vmem:[#allocation2 + $0x90] sm:$0xf] }
 0x4d0   : > { %v5166_v48 = vrot.slane %v5164_v15, 7  ;;  %v5207_v38 = vshrl.u32 %v15447_v34, 16  ;;  %v5210_v29 = vshll.u32 %v15447_v34, 16  ;;  %v5190_v35 = vshrl.u32 %v15445_v21, 16  ;;  %v5409_v43 = vld [vmem:[#allocation2 + $0x84] sm:$0xf] }
 0x4d1   : > { %v5193_v58 = vshll.u32 %v15445_v21, 16  ;;  %v4914_v2 = vmax.f32 %v4882_v56, 0.0  ;;  %v5187_v12 = vsel %vm17827_vm5, %v5179_v3, %v5186_v24  ;;  %v5407_v51 = vsel %vm17845_vm7, %v5188_v31, %v5406_v17  ;;  %v19889_v8 = vpop.f32.mrb[28].mxu1  ;;  %v19903_v42 = vld [vmem:[#allocation2 + $0x4c] sm:$0xf] }
 0x4d2   : > { %v5169_v36 = vor.u32 %v5167_v23, %v5166_v48  ;;  %v5171_v1 = vrot.slane %v5166_v48, 4  ;;  %5405 = vst.msk [vmem:[#allocation2 + $0x7c] sm:$0xf] %vm199_vm0, %v5187_v12  ;;  %5408 = vst [vmem:[#allocation2 + $0x80] sm:$0x1] %v5407_v51  ;;  %v5209_v54 = vrot.slane %v5207_v38, 7  ;;  %5840 = vrot.lane.b32.xlu1 %v19881_v32, %s17549_s30  ;;  %v4883_v3 = vadd.f32 %v19692_v50, %v4788_v41 }
 0x4d3   : > { %v19892_v10 = vrot.slane %v5190_v35, 7  ;;  %v15448_v26 = vpack.c.bf16 %v4914_v2, %v4914_v2  ;;  %v4912_v13 = vmax.f32 %v4880_v39, 0.0  ;;  %v19896_v6 = vpop.f32.mrb[29].mxu1  ;;  %v4917_v52 = vmax.f32 %v4885_v16, 0.0  ;;  %5576 = vrot.lane.b32.xlu0 %v19867_v63, %s17550_s7  ;;  %v5463_v22 = vld [vmem:[#allocation2 + $0x48] sm:$0xf] }
 0x4d4   : > { %v5170_v40 = vsel %vm17827_vm5, %v5162_v0, %v5169_v36  ;;  %v5400_v19 = vsel %vm17845_vm7, %v5171_v1, %v5399_v47  ;;  %v19905_v57 = vpop.f32.mrb[30].mxu1  ;;  %v5212_v62 = vor.u32 %v5210_v29, %v5209_v54  ;;  %v5213_v27 = vrot.slane %v5209_v54, 4  ;;  %v5420_v56 = vld [vmem:[#allocation2 + $0x98] sm:$0x1]  ;;  %v5413_v16 = vld [vmem:[#allocation2 + $0x8c] sm:$0x1] }
 0x4d5   : > { %5398 = vst.msk [vmem:[#allocation2 + $0x70] sm:$0xf] %vm199_vm0, %v5170_v40  ;;  %5401 = vst [vmem:[#allocation2 + $0x74] sm:$0x1] %v5400_v19  ;;  %v5195_v53 = vor.u32 %v5193_v58, %v19892_v10  ;;  %v19911_v0 = vpop.f32.mrb[31].mxu1  ;;  %v5196_v9 = vrot.slane %v19892_v10, 4  ;;  %v15446_v41 = vpack.c.bf16 %v4912_v13, %v4912_v13  ;;  %v15451_v59 = vpack.c.bf16 %v4917_v52, %v4917_v52 }
 0x4d6   : > { %v5215_v7 = vshrl.u32 %v15448_v26, 16  ;;  %v5417_v4 = vsel %vm17834_vm6, %v5212_v62, %v5416_v60  ;;  %v4915_v15 = vmax.f32 %v4883_v3, 0.0  ;;  %v19919_v23 = vcombine.low %v5463_v22, %v19903_v42  ;;  %v19929_v2 = vld [vmem:[#allocation2 + $0x50] ss:$0 sps:$4 sm:$0x11]  }
 0x4d7   : > { %v5410_v44 = vsel %vm17834_vm6, %v5195_v53, %v5409_v43  ;;  %5418 = vst [vmem:[#allocation2 + $0x90] sm:$0xf] %v5417_v4  ;;  %v5218_v17 = vshll.u32 %v15448_v26, 16  ;;  %v5198_v47 = vshrl.u32 %v15446_v41, 16  ;;  %v5241_v21 = vshrl.u32 %v15451_v59, 16  ;;  %5807 = vrot.lane.b32.xlu0 %v19881_v32, %s17550_s7 }
 0x4d8   : > { %5411 = vst [vmem:[#allocation2 + $0x84] sm:$0xf] %v5410_v44  ;;  %v5217_v34 = vrot.slane %v5215_v7, 7  ;;  %v5201_v39 = vshll.u32 %v15446_v41, 16  ;;  %v15449_v24 = vpack.c.bf16 %v4915_v15, %v4915_v15  ;;  %5582 = vrot.lane.b32.xlu1 %v19919_v23, %s17550_s7  ;;  %v4886_v31 = vadd.f32 %v19858_v14, %v19692_v50  ;;  %v5430_v10 = vld [vmem:[#allocation2 + $0xa8] sm:$0xf] }
 0x4d9   : > { %v4884_v48 = vadd.f32 %v19692_v50, %v19869_v33  ;;  %v5200_v35 = vrot.slane %v5198_v47, 7  ;;  %v5243_v58 = vrot.slane %v5241_v21, 7  ;;  %v5244_v12 = vshll.u32 %v15451_v59, 16  ;;  %v5423_v3 = vld [vmem:[#allocation2 + $0x9c] sm:$0xf] }
 0x4da   : > { %v5220_v38 = vor.u32 %v5218_v17, %v5217_v34  ;;  %v5222_v29 = vrot.slane %v5217_v34, 4  ;;  %v5224_v51 = vshrl.u32 %v15449_v24, 16  ;;  %v4918_v36 = vmax.f32 %v4886_v31, 0.0  ;;  %v19946_v53 = vld [vmem:[#allocation2 + $0x40] sm:$0xf] }
 0x4db   : > { %v4916_v1 = vmax.f32 %v4884_v48, 0.0  ;;  %v5203_v33 = vor.u32 %v5201_v39, %v5200_v35  ;;  %v5205_v54 = vrot.slane %v5200_v35, 4  ;;  %v5246_v43 = vor.u32 %v5244_v12, %v5243_v58  ;;  %5617 = vrot.lane.b32.xlu0 %v19919_v23, %s17549_s30  ;;  %v5461_v34 = vld [vmem:[#allocation2 + $0x3c] sm:$0xf] }
 0x4dc   : > { %v5221_v60 = vsel %vm17827_vm5, %v5213_v27, %v5220_v38  ;;  %v5421_v14 = vsel %vm17845_vm7, %v5222_v29, %v5420_v56  ;;  %v5226_v26 = vrot.slane %v5224_v51, 7  ;;  %v5227_v13 = vshll.u32 %v15449_v24, 16  ;;  %5813 = vrot.lane.b32.xlu1 %v19929_v2, %s17550_s7  ;;  %v5434_v56 = vld [vmem:[#allocation2 + $0xb0] sm:$0x1] }
 0x4dd   : > { %5419 = vst.msk [vmem:[#allocation2 + $0x94] sm:$0xf] %vm199_vm0, %v5221_v60  ;;  %5422 = vst [vmem:[#allocation2 + $0x98] sm:$0x1] %v5421_v14  ;;  %v15452_v40 = vpack.c.bf16 %v4918_v36, %v4918_v36  ;;  %v5204_v19 = vsel %vm17827_vm5, %v5196_v9, %v5203_v33  ;;  %v5414_v52 = vsel %vm17845_vm7, %v5205_v54, %v5413_v16  ;;  %v5247_v7 = vrot.slane %v5243_v58, 4 }
 0x4de   : > { %v15450_v62 = vpack.c.bf16 %v4916_v1, %v4916_v1  ;;  %v4889_v27 = vadd.f32 %v19889_v8, %v19692_v50  ;;  %5412 = vst.msk [vmem:[#allocation2 + $0x88] sm:$0xf] %vm199_vm0, %v5204_v19  ;;  %5415 = vst [vmem:[#allocation2 + $0x8c] sm:$0x1] %v5414_v52  ;;  %v5431_v41 = vsel %vm17834_vm6, %v5246_v43, %v5430_v10  ;;  %v5230_v48 = vrot.slane %v5226_v26, 4 }
 0x4df   : > { %v5229_v59 = vor.u32 %v5227_v13, %v5226_v26  ;;  %v5249_v22 = vshrl.u32 %v15452_v40, 16  ;;  %5432 = vst [vmem:[#allocation2 + $0xa8] sm:$0xf] %v5431_v41  ;;  %v5252_v9 = vshll.u32 %v15452_v40, 16  ;;  %v4887_v47 = vadd.f32 %v19692_v50, %v19896_v6  ;;  %5846 = vrot.lane.b32.xlu0 %v19929_v2, %s17549_s30  ;;  %v5427_v6 = vld [vmem:[#allocation2 + $0xa4] sm:$0x1] }
 0x4e0   : > { %v5232_v4 = vshrl.u32 %v15450_v62, 16  ;;  %v5235_v44 = vshll.u32 %v15450_v62, 16  ;;  %v4921_v15 = vmax.f32 %v4889_v27, 0.0  ;;  %v19956_v21 = vcombine.low %v5461_v34, %v19946_v53  ;;  %v19979_v43 = vld [vmem:[#allocation2 + $0x64] sm:$0xf] }
 0x4e1   : > { %v5424_v8 = vsel %vm17834_vm6, %v5229_v59, %v5423_v3  ;;  %v5251_v17 = vrot.slane %v5249_v22, 7  ;;  %v4890_v24 = vadd.f32 %v19905_v57, %v19692_v50  ;;  %v4888_v31 = vadd.f32 %v19692_v50, %v19911_v0  ;;  %v19970_v0 = vld [vmem:[#allocation2 + $0x44] ss:$0 sps:$4 sm:$0x11]   ;;  %v5444_v26 = vld [vmem:[#allocation2 + $0xc0] sm:$0xf] }
 0x4e2   : > { %5425 = vst [vmem:[#allocation2 + $0x9c] sm:$0xf] %v5424_v8  ;;  %v5234_v39 = vrot.slane %v5232_v4, 7  ;;  %v15455_v16 = vpack.c.bf16 %v4921_v15, %v4921_v15  ;;  %v4919_v35 = vmax.f32 %v4887_v47, 0.0  ;;  %5615 = vrot.lane.b32.xlu1 %v19956_v21, %s17549_s30  ;;  %v5467_v3 = vld [vmem:[#allocation2 + $0x60] sm:$0xf] }
 0x4e3   : > { %v5254_v38 = vor.u32 %v5252_v9, %v5251_v17  ;;  %v5256_v29 = vrot.slane %v5251_v17, 4  ;;  %v4922_v50 = vmax.f32 %v4890_v24, 0.0  ;;  %5580 = vrot.lane.b32.xlu0 %v19956_v21, %s17550_s7  ;;  %v4920_v10 = vmax.f32 %v4888_v31, 0.0  ;;  %v5437_v22 = vld [vmem:[#allocation2 + $0xb4] sm:$0xf] }
 0x4e4   : > { %v5237_v58 = vor.u32 %v5235_v44, %v5234_v39  ;;  %v5239_v12 = vrot.slane %v5234_v39, 4  ;;  %v5275_v51 = vshrl.u32 %v15455_v16, 16  ;;  %v5278_v36 = vshll.u32 %v15455_v16, 16  ;;  %v5448_v34 = vld [vmem:[#allocation2 + $0xc8] sm:$0x1] }
 0x4e5   : > { %v5255_v1 = vsel %vm17827_vm5, %v5247_v7, %v5254_v38  ;;  %v5435_v57 = vsel %vm17845_vm7, %v5256_v29, %v5434_v56  ;;  %v15453_v60 = vpack.c.bf16 %v4919_v35, %v4919_v35  ;;  %v15456_v40 = vpack.c.bf16 %v4922_v50, %v4922_v50  ;;  %v19993_v47 = vld [vmem:[#allocation2 + $0x68] ss:$0 sps:$4 sm:$0x11]   ;;  %v5441_v31 = vld [vmem:[#allocation2 + $0xbc] sm:$0x1] }
 0x4e6   : > { %5433 = vst.msk [vmem:[#allocation2 + $0xac] sm:$0xf] %vm199_vm0, %v5255_v1  ;;  %5436 = vst [vmem:[#allocation2 + $0xb0] sm:$0x1] %v5435_v57  ;;  %v5238_v14 = vsel %vm17827_vm5, %v5230_v48, %v5237_v58  ;;  %v5428_v33 = vsel %vm17845_vm7, %v5239_v12, %v5427_v6  ;;  %v5277_v54 = vrot.slane %v5275_v51, 7  ;;  %5844 = vrot.lane.b32.xlu1 %v19970_v0, %s17549_s30 }
 0x4e7   : > { %5426 = vst.msk [vmem:[#allocation2 + $0xa0] sm:$0xf] %vm199_vm0, %v5238_v14  ;;  %5429 = vst [vmem:[#allocation2 + $0xa4] sm:$0x1] %v5428_v33  ;;  %v5258_v13 = vshrl.u32 %v15453_v60, 16  ;;  %v15454_v52 = vpack.c.bf16 %v4920_v10, %v4920_v10  ;;  %v5261_v27 = vshll.u32 %v15453_v60, 16  ;;  %v19985_v41 = vcombine.low %v5467_v3, %v19979_v43  ;;  %5811 = vrot.lane.b32.xlu0 %v19970_v0, %s17550_s7 }
 0x4e8   : > { %v5280_v19 = vor.u32 %v5278_v36, %v5277_v54  ;;  %v5283_v7 = vshrl.u32 %v15456_v40, 16  ;;  %v5286_v15 = vshll.u32 %v15456_v40, 16  ;;  %v5281_v56 = vrot.slane %v5277_v54, 4  ;;  %v19999_v6 = vld [vmem:[#allocation2 + $0x58] sm:$0xf] }
 0x4e9   : > { %v5260_v62 = vrot.slane %v5258_v13, 7  ;;  %v5266_v9 = vshrl.u32 %v15454_v52, 16  ;;  %v5269_v17 = vshll.u32 %v15454_v52, 16  ;;  %v5465_v36 = vld [vmem:[#allocation2 + $0x54] sm:$0xf] }
 0x4ea   : > { %v5445_v59 = vsel %vm17834_vm6, %v5280_v19, %v5444_v26  ;;  %v5285_v44 = vrot.slane %v5283_v7, 7  ;;  %5586 = vrot.lane.b32.xlu1 %v19985_v41, %s17550_s7  ;;  %v20014_v1 = vcombine.low %v5465_v36, %v19999_v6  ;;  %v20020_v57 = vld [vmem:[#allocation2 + $0x5c] ss:$0 sps:$4 sm:$0x11]   ;;  %v5471_v50 = vld [vmem:[#allocation2 + $0x78] sm:$0xf] }
 0x4eb   : > { %5446 = vst [vmem:[#allocation2 + $0xc0] sm:$0xf] %v5445_v59  ;;  %v5263_v4 = vor.u32 %v5261_v27, %v5260_v62  ;;  %v5268_v8 = vrot.slane %v5266_v9, 7  ;;  %5621 = vrot.lane.b32.xlu0 %v19985_v41, %s17549_s30  ;;  %v5264_v48 = vrot.slane %v5260_v62, 4  ;;  %v20024_v60 = vld [vmem:[#allocation2 + $0x7c] sm:$0xf] }
 0x4ec   : > { %v5288_v16 = vor.u32 %v5286_v15, %v5285_v44  ;;  %v5290_v24 = vrot.slane %v5285_v44, 4  ;;  %v20029_v14 = vcombine.low %v5471_v50, %v20024_v60  ;;  %v20035_v33 = vld [vmem:[#allocation2 + $0x80] ss:$0 sps:$4 sm:$0x11]   ;;  %v20039_v54 = vld [vmem:[#allocation2 + $0x70] sm:$0xf] }
 0x4ed   : > { %v5438_v39 = vsel %vm17834_vm6, %v5263_v4, %v5437_v22  ;;  %v5271_v38 = vor.u32 %v5269_v17, %v5268_v8  ;;  %v5273_v29 = vrot.slane %v5268_v8, 4  ;;  %v5469_v10 = vld [vmem:[#allocation2 + $0x6c] sm:$0xf]  ;;  %v20046_v26 = vld [vmem:[%s23693_s1 + $0x120] sm:$0xff]   ;;  %v20060_v19 = vld [vmem:[#allocation2 + $0x94] sm:$0xf] }
 0x4ee   : > { %5439 = vst [vmem:[#allocation2 + $0xb4] sm:$0xf] %v5438_v39  ;;  %v5289_v35 = vsel %vm17827_vm5, %v5281_v56, %v5288_v16  ;;  %v5449_v58 = vsel %vm17845_vm7, %v5290_v24, %v5448_v34  ;;  %5817 = vrot.lane.b32.xlu1 %v19993_v47, %s17550_s7  ;;  %v20049_v13 = vcombine.low %v5469_v10, %v20039_v54  ;;  %v20056_v40 = vld [vmem:[#allocation2 + $0x74] ss:$0 sps:$4 sm:$0x11]   ;;  %v20124_v16 = vpop.permute.xlu1 %5639 }
 0x4ef   : > { %5447 = vst.msk [vmem:[#allocation2 + $0xc4] sm:$0xf] %vm199_vm0, %v5289_v35  ;;  %5450 = vst [vmem:[#allocation2 + $0xc8] sm:$0x1] %v5449_v58  ;;  %v5272_v12 = vsel %vm17827_vm5, %v5264_v48, %v5271_v38  ;;  %v5442_v51 = vsel %vm17845_vm7, %v5273_v29, %v5441_v31  ;;  %5850 = vrot.lane.b32.xlu0 %v19993_v47, %s17549_s30  ;;  %16257 = vmatprep.subr.bf16.mxu0 %v20046_v26  ;;  %v5475_v52 = vld [vmem:[#allocation2 + $0x90] sm:$0xf] }
 0x4f0   : > { %5440 = vst.msk [vmem:[#allocation2 + $0xb8] sm:$0xf] %vm199_vm0, %v5272_v12  ;;  %5443 = vst [vmem:[#allocation2 + $0xbc] sm:$0x1] %v5442_v51  ;;  %v20065_v3 = vcombine.low %v5475_v52, %v20060_v19  ;;  %v20075_v27 = vld [vmem:[#allocation2 + $0x88] sm:$0xf] }
 0x4f1   : > { %v20071_v62 = vld [vmem:[#allocation2 + $0x98] ss:$0 sps:$4 sm:$0x11]   ;;  %v5473_v7 = vld [vmem:[#allocation2 + $0x84] sm:$0xf] }
 0x4f2   : > { %5619 = vrot.lane.b32.xlu1 %v20014_v1, %s17549_s30  ;;  %v20080_v59 = vcombine.low %v5473_v7, %v20075_v27  ;;  %v20086_v22 = vld [vmem:[#allocation2 + $0x8c] ss:$0 sps:$4 sm:$0x11]   ;;  %v5479_v4 = vld [vmem:[#allocation2 + $0xa8] sm:$0xf] }
 0x4f3   : > { %5584 = vrot.lane.b32.xlu0 %v20014_v1, %s17550_s7  ;;  %v20090_v9 = vld [vmem:[#allocation2 + $0xac] sm:$0xf]  ;;  %v20101_v15 = vld [vmem:[#allocation2 + $0xb0] ss:$0 sps:$4 sm:$0x11]  }
 0x4f4   : > { %v20095_v44 = vcombine.low %v5479_v4, %v20090_v9  ;;  %23779 = vst [vmem:[#allocation6_spill] sm:$0xff] %v20101_v15  ;;  %v20105_v34 = vld [vmem:[#allocation2 + $0xa0] sm:$0xf]  ;;  %v5477_v8 = vld [vmem:[#allocation2 + $0x9c] sm:$0xf] }
 0x4f5   : > { %v20110_v17 = vcombine.low %v5477_v8, %v20105_v34  ;;  %v20116_v56 = vld [vmem:[#allocation2 + $0xa4] ss:$0 sps:$4 sm:$0x11]   ;;  %v5483_v24 = vld [vmem:[#allocation2 + $0xc0] sm:$0xf] }
 0x4f6   : > { %5848 = vrot.lane.b32.xlu1 %v20020_v57, %s17549_s30  ;;  %v20120_v39 = vld [vmem:[#allocation2 + $0xc4] sm:$0xf]  ;;  %v5481_v38 = vld [vmem:[#allocation2 + $0xb4] sm:$0xf]  ;;  %v5451_v12 = vld [vmem:[#allocation2] sm:$0xf] }
 0x4f7   : > { %5815 = vrot.lane.b32.xlu0 %v20020_v57, %s17550_s7  ;;  %v14691_v31 = vcombine.low %v5483_v24, %v20120_v39  ;;  %v20129_v48 = vld [vmem:[#allocation2 + $0xb8] sm:$0xf]  ;;  %v20138_v51 = vld [vmem:[#allocation2 + $0xbc] ss:$0 sps:$4 sm:$0x11]  }
 0x4f8   : > { %v20133_v29 = vcombine.low %v5481_v38, %v20129_v48  ;;  %23780 = vst [vmem:[#allocation7_spill] sm:$0xff] %v20138_v51  ;;  %v20142_v50 = vld [vmem:[#allocation2 + $0x4] sm:$0xf]  ;;  %v17290_v7 = vld [vmem:[#allocation2 + $0xc8] ss:$0 sps:$4 sm:$0x11]  }
 0x4f9   : > { %23781 = vst [vmem:[#allocation8_spill] sm:$0xff] %v20142_v50  ;;  %v14675_v52 = vcombine.low %v5451_v12, %v20142_v50  ;;  %v17292_v4 = vld [vmem:[#allocation2 + $0xd4] ss:$0 sps:$4 sm:$0x11]   ;;  %v20160_v50 = vcombine.low %v6598_v18, %v19796_v55 }
 0x4fa   : > { %5590 = vrot.lane.b32.xlu1 %v20029_v14, %s17550_s7 }
 0x4fb   : > { %5625 = vrot.lane.b32.xlu0 %v20029_v14, %s17549_s30 }
 0x4fe   : > { %5821 = vrot.lane.b32.xlu1 %v20035_v33, %s17550_s7 }
 0x4ff   : > { %5854 = vrot.lane.b32.xlu0 %v20035_v33, %s17549_s30 }
 0x502   : > { %5623 = vrot.lane.b32.xlu1 %v20049_v13, %s17549_s30 }
 0x503   : > { %5588 = vrot.lane.b32.xlu0 %v20049_v13, %s17550_s7 }
 0x506   : > { %5852 = vrot.lane.b32.xlu1 %v20056_v40, %s17549_s30 }
 0x507   : > { %5819 = vrot.lane.b32.xlu0 %v20056_v40, %s17550_s7 }
 0x50a   : > { %5594 = vrot.lane.b32.xlu1 %v20065_v3, %s17550_s7 }
 0x50b   : > { %5629 = vrot.lane.b32.xlu0 %v20065_v3, %s17549_s30 }
 0x50e   : > { %5825 = vrot.lane.b32.xlu1 %v20071_v62, %s17550_s7 }
 0x50f   : > { %5858 = vrot.lane.b32.xlu0 %v20071_v62, %s17549_s30 }
 0x512   : > { %5627 = vrot.lane.b32.xlu1 %v20080_v59, %s17549_s30 }
 0x513   : > { %5592 = vrot.lane.b32.xlu0 %v20080_v59, %s17550_s7 }
 0x516   : > { %5856 = vrot.lane.b32.xlu1 %v20086_v22, %s17549_s30 }
 0x517   : > { %5823 = vrot.lane.b32.xlu0 %v20086_v22, %s17550_s7 }
 0x51a   : > { %5598 = vrot.lane.b32.xlu1 %v20095_v44, %s17550_s7 }
 0x51b   : > { %5633 = vrot.lane.b32.xlu0 %v20095_v44, %s17549_s30 }
 0x51e   : > { %5829 = vrot.lane.b32.xlu1 %v20101_v15, %s17550_s7 }
 0x51f   : > { %5862 = vrot.lane.b32.xlu0 %v20101_v15, %s17549_s30  ;;  %v6599_v15 = vld [vmem:[#allocation2 + $0x18] sm:$0xe] }
 0x522   : > { %5631 = vrot.lane.b32.xlu1 %v20110_v17, %s17549_s30 }
 0x523   : > { %5596 = vrot.lane.b32.xlu0 %v20110_v17, %s17550_s7 }
 0x526   : > { %5860 = vrot.lane.b32.xlu1 %v20116_v56, %s17549_s30 }
 0x527   : > { %5827 = vrot.lane.b32.xlu0 %v20116_v56, %s17550_s7 }
 0x52a   : > { %5602 = vrot.lane.b32.xlu1 %v14691_v31, %s17550_s7 }
 0x52b   : > { %5637 = vrot.lane.b32.xlu0 %v14691_v31, %s17549_s30  ;;  %v17296_v31 = vld [vmem:[#allocation2 + $0x8] ss:$0 sps:$4 sm:$0x11]  }
 0x52c   : > { %v5575_v35 = vpop.permute.xlu1 %5574  ;;  %v5610_v58 = vpop.permute.xlu0 %5609 }
 0x52e   : > { %5635 = vrot.lane.b32.xlu1 %v20133_v29, %s17549_s30 }
 0x52f   : > { %5600 = vrot.lane.b32.xlu0 %v20133_v29, %s17550_s7 }
 0x530   : > { %v5839_v36 = vpop.permute.xlu0 %5838  ;;  %v5806_v10 = vpop.permute.xlu1 %5805 }
 0x532   : > { %5864 = vrot.lane.b32.xlu1 %v20138_v51, %s17549_s30 }
 0x533   : > { %5831 = vrot.lane.b32.xlu0 %v20138_v51, %s17550_s7 }
 0x535   : > { %v5573_v8 = vpop.permute.xlu0 %5572  ;;  %v20151_v38 = vpop.permute.xlu1 %5578 }
 0x536   : > { %5833 = vrot.lane.b32.xlu1 %v17290_v7, %s17550_s7  ;;  %v5643_v24 = vsel %vm972_vm8, %v14675_v52, %v5573_v8  ;;  %v20164_v8 = vcombine.low %v6599_v15, %v19738_v25  ;;  %v5646_v15 = vsel %vm972_vm8, %v19811_v46, %v5575_v35  ;;  %v6601_v35 = vld [vmem:[#allocation2 + $0x30] sm:$0xe] }
 0x537   : > { %v20154_v45 = vsel %vm1021_vm9, %v5643_v24, %v5610_v58  ;;  %5866 = vrot.lane.b32.xlu0 %v17290_v7, %s17549_s30  ;;  %v6600_v24 = vld [vmem:[#allocation2 + $0x24] sm:$0xe] }
 0x538   : > { %v5952_v12 = vshll.u32 %v20154_v45, 16 }
 0x539   : > { %v5804_v20 = vpop.permute.xlu0 %5803 }
 0x53a   : > { %5868 = vrot.lane.b32.xlu1 %v17292_v4, %s17549_s30  ;;  %v5954_v51 = vrot.slane %v5952_v12, 1  ;;  %v5872_v52 = vsel %vm972_vm8, %v17296_v31, %v5804_v20  ;;  %v5950_v4 = vshrl.u32 %v20154_v45, 16 }
 0x53b   : > { %v20166_v58 = vpop.permute.xlu1 %5809  ;;  %v20169_v7 = vsel %vm1021_vm9, %v5872_v52, %v5839_v36  ;;  %6666 = vrot.lane.b32.xlu0 %v20160_v50, %s17550_s7  ;;  %v20180_v36 = vcombine.low %v6600_v24, %v19851_v61  ;;  %v5875_v61 = vsel %vm972_vm8, %v19827_v49, %v5806_v10  ;;  %v6602_v49 = vld [vmem:[#allocation2 + $0x3c] sm:$0xe] }
 0x53c   : > { %v5956_v18 = vshll.u32 %v20169_v7, 16  ;;  %v5955_v25 = vor.u32 %v5954_v51, %v5950_v4 }
 0x53d   : > { %v5614_v55 = vpop.permute.xlu0 %5613  ;;  %23782 = vst [vmem:[#allocation9_spill] sm:$0xff] %v20180_v36 }
 0x53e   : > { %6668 = vrot.lane.b32.xlu1 %v20164_v8, %s17550_s7  ;;  %v5958_v20 = vrot.slane %v5956_v18, 1  ;;  %v20195_v18 = vcombine.low %v6601_v35, %v19804_v28 }
 0x53f   : > { %6701 = vrot.lane.b32.xlu0 %v20164_v8, %s17549_s30 }
 0x540   : > { %v5612_v31 = vpop.permute.xlu1 %5611  ;;  %v5959_v52 = vsel %vm1282_vm10, %v5955_v25, %v5958_v20 }
 0x541   : > { %v20185_v12 = vsel %vm1021_vm9, %v5646_v15, %v5612_v31  ;;  %16225 = vmatprep.mubr.msk.bf16.mxu0 %vm1492_vm11, %v5959_v52  ;;  %v5843_v46 = vpop.permute.xlu0 %5842 }
 0x542   : > { %6703 = vrot.lane.b32.xlu1 %v20180_v36, %s17549_s30  ;;  %v5962_v51 = vshll.u32 %v20185_v12, 16  ;;  %v5960_v25 = vshrl.u32 %v20185_v12, 16 }
 0x543   : > { %6670 = vrot.lane.b32.xlu0 %v20180_v36, %s17550_s7 }
 0x544   : > { %v5964_v4 = vrot.slane %v5962_v51, 1  ;;  %v5841_v24 = vpop.permute.xlu1 %5840  ;;  %v20209_v51 = vcombine.low %v6602_v49, %v19946_v53 }
 0x545   : > { %v20200_v20 = vsel %vm1021_vm9, %v5875_v61, %v5841_v24  ;;  %v5577_v31 = vpop.permute.xlu0 %5576  ;;  %v17311_v24 = vld [vmem:[%s23693_s1 + $0x128] sm:$0xff]  }
 0x546   : > { %6672 = vrot.lane.b32.xlu1 %v20195_v18, %s17550_s7  ;;  %v5966_v15 = vshll.u32 %v20200_v20, 16  ;;  %v5649_v28 = vsel %vm972_vm8, %v19758_v37, %v5577_v31  ;;  %v5965_v10 = vor.u32 %v5964_v4, %v5960_v25 }
 0x547   : > { %v20212_v35 = vsel %vm1021_vm9, %v5649_v28, %v5614_v55  ;;  %6705 = vrot.lane.b32.xlu0 %v20195_v18, %s17549_s30  ;;  %v6603_v55 = vld [vmem:[#allocation2 + $0x48] sm:$0xe] }
 0x548   : > { %v5968_v52 = vrot.slane %v5966_v15, 1  ;;  %v5972_v61 = vshll.u32 %v20212_v35, 16  ;;  %v20229_v15 = vcombine.low %v6603_v55, %v19903_v42  ;;  %v5970_v49 = vshrl.u32 %v20212_v35, 16  ;;  %v6605_v55 = vld [vmem:[#allocation2 + $0x60] sm:$0xe] }
 0x549   : > { %v5808_v53 = vpop.permute.xlu0 %5807 }
 0x54a   : > { %v5969_v36 = vsel %vm1282_vm10, %v5965_v10, %v5968_v52  ;;  %6707 = vrot.lane.b32.xlu1 %v20209_v51, %s17549_s30  ;;  %v20223_v37 = vpop.permute.xlu1 %5582  ;;  %v5974_v4 = vrot.slane %v5972_v61, 1  ;;  %v5878_v25 = vsel %vm972_vm8, %v19769_v30, %v5808_v53  ;;  %v17312_v30 = vld [vmem:[%s23693_s1 + $0x130] sm:$0xff]   ;;  %v17313_v53 = vld [vmem:[%s23693_s1 + $0x138] sm:$0xff]  }
 0x54b   : > { %16226 = vmatmul.mubr.msk.bf16.vlgmr.msra.gmra.mrb[32].mxu0 %vm1492_vm11, %v5969_v36  ;;  %v20232_v31 = vsel %vm1021_vm9, %v5878_v25, %v5843_v46  ;;  %6674 = vrot.lane.b32.xlu0 %v20209_v51, %s17550_s7  ;;  %v6604_v10 = vld [vmem:[#allocation2 + $0x54] sm:$0xe] }
 0x54c   : > { %16258 = vmatpush3.bf16.msra.mxu0 %v20046_v26  ;;  %v5976_v28 = vshll.u32 %v20232_v31, 16  ;;  %v5975_v52 = vor.u32 %v5974_v4, %v5970_v49  ;;  %v20247_v26 = vcombine.low %v6604_v10, %v19999_v6  ;;  %v5652_v6 = vsel %vm972_vm8, %v19867_v63, %v20151_v38 }
 0x54d   : > { %16259 = vmatprep.subr.bf16.mxu0 %v17311_v24  ;;  %v5618_v36 = vpop.permute.xlu0 %5617 }
 0x54e   : > { %6676 = vrot.lane.b32.xlu1 %v20229_v15, %s17550_s7  ;;  %v20244_v42 = vpop.permute.xlu1 %5813  ;;  %v5978_v46 = vrot.slane %v5976_v28, 1  ;;  %v17314_v28 = vld [vmem:[%s23693_s1 + $0x140] sm:$0xff]  }
 0x54f   : > { %6709 = vrot.lane.b32.xlu0 %v20229_v15, %s17549_s30 }
 0x550   : > { %16260 = vmatpush3.bf16.msra.mxu0 %v17311_v24  ;;  %v5979_v61 = vsel %vm1282_vm10, %v5975_v52, %v5978_v46  ;;  %v20262_v24 = vcombine.low %v6605_v55, %v19979_v43  ;;  %v6606_v43 = vld [vmem:[#allocation2 + $0x6c] sm:$0xe] }
 0x551   : > { %16261 = vmatprep.subr.bf16.mxu0 %v17312_v30  ;;  %16229 = vmatprep.mubr.msk.bf16.mxu0 %vm1492_vm11, %v5979_v61  ;;  %v5847_v4 = vpop.permute.xlu0 %5846  ;;  %v20281_v61 = vcombine.low %v6606_v43, %v20039_v54 }
 0x552   : > { %6711 = vrot.lane.b32.xlu1 %v20247_v26, %s17549_s30  ;;  %23783 = vst [vmem:[#allocation10_spill] sm:$0xff] %v20262_v24 }
 0x553   : > { %6678 = vrot.lane.b32.xlu0 %v20247_v26, %s17550_s7 }
 0x554   : > { %v5616_v25 = vpop.permute.xlu1 %5615  ;;  %16262 = vmatpush3.bf16.msra.mxu0 %v17312_v30  ;;  %v5881_v30 = vsel %vm972_vm8, %v19881_v32, %v20166_v58  ;;  %v17316_v32 = vld [vmem:[%s23693_s1 + $0x148] sm:$0xff]  }
 0x555   : > { %v20267_v49 = vsel %vm1021_vm9, %v5652_v6, %v5616_v25  ;;  %16263 = vmatprep.subr.bf16.mxu0 %v17313_v53  ;;  %v5581_v63 = vpop.permute.xlu0 %5580 }
 0x556   : > { %v5982_v46 = vshll.u32 %v20267_v49, 16  ;;  %6680 = vrot.lane.b32.xlu1 %v20262_v24, %s17550_s7  ;;  %v5655_v38 = vsel %vm972_vm8, %v19821_v5, %v5581_v63  ;;  %v5980_v54 = vshrl.u32 %v20267_v49, 16 }
 0x557   : > { %v20284_v55 = vsel %vm1021_vm9, %v5655_v38, %v5618_v36  ;;  %6713 = vrot.lane.b32.xlu0 %v20262_v24, %s17549_s30 }
 0x558   : > { %v5984_v10 = vrot.slane %v5982_v46, 1  ;;  %v5845_v52 = vpop.permute.xlu1 %5844  ;;  %16264 = vmatpush3.bf16.msra.mxu0 %v17313_v53  ;;  %v5992_v5 = vshll.u32 %v20284_v55, 16  ;;  %v6607_v53 = vld [vmem:[#allocation2 + $0x78] sm:$0xe] }
 0x559   : > { %v20289_v6 = vsel %vm1021_vm9, %v5881_v30, %v5845_v52  ;;  %16265 = vmatprep.subr.bf16.mxu0 %v17314_v28  ;;  %v5812_v36 = vpop.permute.xlu0 %5811  ;;  %v20304_v30 = vcombine.low %v6607_v53, %v20024_v60 }
 0x55a   : > { %v5986_v58 = vshll.u32 %v20289_v6, 16  ;;  %6715 = vrot.lane.b32.xlu1 %v20281_v61, %s17549_s30  ;;  %v5994_v25 = vrot.slane %v5992_v5, 1  ;;  %v5884_v46 = vsel %vm972_vm8, %v19843_v11, %v5812_v36  ;;  %v5985_v63 = vor.u32 %v5984_v10, %v5980_v54  ;;  %v20316_v11 = vld [vmem:[%s23693_s1 + $0x180] sm:$0xff]  }
 0x55b   : > { %v20307_v52 = vsel %vm1021_vm9, %v5884_v46, %v5847_v4  ;;  %6682 = vrot.lane.b32.xlu0 %v20281_v61, %s17550_s7  ;;  %v5990_v5 = vshrl.u32 %v20284_v55, 16 }
 0x55c   : > { %v5988_v43 = vrot.slane %v5986_v58, 1  ;;  %v20301_v38 = vpop.permute.xlu1 %5586  ;;  %16266 = vmatpush3.bf16.msra.mxu0 %v17314_v28  ;;  %v5996_v24 = vshll.u32 %v20307_v52, 16  ;;  %v6608_v28 = vld [vmem:[#allocation2 + $0x84] sm:$0xe] }
 0x55d   : > { %16267 = vmatprep.subr.bf16.mxu0 %v17316_v32  ;;  %v5622_v4 = vpop.permute.xlu0 %5621  ;;  %v5995_v54 = vor.u32 %v5994_v25, %v5990_v5  ;;  %v20325_v36 = vcombine.low %v6608_v28, %v20075_v27  ;;  %v6609_v25 = vld [vmem:[#allocation2 + $0x90] sm:$0xe]  ;;  %v5658_v27 = vsel %vm972_vm8, %v19956_v21, %v20223_v37 }
 0x55e   : > { %6684 = vrot.lane.b32.xlu1 %v20304_v30, %s17550_s7  ;;  %v5989_v60 = vsel %vm1282_vm10, %v5985_v63, %v5988_v43  ;;  %v5998_v10 = vrot.slane %v5996_v24, 1  ;;  %v20338_v63 = vcombine.low %v6609_v25, %v20060_v19  ;;  %v5887_v19 = vsel %vm972_vm8, %v19970_v0, %v20244_v42 }
 0x55f   : > { %16230 = vmatmul.mubr.msk.bf16.gmra.mrb[36].mxu0 %vm1492_vm11, %v5989_v60  ;;  %6717 = vrot.lane.b32.xlu0 %v20304_v30, %s17549_s30  ;;  %v6610_v60 = vld [vmem:[#allocation2 + $0x9c] sm:$0xe] }
 0x560   : > { %v20322_v58 = vpop.permute.xlu1 %5817  ;;  %16268 = vmatpush3.bf16.msra.mxu0 %v17316_v32  ;;  %v5999_v53 = vsel %vm1282_vm10, %v5995_v54, %v5998_v10  ;;  %v20354_v28 = vcombine.low %v6610_v60, %v20105_v34 }
 0x561   : > { %16301 = vmatprep.subr.bf16.mxu0 %v20316_v11  ;;  %16233 = vmatprep.mubr.msk.bf16.mxu0 %vm1492_vm11, %v5999_v53  ;;  %v5851_v24 = vpop.permute.xlu0 %5850 }
 0x562   : > { %6719 = vrot.lane.b32.xlu1 %v20325_v36, %s17549_s30 }
 0x563   : > { %6686 = vrot.lane.b32.xlu0 %v20325_v36, %s17550_s7 }
 0x564   : > { %v5620_v46 = vpop.permute.xlu1 %5619 }
 0x565   : > { %v20343_v32 = vsel %vm1021_vm9, %v5658_v27, %v5620_v46  ;;  %v5585_v5 = vpop.permute.xlu0 %5584  ;;  %v6611_v27 = vld [vmem:[#allocation2 + $0xa8] sm:$0xe] }
 0x566   : > { %v6002_v43 = vshll.u32 %v20343_v32, 16  ;;  %6688 = vrot.lane.b32.xlu1 %v20338_v63, %s17550_s7  ;;  %v5661_v21 = vsel %vm972_vm8, %v19919_v23, %v5585_v5  ;;  %v6000_v25 = vshrl.u32 %v20343_v32, 16  ;;  %v20372_v60 = vcombine.low %v6611_v27, %v20090_v9 }
 0x567   : > { %v20357_v54 = vsel %vm1021_vm9, %v5661_v21, %v5622_v4  ;;  %6721 = vrot.lane.b32.xlu0 %v20338_v63, %s17549_s30 }
 0x568   : > { %v6004_v37 = vrot.slane %v6002_v43, 1  ;;  %v5849_v10 = vpop.permute.xlu1 %5848  ;;  %v6012_v23 = vshll.u32 %v20357_v54, 16 }
 0x569   : > { %v20362_v53 = vsel %vm1021_vm9, %v5887_v19, %v5849_v10  ;;  %v5816_v34 = vpop.permute.xlu0 %5815  ;;  %v6010_v19 = vshrl.u32 %v20357_v54, 16 }
 0x56a   : > { %v6006_v0 = vshll.u32 %v20362_v53, 16  ;;  %6723 = vrot.lane.b32.xlu1 %v20354_v28, %s17549_s30  ;;  %v6014_v42 = vrot.slane %v6012_v23, 1  ;;  %v5890_v4 = vsel %vm972_vm8, %v19929_v2, %v5816_v34  ;;  %v6005_v46 = vor.u32 %v6004_v37, %v6000_v25  ;;  %v6612_v23 = vld [vmem:[#allocation2 + $0xb4] sm:$0xe] }
 0x56b   : > { %v20375_v21 = vsel %vm1021_vm9, %v5890_v4, %v5851_v24  ;;  %6690 = vrot.lane.b32.xlu0 %v20354_v28, %s17550_s7  ;;  %v6613_v4 = vld [vmem:[#allocation2 + $0xc0] sm:$0xe] }
 0x56c   : > { %v6008_v43 = vrot.slane %v6006_v0, 1  ;;  %v5591_v5 = vpop.permute.xlu1 %5590  ;;  %v6016_v10 = vshll.u32 %v20375_v21, 16  ;;  %v6015_v25 = vor.u32 %v6014_v42, %v6010_v19  ;;  %v20386_v0 = vcombine.low %v6612_v23, %v20129_v48 }
 0x56d   : > { %v5626_v37 = vpop.permute.xlu0 %5625  ;;  %v5664_v42 = vsel %vm972_vm8, %v20014_v1, %v20301_v38  ;;  %v14795_v48 = vcombine.low %v6613_v4, %v20120_v39  ;;  %v5893_v1 = vsel %vm972_vm8, %v20020_v57, %v20322_v58 }
 0x56e   : > { %6692 = vrot.lane.b32.xlu1 %v20372_v60, %s17550_s7  ;;  %v6009_v2 = vsel %vm1282_vm10, %v6005_v46, %v6008_v43  ;;  %v6018_v9 = vrot.slane %v6016_v10, 1  ;;  %23784 = vst [vmem:[#allocation11_spill] sm:$0xff] %v20386_v0  ;;  %v6614_v46 = vld [vmem:[#allocation2 + $0xcc] sm:$0xe] }
 0x56f   : > { %16234 = vmatmul.mubr.msk.bf16.gmra.mrb[40].mxu0 %vm1492_vm11, %v6009_v2  ;;  %6725 = vrot.lane.b32.xlu0 %v20372_v60, %s17549_s30  ;;  %v17536_v2 = vld [vmem:[#allocation2 + $0xd0] sm:$0xf] }
 0x570   : > { %v5822_v24 = vpop.permute.xlu1 %5821  ;;  %v6019_v34 = vsel %vm1282_vm10, %v6015_v25, %v6018_v9  ;;  %v14796_v9 = vcombine.low %v6614_v46, %v17536_v2 }
 0x571   : > { %16237 = vmatprep.mubr.msk.bf16.mxu0 %vm1492_vm11, %v6019_v34  ;;  %v5855_v27 = vpop.permute.xlu0 %5854 }
 0x572   : > { %6727 = vrot.lane.b32.xlu1 %v20386_v0, %s17549_s30 }
 0x573   : > { %6694 = vrot.lane.b32.xlu0 %v20386_v0, %s17550_s7 }
 0x574   : > { %v5624_v43 = vpop.permute.xlu1 %5623 }
 0x575   : > { %v20401_v19 = vsel %vm1021_vm9, %v5664_v42, %v5624_v43  ;;  %v5589_v23 = vpop.permute.xlu0 %5588 }
 0x576   : > { %v6022_v10 = vshll.u32 %v20401_v19, 16  ;;  %6696 = vrot.lane.b32.xlu1 %v14795_v48, %s17550_s7  ;;  %v5667_v25 = vsel %vm972_vm8, %v19985_v41, %v5589_v23  ;;  %v6020_v42 = vshrl.u32 %v20401_v19, 16 }
 0x577   : > { %v20411_v34 = vsel %vm1021_vm9, %v5667_v25, %v5626_v37  ;;  %6729 = vrot.lane.b32.xlu0 %v14795_v48, %s17549_s30 }
 0x578   : > { %v6024_v39 = vrot.slane %v6022_v10, 1  ;;  %v5853_v38 = vpop.permute.xlu1 %5852  ;;  %v6032_v46 = vshll.u32 %v20411_v34, 16  ;;  %v6030_v23 = vshrl.u32 %v20411_v34, 16 }
 0x579   : > { %v20415_v4 = vsel %vm1021_vm9, %v5893_v1, %v5853_v38  ;;  %v5820_v43 = vpop.permute.xlu0 %5819 }
 0x57a   : > { %v6026_v41 = vshll.u32 %v20415_v4, 16  ;;  %6731 = vrot.lane.b32.xlu1 %v14796_v9, %s17549_s30  ;;  %v6034_v57 = vrot.slane %v6032_v46, 1  ;;  %v5896_v58 = vsel %vm972_vm8, %v19993_v47, %v5820_v43  ;;  %v6025_v37 = vor.u32 %v6024_v39, %v6020_v42 }
 0x57b   : > { %v20424_v48 = vsel %vm1021_vm9, %v5896_v58, %v5855_v27  ;;  %v5670_v27 = vsel %vm972_vm8, %v20049_v13, %v5591_v5 }
 0x57c   : > { %v6028_v10 = vrot.slane %v6026_v41, 1  ;;  %v5595_v2 = vpop.permute.xlu1 %5594  ;;  %v6036_v25 = vshll.u32 %v20424_v48, 16  ;;  %v6035_v46 = vor.u32 %v6034_v57, %v6030_v23  ;;  %v5899_v57 = vsel %vm972_vm8, %v20056_v40, %v5822_v24 }
 0x57d   : > { %v5630_v38 = vpop.permute.xlu0 %5629 }
 0x57e   : > { %v6029_v1 = vsel %vm1282_vm10, %v6025_v37, %v6028_v10  ;;  %v6038_v9 = vrot.slane %v6036_v25, 1 }
 0x57f   : > { %16238 = vmatmul.mubr.msk.bf16.gmra.mrb[44].mxu0 %vm1492_vm11, %v6029_v1 }
 0x580   : > { %v5826_v0 = vpop.permute.xlu1 %5825  ;;  %v6039_v47 = vsel %vm1282_vm10, %v6035_v46, %v6038_v9 }
 0x581   : > { %16241 = vmatprep.mubr.msk.bf16.mxu0 %vm1492_vm11, %v6039_v47  ;;  %v5859_v39 = vpop.permute.xlu0 %5858 }
 0x584   : > { %v5628_v42 = vpop.permute.xlu1 %5627 }
 0x585   : > { %v20435_v41 = vsel %vm1021_vm9, %v5670_v27, %v5628_v42  ;;  %v5593_v58 = vpop.permute.xlu0 %5592 }
 0x586   : > { %v6042_v43 = vshll.u32 %v20435_v41, 16  ;;  %v5673_v37 = vsel %vm972_vm8, %v20029_v14, %v5593_v58  ;;  %v6040_v1 = vshrl.u32 %v20435_v41, 16 }
 0x587   : > { %v20443_v25 = vsel %vm1021_vm9, %v5673_v37, %v5630_v38 }
 0x588   : > { %v6044_v10 = vrot.slane %v6042_v43, 1  ;;  %v5857_v23 = vpop.permute.xlu1 %5856  ;;  %v6052_v5 = vshll.u32 %v20443_v25, 16  ;;  %v6050_v42 = vshrl.u32 %v20443_v25, 16 }
 0x589   : > { %v20446_v13 = vsel %vm1021_vm9, %v5899_v57, %v5857_v23  ;;  %v5824_v46 = vpop.permute.xlu0 %5823 }
 0x58a   : > { %v6046_v9 = vshll.u32 %v20446_v13, 16  ;;  %v6054_v47 = vrot.slane %v6052_v5, 1  ;;  %v5902_v14 = vsel %vm972_vm8, %v20035_v33, %v5824_v46  ;;  %v6045_v40 = vor.u32 %v6044_v10, %v6040_v1 }
 0x58b   : > { %v20454_v38 = vsel %vm1021_vm9, %v5902_v14, %v5859_v39  ;;  %v5676_v39 = vsel %vm972_vm8, %v20080_v59, %v5595_v2 }
 0x58c   : > { %v6048_v24 = vrot.slane %v6046_v9, 1  ;;  %v5599_v27 = vpop.permute.xlu1 %5598  ;;  %v6056_v43 = vshll.u32 %v20454_v38, 16  ;;  %v6055_v23 = vor.u32 %v6054_v47, %v6050_v42  ;;  %v5905_v47 = vsel %vm972_vm8, %v20086_v22, %v5826_v0 }
 0x58d   : > { %v5634_v37 = vpop.permute.xlu0 %5633 }
 0x58e   : > { %v6049_v58 = vsel %vm1282_vm10, %v6045_v40, %v6048_v24  ;;  %v6058_v57 = vrot.slane %v6056_v43, 1 }
 0x58f   : > { %16242 = vmatmul.mubr.msk.bf16.gmra.mrb[48].mxu0 %vm1492_vm11, %v6049_v58 }
 0x590   : > { %v5830_v5 = vpop.permute.xlu1 %5829  ;;  %v6059_v33 = vsel %vm1282_vm10, %v6055_v23, %v6058_v57 }
 0x591   : > { %16245 = vmatprep.mubr.msk.bf16.mxu0 %vm1492_vm11, %v6059_v33  ;;  %v5863_v10 = vpop.permute.xlu0 %5862 }
 0x594   : > { %v5632_v1 = vpop.permute.xlu1 %5631 }
 0x595   : > { %v20465_v9 = vsel %vm1021_vm9, %v5676_v39, %v5632_v1  ;;  %v5597_v14 = vpop.permute.xlu0 %5596 }
 0x596   : > { %v6062_v46 = vshll.u32 %v20465_v9, 16  ;;  %v5679_v40 = vsel %vm972_vm8, %v20065_v3, %v5597_v14  ;;  %v6060_v58 = vshrl.u32 %v20465_v9, 16 }
 0x597   : > { %v20473_v43 = vsel %vm1021_vm9, %v5679_v40, %v5634_v37 }
 0x598   : > { %v6064_v24 = vrot.slane %v6062_v46, 1  ;;  %v5861_v42 = vpop.permute.xlu1 %5860  ;;  %v6072_v2 = vshll.u32 %v20473_v43, 16  ;;  %v6070_v1 = vshrl.u32 %v20473_v43, 16 }
 0x599   : > { %v20476_v59 = vsel %vm1021_vm9, %v5905_v47, %v5861_v42  ;;  %v5828_v23 = vpop.permute.xlu0 %5827 }
 0x59a   : > { %v6066_v57 = vshll.u32 %v20476_v59, 16  ;;  %v6074_v33 = vrot.slane %v6072_v2, 1  ;;  %v5908_v3 = vsel %vm972_vm8, %v20071_v62, %v5828_v23  ;;  %v6065_v22 = vor.u32 %v6064_v24, %v6060_v58 }
 0x59b   : > { %v20484_v37 = vsel %vm1021_vm9, %v5908_v3, %v5863_v10  ;;  %v5682_v62 = vsel %vm972_vm8, %v20110_v17, %v5599_v27  ;;  %v5911_v17 = vsel %vm972_vm8, %v20116_v56, %v5830_v5 }
 0x59c   : > { %v6068_v0 = vrot.slane %v6066_v57, 1  ;;  %v5603_v39 = vpop.permute.xlu1 %5602  ;;  %v6076_v46 = vshll.u32 %v20484_v37, 16  ;;  %v6075_v42 = vor.u32 %v6074_v33, %v6070_v1 }
 0x59d   : > { %v5638_v40 = vpop.permute.xlu0 %5637  ;;  %v5688_v58 = vsel %vm972_vm8, %v20133_v29, %v5603_v39 }
 0x59e   : > { %v6069_v14 = vsel %vm1282_vm10, %v6065_v22, %v6068_v0  ;;  %v6078_v47 = vrot.slane %v6076_v46, 1  ;;  %v20509_v0 = vsel %vm1021_vm9, %v5688_v58, %v20124_v16  ;;  %v23785_v16 = vld [vmem:[#allocation6_spill] sm:$0xff] }
 0x59f   : > { %16246 = vmatmul.mubr.msk.bf16.gmra.mrb[52].mxu0 %vm1492_vm11, %v6069_v14  ;;  %v6102_v56 = vshll.u32 %v20509_v0, 16 }
 0x5a0   : > { %v5636_v24 = vpop.permute.xlu1 %5635  ;;  %v6079_v10 = vsel %vm1282_vm10, %v6075_v42, %v6078_v47 }
 0x5a1   : > { %v20493_v2 = vsel %vm1021_vm9, %v5682_v62, %v5636_v24  ;;  %16249 = vmatprep.mubr.msk.bf16.mxu0 %vm1492_vm11, %v6079_v10  ;;  %v5601_v23 = vpop.permute.xlu0 %5600  ;;  %v6104_v58 = vrot.slane %v6102_v56, 1 }
 0x5a2   : > { %v6082_v57 = vshll.u32 %v20493_v2, 16  ;;  %v5685_v33 = vsel %vm972_vm8, %v20095_v44, %v5601_v23  ;;  %v6080_v39 = vshrl.u32 %v20493_v2, 16 }
 0x5a3   : > { %v20505_v22 = vsel %vm1021_vm9, %v5685_v33, %v5638_v40 }
 0x5a4   : > { %v6084_v27 = vrot.slane %v6082_v57, 1  ;;  %v5865_v3 = vpop.permute.xlu1 %5864  ;;  %v6092_v44 = vshll.u32 %v20505_v22, 16  ;;  %v23786_v57 = vld [vmem:[#allocation7_spill] sm:$0xff]  ;;  %v6090_v33 = vshrl.u32 %v20505_v22, 16 }
 0x5a5   : > { %v20512_v29 = vsel %vm1021_vm9, %v5911_v17, %v5865_v3  ;;  %v5832_v46 = vpop.permute.xlu0 %5831 }
 0x5a6   : > { %v6086_v1 = vshll.u32 %v20512_v29, 16  ;;  %v6085_v5 = vor.u32 %v6084_v27, %v6080_v39  ;;  %v6094_v47 = vrot.slane %v6092_v44, 1  ;;  %v5914_v62 = vsel %vm972_vm8, %v23785_v16, %v5832_v46 }
 0x5a7   : > { %v6100_v39 = vshrl.u32 %v20509_v0, 16 }
 0x5a8   : > { %v6088_v14 = vrot.slane %v6086_v1, 1  ;;  %v5834_v40 = vpop.permute.xlu1 %5833  ;;  %v6095_v46 = vor.u32 %v6094_v47, %v6090_v33  ;;  %v17319_v47 = vld [vmem:[%s23693_s1 + $0x190] sm:$0xff]  }
 0x5a9   : > { %v5867_v24 = vpop.permute.xlu0 %5866  ;;  %v5917_v23 = vsel %vm972_vm8, %v23786_v57, %v5834_v40  ;;  %v6597_v57 = vld [vmem:[#allocation2] sm:$0xe] }
 0x5aa   : > { %v6089_v42 = vsel %vm1282_vm10, %v6085_v5, %v6088_v14  ;;  %v20523_v10 = vsel %vm1021_vm9, %v5914_v62, %v5867_v24  ;;  %v6105_v14 = vor.u32 %v6104_v58, %v6100_v39  ;;  %v6846_v39 = vrot.slane %v20169_v7, 1 }
 0x5ab   : > { %16250 = vmatmul.mubr.msk.bf16.gmra.mrb[56].mxu0 %vm1492_vm11, %v6089_v42  ;;  %v6096_v27 = vshll.u32 %v20523_v10, 16  ;;  %v17318_v42 = vld [vmem:[%s23693_s1 + $0x188] sm:$0xff]  }
 0x5ac   : > { %v5869_v17 = vpop.permute.xlu1 %5868 }
 0x5ad   : > { %v20530_v3 = vsel %vm1021_vm9, %v5917_v23, %v5869_v17  ;;  %v6098_v44 = vrot.slane %v6096_v27, 1 }
 0x5ae   : > { %v6106_v1 = vshll.u32 %v20530_v3, 16 }
 0x5af   : > { %v6099_v56 = vsel %vm1282_vm10, %v6095_v46, %v6098_v44 }
 0x5b0   : > { %v6108_v5 = vrot.slane %v6106_v1, 1  ;;  %16253 = vmatprep.mubr.msk.bf16.mxu0 %vm1492_vm11, %v6099_v56 }
 0x5b2   : > { %v6109_v40 = vsel %vm1282_vm10, %v6105_v14, %v6108_v5 }
 0x5b3   : > { %16254 = vmatmul.mubr.msk.bf16.gmra.mrb[60].mxu0 %vm1492_vm11, %v6109_v40 }
 0x5b4   : > { %16269 = vmatprep.mubr.msk.bf16.mxu0 %vm1492_vm11, %v20154_v45  ;;  %v17320_v45 = vld [vmem:[%s23693_s1 + $0x198] sm:$0xff]  }
 0x5bb   : > { %16270 = vmatmul.mubr.msk.bf16.vlgmr.msra.gmra.mrb[32].mxu0 %vm1492_vm11, %v20185_v12  ;;  %v17321_v12 = vld [vmem:[%s23693_s1 + $0x1a0] sm:$0xff]  }
 0x5bc   : > { %16302 = vmatpush3.bf16.msra.mxu0 %v20316_v11  ;;  %16273 = vmatprep.mubr.msk.bf16.mxu0 %vm1492_vm11, %v20212_v35  ;;  %v6667_v35 = vpop.permute.xlu0 %6666  ;;  %v17322_v11 = vld [vmem:[%s23693_s1 + $0x1a8] sm:$0xff]  }
 0x5bd   : > { %16303 = vmatprep.subr.bf16.mxu0 %v17318_v42 }
 0x5c0   : > { %16304 = vmatpush3.bf16.msra.mxu0 %v17318_v42  ;;  %v6852_v42 = vrot.slane %v20232_v31, 1 }
 0x5c1   : > { %16305 = vmatprep.subr.bf16.mxu0 %v17319_v47 }
 0x5c3   : > { %16274 = vmatmul.mubr.msk.bf16.gmra.mrb[36].mxu0 %vm1492_vm11, %v20267_v49  ;;  %v6702_v49 = vpop.permute.xlu0 %6701 }
 0x5c4   : > { %16277 = vmatprep.mubr.msk.bf16.mxu0 %vm1492_vm11, %v20284_v55  ;;  %16306 = vmatpush3.bf16.msra.mxu0 %v17319_v47  ;;  %v6669_v55 = vpop.permute.xlu1 %6668 }
 0x5c5   : > { %16307 = vmatprep.subr.bf16.mxu0 %v17320_v45  ;;  %v6738_v1 = vsel %vm972_vm8, %v20160_v50, %v6669_v55  ;;  %v6849_v50 = vrot.slane %v20200_v20, 1 }
 0x5c7   : > { %v6671_v16 = vpop.permute.xlu0 %6670 }
 0x5c8   : > { %16308 = vmatpush3.bf16.msra.mxu0 %v17320_v45  ;;  %v6704_v62 = vpop.permute.xlu1 %6703  ;;  %v6741_v5 = vsel %vm972_vm8, %v20164_v8, %v6671_v16  ;;  %v23788_v8 = vld [vmem:[#allocation9_spill] sm:$0xff]  ;;  %v6855_v16 = vrot.slane %v20289_v6, 1 }
 0x5c9   : > { %16309 = vmatprep.subr.bf16.mxu0 %v17321_v12  ;;  %v6784_v46 = vsel %vm1021_vm9, %v6738_v1, %v6704_v62  ;;  %v6858_v62 = vrot.slane %v20307_v52, 1 }
 0x5ca   : > { %v6848_v7 = vrot.slane %v6784_v46, 1  ;;  %v6870_v46 = vrot.slane %v20424_v48, 1 }
 0x5cb   : > { %16278 = vmatmul.mubr.msk.bf16.gmra.mrb[40].mxu0 %vm1492_vm11, %v20343_v32  ;;  %v6706_v24 = vpop.permute.xlu0 %6705 }
 0x5cc   : > { %16281 = vmatprep.mubr.msk.bf16.mxu0 %vm1492_vm11, %v20357_v54  ;;  %16310 = vmatpush3.bf16.msra.mxu0 %v17321_v12  ;;  %v6673_v58 = vpop.permute.xlu1 %6672  ;;  %v6850_v47 = vsel %vm2179_vm12, %v6848_v7, %v6849_v50 }
 0x5cd   : > { %16311 = vmatprep.subr.bf16.mxu0 %v17322_v11  ;;  %v6744_v45 = vsel %vm972_vm8, %v23788_v8, %v6673_v58 }
 0x5cf   : > { %v6675_v32 = vpop.permute.xlu0 %6674 }
 0x5d0   : > { %16312 = vmatpush3.bf16.msra.mxu0 %v17322_v11  ;;  %v6708_v54 = vpop.permute.xlu1 %6707  ;;  %v6747_v12 = vsel %vm972_vm8, %v20195_v18, %v6675_v32 }
 0x5d3   : > { %16282 = vmatmul.mubr.msk.bf16.gmra.mrb[44].mxu0 %vm1492_vm11, %v20401_v19  ;;  %v6710_v19 = vpop.permute.xlu0 %6709 }
 0x5d4   : > { %16285 = vmatprep.mubr.msk.bf16.mxu0 %vm1492_vm11, %v20411_v34  ;;  %v6677_v23 = vpop.permute.xlu1 %6676  ;;  %v23787_v34 = vld [vmem:[#allocation8_spill] sm:$0xff]  ;;  %v6790_v11 = vsel %vm1021_vm9, %v6747_v12, %v6710_v19 }
 0x5d5   : > { %v14779_v33 = vcombine.low %v6597_v57, %v23787_v34  ;;  %v6857_v55 = vrot.slane %v6790_v11, 1 }
 0x5d7   : > { %v6735_v17 = vsel %vm972_vm8, %v14779_v33, %v6667_v35  ;;  %v6679_v27 = vpop.permute.xlu0 %6678  ;;  %v6859_v57 = vsel %vm2179_vm12, %v6857_v55, %v6858_v62 }
 0x5d8   : > { %v6753_v32 = vsel %vm972_vm8, %v20229_v15, %v6679_v27 }
 0x5db   : > { %16286 = vmatmul.mubr.msk.bf16.gmra.mrb[48].mxu0 %vm1492_vm11, %v20435_v41  ;;  %v6782_v41 = vsel %vm1021_vm9, %v6735_v17, %v6702_v49 }
 0x5dc   : > { %16289 = vmatprep.mubr.msk.bf16.mxu0 %vm1492_vm11, %v20443_v25  ;;  %v6712_v25 = vpop.permute.xlu1 %6711 }
 0x5e0   : > { %v6681_v44 = vpop.permute.xlu1 %6680 }
 0x5e1   : > { %v6756_v15 = vsel %vm972_vm8, %v20247_v26, %v6681_v44  ;;  %v6867_v26 = vrot.slane %v20415_v4, 1 }
 0x5e3   : > { %16290 = vmatmul.mubr.msk.bf16.gmra.mrb[52].mxu0 %vm1492_vm11, %v20465_v9  ;;  %v6845_v9 = vrot.slane %v6782_v41, 1 }
 0x5e4   : > { %16293 = vmatprep.mubr.msk.bf16.mxu0 %vm1492_vm11, %v20473_v43  ;;  %v6714_v43 = vpop.permute.xlu0 %6713  ;;  %v6716_v40 = vpop.permute.xlu1 %6715 }
 0x5e5   : > { %v6794_v19 = vsel %vm1021_vm9, %v6753_v32, %v6714_v43  ;;  %v6796_v41 = vsel %vm1021_vm9, %v6756_v15, %v6716_v40  ;;  %v6888_v32 = vrot.slane %v20523_v10, 1  ;;  %v7817_v10 = vld [vmem:[#allocation2 + $0x1a4] sm:$0xf] }
 0x5e6   : > { %v6863_v34 = vrot.slane %v6794_v19, 1 }
 0x5e8   : > { %v6683_v14 = vpop.permute.xlu0 %6682  ;;  %v6685_v49 = vpop.permute.xlu1 %6684 }
 0x5eb   : > { %16294 = vmatmul.mubr.msk.bf16.gmra.mrb[56].mxu0 %vm1492_vm11, %v20493_v2  ;;  %v6847_v2 = vsel %vm2179_vm12, %v6845_v9, %v6846_v39 }
 0x5ec   : > { %16297 = vmatprep.mubr.msk.bf16.mxu0 %vm1492_vm11, %v20505_v22  ;;  %v6786_v22 = vsel %vm1021_vm9, %v6741_v5, %v6706_v24  ;;  %v6718_v20 = vpop.permute.xlu0 %6717  ;;  %v6750_v24 = vsel %vm972_vm8, %v20209_v51, %v6677_v23  ;;  %v6720_v6 = vpop.permute.xlu1 %6719  ;;  %v6861_v51 = vrot.slane %v20362_v53, 1  ;;  %v6864_v23 = vrot.slane %v20375_v21, 1 }
 0x5ed   : > { %v6851_v56 = vrot.slane %v6786_v22, 1  ;;  %v6792_v58 = vsel %vm1021_vm9, %v6750_v24, %v6712_v25  ;;  %v23789_v25 = vld [vmem:[#allocation10_spill] sm:$0xff]  ;;  %v6866_v21 = vrot.slane %v6796_v41, 1  ;;  %v6762_v5 = vsel %vm972_vm8, %v20281_v61, %v6685_v49 }
 0x5ee   : > { %v6860_v52 = vrot.slane %v6792_v58, 1  ;;  %v6759_v9 = vsel %vm972_vm8, %v23789_v25, %v6683_v14  ;;  %v6865_v39 = vsel %vm2179_vm12, %v6863_v34, %v6864_v23  ;;  %v6800_v22 = vsel %vm1021_vm9, %v6762_v5, %v6720_v6 }
 0x5ef   : > { %v6853_v35 = vsel %vm2179_vm12, %v6851_v56, %v6852_v42  ;;  %v6798_v53 = vsel %vm1021_vm9, %v6759_v9, %v6718_v20  ;;  %v6872_v48 = vrot.slane %v6800_v22, 1  ;;  %v6873_v61 = vrot.slane %v20446_v13, 1 }
 0x5f0   : > { %v6689_v17 = vpop.permute.xlu1 %6688  ;;  %v6862_v27 = vsel %vm2179_vm12, %v6860_v52, %v6861_v51  ;;  %v6869_v43 = vrot.slane %v6798_v53, 1  ;;  %v6876_v42 = vrot.slane %v20454_v38, 1  ;;  %v6882_v20 = vrot.slane %v20484_v37, 1  ;;  %v7818_v51 = vld [vmem:[#allocation2 + $0x1a8] sm:$0xf] }
 0x5f1   : > { %v6891_v34 = vrot.slane %v20530_v3, 1  ;;  %v14882_v23 = vcombine.low %v7817_v10, %v7818_v51 }
 0x5f2   : > { %v6871_v56 = vsel %vm2179_vm12, %v6869_v43, %v6870_v46 }
 0x5f3   : > { %16298 = vmatmul.mubr.msk.bf16.gmra.mrb[60].mxu0 %vm1492_vm11, %v20509_v0  ;;  %v6788_v0 = vsel %vm1021_vm9, %v6744_v45, %v6708_v54  ;;  %v6687_v54 = vpop.permute.xlu0 %6686  ;;  %7971 = vrot.lane.b32.xlu1 %v14882_v23, %s17549_s30 }
 0x5f4   : > { %16313 = vmatprep.mubr.msk.bf16.mxu0 %vm1492_vm11, %v6847_v2  ;;  %v6854_v31 = vrot.slane %v6788_v0, 1  ;;  %v6724_v44 = vpop.permute.xlu1 %6723  ;;  %v6868_v2 = vsel %vm2179_vm12, %v6866_v21, %v6867_v26  ;;  %v6765_v7 = vsel %vm972_vm8, %v20304_v30, %v6687_v54  ;;  %v6874_v30 = vsel %vm2179_vm12, %v6872_v48, %v6873_v61  ;;  %v23790_v54 = vld [vmem:[#allocation11_spill] sm:$0xff] }
 0x5f6   : > { %v6856_v18 = vsel %vm2179_vm12, %v6854_v31, %v6855_v16 }
 0x5f7   : > { %v6722_v33 = vpop.permute.xlu0 %6721 }
 0x5f8   : > { %v6802_v14 = vsel %vm1021_vm9, %v6765_v7, %v6722_v33  ;;  %v6693_v50 = vpop.permute.xlu1 %6692  ;;  %v20686_v33 = vld [vmem:[%s23694_s2 + $0x2] ss:$0 sm:$0xff] }
 0x5f9   : > { %v6875_v40 = vrot.slane %v6802_v14, 1 }
 0x5fb   : > { %16314 = vmatmul.mubr.msk.bf16.vlgmr.msra.gmra.mrb[32].mxu0 %vm1492_vm11, %v6850_v47  ;;  %v6691_v1 = vpop.permute.xlu0 %6690  ;;  %v6768_v47 = vsel %vm972_vm8, %v20325_v36, %v6689_v17  ;;  %v6877_v12 = vsel %vm2179_vm12, %v6875_v40, %v6876_v42  ;;  %v6879_v36 = vrot.slane %v20476_v59, 1 }
 0x5fc   : > { %16317 = vmatprep.mubr.msk.bf16.mxu0 %vm1492_vm11, %v6853_v35  ;;  %v6804_v8 = vsel %vm1021_vm9, %v6768_v47, %v6724_v44  ;;  %v6771_v45 = vsel %vm972_vm8, %v20338_v63, %v6691_v1  ;;  %v6728_v35 = vpop.permute.xlu1 %6727  ;;  %v6774_v63 = vsel %vm972_vm8, %v20354_v28, %v6693_v50  ;;  %v6885_v28 = vrot.slane %v20512_v29, 1 }
 0x5fd   : > { %v6878_v38 = vrot.slane %v6804_v8, 1  ;;  %v6808_v16 = vsel %vm1021_vm9, %v6774_v63, %v6728_v35 }
 0x5fe   : > { %v6884_v37 = vrot.slane %v6808_v16, 1  ;;  %v7671_v16 = vld [vmem:[#allocation2 + $0xe4] sm:$0xf] }
 0x5ff   : > { %v6726_v4 = vpop.permute.xlu0 %6725  ;;  %v6880_v55 = vsel %vm2179_vm12, %v6878_v38, %v6879_v36 }
 0x600   : > { %v6806_v13 = vsel %vm1021_vm9, %v6771_v45, %v6726_v4  ;;  %v6697_v49 = vpop.permute.xlu1 %6696 }
 0x601   : > { %v6881_v11 = vrot.slane %v6806_v13, 1 }
 0x603   : > { %16318 = vmatmul.mubr.msk.bf16.gmra.mrb[36].mxu0 %vm1492_vm11, %v6856_v18  ;;  %v6695_v0 = vpop.permute.xlu0 %6694  ;;  %v6883_v24 = vsel %vm2179_vm12, %v6881_v11, %v6882_v20  ;;  %v7678_v11 = vld [vmem:[#allocation2 + $0xf0] sm:$0xf] }
 0x604   : > { %16321 = vmatprep.mubr.msk.bf16.mxu0 %vm1492_vm11, %v6859_v57  ;;  %v6777_v62 = vsel %vm972_vm8, %v20372_v60, %v6695_v0  ;;  %v6732_v58 = vpop.permute.xlu1 %6731  ;;  %v6780_v57 = vsel %vm972_vm8, %v23790_v54, %v6697_v49  ;;  %v6886_v60 = vsel %vm2179_vm12, %v6884_v37, %v6885_v28 }
 0x605   : > { %v6812_v19 = vsel %vm1021_vm9, %v6780_v57, %v6732_v58 }
 0x606   : > { %v6890_v52 = vrot.slane %v6812_v19, 1 }
 0x607   : > { %v6730_v31 = vpop.permute.xlu0 %6729 }
 0x608   : > { %v6810_v59 = vsel %vm1021_vm9, %v6777_v62, %v6730_v31  ;;  %v6892_v29 = vsel %vm2179_vm12, %v6890_v52, %v6891_v34 }
 0x609   : > { %v6887_v18 = vrot.slane %v6810_v59, 1 }
 0x60b   : > { %16322 = vmatmul.mubr.msk.bf16.gmra.mrb[40].mxu0 %vm1492_vm11, %v6862_v27  ;;  %v6889_v6 = vsel %vm2179_vm12, %v6887_v18, %v6888_v32  ;;  %v7682_v18 = vld [vmem:[#allocation2 + $0xf8] sm:$0x1] }
 0x60c   : > { %16325 = vmatprep.mubr.msk.bf16.mxu0 %vm1492_vm11, %v6865_v39 }
 0x613   : > { %16326 = vmatmul.mubr.msk.bf16.gmra.mrb[44].mxu0 %vm1492_vm11, %v6868_v2 }
 0x614   : > { %16329 = vmatprep.mubr.msk.bf16.mxu0 %vm1492_vm11, %v6871_v56 }
 0x61b   : > { %16330 = vmatmul.mubr.msk.bf16.gmra.mrb[48].mxu0 %vm1492_vm11, %v6874_v30 }
 0x61c   : > { %16333 = vmatprep.mubr.msk.bf16.mxu0 %vm1492_vm11, %v6877_v12 }
 0x623   : > { %16334 = vmatmul.mubr.msk.bf16.gmra.mrb[52].mxu0 %vm1492_vm11, %v6880_v55 }
 0x624   : > { %16337 = vmatprep.mubr.msk.bf16.mxu0 %vm1492_vm11, %v6883_v24 }
 0x62b   : > { %16338 = vmatmul.mubr.msk.bf16.gmra.mrb[56].mxu0 %vm1492_vm11, %v6886_v60 }
 0x62c   : > { %16341 = vmatprep.mubr.msk.bf16.mxu0 %vm1492_vm11, %v6889_v6  ;;  %v7675_v6 = vld [vmem:[#allocation2 + $0xec] sm:$0x1] }
 0x633   : > { %16342 = vmatmul.mubr.msk.bf16.gmra.mrb[60].mxu0 %vm1492_vm11, %v6892_v29 }
 0x6ce   : > { %v16315_v15 = vpop.f32.mrb[32].mxu0 }
 0x6cf   : > { %v7193_v17 = vadd.f32 %v16315_v15, %v20686_v33  ;;  %v7024_v27 = vpop.f32.mrb[33].mxu0 }
 0x6d0   : > { %v7191_v3 = vadd.f32 %v20686_v33, %v7024_v27  ;;  %v16316_v41 = vpop.f32.mrb[34].mxu0 }
 0x6d1   : > { %v7225_v25 = vmax.f32 %v7193_v17, 0.0  ;;  %v7194_v9 = vadd.f32 %v16316_v41, %v20686_v33  ;;  %v7027_v39 = vpop.f32.mrb[35].mxu0 }
 0x6d2   : > { %v7223_v53 = vmax.f32 %v7191_v3, 0.0  ;;  %v7192_v21 = vadd.f32 %v20686_v33, %v7027_v39 }
 0x6d3   : > { %v15459_v43 = vpack.c.bf16 %v7225_v25, %v7225_v25  ;;  %v7226_v1 = vmax.f32 %v7194_v9, 0.0 }
 0x6d4   : > { %v15457_v26 = vpack.c.bf16 %v7223_v53, %v7223_v53  ;;  %v7224_v44 = vmax.f32 %v7192_v21, 0.0 }
 0x6d5   : > { %v7369_v46 = vshrl.u32 %v15459_v43, 16  ;;  %v15460_v5 = vpack.c.bf16 %v7226_v1, %v7226_v1  ;;  %v7372_v2 = vshll.u32 %v15459_v43, 16 }
 0x6d6   : > { %v7352_v22 = vshrl.u32 %v15457_v26, 16  ;;  %v7355_v7 = vshll.u32 %v15457_v26, 16  ;;  %v15458_v56 = vpack.c.bf16 %v7224_v44, %v7224_v44  ;;  %v16319_v14 = vpop.f32.mrb[36].mxu0 }
 0x6d7   : > { %v7371_v4 = vrot.slane %v7369_v46, 7  ;;  %v7377_v48 = vshrl.u32 %v15460_v5, 16  ;;  %v7380_v50 = vshll.u32 %v15460_v5, 16  ;;  %v7197_v40 = vadd.f32 %v16319_v14, %v20686_v33  ;;  %v7040_v61 = vpop.f32.mrb[37].mxu0  ;;  %v7692_v46 = vld [vmem:[#allocation2 + $0x108] sm:$0xf] }
 0x6d8   : > { %v7354_v42 = vrot.slane %v7352_v22, 7  ;;  %v7360_v47 = vshrl.u32 %v15458_v56, 16  ;;  %v7363_v30 = vshll.u32 %v15458_v56, 16  ;;  %v7195_v8 = vadd.f32 %v20686_v33, %v7040_v61  ;;  %v16320_v45 = vpop.f32.mrb[38].mxu0  ;;  %v7685_v14 = vld [vmem:[#allocation2 + $0xfc] sm:$0xf] }
 0x6d9   : > { %v7374_v0 = vor.u32 %v7372_v2, %v7371_v4  ;;  %v7375_v12 = vrot.slane %v7371_v4, 4  ;;  %v7379_v35 = vrot.slane %v7377_v48, 7  ;;  %v7229_v13 = vmax.f32 %v7197_v40, 0.0  ;;  %v7043_v38 = vpop.f32.mrb[39].mxu0 }
 0x6da   : > { %v7357_v36 = vor.u32 %v7355_v7, %v7354_v42  ;;  %v7358_v20 = vrot.slane %v7354_v42, 4  ;;  %v7362_v31 = vrot.slane %v7360_v47, 7  ;;  %v7227_v63 = vmax.f32 %v7195_v8, 0.0 }
 0x6db   : > { %v7679_v55 = vsel %vm17834_vm6, %v7374_v0, %v7678_v11  ;;  %v7382_v62 = vor.u32 %v7380_v50, %v7379_v35  ;;  %v7384_v24 = vrot.slane %v7379_v35, 4  ;;  %v15463_v59 = vpack.c.bf16 %v7229_v13, %v7229_v13 }
 0x6dc   : > { %7680 = vst [vmem:[#allocation2 + $0xf0] sm:$0xf] %v7679_v55  ;;  %v7672_v37 = vsel %vm17834_vm6, %v7357_v36, %v7671_v16  ;;  %v7365_v28 = vor.u32 %v7363_v30, %v7362_v31  ;;  %v7367_v58 = vrot.slane %v7362_v31, 4  ;;  %v15461_v32 = vpack.c.bf16 %v7227_v63, %v7227_v63  ;;  %v7696_v16 = vld [vmem:[#allocation2 + $0x110] sm:$0x1] }
 0x6dd   : > { %7673 = vst [vmem:[#allocation2 + $0xe4] sm:$0xf] %v7672_v37  ;;  %v7383_v57 = vsel %vm17827_vm5, %v7375_v12, %v7382_v62  ;;  %v7683_v19 = vsel %vm17845_vm7, %v7384_v24, %v7682_v18  ;;  %v7403_v52 = vshrl.u32 %v15463_v59, 16  ;;  %v7406_v10 = vshll.u32 %v15463_v59, 16 }
 0x6de   : > { %7681 = vst.msk [vmem:[#allocation2 + $0xf4] sm:$0xf] %vm199_vm0, %v7383_v57  ;;  %7684 = vst [vmem:[#allocation2 + $0xf8] sm:$0x1] %v7683_v19  ;;  %v7366_v34 = vsel %vm17827_vm5, %v7358_v20, %v7365_v28  ;;  %v7676_v29 = vsel %vm17845_vm7, %v7367_v58, %v7675_v6  ;;  %v7386_v51 = vshrl.u32 %v15461_v32, 16  ;;  %v16323_v23 = vpop.f32.mrb[40].mxu0  ;;  %v7198_v17 = vadd.f32 %v16320_v45, %v20686_v33 }
 0x6df   : > { %7674 = vst.msk [vmem:[#allocation2 + $0xe8] sm:$0xf] %vm199_vm0, %v7366_v34  ;;  %7677 = vst [vmem:[#allocation2 + $0xec] sm:$0x1] %v7676_v29  ;;  %v20708_v15 = vrot.slane %v7403_v52, 7  ;;  %v7196_v27 = vadd.f32 %v20686_v33, %v7043_v38  ;;  %v7201_v3 = vadd.f32 %v16323_v23, %v20686_v33  ;;  %v7056_v41 = vpop.f32.mrb[41].mxu0 }
 0x6e0   : > { %v7388_v25 = vrot.slane %v7386_v51, 7  ;;  %v7389_v9 = vshll.u32 %v15461_v32, 16  ;;  %v7199_v39 = vadd.f32 %v20686_v33, %v7056_v41  ;;  %v16324_v53 = vpop.f32.mrb[42].mxu0  ;;  %v7230_v1 = vmax.f32 %v7198_v17, 0.0  ;;  %v7689_v19 = vld [vmem:[#allocation2 + $0x104] sm:$0x1] }
 0x6e1   : > { %v7408_v21 = vor.u32 %v7406_v10, %v20708_v15  ;;  %v7409_v43 = vrot.slane %v20708_v15, 4  ;;  %v7228_v26 = vmax.f32 %v7196_v27, 0.0  ;;  %v7059_v44 = vpop.f32.mrb[43].mxu0  ;;  %v7233_v22 = vmax.f32 %v7201_v3, 0.0  ;;  %v7706_v3 = vld [vmem:[#allocation2 + $0x120] sm:$0xf] }
 0x6e2   : > { %v7391_v5 = vor.u32 %v7389_v9, %v7388_v25  ;;  %v7392_v2 = vrot.slane %v7388_v25, 4  ;;  %v7231_v7 = vmax.f32 %v7199_v39, 0.0  ;;  %v15464_v4 = vpack.c.bf16 %v7230_v1, %v7230_v1  ;;  %v7699_v41 = vld [vmem:[#allocation2 + $0x114] sm:$0xf]  ;;  %v17356_v25 = vld [vmem:[%s23693_s1 + $0x1e0] sm:$0xff]  }
 0x6e3   : > { %v7693_v56 = vsel %vm17834_vm6, %v7408_v21, %v7692_v46  ;;  %v15462_v48 = vpack.c.bf16 %v7228_v26, %v7228_v26  ;;  %v7202_v50 = vadd.f32 %v16324_v53, %v20686_v33  ;;  %v15467_v61 = vpack.c.bf16 %v7233_v22, %v7233_v22  ;;  %16345 = vmatprep.subr.bf16.mxu1 %v17356_v25 }
 0x6e4   : > { %7694 = vst [vmem:[#allocation2 + $0x108] sm:$0xf] %v7693_v56  ;;  %v7686_v40 = vsel %vm17834_vm6, %v7391_v5, %v7685_v14  ;;  %v15465_v42 = vpack.c.bf16 %v7231_v7, %v7231_v7  ;;  %v7200_v47 = vadd.f32 %v20686_v33, %v7059_v44  ;;  %v7411_v30 = vshrl.u32 %v15464_v4, 16  ;;  %16346 = vmatpush3.bf16.msra.mxu1 %v17356_v25  ;;  %v8930_v54 = vld [vmem:[#allocation2 + $0xe4] sm:$0xe] }
 0x6e5   : > { %7687 = vst [vmem:[#allocation2 + $0xfc] sm:$0xf] %v7686_v40  ;;  %v7414_v8 = vshll.u32 %v15464_v4, 16  ;;  %v7394_v45 = vshrl.u32 %v15462_v48, 16  ;;  %v7397_v0 = vshll.u32 %v15462_v48, 16  ;;  %v7437_v12 = vshrl.u32 %v15467_v61, 16 }
 0x6e6   : > { %v7440_v35 = vshll.u32 %v15467_v61, 16  ;;  %v7420_v13 = vshrl.u32 %v15465_v42, 16  ;;  %v7423_v38 = vshll.u32 %v15465_v42, 16  ;;  %v16327_v11 = vpop.f32.mrb[44].mxu0  ;;  %v7413_v36 = vrot.slane %v7411_v30, 7  ;;  %v17358_v61 = vld [vmem:[%s23693_s1 + $0x1e8] sm:$0xff]  }
 0x6e7   : > { %v7396_v20 = vrot.slane %v7394_v45, 7  ;;  %v7234_v31 = vmax.f32 %v7202_v50, 0.0  ;;  %v7232_v63 = vmax.f32 %v7200_v47, 0.0  ;;  %v7072_v55 = vpop.f32.mrb[45].mxu0  ;;  %v20722_v62 = vrot.slane %v7437_v12, 7  ;;  %16347 = vmatprep.subr.bf16.mxu1 %v17358_v61 }
 0x6e8   : > { %v20724_v24 = vrot.slane %v7420_v13, 7  ;;  %v7205_v59 = vadd.f32 %v16327_v11, %v20686_v33  ;;  %v7203_v37 = vadd.f32 %v20686_v33, %v7072_v55  ;;  %v16328_v18 = vpop.f32.mrb[46].mxu0  ;;  %v7416_v28 = vor.u32 %v7414_v8, %v7413_v36  ;;  %v20732_v51 = vld [vmem:[#allocation2 + $0xf4] sm:$0xf]  ;;  %16348 = vmatpush3.bf16.msra.mxu1 %v17358_v61 }
 0x6e9   : > { %v7418_v58 = vrot.slane %v7413_v36, 4  ;;  %v7399_v32 = vor.u32 %v7397_v0, %v7396_v20  ;;  %v7401_v57 = vrot.slane %v7396_v20, 4  ;;  %v7075_v6 = vpop.f32.mrb[47].mxu0  ;;  %v7442_v52 = vor.u32 %v7440_v35, %v20722_v62  ;;  %v20763_v30 = vld [vmem:[#allocation2 + $0xf8] ss:$0 sps:$4 sm:$0x11]  }
 0x6ea   : > { %v7443_v34 = vrot.slane %v20722_v62, 4  ;;  %v7425_v29 = vor.u32 %v7423_v38, %v20724_v24  ;;  %v7426_v10 = vrot.slane %v20724_v24, 4  ;;  %v7417_v23 = vsel %vm17827_vm5, %v7409_v43, %v7416_v28  ;;  %v7787_v43 = vld [vmem:[#allocation2 + $0xf0] sm:$0xf] }
 0x6eb   : > { %v7697_v15 = vsel %vm17845_vm7, %v7418_v58, %v7696_v16  ;;  %v7400_v17 = vsel %vm17827_vm5, %v7392_v2, %v7399_v32  ;;  %v7690_v27 = vsel %vm17845_vm7, %v7401_v57, %v7689_v19  ;;  %7695 = vst.msk [vmem:[#allocation2 + $0x10c] sm:$0xf] %vm199_vm0, %v7417_v23  ;;  %v7707_v9 = vsel %vm17834_vm6, %v7442_v52, %v7706_v3  ;;  %v7703_v16 = vld [vmem:[#allocation2 + $0x11c] sm:$0x1]  ;;  %v17360_v58 = vld [vmem:[%s23693_s1 + $0x1f0] sm:$0xff]  }
 0x6ec   : > { %7698 = vst [vmem:[#allocation2 + $0x110] sm:$0x1] %v7697_v15  ;;  %7688 = vst.msk [vmem:[#allocation2 + $0x100] sm:$0xf] %vm199_vm0, %v7400_v17  ;;  %v7700_v39 = vsel %vm17834_vm6, %v7425_v29, %v7699_v41  ;;  %v15468_v53 = vpack.c.bf16 %v7234_v31, %v7234_v31  ;;  %v15466_v21 = vpack.c.bf16 %v7232_v63, %v7232_v63  ;;  %v7237_v1 = vmax.f32 %v7205_v59, 0.0 }
 0x6ed   : > { %7691 = vst [vmem:[#allocation2 + $0x104] sm:$0x1] %v7690_v27  ;;  %7708 = vst [vmem:[#allocation2 + $0x120] sm:$0xf] %v7707_v9  ;;  %v7235_v26 = vmax.f32 %v7203_v37, 0.0  ;;  %v20752_v44 = vcombine.low %v7787_v43, %v20732_v51  ;;  %v7206_v46 = vadd.f32 %v16328_v18, %v20686_v33  ;;  %v7204_v50 = vadd.f32 %v20686_v33, %v7075_v6 }
 0x6ee   : > { %7701 = vst [vmem:[#allocation2 + $0x114] sm:$0xf] %v7700_v39  ;;  %v7445_v5 = vshrl.u32 %v15468_v53, 16  ;;  %v7448_v2 = vshll.u32 %v15468_v53, 16  ;;  %v7428_v22 = vshrl.u32 %v15466_v21, 16  ;;  %v7431_v7 = vshll.u32 %v15466_v21, 16  ;;  %16349 = vmatprep.subr.bf16.mxu1 %v17360_v58 }
 0x6ef   : > { %v16331_v56 = vpop.f32.mrb[48].mxu0  ;;  %v15471_v14 = vpack.c.bf16 %v7237_v1, %v7237_v1  ;;  %v15469_v4 = vpack.c.bf16 %v7235_v26, %v7235_v26  ;;  %7941 = vrot.lane.b32.xlu0 %v20752_v44, %s17549_s30  ;;  %7906 = vrot.lane.b32.xlu1 %v20752_v44, %s17550_s7  ;;  %v7238_v48 = vmax.f32 %v7206_v46, 0.0  ;;  %v7710_v31 = vld [vmem:[#allocation2 + $0x128] sm:$0x1]  ;;  %v7236_v28 = vmax.f32 %v7204_v50, 0.0  ;;  %v17362_v26 = vld [vmem:[%s23693_s1 + $0x1f8] sm:$0xff]  }
 0x6f0   : > { %v7088_v40 = vpop.f32.mrb[49].mxu0  ;;  %v7447_v42 = vrot.slane %v7445_v5, 7  ;;  %v7430_v47 = vrot.slane %v7428_v22, 7  ;;  %v7209_v8 = vadd.f32 %v16331_v56, %v20686_v33  ;;  %v7720_v52 = vld [vmem:[#allocation2 + $0x138] sm:$0xf]  ;;  %16350 = vmatpush3.bf16.msra.mxu1 %v17360_v58 }
 0x6f1   : > { %v7207_v45 = vadd.f32 %v20686_v33, %v7088_v40  ;;  %v20767_v0 = vpop.f32.mrb[50].mxu0  ;;  %v7471_v12 = vshrl.u32 %v15471_v14, 16  ;;  %v7474_v35 = vshll.u32 %v15471_v14, 16  ;;  %v7454_v13 = vshrl.u32 %v15469_v4, 16  ;;  %v7713_v29 = vld [vmem:[#allocation2 + $0x12c] sm:$0xf]  ;;  %16351 = vmatprep.subr.bf16.mxu1 %v17362_v26 }
 0x6f2   : > { %v7457_v38 = vshll.u32 %v15469_v4, 16  ;;  %v7091_v11 = vpop.f32.mrb[51].mxu0  ;;  %v7450_v36 = vor.u32 %v7448_v2, %v7447_v42  ;;  %v7452_v20 = vrot.slane %v7447_v42, 4  ;;  %v7433_v63 = vor.u32 %v7431_v7, %v7430_v47  ;;  %v20792_v23 = vld [vmem:[#allocation2 + $0xe8] sm:$0xf] }
 0x6f3   : > { %v7435_v55 = vrot.slane %v7430_v47, 4  ;;  %v20769_v59 = vrot.slane %v7471_v12, 7  ;;  %v20771_v37 = vrot.slane %v7454_v13, 7  ;;  %v15472_v18 = vpack.c.bf16 %v7238_v48, %v7238_v48  ;;  %8170 = vrot.lane.b32.xlu0 %v20763_v30, %s17549_s30  ;;  %8137 = vrot.lane.b32.xlu1 %v20763_v30, %s17550_s7  ;;  %v7785_v15 = vld [vmem:[#allocation2 + $0xe4] sm:$0xf] }
 0x6f4   : > { %v7451_v32 = vsel %vm17827_vm5, %v7443_v34, %v7450_v36  ;;  %v7711_v57 = vsel %vm17845_vm7, %v7452_v20, %v7710_v31  ;;  %v7434_v19 = vsel %vm17827_vm5, %v7426_v10, %v7433_v63  ;;  %v15470_v3 = vpack.c.bf16 %v7236_v28, %v7236_v28  ;;  %v20800_v25 = vld [vmem:[#allocation2 + $0x10c] sm:$0xf]  ;;  %v7791_v7 = vld [vmem:[#allocation2 + $0x108] sm:$0xf]  ;;  %v7724_v14 = vld [vmem:[#allocation2 + $0x140] sm:$0x1]  ;;  %16352 = vmatpush3.bf16.msra.mxu1 %v17362_v26 }
 0x6f5   : > { %v7704_v6 = vsel %vm17845_vm7, %v7435_v55, %v7703_v16  ;;  %7709 = vst.msk [vmem:[#allocation2 + $0x124] sm:$0xf] %vm199_vm0, %v7451_v32  ;;  %7712 = vst [vmem:[#allocation2 + $0x128] sm:$0x1] %v7711_v57  ;;  %v7476_v62 = vor.u32 %v7474_v35, %v20769_v59  ;;  %v7477_v24 = vrot.slane %v20769_v59, 4  ;;  %v7459_v34 = vor.u32 %v7457_v38, %v20771_v37 }
 0x6f6   : > { %7702 = vst.msk [vmem:[#allocation2 + $0x118] sm:$0xf] %vm199_vm0, %v7434_v19  ;;  %7705 = vst [vmem:[#allocation2 + $0x11c] sm:$0x1] %v7704_v6  ;;  %v7460_v10 = vrot.slane %v20771_v37, 4  ;;  %v7479_v17 = vshrl.u32 %v15472_v18, 16  ;;  %v20807_v43 = vcombine.low %v7785_v15, %v20792_v23  ;;  %v20817_v48 = vcombine.low %v7791_v7, %v20800_v25 }
 0x6f7   : > { %v7482_v27 = vshll.u32 %v15472_v18, 16  ;;  %v7241_v41 = vmax.f32 %v7209_v8, 0.0  ;;  %v16335_v9 = vpop.f32.mrb[52].mxu0  ;;  %v7721_v39 = vsel %vm17834_vm6, %v7476_v62, %v7720_v52  ;;  %v7714_v53 = vsel %vm17834_vm6, %v7459_v34, %v7713_v29  ;;  %v20824_v12 = vld [vmem:[#allocation2 + $0xec] ss:$0 sps:$4 sm:$0x11]  }
 0x6f8   : > { %v7239_v21 = vmax.f32 %v7207_v45, 0.0  ;;  %v7104_v1 = vpop.f32.mrb[53].mxu0  ;;  %7722 = vst [vmem:[#allocation2 + $0x138] sm:$0xf] %v7721_v39  ;;  %7715 = vst [vmem:[#allocation2 + $0x12c] sm:$0xf] %v7714_v53  ;;  %7904 = vrot.lane.b32.xlu0 %v20807_v43, %s17550_s7  ;;  %v7210_v50 = vadd.f32 %v20767_v0, %v20686_v33  ;;  %v7208_v40 = vadd.f32 %v20686_v33, %v7091_v11  ;;  %7910 = vrot.lane.b32.xlu1 %v20817_v48, %s17550_s7 }
 0x6f9   : > { %v7481_v46 = vrot.slane %v7479_v17, 7  ;;  %v7462_v5 = vshrl.u32 %v15470_v3, 16  ;;  %v7465_v2 = vshll.u32 %v15470_v3, 16  ;;  %v15475_v22 = vpack.c.bf16 %v7241_v41, %v7241_v41  ;;  %v20812_v56 = vpop.f32.mrb[54].mxu0  ;;  %v17363_v0 = vld [vmem:[%s23693_s1 + $0x200] sm:$0xff]  }
 0x6fa   : > { %v15473_v4 = vpack.c.bf16 %v7239_v21, %v7239_v21  ;;  %v20822_v61 = vpop.f32.mrb[55].mxu0  ;;  %v7242_v36 = vmax.f32 %v7210_v50, 0.0  ;;  %v7717_v55 = vld [vmem:[#allocation2 + $0x134] sm:$0x1]  ;;  %v7240_v18 = vmax.f32 %v7208_v40, 0.0  ;;  %16353 = vmatprep.subr.bf16.mxu1 %v17363_v0  ;;  %v7213_v19 = vadd.f32 %v16335_v9, %v20686_v33 }
 0x6fb   : > { %v7484_v42 = vor.u32 %v7482_v27, %v7481_v46  ;;  %v7486_v47 = vrot.slane %v7481_v46, 4  ;;  %v7464_v8 = vrot.slane %v7462_v5, 7  ;;  %v7505_v45 = vshrl.u32 %v15475_v22, 16  ;;  %v20842_v28 = vld [vmem:[#allocation2 + $0x110] ss:$0 sps:$4 sm:$0x11]   ;;  %16354 = vmatpush3.bf16.msra.mxu1 %v17363_v0 }
 0x6fc   : > { %v7508_v35 = vshll.u32 %v15475_v22, 16  ;;  %v7488_v13 = vshrl.u32 %v15473_v4, 16  ;;  %v7491_v38 = vshll.u32 %v15473_v4, 16  ;;  %v15476_v37 = vpack.c.bf16 %v7242_v36, %v7242_v36  ;;  %8135 = vrot.lane.b32.xlu0 %v20824_v12, %s17550_s7  ;;  %v7734_v57 = vld [vmem:[#allocation2 + $0x150] sm:$0xf]  ;;  %8141 = vrot.lane.b32.xlu1 %v20842_v28, %s17550_s7 }
 0x6fd   : > { %v7485_v11 = vsel %vm17827_vm5, %v7477_v24, %v7484_v42  ;;  %v7725_v20 = vsel %vm17845_vm7, %v7486_v47, %v7724_v14  ;;  %v7467_v31 = vor.u32 %v7465_v2, %v7464_v8  ;;  %v7469_v63 = vrot.slane %v7464_v8, 4  ;;  %v20850_v52 = vld [vmem:[#allocation2 + $0x100] sm:$0xf]  ;;  %v7727_v15 = vld [vmem:[#allocation2 + $0x144] sm:$0xf]  ;;  %v17364_v2 = vld [vmem:[%s23693_s1 + $0x208] sm:$0xff]  }
 0x6fe   : > { %7723 = vst.msk [vmem:[#allocation2 + $0x13c] sm:$0xf] %vm199_vm0, %v7485_v11  ;;  %7726 = vst [vmem:[#allocation2 + $0x140] sm:$0x1] %v7725_v20  ;;  %v20836_v16 = vrot.slane %v7505_v45, 7  ;;  %v20838_v59 = vrot.slane %v7488_v13, 7  ;;  %v7211_v6 = vadd.f32 %v20686_v33, %v7104_v1  ;;  %v15474_v41 = vpack.c.bf16 %v7240_v18, %v7240_v18  ;;  %16355 = vmatprep.subr.bf16.mxu1 %v17364_v2 }
 0x6ff   : > { %v7468_v58 = vsel %vm17827_vm5, %v7460_v10, %v7467_v31  ;;  %v7718_v32 = vsel %vm17845_vm7, %v7469_v63, %v7717_v55  ;;  %v16339_v29 = vpop.f32.mrb[56].mxu0  ;;  %v7513_v27 = vshrl.u32 %v15476_v37, 16  ;;  %v7516_v3 = vshll.u32 %v15476_v37, 16  ;;  %v7789_v39 = vld [vmem:[#allocation2 + $0xfc] sm:$0xf]  ;;  %16356 = vmatpush3.bf16.msra.mxu1 %v17364_v2 }
 0x700   : > { %7716 = vst.msk [vmem:[#allocation2 + $0x130] sm:$0xf] %vm199_vm0, %v7468_v58  ;;  %7719 = vst [vmem:[#allocation2 + $0x134] sm:$0x1] %v7718_v32  ;;  %v7510_v62 = vor.u32 %v7508_v35, %v20836_v16  ;;  %v7511_v24 = vrot.slane %v20836_v16, 4  ;;  %v7493_v34 = vor.u32 %v7491_v38, %v20838_v59  ;;  %v7494_v10 = vrot.slane %v20838_v59, 4  ;;  %7945 = vrot.lane.b32.xlu0 %v20817_v48, %s17549_s30 }
 0x701   : > { %v7120_v17 = vpop.f32.mrb[57].mxu0  ;;  %v7245_v9 = vmax.f32 %v7213_v19, 0.0  ;;  %v7243_v26 = vmax.f32 %v7211_v6, 0.0  ;;  %v20868_v46 = vcombine.low %v7789_v39, %v20850_v52  ;;  %v7515_v22 = vrot.slane %v7513_v27, 7  ;;  %v7738_v50 = vld [vmem:[#allocation2 + $0x158] sm:$0x1] }
 0x702   : > { %v20859_v53 = vpop.f32.mrb[58].mxu0  ;;  %v7735_v21 = vsel %vm17834_vm6, %v7510_v62, %v7734_v57  ;;  %v7728_v1 = vsel %vm17834_vm6, %v7493_v34, %v7727_v15  ;;  %v7496_v7 = vshrl.u32 %v15474_v41, 16  ;;  %v7499_v14 = vshll.u32 %v15474_v41, 16  ;;  %v20882_v36 = vld [vmem:[#allocation2 + $0x104] ss:$0 sps:$4 sm:$0x11]  }
 0x703   : > { %v20870_v5 = vpop.f32.mrb[59].mxu0  ;;  %7736 = vst [vmem:[#allocation2 + $0x150] sm:$0xf] %v7735_v21  ;;  %7729 = vst [vmem:[#allocation2 + $0x144] sm:$0xf] %v7728_v1  ;;  %v15479_v4 = vpack.c.bf16 %v7245_v9, %v7245_v9  ;;  %v15477_v40 = vpack.c.bf16 %v7243_v26, %v7243_v26  ;;  %7943 = vrot.lane.b32.xlu1 %v20868_v46, %s17549_s30  ;;  %v7214_v42 = vadd.f32 %v20812_v56, %v20686_v33 }
 0x704   : > { %v7212_v47 = vadd.f32 %v20686_v33, %v20822_v61  ;;  %v7217_v8 = vadd.f32 %v16339_v29, %v20686_v33  ;;  %v7518_v45 = vor.u32 %v7516_v3, %v7515_v22  ;;  %v7520_v35 = vrot.slane %v7515_v22, 4  ;;  %8174 = vrot.lane.b32.xlu0 %v20842_v28, %s17549_s30  ;;  %v7731_v59 = vld [vmem:[#allocation2 + $0x14c] sm:$0x1]  ;;  %v7748_v3 = vld [vmem:[#allocation2 + $0x168] sm:$0xf] }
 0x705   : > { %v7498_v13 = vrot.slane %v7496_v7, 7  ;;  %v7539_v38 = vshrl.u32 %v15479_v4, 16  ;;  %v7542_v0 = vshll.u32 %v15479_v4, 16  ;;  %v7522_v11 = vshrl.u32 %v15477_v40, 16  ;;  %v7795_v26 = vld [vmem:[#allocation2 + $0x120] sm:$0xf] }
 0x706   : > { %v7525_v20 = vshll.u32 %v15477_v40, 16  ;;  %v7246_v31 = vmax.f32 %v7214_v42, 0.0  ;;  %v7519_v56 = vsel %vm17827_vm5, %v7511_v24, %v7518_v45  ;;  %v7739_v61 = vsel %vm17845_vm7, %v7520_v35, %v7738_v50  ;;  %v20890_v16 = vpop.f32.mrb[60].mxu0  ;;  %v20904_v24 = vld [vmem:[#allocation2 + $0x124] sm:$0xf] }
 0x707   : > { %v7501_v63 = vor.u32 %v7499_v14, %v7498_v13  ;;  %v7503_v55 = vrot.slane %v7498_v13, 4  ;;  %7737 = vst.msk [vmem:[#allocation2 + $0x154] sm:$0xf] %vm199_vm0, %v7519_v56  ;;  %7740 = vst [vmem:[#allocation2 + $0x158] sm:$0x1] %v7739_v61  ;;  %v7541_v37 = vrot.slane %v7539_v38, 7  ;;  %8172 = vrot.lane.b32.xlu1 %v20882_v36, %s17549_s30  ;;  %v7215_v62 = vadd.f32 %v20686_v33, %v7120_v17 }
 0x708   : > { %v20893_v18 = vrot.slane %v7522_v11, 7  ;;  %v15480_v58 = vpack.c.bf16 %v7246_v31, %v7246_v31  ;;  %v7244_v32 = vmax.f32 %v7212_v47, 0.0  ;;  %v20897_v57 = vpop.f32.mrb[61].mxu0  ;;  %v7249_v29 = vmax.f32 %v7217_v8, 0.0  ;;  %7908 = vrot.lane.b32.xlu0 %v20868_v46, %s17550_s7  ;;  %v7741_v17 = vld [vmem:[#allocation2 + $0x15c] sm:$0xf] }
 0x709   : > { %v7502_v19 = vsel %vm17827_vm5, %v7494_v10, %v7501_v63  ;;  %v7732_v6 = vsel %vm17845_vm7, %v7503_v55, %v7731_v59  ;;  %v20906_v34 = vpop.f32.mrb[62].mxu0  ;;  %v7544_v15 = vor.u32 %v7542_v0, %v7541_v37  ;;  %v7545_v27 = vrot.slane %v7541_v37, 4  ;;  %v7752_v47 = vld [vmem:[#allocation2 + $0x170] sm:$0x1] }
 0x70a   : > { %7730 = vst.msk [vmem:[#allocation2 + $0x148] sm:$0xf] %vm199_vm0, %v7502_v19  ;;  %7733 = vst [vmem:[#allocation2 + $0x14c] sm:$0x1] %v7732_v6  ;;  %v7527_v41 = vor.u32 %v7525_v20, %v20893_v18  ;;  %v20912_v10 = vpop.f32.mrb[63].mxu0  ;;  %v7528_v9 = vrot.slane %v20893_v18, 4  ;;  %v15478_v21 = vpack.c.bf16 %v7244_v32, %v7244_v32  ;;  %v15483_v1 = vpack.c.bf16 %v7249_v29, %v7249_v29 }
 0x70b   : > { %v7547_v39 = vshrl.u32 %v15480_v58, 16  ;;  %v7749_v2 = vsel %vm17834_vm6, %v7544_v15, %v7748_v3  ;;  %v7247_v7 = vmax.f32 %v7215_v62, 0.0  ;;  %v20920_v14 = vcombine.low %v7795_v26, %v20904_v24  ;;  %v20930_v31 = vld [vmem:[#allocation2 + $0x128] ss:$0 sps:$4 sm:$0x11]  }
 0x70c   : > { %v7742_v22 = vsel %vm17834_vm6, %v7527_v41, %v7741_v17  ;;  %7750 = vst [vmem:[#allocation2 + $0x168] sm:$0xf] %v7749_v2  ;;  %v7550_v50 = vshll.u32 %v15480_v58, 16  ;;  %v7530_v40 = vshrl.u32 %v15478_v21, 16  ;;  %v7573_v42 = vshrl.u32 %v15483_v1, 16  ;;  %8139 = vrot.lane.b32.xlu0 %v20882_v36, %s17550_s7 }
 0x70d   : > { %7743 = vst [vmem:[#allocation2 + $0x15c] sm:$0xf] %v7742_v22  ;;  %v7549_v4 = vrot.slane %v7547_v39, 7  ;;  %v7533_v8 = vshll.u32 %v15478_v21, 16  ;;  %v15481_v45 = vpack.c.bf16 %v7247_v7, %v7247_v7  ;;  %7914 = vrot.lane.b32.xlu1 %v20920_v14, %s17550_s7  ;;  %v7218_v35 = vadd.f32 %v20859_v53, %v20686_v33  ;;  %v7745_v18 = vld [vmem:[#allocation2 + $0x164] sm:$0x1] }
 0x70e   : > { %v7216_v13 = vadd.f32 %v20686_v33, %v20870_v5  ;;  %v7532_v11 = vrot.slane %v7530_v40, 7  ;;  %v7575_v20 = vrot.slane %v7573_v42, 7  ;;  %v7576_v56 = vshll.u32 %v15483_v1, 16  ;;  %v7762_v15 = vld [vmem:[#allocation2 + $0x180] sm:$0xf] }
 0x70f   : > { %v7552_v38 = vor.u32 %v7550_v50, %v7549_v4  ;;  %v7554_v0 = vrot.slane %v7549_v4, 4  ;;  %v7556_v61 = vshrl.u32 %v15481_v45, 16  ;;  %v7250_v63 = vmax.f32 %v7218_v35, 0.0  ;;  %v20947_v41 = vld [vmem:[#allocation2 + $0x118] sm:$0xf] }
 0x710   : > { %v7248_v55 = vmax.f32 %v7216_v13, 0.0  ;;  %v7535_v5 = vor.u32 %v7533_v8, %v7532_v11  ;;  %v7537_v37 = vrot.slane %v7532_v11, 4  ;;  %v7578_v58 = vor.u32 %v7576_v56, %v7575_v20  ;;  %7949 = vrot.lane.b32.xlu0 %v20920_v14, %s17549_s30  ;;  %v7755_v1 = vld [vmem:[#allocation2 + $0x174] sm:$0xf]  ;;  %v7766_v11 = vld [vmem:[#allocation2 + $0x188] sm:$0x1] }
 0x711   : > { %v7553_v59 = vsel %vm17827_vm5, %v7545_v27, %v7552_v38  ;;  %v7753_v53 = vsel %vm17845_vm7, %v7554_v0, %v7752_v47  ;;  %v7558_v32 = vrot.slane %v7556_v61, 7  ;;  %v7559_v19 = vshll.u32 %v15481_v45, 16  ;;  %8145 = vrot.lane.b32.xlu1 %v20930_v31, %s17550_s7  ;;  %v7793_v4 = vld [vmem:[#allocation2 + $0x114] sm:$0xf]  ;;  %v7759_v61 = vld [vmem:[#allocation2 + $0x17c] sm:$0x1] }
 0x712   : > { %7751 = vst.msk [vmem:[#allocation2 + $0x16c] sm:$0xf] %vm199_vm0, %v7553_v59  ;;  %7754 = vst [vmem:[#allocation2 + $0x170] sm:$0x1] %v7753_v53  ;;  %v15484_v6 = vpack.c.bf16 %v7250_v63, %v7250_v63  ;;  %v7536_v29 = vsel %vm17827_vm5, %v7528_v9, %v7535_v5  ;;  %v7746_v62 = vsel %vm17845_vm7, %v7537_v37, %v7745_v18  ;;  %v7579_v17 = vrot.slane %v7575_v20, 4 }
 0x713   : > { %v15482_v27 = vpack.c.bf16 %v7248_v55, %v7248_v55  ;;  %v7221_v3 = vadd.f32 %v20890_v16, %v20686_v33  ;;  %7744 = vst.msk [vmem:[#allocation2 + $0x160] sm:$0xf] %vm199_vm0, %v7536_v29  ;;  %7747 = vst [vmem:[#allocation2 + $0x164] sm:$0x1] %v7746_v62  ;;  %v7763_v39 = vsel %vm17834_vm6, %v7578_v58, %v7762_v15  ;;  %v7562_v13 = vrot.slane %v7558_v32, 4 }
 0x714   : > { %v7561_v21 = vor.u32 %v7559_v19, %v7558_v32  ;;  %v7581_v9 = vshrl.u32 %v15484_v6, 16  ;;  %7764 = vst [vmem:[#allocation2 + $0x180] sm:$0xf] %v7763_v39  ;;  %v7584_v26 = vshll.u32 %v15484_v6, 16  ;;  %v7219_v40 = vadd.f32 %v20686_v33, %v20897_v57  ;;  %8178 = vrot.lane.b32.xlu0 %v20930_v31, %s17549_s30  ;;  %v20980_v32 = vld [vmem:[#allocation2 + $0x13c] sm:$0xf] }
 0x715   : > { %v7564_v2 = vshrl.u32 %v15482_v27, 16  ;;  %v7567_v22 = vshll.u32 %v15482_v27, 16  ;;  %v7253_v7 = vmax.f32 %v7221_v3, 0.0  ;;  %v20957_v42 = vcombine.low %v7793_v4, %v20947_v41  ;;  %v20971_v53 = vld [vmem:[#allocation2 + $0x11c] ss:$0 sps:$4 sm:$0x11]  }
 0x716   : > { %v7756_v16 = vsel %vm17834_vm6, %v7561_v21, %v7755_v1  ;;  %v7583_v50 = vrot.slane %v7581_v9, 7  ;;  %v7222_v45 = vadd.f32 %v20906_v34, %v20686_v33  ;;  %v7220_v35 = vadd.f32 %v20686_v33, %v20912_v10  ;;  %v7799_v15 = vld [vmem:[#allocation2 + $0x138] sm:$0xf] }
 0x717   : > { %7757 = vst [vmem:[#allocation2 + $0x174] sm:$0xf] %v7756_v16  ;;  %v7566_v47 = vrot.slane %v7564_v2, 7  ;;  %v15487_v8 = vpack.c.bf16 %v7253_v7, %v7253_v7  ;;  %v7251_v57 = vmax.f32 %v7219_v40, 0.0  ;;  %7947 = vrot.lane.b32.xlu1 %v20957_v42, %s17549_s30  ;;  %v7776_v27 = vld [vmem:[#allocation2 + $0x198] sm:$0xf]  ;;  %v20986_v21 = vcombine.low %v7799_v15, %v20980_v32 }
 0x718   : > { %v7586_v38 = vor.u32 %v7584_v26, %v7583_v50  ;;  %v7588_v0 = vrot.slane %v7583_v50, 4  ;;  %v7254_v10 = vmax.f32 %v7222_v45, 0.0  ;;  %7912 = vrot.lane.b32.xlu0 %v20957_v42, %s17550_s7  ;;  %v7252_v58 = vmax.f32 %v7220_v35, 0.0  ;;  %v7769_v2 = vld [vmem:[#allocation2 + $0x18c] sm:$0xf] }
 0x719   : > { %v7569_v20 = vor.u32 %v7567_v22, %v7566_v47  ;;  %v7571_v56 = vrot.slane %v7566_v47, 4  ;;  %v7607_v63 = vshrl.u32 %v15487_v8, 16  ;;  %v7610_v55 = vshll.u32 %v15487_v8, 16  ;;  %v20994_v50 = vld [vmem:[#allocation2 + $0x140] ss:$0 sps:$4 sm:$0x11]  }
 0x71a   : > { %v7587_v59 = vsel %vm17827_vm5, %v7579_v17, %v7586_v38  ;;  %v7767_v34 = vsel %vm17845_vm7, %v7588_v0, %v7766_v11  ;;  %v15485_v33 = vpack.c.bf16 %v7251_v57, %v7251_v57  ;;  %v15488_v6 = vpack.c.bf16 %v7254_v10, %v7254_v10  ;;  %v21000_v11 = vld [vmem:[#allocation2 + $0x130] sm:$0xf]  ;;  %v7807_v15 = vld [vmem:[#allocation2 + $0x168] sm:$0xf] }
 0x71b   : > { %7765 = vst.msk [vmem:[#allocation2 + $0x184] sm:$0xf] %vm199_vm0, %v7587_v59  ;;  %7768 = vst [vmem:[#allocation2 + $0x188] sm:$0x1] %v7767_v34  ;;  %v7570_v5 = vsel %vm17827_vm5, %v7562_v13, %v7569_v20  ;;  %v7760_v37 = vsel %vm17845_vm7, %v7571_v56, %v7759_v61  ;;  %v7609_v18 = vrot.slane %v7607_v63, 7  ;;  %8176 = vrot.lane.b32.xlu1 %v20971_v53, %s17549_s30 }
 0x71c   : > { %7758 = vst.msk [vmem:[#allocation2 + $0x178] sm:$0xf] %vm199_vm0, %v7570_v5  ;;  %7761 = vst [vmem:[#allocation2 + $0x17c] sm:$0x1] %v7760_v37  ;;  %v7590_v19 = vshrl.u32 %v15485_v33, 16  ;;  %v15486_v62 = vpack.c.bf16 %v7252_v58, %v7252_v58  ;;  %v7593_v17 = vshll.u32 %v15485_v33, 16  ;;  %8143 = vrot.lane.b32.xlu0 %v20971_v53, %s17550_s7 }
 0x71d   : > { %v7612_v29 = vor.u32 %v7610_v55, %v7609_v18  ;;  %v7615_v39 = vshrl.u32 %v15488_v6, 16  ;;  %v7618_v7 = vshll.u32 %v15488_v6, 16  ;;  %v7613_v40 = vrot.slane %v7609_v18, 4  ;;  %v7780_v13 = vld [vmem:[#allocation2 + $0x1a0] sm:$0x1] }
 0x71e   : > { %v7592_v3 = vrot.slane %v7590_v19, 7  ;;  %v7598_v9 = vshrl.u32 %v15486_v62, 16  ;;  %v7601_v16 = vshll.u32 %v15486_v62, 16  ;;  %v7773_v56 = vld [vmem:[#allocation2 + $0x194] sm:$0x1] }
 0x71f   : > { %v7777_v1 = vsel %vm17834_vm6, %v7612_v29, %v7776_v27  ;;  %v7617_v22 = vrot.slane %v7615_v39, 7  ;;  %7918 = vrot.lane.b32.xlu1 %v20986_v21, %s17550_s7  ;;  %v7797_v55 = vld [vmem:[#allocation2 + $0x12c] sm:$0xf]  ;;  %v21021_v34 = vld [vmem:[#allocation2 + $0x134] ss:$0 sps:$4 sm:$0x11]  }
 0x720   : > { %7778 = vst [vmem:[#allocation2 + $0x198] sm:$0xf] %v7777_v1  ;;  %v7595_v26 = vor.u32 %v7593_v17, %v7592_v3  ;;  %v7600_v4 = vrot.slane %v7598_v9, 7  ;;  %7953 = vrot.lane.b32.xlu0 %v20986_v21, %s17549_s30  ;;  %v7596_v35 = vrot.slane %v7592_v3, 4  ;;  %v21015_v59 = vcombine.low %v7797_v55, %v21000_v11  ;;  %v21025_v33 = vld [vmem:[#allocation2 + $0x154] sm:$0xf] }
 0x721   : > { %v7620_v8 = vor.u32 %v7618_v7, %v7617_v22  ;;  %v7622_v45 = vrot.slane %v7617_v22, 4  ;;  %v7803_v10 = vld [vmem:[#allocation2 + $0x150] sm:$0xf]  ;;  %v21036_v37 = vld [vmem:[#allocation2 + $0x158] ss:$0 sps:$4 sm:$0x11]  }
 0x722   : > { %v7770_v47 = vsel %vm17834_vm6, %v7595_v26, %v7769_v2  ;;  %v7603_v38 = vor.u32 %v7601_v16, %v7600_v4  ;;  %v7605_v0 = vrot.slane %v7600_v4, 4  ;;  %v21030_v5 = vcombine.low %v7803_v10, %v21025_v33  ;;  %v21040_v18 = vld [vmem:[#allocation2 + $0x148] sm:$0xf]  ;;  %v7801_v58 = vld [vmem:[#allocation2 + $0x144] sm:$0xf]  ;;  %v21047_v19 = vld [vmem:[%s23693_s1 + $0x1b0] sm:$0xff]  }
 0x723   : > { %7771 = vst [vmem:[#allocation2 + $0x18c] sm:$0xf] %v7770_v47  ;;  %v7621_v57 = vsel %vm17827_vm5, %v7613_v40, %v7620_v8  ;;  %v7781_v20 = vsel %vm17845_vm7, %v7622_v45, %v7780_v13  ;;  %8149 = vrot.lane.b32.xlu1 %v20994_v50, %s17550_s7  ;;  %v21050_v6 = vcombine.low %v7801_v58, %v21040_v18  ;;  %v21057_v29 = vld [vmem:[#allocation2 + $0x14c] ss:$0 sps:$4 sm:$0x11]   ;;  %v21125_v45 = vpop.permute.xlu1 %7971 }
 0x724   : > { %7779 = vst.msk [vmem:[#allocation2 + $0x19c] sm:$0xf] %vm199_vm0, %v7621_v57  ;;  %7782 = vst [vmem:[#allocation2 + $0x1a0] sm:$0x1] %v7781_v20  ;;  %v7604_v61 = vsel %vm17827_vm5, %v7596_v35, %v7603_v38  ;;  %v7774_v63 = vsel %vm17845_vm7, %v7605_v0, %v7773_v56  ;;  %8182 = vrot.lane.b32.xlu0 %v20994_v50, %s17549_s30  ;;  %16389 = vmatprep.subr.bf16.mxu1 %v21047_v19  ;;  %v21061_v62 = vld [vmem:[#allocation2 + $0x16c] sm:$0xf] }
 0x725   : > { %7772 = vst.msk [vmem:[#allocation2 + $0x190] sm:$0xf] %vm199_vm0, %v7604_v61  ;;  %7775 = vst [vmem:[#allocation2 + $0x194] sm:$0x1] %v7774_v63  ;;  %v21066_v27 = vcombine.low %v7807_v15, %v21061_v62  ;;  %v21076_v17 = vld [vmem:[#allocation2 + $0x160] sm:$0xf] }
 0x726   : > { %v21072_v3 = vld [vmem:[#allocation2 + $0x170] ss:$0 sps:$4 sm:$0x11]   ;;  %v7805_v39 = vld [vmem:[#allocation2 + $0x15c] sm:$0xf] }
 0x727   : > { %7951 = vrot.lane.b32.xlu1 %v21015_v59, %s17549_s30  ;;  %v21081_v1 = vcombine.low %v7805_v39, %v21076_v17  ;;  %v21087_v9 = vld [vmem:[#allocation2 + $0x164] ss:$0 sps:$4 sm:$0x11]   ;;  %v7811_v2 = vld [vmem:[#allocation2 + $0x180] sm:$0xf] }
 0x728   : > { %7916 = vrot.lane.b32.xlu0 %v21015_v59, %s17550_s7  ;;  %v21091_v26 = vld [vmem:[#allocation2 + $0x184] sm:$0xf]  ;;  %v21102_v7 = vld [vmem:[#allocation2 + $0x188] ss:$0 sps:$4 sm:$0x11]  }
 0x729   : > { %v21096_v22 = vcombine.low %v7811_v2, %v21091_v26  ;;  %23794 = vst [vmem:[#allocation6_spill] sm:$0xff] %v21102_v7  ;;  %v21106_v4 = vld [vmem:[#allocation2 + $0x178] sm:$0xf]  ;;  %v7809_v16 = vld [vmem:[#allocation2 + $0x174] sm:$0xf] }
 0x72a   : > { %v21111_v40 = vcombine.low %v7809_v16, %v21106_v4  ;;  %v21117_v47 = vld [vmem:[#allocation2 + $0x17c] ss:$0 sps:$4 sm:$0x11]   ;;  %v7815_v35 = vld [vmem:[#allocation2 + $0x198] sm:$0xf] }
 0x72b   : > { %8180 = vrot.lane.b32.xlu1 %v21021_v34, %s17549_s30  ;;  %v21121_v8 = vld [vmem:[#allocation2 + $0x19c] sm:$0xf]  ;;  %v7813_v0 = vld [vmem:[#allocation2 + $0x18c] sm:$0xf]  ;;  %v7783_v61 = vld [vmem:[#allocation2 + $0xd8] sm:$0xf] }
 0x72c   : > { %8147 = vrot.lane.b32.xlu0 %v21021_v34, %s17550_s7  ;;  %v14881_v13 = vcombine.low %v7815_v35, %v21121_v8  ;;  %v21130_v38 = vld [vmem:[#allocation2 + $0x190] sm:$0xf]  ;;  %v21139_v63 = vld [vmem:[#allocation2 + $0x194] ss:$0 sps:$4 sm:$0x11]  }
 0x72d   : > { %v21134_v57 = vcombine.low %v7813_v0, %v21130_v38  ;;  %23795 = vst [vmem:[#allocation7_spill] sm:$0xff] %v21139_v63  ;;  %v21143_v10 = vld [vmem:[#allocation2 + $0xdc] sm:$0xf]  ;;  %v17355_v39 = vld [vmem:[#allocation2 + $0x1a0] ss:$0 sps:$4 sm:$0x11]  }
 0x72e   : > { %23796 = vst [vmem:[#allocation8_spill] sm:$0xff] %v21143_v10  ;;  %v14865_v15 = vcombine.low %v7783_v61, %v21143_v10  ;;  %v17357_v2 = vld [vmem:[#allocation2 + $0x1ac] ss:$0 sps:$4 sm:$0x11]   ;;  %v21161_v10 = vcombine.low %v8930_v54, %v20792_v23 }
 0x72f   : > { %7922 = vrot.lane.b32.xlu1 %v21030_v5, %s17550_s7 }
 0x730   : > { %7957 = vrot.lane.b32.xlu0 %v21030_v5, %s17549_s30 }
 0x733   : > { %8153 = vrot.lane.b32.xlu1 %v21036_v37, %s17550_s7 }
 0x734   : > { %8186 = vrot.lane.b32.xlu0 %v21036_v37, %s17549_s30 }
 0x737   : > { %7955 = vrot.lane.b32.xlu1 %v21050_v6, %s17549_s30 }
 0x738   : > { %7920 = vrot.lane.b32.xlu0 %v21050_v6, %s17550_s7 }
 0x73b   : > { %8184 = vrot.lane.b32.xlu1 %v21057_v29, %s17549_s30 }
 0x73c   : > { %8151 = vrot.lane.b32.xlu0 %v21057_v29, %s17550_s7 }
 0x73f   : > { %7926 = vrot.lane.b32.xlu1 %v21066_v27, %s17550_s7 }
 0x740   : > { %7961 = vrot.lane.b32.xlu0 %v21066_v27, %s17549_s30 }
 0x743   : > { %8157 = vrot.lane.b32.xlu1 %v21072_v3, %s17550_s7 }
 0x744   : > { %8190 = vrot.lane.b32.xlu0 %v21072_v3, %s17549_s30 }
 0x747   : > { %7959 = vrot.lane.b32.xlu1 %v21081_v1, %s17549_s30 }
 0x748   : > { %7924 = vrot.lane.b32.xlu0 %v21081_v1, %s17550_s7 }
 0x74b   : > { %8188 = vrot.lane.b32.xlu1 %v21087_v9, %s17549_s30 }
 0x74c   : > { %8155 = vrot.lane.b32.xlu0 %v21087_v9, %s17550_s7 }
 0x74f   : > { %7930 = vrot.lane.b32.xlu1 %v21096_v22, %s17550_s7 }
 0x750   : > { %7965 = vrot.lane.b32.xlu0 %v21096_v22, %s17549_s30 }
 0x753   : > { %8161 = vrot.lane.b32.xlu1 %v21102_v7, %s17550_s7 }
 0x754   : > { %8194 = vrot.lane.b32.xlu0 %v21102_v7, %s17549_s30  ;;  %v8931_v7 = vld [vmem:[#allocation2 + $0xf0] sm:$0xe] }
 0x757   : > { %7963 = vrot.lane.b32.xlu1 %v21111_v40, %s17549_s30 }
 0x758   : > { %7928 = vrot.lane.b32.xlu0 %v21111_v40, %s17550_s7 }
 0x75b   : > { %8192 = vrot.lane.b32.xlu1 %v21117_v47, %s17549_s30 }
 0x75c   : > { %8159 = vrot.lane.b32.xlu0 %v21117_v47, %s17550_s7 }
 0x75f   : > { %7934 = vrot.lane.b32.xlu1 %v14881_v13, %s17550_s7 }
 0x760   : > { %7969 = vrot.lane.b32.xlu0 %v14881_v13, %s17549_s30  ;;  %v17361_v13 = vld [vmem:[#allocation2 + $0xe0] ss:$0 sps:$4 sm:$0x11]  }
 0x761   : > { %v7907_v20 = vpop.permute.xlu1 %7906  ;;  %v7942_v56 = vpop.permute.xlu0 %7941 }
 0x763   : > { %7967 = vrot.lane.b32.xlu1 %v21134_v57, %s17549_s30 }
 0x764   : > { %7932 = vrot.lane.b32.xlu0 %v21134_v57, %s17550_s7 }
 0x765   : > { %v8171_v55 = vpop.permute.xlu0 %8170  ;;  %v8138_v58 = vpop.permute.xlu1 %8137 }
 0x767   : > { %8196 = vrot.lane.b32.xlu1 %v21139_v63, %s17549_s30 }
 0x768   : > { %8163 = vrot.lane.b32.xlu0 %v21139_v63, %s17550_s7 }
 0x76a   : > { %v7905_v16 = vpop.permute.xlu0 %7904  ;;  %v21152_v0 = vpop.permute.xlu1 %7910 }
 0x76b   : > { %8165 = vrot.lane.b32.xlu1 %v17355_v39, %s17550_s7  ;;  %v7975_v35 = vsel %vm972_vm8, %v14865_v15, %v7905_v16  ;;  %v21165_v16 = vcombine.low %v8931_v7, %v20732_v51  ;;  %v7978_v7 = vsel %vm972_vm8, %v20807_v43, %v7907_v20  ;;  %v8933_v20 = vld [vmem:[#allocation2 + $0x108] sm:$0xe] }
 0x76c   : > { %v21155_v60 = vsel %vm1021_vm9, %v7975_v35, %v7942_v56  ;;  %8198 = vrot.lane.b32.xlu0 %v17355_v39, %s17549_s30  ;;  %v8932_v35 = vld [vmem:[#allocation2 + $0xfc] sm:$0xe] }
 0x76d   : > { %v8284_v61 = vshll.u32 %v21155_v60, 16 }
 0x76e   : > { %v8136_v49 = vpop.permute.xlu0 %8135  ;;  %v21167_v56 = vpop.permute.xlu1 %8141 }
 0x76f   : > { %8200 = vrot.lane.b32.xlu1 %v17357_v2, %s17549_s30  ;;  %v8286_v63 = vrot.slane %v8284_v61, 1  ;;  %v8204_v15 = vsel %vm972_vm8, %v17361_v13, %v8136_v49  ;;  %v8282_v2 = vshrl.u32 %v21155_v60, 16 }
 0x770   : > { %v21170_v39 = vsel %vm1021_vm9, %v8204_v15, %v8171_v55  ;;  %8998 = vrot.lane.b32.xlu0 %v21161_v10, %s17550_s7  ;;  %v21181_v55 = vcombine.low %v8932_v35, %v20850_v52  ;;  %v8207_v52 = vsel %vm972_vm8, %v20824_v12, %v8138_v58  ;;  %v8934_v12 = vld [vmem:[#allocation2 + $0x114] sm:$0xe] }
 0x771   : > { %v8288_v54 = vshll.u32 %v21170_v39, 16  ;;  %v8287_v51 = vor.u32 %v8286_v63, %v8282_v2 }
 0x772   : > { %v7946_v23 = vpop.permute.xlu0 %7945  ;;  %23797 = vst [vmem:[#allocation9_spill] sm:$0xff] %v21181_v55 }
 0x773   : > { %9000 = vrot.lane.b32.xlu1 %v21165_v16, %s17550_s7  ;;  %v8290_v49 = vrot.slane %v8288_v54, 1  ;;  %v21196_v54 = vcombine.low %v8933_v20, %v20800_v25 }
 0x774   : > { %9033 = vrot.lane.b32.xlu0 %v21165_v16, %s17549_s30 }
 0x775   : > { %v7944_v13 = vpop.permute.xlu1 %7943  ;;  %v8291_v15 = vsel %vm1282_vm10, %v8287_v51, %v8290_v49 }
 0x776   : > { %v21186_v61 = vsel %vm1021_vm9, %v7978_v7, %v7944_v13  ;;  %16357 = vmatprep.mubr.msk.bf16.mxu1 %vm1492_vm11, %v8291_v15  ;;  %v8175_v43 = vpop.permute.xlu0 %8174 }
 0x777   : > { %9035 = vrot.lane.b32.xlu1 %v21181_v55, %s17549_s30  ;;  %v8294_v63 = vshll.u32 %v21186_v61, 16  ;;  %v8292_v51 = vshrl.u32 %v21186_v61, 16 }
 0x778   : > { %9002 = vrot.lane.b32.xlu0 %v21181_v55, %s17550_s7 }
 0x779   : > { %v8296_v2 = vrot.slane %v8294_v63, 1  ;;  %v8173_v35 = vpop.permute.xlu1 %8172  ;;  %v21210_v63 = vcombine.low %v8934_v12, %v20947_v41 }
 0x77a   : > { %v21201_v49 = vsel %vm1021_vm9, %v8207_v52, %v8173_v35  ;;  %v7909_v13 = vpop.permute.xlu0 %7908  ;;  %v17376_v35 = vld [vmem:[%s23693_s1 + $0x1b8] sm:$0xff]  }
 0x77b   : > { %9004 = vrot.lane.b32.xlu1 %v21196_v54, %s17550_s7  ;;  %v8298_v7 = vshll.u32 %v21201_v49, 16  ;;  %v7981_v25 = vsel %vm972_vm8, %v20752_v44, %v7909_v13  ;;  %v8297_v58 = vor.u32 %v8296_v2, %v8292_v51 }
 0x77c   : > { %v21213_v20 = vsel %vm1021_vm9, %v7981_v25, %v7946_v23  ;;  %9037 = vrot.lane.b32.xlu0 %v21196_v54, %s17549_s30  ;;  %v8935_v23 = vld [vmem:[#allocation2 + $0x120] sm:$0xe] }
 0x77d   : > { %v8300_v15 = vrot.slane %v8298_v7, 1  ;;  %v8304_v52 = vshll.u32 %v21213_v20, 16  ;;  %v21230_v7 = vcombine.low %v8935_v23, %v20904_v24  ;;  %v8302_v12 = vshrl.u32 %v21213_v20, 16  ;;  %v8937_v23 = vld [vmem:[#allocation2 + $0x138] sm:$0xe] }
 0x77e   : > { %v8140_v41 = vpop.permute.xlu0 %8139 }
 0x77f   : > { %v8301_v55 = vsel %vm1282_vm10, %v8297_v58, %v8300_v15  ;;  %9039 = vrot.lane.b32.xlu1 %v21210_v63, %s17549_s30  ;;  %v21224_v44 = vpop.permute.xlu1 %7914  ;;  %v8306_v2 = vrot.slane %v8304_v52, 1  ;;  %v8210_v51 = vsel %vm972_vm8, %v20763_v30, %v8140_v41  ;;  %v17377_v30 = vld [vmem:[%s23693_s1 + $0x1c0] sm:$0xff]   ;;  %v8936_v58 = vld [vmem:[#allocation2 + $0x12c] sm:$0xe] }
 0x780   : > { %16358 = vmatmul.mubr.msk.bf16.vlgmr.msra.gmra.mrb[32].mxu1 %vm1492_vm11, %v8301_v55  ;;  %v21233_v13 = vsel %vm1021_vm9, %v8210_v51, %v8175_v43  ;;  %9006 = vrot.lane.b32.xlu0 %v21210_v63, %s17550_s7  ;;  %v17378_v41 = vld [vmem:[%s23693_s1 + $0x1c8] sm:$0xff]  }
 0x781   : > { %16390 = vmatpush3.bf16.msra.mxu1 %v21047_v19  ;;  %v8308_v25 = vshll.u32 %v21233_v13, 16  ;;  %v8307_v15 = vor.u32 %v8306_v2, %v8302_v12  ;;  %v21248_v19 = vcombine.low %v8936_v58, %v21000_v11  ;;  %v7984_v11 = vsel %vm972_vm8, %v20868_v46, %v21152_v0 }
 0x782   : > { %16391 = vmatprep.subr.bf16.mxu1 %v17376_v35  ;;  %v7950_v55 = vpop.permute.xlu0 %7949 }
 0x783   : > { %9008 = vrot.lane.b32.xlu1 %v21230_v7, %s17550_s7  ;;  %v21245_v24 = vpop.permute.xlu1 %8145  ;;  %v8310_v43 = vrot.slane %v8308_v25, 1  ;;  %v17379_v25 = vld [vmem:[%s23693_s1 + $0x1d0] sm:$0xff]  }
 0x784   : > { %9041 = vrot.lane.b32.xlu0 %v21230_v7, %s17549_s30 }
 0x785   : > { %16392 = vmatpush3.bf16.msra.mxu1 %v17376_v35  ;;  %v8311_v52 = vsel %vm1282_vm10, %v8307_v15, %v8310_v43  ;;  %v21263_v35 = vcombine.low %v8937_v23, %v20980_v32  ;;  %v8938_v32 = vld [vmem:[#allocation2 + $0x144] sm:$0xe] }
 0x786   : > { %16393 = vmatprep.subr.bf16.mxu1 %v17377_v30  ;;  %16361 = vmatprep.mubr.msk.bf16.mxu1 %vm1492_vm11, %v8311_v52  ;;  %v8179_v2 = vpop.permute.xlu0 %8178  ;;  %v21282_v52 = vcombine.low %v8938_v32, %v21040_v18 }
 0x787   : > { %9043 = vrot.lane.b32.xlu1 %v21248_v19, %s17549_s30  ;;  %23798 = vst [vmem:[#allocation10_spill] sm:$0xff] %v21263_v35 }
 0x788   : > { %9010 = vrot.lane.b32.xlu0 %v21248_v19, %s17550_s7 }
 0x789   : > { %v7948_v51 = vpop.permute.xlu1 %7947  ;;  %16394 = vmatpush3.bf16.msra.mxu1 %v17377_v30  ;;  %v8213_v30 = vsel %vm972_vm8, %v20882_v36, %v21167_v56  ;;  %v17381_v36 = vld [vmem:[%s23693_s1 + $0x1d8] sm:$0xff]  }
 0x78a   : > { %v21268_v12 = vsel %vm1021_vm9, %v7984_v11, %v7948_v51  ;;  %16395 = vmatprep.subr.bf16.mxu1 %v17378_v41  ;;  %v7913_v46 = vpop.permute.xlu0 %7912 }
 0x78b   : > { %v8314_v43 = vshll.u32 %v21268_v12, 16  ;;  %9012 = vrot.lane.b32.xlu1 %v21263_v35, %s17550_s7  ;;  %v7987_v0 = vsel %vm972_vm8, %v20817_v48, %v7913_v46  ;;  %v8312_v18 = vshrl.u32 %v21268_v12, 16 }
 0x78c   : > { %v21285_v23 = vsel %vm1021_vm9, %v7987_v0, %v7950_v55  ;;  %9045 = vrot.lane.b32.xlu0 %v21263_v35, %s17549_s30 }
 0x78d   : > { %v8316_v58 = vrot.slane %v8314_v43, 1  ;;  %v8177_v15 = vpop.permute.xlu1 %8176  ;;  %16396 = vmatpush3.bf16.msra.mxu1 %v17378_v41  ;;  %v8324_v48 = vshll.u32 %v21285_v23, 16  ;;  %v8939_v41 = vld [vmem:[#allocation2 + $0x150] sm:$0xe] }
 0x78e   : > { %v21290_v11 = vsel %vm1021_vm9, %v8213_v30, %v8177_v15  ;;  %16397 = vmatprep.subr.bf16.mxu1 %v17379_v25  ;;  %v8144_v55 = vpop.permute.xlu0 %8143  ;;  %v21305_v30 = vcombine.low %v8939_v41, %v21025_v33 }
 0x78f   : > { %v8318_v56 = vshll.u32 %v21290_v11, 16  ;;  %9047 = vrot.lane.b32.xlu1 %v21282_v52, %s17549_s30  ;;  %v8326_v51 = vrot.slane %v8324_v48, 1  ;;  %v8216_v43 = vsel %vm972_vm8, %v20842_v28, %v8144_v55  ;;  %v8317_v46 = vor.u32 %v8316_v58, %v8312_v18  ;;  %v21317_v28 = vld [vmem:[%s23693_s1 + $0x210] sm:$0xff]  }
 0x790   : > { %v21308_v15 = vsel %vm1021_vm9, %v8216_v43, %v8179_v2  ;;  %9014 = vrot.lane.b32.xlu0 %v21282_v52, %s17550_s7  ;;  %v8322_v48 = vshrl.u32 %v21285_v23, 16 }
 0x791   : > { %v8320_v32 = vrot.slane %v8318_v56, 1  ;;  %v21302_v0 = vpop.permute.xlu1 %7918  ;;  %16398 = vmatpush3.bf16.msra.mxu1 %v17379_v25  ;;  %v8328_v35 = vshll.u32 %v21308_v15, 16  ;;  %v8940_v25 = vld [vmem:[#allocation2 + $0x15c] sm:$0xe] }
 0x792   : > { %16399 = vmatprep.subr.bf16.mxu1 %v17381_v36  ;;  %v7954_v2 = vpop.permute.xlu0 %7953  ;;  %v8327_v18 = vor.u32 %v8326_v51, %v8322_v48  ;;  %v21326_v55 = vcombine.low %v8940_v25, %v21076_v17  ;;  %v8941_v51 = vld [vmem:[#allocation2 + $0x168] sm:$0xe]  ;;  %v7990_v17 = vsel %vm972_vm8, %v20957_v42, %v21224_v44 }
 0x793   : > { %9016 = vrot.lane.b32.xlu1 %v21305_v30, %s17550_s7  ;;  %v8321_v33 = vsel %vm1282_vm10, %v8317_v46, %v8320_v32  ;;  %v8330_v58 = vrot.slane %v8328_v35, 1  ;;  %v21339_v46 = vcombine.low %v8941_v51, %v21061_v62  ;;  %v8219_v62 = vsel %vm972_vm8, %v20971_v53, %v21245_v24 }
 0x794   : > { %16362 = vmatmul.mubr.msk.bf16.gmra.mrb[36].mxu1 %vm1492_vm11, %v8321_v33  ;;  %9049 = vrot.lane.b32.xlu0 %v21305_v30, %s17549_s30  ;;  %v8942_v33 = vld [vmem:[#allocation2 + $0x174] sm:$0xe] }
 0x795   : > { %v21323_v56 = vpop.permute.xlu1 %8149  ;;  %16400 = vmatpush3.bf16.msra.mxu1 %v17381_v36  ;;  %v8331_v41 = vsel %vm1282_vm10, %v8327_v18, %v8330_v58  ;;  %v21355_v25 = vcombine.low %v8942_v33, %v21106_v4 }
 0x796   : > { %16433 = vmatprep.subr.bf16.mxu1 %v21317_v28  ;;  %16365 = vmatprep.mubr.msk.bf16.mxu1 %vm1492_vm11, %v8331_v41  ;;  %v8183_v35 = vpop.permute.xlu0 %8182 }
 0x797   : > { %9051 = vrot.lane.b32.xlu1 %v21326_v55, %s17549_s30 }
 0x798   : > { %9018 = vrot.lane.b32.xlu0 %v21326_v55, %s17550_s7 }
 0x799   : > { %v7952_v43 = vpop.permute.xlu1 %7951 }
 0x79a   : > { %v21344_v36 = vsel %vm1021_vm9, %v7990_v17, %v7952_v43  ;;  %v7917_v48 = vpop.permute.xlu0 %7916  ;;  %v8943_v17 = vld [vmem:[#allocation2 + $0x180] sm:$0xe] }
 0x79b   : > { %v8334_v32 = vshll.u32 %v21344_v36, 16  ;;  %9020 = vrot.lane.b32.xlu1 %v21339_v46, %s17550_s7  ;;  %v7993_v42 = vsel %vm972_vm8, %v20920_v14, %v7917_v48  ;;  %v8332_v51 = vshrl.u32 %v21344_v36, 16  ;;  %v21373_v33 = vcombine.low %v8943_v17, %v21091_v26 }
 0x79c   : > { %v21358_v18 = vsel %vm1021_vm9, %v7993_v42, %v7954_v2  ;;  %9053 = vrot.lane.b32.xlu0 %v21339_v46, %s17549_s30 }
 0x79d   : > { %v8336_v44 = vrot.slane %v8334_v32, 1  ;;  %v8181_v58 = vpop.permute.xlu1 %8180  ;;  %v8344_v14 = vshll.u32 %v21358_v18, 16 }
 0x79e   : > { %v21363_v41 = vsel %vm1021_vm9, %v8219_v62, %v8181_v58  ;;  %v8148_v4 = vpop.permute.xlu0 %8147  ;;  %v8342_v62 = vshrl.u32 %v21358_v18, 16 }
 0x79f   : > { %v8338_v53 = vshll.u32 %v21363_v41, 16  ;;  %9055 = vrot.lane.b32.xlu1 %v21355_v25, %s17549_s30  ;;  %v8346_v24 = vrot.slane %v8344_v14, 1  ;;  %v8222_v2 = vsel %vm972_vm8, %v20930_v31, %v8148_v4  ;;  %v8337_v43 = vor.u32 %v8336_v44, %v8332_v51  ;;  %v8944_v14 = vld [vmem:[#allocation2 + $0x18c] sm:$0xe] }
 0x7a0   : > { %v21376_v42 = vsel %vm1021_vm9, %v8222_v2, %v8183_v35  ;;  %9022 = vrot.lane.b32.xlu0 %v21355_v25, %s17550_s7  ;;  %v8945_v2 = vld [vmem:[#allocation2 + $0x198] sm:$0xe] }
 0x7a1   : > { %v8340_v32 = vrot.slane %v8338_v53, 1  ;;  %v7923_v48 = vpop.permute.xlu1 %7922  ;;  %v8348_v58 = vshll.u32 %v21376_v42, 16  ;;  %v8347_v51 = vor.u32 %v8346_v24, %v8342_v62  ;;  %v21387_v53 = vcombine.low %v8944_v14, %v21130_v38 }
 0x7a2   : > { %v7958_v44 = vpop.permute.xlu0 %7957  ;;  %v7996_v24 = vsel %vm972_vm8, %v21015_v59, %v21302_v0  ;;  %v14985_v38 = vcombine.low %v8945_v2, %v21121_v8  ;;  %v8225_v59 = vsel %vm972_vm8, %v21021_v34, %v21323_v56 }
 0x7a3   : > { %9024 = vrot.lane.b32.xlu1 %v21373_v33, %s17550_s7  ;;  %v8341_v31 = vsel %vm1282_vm10, %v8337_v43, %v8340_v32  ;;  %v8350_v26 = vrot.slane %v8348_v58, 1  ;;  %23799 = vst [vmem:[#allocation11_spill] sm:$0xff] %v21387_v53  ;;  %v8946_v43 = vld [vmem:[#allocation2 + $0x1a4] sm:$0xe] }
 0x7a4   : > { %16366 = vmatmul.mubr.msk.bf16.gmra.mrb[40].mxu1 %vm1492_vm11, %v8341_v31  ;;  %9057 = vrot.lane.b32.xlu0 %v21373_v33, %s17549_s30  ;;  %v17537_v31 = vld [vmem:[#allocation2 + $0x1a8] sm:$0xf] }
 0x7a5   : > { %v8154_v35 = vpop.permute.xlu1 %8153  ;;  %v8351_v4 = vsel %vm1282_vm10, %v8347_v51, %v8350_v26  ;;  %v14986_v26 = vcombine.low %v8946_v43, %v17537_v31 }
 0x7a6   : > { %16369 = vmatprep.mubr.msk.bf16.mxu1 %vm1492_vm11, %v8351_v4  ;;  %v8187_v17 = vpop.permute.xlu0 %8186 }
 0x7a7   : > { %9059 = vrot.lane.b32.xlu1 %v21387_v53, %s17549_s30 }
 0x7a8   : > { %9026 = vrot.lane.b32.xlu0 %v21387_v53, %s17550_s7 }
 0x7a9   : > { %v7956_v32 = vpop.permute.xlu1 %7955 }
 0x7aa   : > { %v21402_v62 = vsel %vm1021_vm9, %v7996_v24, %v7956_v32  ;;  %v7921_v14 = vpop.permute.xlu0 %7920 }
 0x7ab   : > { %v8354_v58 = vshll.u32 %v21402_v62, 16  ;;  %9028 = vrot.lane.b32.xlu1 %v14985_v38, %s17550_s7  ;;  %v7999_v51 = vsel %vm972_vm8, %v20986_v21, %v7921_v14  ;;  %v8352_v24 = vshrl.u32 %v21402_v62, 16 }
 0x7ac   : > { %v21412_v4 = vsel %vm1021_vm9, %v7999_v51, %v7958_v44  ;;  %9061 = vrot.lane.b32.xlu0 %v14985_v38, %s17549_s30 }
 0x7ad   : > { %v8356_v8 = vrot.slane %v8354_v58, 1  ;;  %v8185_v0 = vpop.permute.xlu1 %8184  ;;  %v8364_v43 = vshll.u32 %v21412_v4, 16  ;;  %v8362_v14 = vshrl.u32 %v21412_v4, 16 }
 0x7ae   : > { %v21416_v2 = vsel %vm1021_vm9, %v8225_v59, %v8185_v0  ;;  %v8152_v32 = vpop.permute.xlu0 %8151 }
 0x7af   : > { %v8358_v21 = vshll.u32 %v21416_v2, 16  ;;  %9063 = vrot.lane.b32.xlu1 %v14986_v26, %s17549_s30  ;;  %v8366_v34 = vrot.slane %v8364_v43, 1  ;;  %v8228_v56 = vsel %vm972_vm8, %v20994_v50, %v8152_v32  ;;  %v8357_v44 = vor.u32 %v8356_v8, %v8352_v24 }
 0x7b0   : > { %v21425_v38 = vsel %vm1021_vm9, %v8228_v56, %v8187_v17  ;;  %v8002_v17 = vsel %vm972_vm8, %v21050_v6, %v7923_v48 }
 0x7b1   : > { %v8360_v58 = vrot.slane %v8358_v21, 1  ;;  %v7927_v31 = vpop.permute.xlu1 %7926  ;;  %v8368_v51 = vshll.u32 %v21425_v38, 16  ;;  %v8367_v43 = vor.u32 %v8366_v34, %v8362_v14  ;;  %v8231_v34 = vsel %vm972_vm8, %v21057_v29, %v8154_v35 }
 0x7b2   : > { %v7962_v0 = vpop.permute.xlu0 %7961 }
 0x7b3   : > { %v8361_v59 = vsel %vm1282_vm10, %v8357_v44, %v8360_v58  ;;  %v8370_v26 = vrot.slane %v8368_v51, 1 }
 0x7b4   : > { %16370 = vmatmul.mubr.msk.bf16.gmra.mrb[44].mxu1 %vm1492_vm11, %v8361_v59 }
 0x7b5   : > { %v8158_v53 = vpop.permute.xlu1 %8157  ;;  %v8371_v50 = vsel %vm1282_vm10, %v8367_v43, %v8370_v26 }
 0x7b6   : > { %16373 = vmatprep.mubr.msk.bf16.mxu1 %vm1492_vm11, %v8371_v50  ;;  %v8191_v8 = vpop.permute.xlu0 %8190 }
 0x7b9   : > { %v7960_v24 = vpop.permute.xlu1 %7959 }
 0x7ba   : > { %v21436_v21 = vsel %vm1021_vm9, %v8002_v17, %v7960_v24  ;;  %v7925_v56 = vpop.permute.xlu0 %7924 }
 0x7bb   : > { %v8374_v32 = vshll.u32 %v21436_v21, 16  ;;  %v8005_v44 = vsel %vm972_vm8, %v21030_v5, %v7925_v56  ;;  %v8372_v59 = vshrl.u32 %v21436_v21, 16 }
 0x7bc   : > { %v21444_v51 = vsel %vm1021_vm9, %v8005_v44, %v7962_v0 }
 0x7bd   : > { %v8376_v58 = vrot.slane %v8374_v32, 1  ;;  %v8189_v14 = vpop.permute.xlu1 %8188  ;;  %v8384_v48 = vshll.u32 %v21444_v51, 16  ;;  %v8382_v24 = vshrl.u32 %v21444_v51, 16 }
 0x7be   : > { %v21447_v6 = vsel %vm1021_vm9, %v8231_v34, %v8189_v14  ;;  %v8156_v43 = vpop.permute.xlu0 %8155 }
 0x7bf   : > { %v8378_v26 = vshll.u32 %v21447_v6, 16  ;;  %v8386_v50 = vrot.slane %v8384_v48, 1  ;;  %v8234_v5 = vsel %vm972_vm8, %v21036_v37, %v8156_v43  ;;  %v8377_v29 = vor.u32 %v8376_v58, %v8372_v59 }
 0x7c0   : > { %v21455_v0 = vsel %vm1021_vm9, %v8234_v5, %v8191_v8  ;;  %v8008_v8 = vsel %vm972_vm8, %v21081_v1, %v7927_v31 }
 0x7c1   : > { %v8380_v35 = vrot.slane %v8378_v26, 1  ;;  %v7931_v17 = vpop.permute.xlu1 %7930  ;;  %v8388_v32 = vshll.u32 %v21455_v0, 16  ;;  %v8387_v14 = vor.u32 %v8386_v50, %v8382_v24  ;;  %v8237_v50 = vsel %vm972_vm8, %v21087_v9, %v8158_v53 }
 0x7c2   : > { %v7966_v44 = vpop.permute.xlu0 %7965 }
 0x7c3   : > { %v8381_v56 = vsel %vm1282_vm10, %v8377_v29, %v8380_v35  ;;  %v8390_v34 = vrot.slane %v8388_v32, 1 }
 0x7c4   : > { %16374 = vmatmul.mubr.msk.bf16.gmra.mrb[48].mxu1 %vm1492_vm11, %v8381_v56 }
 0x7c5   : > { %v8162_v48 = vpop.permute.xlu1 %8161  ;;  %v8391_v37 = vsel %vm1282_vm10, %v8387_v14, %v8390_v34 }
 0x7c6   : > { %16377 = vmatprep.mubr.msk.bf16.mxu1 %vm1492_vm11, %v8391_v37  ;;  %v8195_v58 = vpop.permute.xlu0 %8194 }
 0x7c9   : > { %v7964_v59 = vpop.permute.xlu1 %7963 }
 0x7ca   : > { %v21466_v26 = vsel %vm1021_vm9, %v8008_v8, %v7964_v59  ;;  %v7929_v5 = vpop.permute.xlu0 %7928 }
 0x7cb   : > { %v8394_v43 = vshll.u32 %v21466_v26, 16  ;;  %v8011_v29 = vsel %vm972_vm8, %v21066_v27, %v7929_v5  ;;  %v8392_v56 = vshrl.u32 %v21466_v26, 16 }
 0x7cc   : > { %v21474_v32 = vsel %vm1021_vm9, %v8011_v29, %v7966_v44 }
 0x7cd   : > { %v8396_v35 = vrot.slane %v8394_v43, 1  ;;  %v8193_v24 = vpop.permute.xlu1 %8192  ;;  %v8404_v31 = vshll.u32 %v21474_v32, 16  ;;  %v8402_v59 = vshrl.u32 %v21474_v32, 16 }
 0x7ce   : > { %v21477_v1 = vsel %vm1021_vm9, %v8237_v50, %v8193_v24  ;;  %v8160_v14 = vpop.permute.xlu0 %8159 }
 0x7cf   : > { %v8398_v34 = vshll.u32 %v21477_v1, 16  ;;  %v8406_v37 = vrot.slane %v8404_v31, 1  ;;  %v8240_v27 = vsel %vm972_vm8, %v21072_v3, %v8160_v14  ;;  %v8397_v9 = vor.u32 %v8396_v35, %v8392_v56 }
 0x7d0   : > { %v21485_v44 = vsel %vm1021_vm9, %v8240_v27, %v8195_v58  ;;  %v8014_v3 = vsel %vm972_vm8, %v21111_v40, %v7931_v17  ;;  %v8243_v40 = vsel %vm972_vm8, %v21117_v47, %v8162_v48 }
 0x7d1   : > { %v8400_v53 = vrot.slane %v8398_v34, 1  ;;  %v7935_v8 = vpop.permute.xlu1 %7934  ;;  %v8408_v43 = vshll.u32 %v21485_v44, 16  ;;  %v8407_v24 = vor.u32 %v8406_v37, %v8402_v59 }
 0x7d2   : > { %v7970_v29 = vpop.permute.xlu0 %7969  ;;  %v8020_v56 = vsel %vm972_vm8, %v21134_v57, %v7935_v8 }
 0x7d3   : > { %v8401_v5 = vsel %vm1282_vm10, %v8397_v9, %v8400_v53  ;;  %v8410_v50 = vrot.slane %v8408_v43, 1  ;;  %v21510_v53 = vsel %vm1021_vm9, %v8020_v56, %v21125_v45  ;;  %v23800_v45 = vld [vmem:[#allocation6_spill] sm:$0xff] }
 0x7d4   : > { %16378 = vmatmul.mubr.msk.bf16.gmra.mrb[52].mxu1 %vm1492_vm11, %v8401_v5  ;;  %v8434_v47 = vshll.u32 %v21510_v53, 16 }
 0x7d5   : > { %v7968_v35 = vpop.permute.xlu1 %7967  ;;  %v8411_v58 = vsel %vm1282_vm10, %v8407_v24, %v8410_v50 }
 0x7d6   : > { %v21494_v31 = vsel %vm1021_vm9, %v8014_v3, %v7968_v35  ;;  %16381 = vmatprep.mubr.msk.bf16.mxu1 %vm1492_vm11, %v8411_v58  ;;  %v7933_v14 = vpop.permute.xlu0 %7932  ;;  %v8436_v56 = vrot.slane %v8434_v47, 1 }
 0x7d7   : > { %v8414_v34 = vshll.u32 %v21494_v31, 16  ;;  %v8017_v37 = vsel %vm972_vm8, %v21096_v22, %v7933_v14  ;;  %v8412_v8 = vshrl.u32 %v21494_v31, 16 }
 0x7d8   : > { %v21506_v9 = vsel %vm1021_vm9, %v8017_v37, %v7970_v29 }
 0x7d9   : > { %v8416_v17 = vrot.slane %v8414_v34, 1  ;;  %v8197_v27 = vpop.permute.xlu1 %8196  ;;  %v8424_v22 = vshll.u32 %v21506_v9, 16  ;;  %v23801_v34 = vld [vmem:[#allocation7_spill] sm:$0xff]  ;;  %v8422_v37 = vshrl.u32 %v21506_v9, 16 }
 0x7da   : > { %v21513_v57 = vsel %vm1021_vm9, %v8243_v40, %v8197_v27  ;;  %v8164_v43 = vpop.permute.xlu0 %8163 }
 0x7db   : > { %v8418_v59 = vshll.u32 %v21513_v57, 16  ;;  %v8417_v48 = vor.u32 %v8416_v17, %v8412_v8  ;;  %v8426_v50 = vrot.slane %v8424_v22, 1  ;;  %v8246_v3 = vsel %vm972_vm8, %v23800_v45, %v8164_v43 }
 0x7dc   : > { %v8432_v8 = vshrl.u32 %v21510_v53, 16 }
 0x7dd   : > { %v8420_v5 = vrot.slane %v8418_v59, 1  ;;  %v8166_v29 = vpop.permute.xlu1 %8165  ;;  %v8427_v43 = vor.u32 %v8426_v50, %v8422_v37  ;;  %v17384_v50 = vld [vmem:[%s23693_s1 + $0x220] sm:$0xff]  }
 0x7de   : > { %v8199_v35 = vpop.permute.xlu0 %8198  ;;  %v8249_v14 = vsel %vm972_vm8, %v23801_v34, %v8166_v29  ;;  %v8929_v34 = vld [vmem:[#allocation2 + $0xd8] sm:$0xe] }
 0x7df   : > { %v8421_v24 = vsel %vm1282_vm10, %v8417_v48, %v8420_v5  ;;  %v21524_v58 = vsel %vm1021_vm9, %v8246_v3, %v8199_v35  ;;  %v8437_v5 = vor.u32 %v8436_v56, %v8432_v8  ;;  %v9178_v8 = vrot.slane %v21170_v39, 1 }
 0x7e0   : > { %16382 = vmatmul.mubr.msk.bf16.gmra.mrb[56].mxu1 %vm1492_vm11, %v8421_v24  ;;  %v8428_v17 = vshll.u32 %v21524_v58, 16  ;;  %v17383_v24 = vld [vmem:[%s23693_s1 + $0x218] sm:$0xff]  }
 0x7e1   : > { %v8201_v40 = vpop.permute.xlu1 %8200 }
 0x7e2   : > { %v21531_v27 = vsel %vm1021_vm9, %v8249_v14, %v8201_v40  ;;  %v8430_v22 = vrot.slane %v8428_v17, 1 }
 0x7e3   : > { %v8438_v59 = vshll.u32 %v21531_v27, 16 }
 0x7e4   : > { %v8431_v47 = vsel %vm1282_vm10, %v8427_v43, %v8430_v22 }
 0x7e5   : > { %v8440_v48 = vrot.slane %v8438_v59, 1  ;;  %16385 = vmatprep.mubr.msk.bf16.mxu1 %vm1492_vm11, %v8431_v47 }
 0x7e7   : > { %v8441_v29 = vsel %vm1282_vm10, %v8437_v5, %v8440_v48 }
 0x7e8   : > { %16386 = vmatmul.mubr.msk.bf16.gmra.mrb[60].mxu1 %vm1492_vm11, %v8441_v29 }
 0x7e9   : > { %16401 = vmatprep.mubr.msk.bf16.mxu1 %vm1492_vm11, %v21155_v60  ;;  %v17385_v60 = vld [vmem:[%s23693_s1 + $0x228] sm:$0xff]  }
 0x7f0   : > { %16402 = vmatmul.mubr.msk.bf16.vlgmr.msra.gmra.mrb[32].mxu1 %vm1492_vm11, %v21186_v61  ;;  %v17386_v61 = vld [vmem:[%s23693_s1 + $0x230] sm:$0xff]  }
 0x7f1   : > { %16434 = vmatpush3.bf16.msra.mxu1 %v21317_v28  ;;  %16405 = vmatprep.mubr.msk.bf16.mxu1 %vm1492_vm11, %v21213_v20  ;;  %v8999_v20 = vpop.permute.xlu0 %8998  ;;  %v17387_v28 = vld [vmem:[%s23693_s1 + $0x238] sm:$0xff]  }
 0x7f2   : > { %16435 = vmatprep.subr.bf16.mxu1 %v17383_v24 }
 0x7f5   : > { %16436 = vmatpush3.bf16.msra.mxu1 %v17383_v24  ;;  %v9184_v24 = vrot.slane %v21233_v13, 1 }
 0x7f6   : > { %16437 = vmatprep.subr.bf16.mxu1 %v17384_v50 }
 0x7f8   : > { %16406 = vmatmul.mubr.msk.bf16.gmra.mrb[36].mxu1 %vm1492_vm11, %v21268_v12  ;;  %v9034_v12 = vpop.permute.xlu0 %9033 }
 0x7f9   : > { %16409 = vmatprep.mubr.msk.bf16.mxu1 %vm1492_vm11, %v21285_v23  ;;  %16438 = vmatpush3.bf16.msra.mxu1 %v17384_v50  ;;  %v9001_v23 = vpop.permute.xlu1 %9000 }
 0x7fa   : > { %16439 = vmatprep.subr.bf16.mxu1 %v17385_v60  ;;  %v9070_v59 = vsel %vm972_vm8, %v21161_v10, %v9001_v23  ;;  %v9181_v10 = vrot.slane %v21201_v49, 1 }
 0x7fc   : > { %v9003_v45 = vpop.permute.xlu0 %9002 }
 0x7fd   : > { %16440 = vmatpush3.bf16.msra.mxu1 %v17385_v60  ;;  %v9036_v3 = vpop.permute.xlu1 %9035  ;;  %v9073_v48 = vsel %vm972_vm8, %v21165_v16, %v9003_v45  ;;  %v23803_v16 = vld [vmem:[#allocation9_spill] sm:$0xff]  ;;  %v9187_v45 = vrot.slane %v21290_v11, 1 }
 0x7fe   : > { %16441 = vmatprep.subr.bf16.mxu1 %v17386_v61  ;;  %v9116_v43 = vsel %vm1021_vm9, %v9070_v59, %v9036_v3  ;;  %v9190_v3 = vrot.slane %v21308_v15, 1 }
 0x7ff   : > { %v9180_v39 = vrot.slane %v9116_v43, 1  ;;  %v9202_v43 = vrot.slane %v21425_v38, 1 }
 0x800   : > { %16410 = vmatmul.mubr.msk.bf16.gmra.mrb[40].mxu1 %vm1492_vm11, %v21344_v36  ;;  %v9038_v35 = vpop.permute.xlu0 %9037 }
 0x801   : > { %16413 = vmatprep.mubr.msk.bf16.mxu1 %vm1492_vm11, %v21358_v18  ;;  %16442 = vmatpush3.bf16.msra.mxu1 %v17386_v61  ;;  %v9005_v56 = vpop.permute.xlu1 %9004  ;;  %v9182_v50 = vsel %vm2179_vm12, %v9180_v39, %v9181_v10 }
 0x802   : > { %16443 = vmatprep.subr.bf16.mxu1 %v17387_v28  ;;  %v9076_v60 = vsel %vm972_vm8, %v23803_v16, %v9005_v56 }
 0x804   : > { %v9007_v36 = vpop.permute.xlu0 %9006 }
 0x805   : > { %16444 = vmatpush3.bf16.msra.mxu1 %v17387_v28  ;;  %v9040_v18 = vpop.permute.xlu1 %9039  ;;  %v9079_v61 = vsel %vm972_vm8, %v21196_v54, %v9007_v36 }
 0x808   : > { %16414 = vmatmul.mubr.msk.bf16.gmra.mrb[44].mxu1 %vm1492_vm11, %v21402_v62  ;;  %v9042_v62 = vpop.permute.xlu0 %9041 }
 0x809   : > { %16417 = vmatprep.mubr.msk.bf16.mxu1 %vm1492_vm11, %v21412_v4  ;;  %v9009_v14 = vpop.permute.xlu1 %9008  ;;  %v23802_v4 = vld [vmem:[#allocation8_spill] sm:$0xff]  ;;  %v9122_v28 = vsel %vm1021_vm9, %v9079_v61, %v9042_v62 }
 0x80a   : > { %v14969_v37 = vcombine.low %v8929_v34, %v23802_v4  ;;  %v9189_v23 = vrot.slane %v9122_v28, 1 }
 0x80c   : > { %v9067_v40 = vsel %vm972_vm8, %v14969_v37, %v8999_v20  ;;  %v9011_v17 = vpop.permute.xlu0 %9010  ;;  %v9191_v34 = vsel %vm2179_vm12, %v9189_v23, %v9190_v3 }
 0x80d   : > { %v9085_v36 = vsel %vm972_vm8, %v21230_v7, %v9011_v17 }
 0x810   : > { %16418 = vmatmul.mubr.msk.bf16.gmra.mrb[48].mxu1 %vm1492_vm11, %v21436_v21  ;;  %v9114_v21 = vsel %vm1021_vm9, %v9067_v40, %v9034_v12 }
 0x811   : > { %16421 = vmatprep.mubr.msk.bf16.mxu1 %vm1492_vm11, %v21444_v51  ;;  %v9044_v51 = vpop.permute.xlu1 %9043 }
 0x815   : > { %v9013_v22 = vpop.permute.xlu1 %9012 }
 0x816   : > { %v9088_v7 = vsel %vm972_vm8, %v21248_v19, %v9013_v22  ;;  %v9199_v19 = vrot.slane %v21416_v2, 1 }
 0x818   : > { %16422 = vmatmul.mubr.msk.bf16.gmra.mrb[52].mxu1 %vm1492_vm11, %v21466_v26  ;;  %v9177_v26 = vrot.slane %v9114_v21, 1 }
 0x819   : > { %16425 = vmatprep.mubr.msk.bf16.mxu1 %vm1492_vm11, %v21474_v32  ;;  %v9046_v32 = vpop.permute.xlu0 %9045  ;;  %v9048_v29 = vpop.permute.xlu1 %9047 }
 0x81a   : > { %v9126_v62 = vsel %vm1021_vm9, %v9085_v36, %v9046_v32  ;;  %v9128_v21 = vsel %vm1021_vm9, %v9088_v7, %v9048_v29  ;;  %v9220_v36 = vrot.slane %v21524_v58, 1  ;;  %v10149_v58 = vld [vmem:[#allocation2 + $0xcc] sm:$0xf] }
 0x81b   : > { %v9195_v4 = vrot.slane %v9126_v62, 1 }
 0x81d   : > { %v9015_v5 = vpop.permute.xlu0 %9014  ;;  %v9017_v12 = vpop.permute.xlu1 %9016 }
 0x820   : > { %16426 = vmatmul.mubr.msk.bf16.gmra.mrb[56].mxu1 %vm1492_vm11, %v21494_v31  ;;  %v9179_v31 = vsel %vm2179_vm12, %v9177_v26, %v9178_v8 }
 0x821   : > { %16429 = vmatprep.mubr.msk.bf16.mxu1 %vm1492_vm11, %v21506_v9  ;;  %v9118_v9 = vsel %vm1021_vm9, %v9073_v48, %v9038_v35  ;;  %v9050_v49 = vpop.permute.xlu0 %9049  ;;  %v9082_v35 = vsel %vm972_vm8, %v21210_v63, %v9009_v14  ;;  %v9052_v11 = vpop.permute.xlu1 %9051  ;;  %v9193_v63 = vrot.slane %v21363_v41, 1  ;;  %v9196_v14 = vrot.slane %v21376_v42, 1 }
 0x822   : > { %v9183_v47 = vrot.slane %v9118_v9, 1  ;;  %v9124_v56 = vsel %vm1021_vm9, %v9082_v35, %v9044_v51  ;;  %v23804_v51 = vld [vmem:[#allocation10_spill] sm:$0xff]  ;;  %v9198_v42 = vrot.slane %v9128_v21, 1  ;;  %v9094_v48 = vsel %vm972_vm8, %v21282_v52, %v9017_v12 }
 0x823   : > { %v9192_v15 = vrot.slane %v9124_v56, 1  ;;  %v9091_v26 = vsel %vm972_vm8, %v23804_v51, %v9015_v5  ;;  %v9197_v8 = vsel %vm2179_vm12, %v9195_v4, %v9196_v14  ;;  %v9132_v9 = vsel %vm1021_vm9, %v9094_v48, %v9052_v11 }
 0x824   : > { %v9185_v20 = vsel %vm2179_vm12, %v9183_v47, %v9184_v24  ;;  %v9130_v41 = vsel %vm1021_vm9, %v9091_v26, %v9050_v49  ;;  %v9204_v38 = vrot.slane %v9132_v9, 1  ;;  %v9205_v52 = vrot.slane %v21447_v6, 1 }
 0x825   : > { %v9021_v40 = vpop.permute.xlu1 %9020  ;;  %v9194_v17 = vsel %vm2179_vm12, %v9192_v15, %v9193_v63  ;;  %v9201_v32 = vrot.slane %v9130_v41, 1  ;;  %v9208_v24 = vrot.slane %v21455_v0, 1  ;;  %v9214_v49 = vrot.slane %v21485_v44, 1  ;;  %v10150_v63 = vld [vmem:[#allocation2 + $0xd0] sm:$0xf] }
 0x826   : > { %v9223_v4 = vrot.slane %v21531_v27, 1  ;;  %v15072_v14 = vcombine.low %v10149_v58, %v10150_v63 }
 0x827   : > { %v9203_v47 = vsel %vm2179_vm12, %v9201_v32, %v9202_v43 }
 0x828   : > { %16430 = vmatmul.mubr.msk.bf16.gmra.mrb[60].mxu1 %vm1492_vm11, %v21510_v53  ;;  %v9120_v53 = vsel %vm1021_vm9, %v9076_v60, %v9040_v18  ;;  %v9019_v18 = vpop.permute.xlu0 %9018  ;;  %10303 = vrot.lane.b32.xlu1 %v15072_v14, %s17549_s30 }
 0x829   : > { %16445 = vmatprep.mubr.msk.bf16.mxu1 %vm1492_vm11, %v9179_v31  ;;  %v9186_v13 = vrot.slane %v9120_v53, 1  ;;  %v9056_v22 = vpop.permute.xlu1 %9055  ;;  %v9200_v31 = vsel %vm2179_vm12, %v9198_v42, %v9199_v19  ;;  %v9097_v39 = vsel %vm972_vm8, %v21305_v30, %v9019_v18  ;;  %v9206_v30 = vsel %vm2179_vm12, %v9204_v38, %v9205_v52  ;;  %v23805_v18 = vld [vmem:[#allocation11_spill] sm:$0xff] }
 0x82b   : > { %v9188_v54 = vsel %vm2179_vm12, %v9186_v13, %v9187_v45 }
 0x82c   : > { %v9054_v37 = vpop.permute.xlu0 %9053 }
 0x82d   : > { %v9134_v5 = vsel %vm1021_vm9, %v9097_v39, %v9054_v37  ;;  %v9025_v10 = vpop.permute.xlu1 %9024  ;;  %v21687_v37 = vld [vmem:[%s23694_s2 + $0x3] ss:$0 sm:$0xff] }
 0x82e   : > { %v9207_v29 = vrot.slane %v9134_v5, 1 }
 0x830   : > { %16446 = vmatmul.mubr.msk.bf16.vlgmr.msra.gmra.mrb[32].mxu1 %vm1492_vm11, %v9182_v50  ;;  %v9023_v59 = vpop.permute.xlu0 %9022  ;;  %v9100_v50 = vsel %vm972_vm8, %v21326_v55, %v9021_v40  ;;  %v9209_v61 = vsel %vm2179_vm12, %v9207_v29, %v9208_v24  ;;  %v9211_v55 = vrot.slane %v21477_v1, 1 }
 0x831   : > { %16449 = vmatprep.mubr.msk.bf16.mxu1 %vm1492_vm11, %v9185_v20  ;;  %v9136_v16 = vsel %vm1021_vm9, %v9100_v50, %v9056_v22  ;;  %v9103_v60 = vsel %vm972_vm8, %v21339_v46, %v9023_v59  ;;  %v9060_v20 = vpop.permute.xlu1 %9059  ;;  %v9106_v46 = vsel %vm972_vm8, %v21355_v25, %v9025_v10  ;;  %v9217_v25 = vrot.slane %v21513_v57, 1 }
 0x832   : > { %v9210_v0 = vrot.slane %v9136_v16, 1  ;;  %v9140_v45 = vsel %vm1021_vm9, %v9106_v46, %v9060_v20 }
 0x833   : > { %v9216_v44 = vrot.slane %v9140_v45, 1  ;;  %v10003_v45 = vld [vmem:[#allocation2 + $0xc] sm:$0xf] }
 0x834   : > { %v9058_v2 = vpop.permute.xlu0 %9057  ;;  %v9212_v23 = vsel %vm2179_vm12, %v9210_v0, %v9211_v55 }
 0x835   : > { %v9138_v6 = vsel %vm1021_vm9, %v9103_v60, %v9058_v2  ;;  %v9029_v12 = vpop.permute.xlu1 %9028 }
 0x836   : > { %v9213_v28 = vrot.slane %v9138_v6, 1 }
 0x838   : > { %16450 = vmatmul.mubr.msk.bf16.gmra.mrb[36].mxu1 %vm1492_vm11, %v9188_v54  ;;  %v9027_v53 = vpop.permute.xlu0 %9026  ;;  %v9215_v35 = vsel %vm2179_vm12, %v9213_v28, %v9214_v49  ;;  %v10010_v28 = vld [vmem:[#allocation2 + $0x18] sm:$0xf] }
 0x839   : > { %16453 = vmatprep.mubr.msk.bf16.mxu1 %vm1492_vm11, %v9191_v34  ;;  %v9109_v3 = vsel %vm972_vm8, %v21373_v33, %v9027_v53  ;;  %v9064_v56 = vpop.permute.xlu1 %9063  ;;  %v9112_v34 = vsel %vm972_vm8, %v23805_v18, %v9029_v12  ;;  %v9218_v33 = vsel %vm2179_vm12, %v9216_v44, %v9217_v25 }
 0x83a   : > { %v9144_v62 = vsel %vm1021_vm9, %v9112_v34, %v9064_v56 }
 0x83b   : > { %v9222_v15 = vrot.slane %v9144_v62, 1 }
 0x83c   : > { %v9062_v13 = vpop.permute.xlu0 %9061 }
 0x83d   : > { %v9142_v1 = vsel %vm1021_vm9, %v9109_v3, %v9062_v13  ;;  %v9224_v57 = vsel %vm2179_vm12, %v9222_v15, %v9223_v4 }
 0x83e   : > { %v9219_v54 = vrot.slane %v9142_v1, 1 }
 0x840   : > { %16454 = vmatmul.mubr.msk.bf16.gmra.mrb[40].mxu1 %vm1492_vm11, %v9194_v17  ;;  %v9221_v11 = vsel %vm2179_vm12, %v9219_v54, %v9220_v36  ;;  %v10014_v54 = vld [vmem:[#allocation2 + $0x20] sm:$0x1] }
 0x841   : > { %16457 = vmatprep.mubr.msk.bf16.mxu1 %vm1492_vm11, %v9197_v8 }
 0x848   : > { %16458 = vmatmul.mubr.msk.bf16.gmra.mrb[44].mxu1 %vm1492_vm11, %v9200_v31 }
 0x849   : > { %16461 = vmatprep.mubr.msk.bf16.mxu1 %vm1492_vm11, %v9203_v47 }
 0x850   : > { %16462 = vmatmul.mubr.msk.bf16.gmra.mrb[48].mxu1 %vm1492_vm11, %v9206_v30 }
 0x851   : > { %16465 = vmatprep.mubr.msk.bf16.mxu1 %vm1492_vm11, %v9209_v61 }
 0x858   : > { %16466 = vmatmul.mubr.msk.bf16.gmra.mrb[52].mxu1 %vm1492_vm11, %v9212_v23 }
 0x859   : > { %16469 = vmatprep.mubr.msk.bf16.mxu1 %vm1492_vm11, %v9215_v35 }
 0x860   : > { %16470 = vmatmul.mubr.msk.bf16.gmra.mrb[56].mxu1 %vm1492_vm11, %v9218_v33 }
 0x861   : > { %16473 = vmatprep.mubr.msk.bf16.mxu1 %vm1492_vm11, %v9221_v11  ;;  %v10007_v11 = vld [vmem:[#allocation2 + $0x14] sm:$0x1] }
 0x868   : > { %16474 = vmatmul.mubr.msk.bf16.gmra.mrb[60].mxu1 %vm1492_vm11, %v9224_v57 }
 0x903   : > { %v16447_v7 = vpop.f32.mrb[32].mxu1 }
 0x904   : > { %v9525_v40 = vadd.f32 %v16447_v7, %v21687_v37  ;;  %v9356_v17 = vpop.f32.mrb[33].mxu1 }
 0x905   : > { %v9523_v27 = vadd.f32 %v21687_v37, %v9356_v17  ;;  %v16448_v21 = vpop.f32.mrb[34].mxu1 }
 0x906   : > { %v9557_v51 = vmax.f32 %v9525_v40, 0.0  ;;  %v9526_v26 = vadd.f32 %v16448_v21, %v21687_v37  ;;  %v9359_v8 = vpop.f32.mrb[35].mxu1 }
 0x907   : > { %v9555_v41 = vmax.f32 %v9523_v27, 0.0  ;;  %v9524_v42 = vadd.f32 %v21687_v37, %v9359_v8 }
 0x908   : > { %v15491_v32 = vpack.c.bf16 %v9557_v51, %v9557_v51  ;;  %v9558_v59 = vmax.f32 %v9526_v26, 0.0 }
 0x909   : > { %v15489_v19 = vpack.c.bf16 %v9555_v41, %v9555_v41  ;;  %v9556_v22 = vmax.f32 %v9524_v42, 0.0 }
 0x90a   : > { %v9701_v43 = vshrl.u32 %v15491_v32, 16  ;;  %v15492_v48 = vpack.c.bf16 %v9558_v59, %v9558_v59  ;;  %v9704_v31 = vshll.u32 %v15491_v32, 16 }
 0x90b   : > { %v9684_v9 = vshrl.u32 %v15489_v19, 16  ;;  %v9687_v39 = vshll.u32 %v15489_v19, 16  ;;  %v15490_v47 = vpack.c.bf16 %v9556_v22, %v9556_v22  ;;  %v16451_v5 = vpop.f32.mrb[36].mxu1 }
 0x90c   : > { %v9703_v2 = vrot.slane %v9701_v43, 7  ;;  %v9709_v38 = vshrl.u32 %v15492_v48, 16  ;;  %v9712_v10 = vshll.u32 %v15492_v48, 16  ;;  %v9529_v29 = vadd.f32 %v16451_v5, %v21687_v37  ;;  %v9372_v52 = vpop.f32.mrb[37].mxu1  ;;  %v10024_v43 = vld [vmem:[#allocation2 + $0x30] sm:$0xf] }
 0x90d   : > { %v9686_v24 = vrot.slane %v9684_v9, 7  ;;  %v9692_v50 = vshrl.u32 %v15490_v47, 16  ;;  %v9695_v30 = vshll.u32 %v15490_v47, 16  ;;  %v9527_v16 = vadd.f32 %v21687_v37, %v9372_v52  ;;  %v16452_v60 = vpop.f32.mrb[38].mxu1  ;;  %v10017_v5 = vld [vmem:[#allocation2 + $0x24] sm:$0xf] }
 0x90e   : > { %v9706_v53 = vor.u32 %v9704_v31, %v9703_v2  ;;  %v9707_v61 = vrot.slane %v9703_v2, 4  ;;  %v9711_v20 = vrot.slane %v9709_v38, 7  ;;  %v9561_v6 = vmax.f32 %v9529_v29, 0.0  ;;  %v9375_v0 = vpop.f32.mrb[39].mxu1 }
 0x90f   : > { %v9689_v55 = vor.u32 %v9687_v39, %v9686_v24  ;;  %v9690_v49 = vrot.slane %v9686_v24, 4  ;;  %v9694_v13 = vrot.slane %v9692_v50, 7  ;;  %v9559_v46 = vmax.f32 %v9527_v16, 0.0 }
 0x910   : > { %v10011_v23 = vsel %vm17834_vm6, %v9706_v53, %v10010_v28  ;;  %v9714_v3 = vor.u32 %v9712_v10, %v9711_v20  ;;  %v9716_v35 = vrot.slane %v9711_v20, 4  ;;  %v15495_v1 = vpack.c.bf16 %v9561_v6, %v9561_v6 }
 0x911   : > { %10012 = vst [vmem:[#allocation2 + $0x18] sm:$0xf] %v10011_v23  ;;  %v10004_v44 = vsel %vm17834_vm6, %v9689_v55, %v10003_v45  ;;  %v9697_v25 = vor.u32 %v9695_v30, %v9694_v13  ;;  %v9699_v56 = vrot.slane %v9694_v13, 4  ;;  %v15493_v36 = vpack.c.bf16 %v9559_v46, %v9559_v46  ;;  %v10028_v45 = vld [vmem:[#allocation2 + $0x38] sm:$0x1] }
 0x912   : > { %10005 = vst [vmem:[#allocation2 + $0xc] sm:$0xf] %v10004_v44  ;;  %v9715_v34 = vsel %vm17827_vm5, %v9707_v61, %v9714_v3  ;;  %v10015_v62 = vsel %vm17845_vm7, %v9716_v35, %v10014_v54  ;;  %v9735_v15 = vshrl.u32 %v15495_v1, 16  ;;  %v9738_v58 = vshll.u32 %v15495_v1, 16 }
 0x913   : > { %10013 = vst.msk [vmem:[#allocation2 + $0x1c] sm:$0xf] %vm199_vm0, %v9715_v34  ;;  %10016 = vst [vmem:[#allocation2 + $0x20] sm:$0x1] %v10015_v62  ;;  %v9698_v4 = vsel %vm17827_vm5, %v9690_v49, %v9697_v25  ;;  %v10008_v57 = vsel %vm17845_vm7, %v9699_v56, %v10007_v11  ;;  %v9718_v63 = vshrl.u32 %v15493_v36, 16  ;;  %v16455_v14 = vpop.f32.mrb[40].mxu1  ;;  %v9530_v40 = vadd.f32 %v16452_v60, %v21687_v37 }
 0x914   : > { %10006 = vst.msk [vmem:[#allocation2 + $0x10] sm:$0xf] %vm199_vm0, %v9698_v4  ;;  %10009 = vst [vmem:[#allocation2 + $0x14] sm:$0x1] %v10008_v57  ;;  %v21709_v7 = vrot.slane %v9735_v15, 7  ;;  %v9528_v17 = vadd.f32 %v21687_v37, %v9375_v0  ;;  %v9533_v27 = vadd.f32 %v16455_v14, %v21687_v37  ;;  %v9388_v21 = vpop.f32.mrb[41].mxu1 }
 0x915   : > { %v9720_v51 = vrot.slane %v9718_v63, 7  ;;  %v9721_v26 = vshll.u32 %v15493_v36, 16  ;;  %v9531_v8 = vadd.f32 %v21687_v37, %v9388_v21  ;;  %v16456_v41 = vpop.f32.mrb[42].mxu1  ;;  %v9562_v59 = vmax.f32 %v9530_v40, 0.0  ;;  %v10021_v62 = vld [vmem:[#allocation2 + $0x2c] sm:$0x1] }
 0x916   : > { %v9740_v42 = vor.u32 %v9738_v58, %v21709_v7  ;;  %v9741_v32 = vrot.slane %v21709_v7, 4  ;;  %v9560_v19 = vmax.f32 %v9528_v17, 0.0  ;;  %v9391_v22 = vpop.f32.mrb[43].mxu1  ;;  %v9565_v9 = vmax.f32 %v9533_v27, 0.0  ;;  %v10038_v27 = vld [vmem:[#allocation2 + $0x48] sm:$0xf] }
 0x917   : > { %v9723_v48 = vor.u32 %v9721_v26, %v9720_v51  ;;  %v9724_v31 = vrot.slane %v9720_v51, 4  ;;  %v9563_v39 = vmax.f32 %v9531_v8, 0.0  ;;  %v15496_v2 = vpack.c.bf16 %v9562_v59, %v9562_v59  ;;  %v10031_v21 = vld [vmem:[#allocation2 + $0x3c] sm:$0xf]  ;;  %v17421_v51 = vld [vmem:[%s23693_s1 + $0x270] sm:$0xff]  }
 0x918   : > { %v10025_v47 = vsel %vm17834_vm6, %v9740_v42, %v10024_v43  ;;  %v15494_v38 = vpack.c.bf16 %v9560_v19, %v9560_v19  ;;  %v9534_v10 = vadd.f32 %v16456_v41, %v21687_v37  ;;  %v15499_v52 = vpack.c.bf16 %v9565_v9, %v9565_v9  ;;  %16477 = vmatprep.subr.bf16.mxu0 %v17421_v51 }
 0x919   : > { %10026 = vst [vmem:[#allocation2 + $0x30] sm:$0xf] %v10025_v47  ;;  %v10018_v29 = vsel %vm17834_vm6, %v9723_v48, %v10017_v5  ;;  %v15497_v24 = vpack.c.bf16 %v9563_v39, %v9563_v39  ;;  %v9532_v50 = vadd.f32 %v21687_v37, %v9391_v22  ;;  %v9743_v30 = vshrl.u32 %v15496_v2, 16  ;;  %16478 = vmatpush3.bf16.msra.mxu0 %v17421_v51  ;;  %v11262_v18 = vld [vmem:[#allocation2 + $0xc] sm:$0xe] }
 0x91a   : > { %10019 = vst [vmem:[#allocation2 + $0x24] sm:$0xf] %v10018_v29  ;;  %v9746_v16 = vshll.u32 %v15496_v2, 16  ;;  %v9726_v60 = vshrl.u32 %v15494_v38, 16  ;;  %v9729_v53 = vshll.u32 %v15494_v38, 16  ;;  %v9769_v61 = vshrl.u32 %v15499_v52, 16 }
 0x91b   : > { %v9772_v20 = vshll.u32 %v15499_v52, 16  ;;  %v9752_v6 = vshrl.u32 %v15497_v24, 16  ;;  %v9755_v0 = vshll.u32 %v15497_v24, 16  ;;  %v16459_v28 = vpop.f32.mrb[44].mxu1  ;;  %v9745_v55 = vrot.slane %v9743_v30, 7  ;;  %v17423_v52 = vld [vmem:[%s23693_s1 + $0x278] sm:$0xff]  }
 0x91c   : > { %v9728_v49 = vrot.slane %v9726_v60, 7  ;;  %v9566_v13 = vmax.f32 %v9534_v10, 0.0  ;;  %v9564_v46 = vmax.f32 %v9532_v50, 0.0  ;;  %v9404_v23 = vpop.f32.mrb[45].mxu1  ;;  %v21723_v3 = vrot.slane %v9769_v61, 7  ;;  %16479 = vmatprep.subr.bf16.mxu0 %v17423_v52 }
 0x91d   : > { %v21725_v35 = vrot.slane %v9752_v6, 7  ;;  %v9537_v1 = vadd.f32 %v16459_v28, %v21687_v37  ;;  %v9535_v44 = vadd.f32 %v21687_v37, %v9404_v23  ;;  %v16460_v54 = vpop.f32.mrb[46].mxu1  ;;  %v9748_v25 = vor.u32 %v9746_v16, %v9745_v55  ;;  %v21733_v63 = vld [vmem:[#allocation2 + $0x1c] sm:$0xf]  ;;  %16480 = vmatpush3.bf16.msra.mxu0 %v17423_v52 }
 0x91e   : > { %v9750_v56 = vrot.slane %v9745_v55, 4  ;;  %v9731_v36 = vor.u32 %v9729_v53, %v9728_v49  ;;  %v9733_v34 = vrot.slane %v9728_v49, 4  ;;  %v9407_v11 = vpop.f32.mrb[47].mxu1  ;;  %v9774_v15 = vor.u32 %v9772_v20, %v21723_v3  ;;  %v21764_v30 = vld [vmem:[#allocation2 + $0x20] ss:$0 sps:$4 sm:$0x11]  }
 0x91f   : > { %v9775_v4 = vrot.slane %v21723_v3, 4  ;;  %v9757_v57 = vor.u32 %v9755_v0, %v21725_v35  ;;  %v9758_v58 = vrot.slane %v21725_v35, 4  ;;  %v9749_v14 = vsel %vm17827_vm5, %v9741_v32, %v9748_v25  ;;  %v10119_v32 = vld [vmem:[#allocation2 + $0x18] sm:$0xf] }
 0x920   : > { %v10029_v7 = vsel %vm17845_vm7, %v9750_v56, %v10028_v45  ;;  %v9732_v40 = vsel %vm17827_vm5, %v9724_v31, %v9731_v36  ;;  %v10022_v17 = vsel %vm17845_vm7, %v9733_v34, %v10021_v62  ;;  %10027 = vst.msk [vmem:[#allocation2 + $0x34] sm:$0xf] %vm199_vm0, %v9749_v14  ;;  %v10039_v26 = vsel %vm17834_vm6, %v9774_v15, %v10038_v27  ;;  %v10035_v45 = vld [vmem:[#allocation2 + $0x44] sm:$0x1]  ;;  %v10052_v15 = vld [vmem:[#allocation2 + $0x60] sm:$0xf] }
 0x921   : > { %10030 = vst [vmem:[#allocation2 + $0x38] sm:$0x1] %v10029_v7  ;;  %10020 = vst.msk [vmem:[#allocation2 + $0x28] sm:$0xf] %vm199_vm0, %v9732_v40  ;;  %v10032_v8 = vsel %vm17834_vm6, %v9757_v57, %v10031_v21  ;;  %v15500_v41 = vpack.c.bf16 %v9566_v13, %v9566_v13  ;;  %v15498_v42 = vpack.c.bf16 %v9564_v46, %v9564_v46  ;;  %v9569_v59 = vmax.f32 %v9537_v1, 0.0  ;;  %v17425_v56 = vld [vmem:[%s23693_s1 + $0x280] sm:$0xff]  }
 0x922   : > { %10023 = vst [vmem:[#allocation2 + $0x2c] sm:$0x1] %v10022_v17  ;;  %10040 = vst [vmem:[#allocation2 + $0x48] sm:$0xf] %v10039_v26  ;;  %v9567_v19 = vmax.f32 %v9535_v44, 0.0  ;;  %v21753_v22 = vcombine.low %v10119_v32, %v21733_v63  ;;  %v9538_v43 = vadd.f32 %v16460_v54, %v21687_v37  ;;  %v9536_v10 = vadd.f32 %v21687_v37, %v9407_v11 }
 0x923   : > { %10033 = vst [vmem:[#allocation2 + $0x3c] sm:$0xf] %v10032_v8  ;;  %v9777_v48 = vshrl.u32 %v15500_v41, 16  ;;  %v9780_v31 = vshll.u32 %v15500_v41, 16  ;;  %v9760_v9 = vshrl.u32 %v15498_v42, 16  ;;  %v9763_v39 = vshll.u32 %v15498_v42, 16  ;;  %16481 = vmatprep.subr.bf16.mxu0 %v17425_v56 }
 0x924   : > { %v16463_v47 = vpop.f32.mrb[48].mxu1  ;;  %v15503_v5 = vpack.c.bf16 %v9569_v59, %v9569_v59  ;;  %v15501_v2 = vpack.c.bf16 %v9567_v19, %v9567_v19  ;;  %10273 = vrot.lane.b32.xlu0 %v21753_v22, %s17549_s30  ;;  %10238 = vrot.lane.b32.xlu1 %v21753_v22, %s17550_s7  ;;  %v9570_v38 = vmax.f32 %v9538_v43, 0.0  ;;  %v10042_v13 = vld [vmem:[#allocation2 + $0x50] sm:$0x1]  ;;  %v9568_v25 = vmax.f32 %v9536_v10, 0.0  ;;  %v17427_v19 = vld [vmem:[%s23693_s1 + $0x288] sm:$0xff]  }
 0x925   : > { %v9420_v29 = vpop.f32.mrb[49].mxu1  ;;  %v9779_v24 = vrot.slane %v9777_v48, 7  ;;  %v9762_v50 = vrot.slane %v9760_v9, 7  ;;  %v9541_v16 = vadd.f32 %v16463_v47, %v21687_v37  ;;  %v10045_v57 = vld [vmem:[#allocation2 + $0x54] sm:$0xf]  ;;  %16482 = vmatpush3.bf16.msra.mxu0 %v17425_v56 }
 0x926   : > { %v9539_v60 = vadd.f32 %v21687_v37, %v9420_v29  ;;  %v21768_v53 = vpop.f32.mrb[50].mxu1  ;;  %v9803_v61 = vshrl.u32 %v15503_v5, 16  ;;  %v9806_v20 = vshll.u32 %v15503_v5, 16  ;;  %v9786_v6 = vshrl.u32 %v15501_v2, 16  ;;  %v21793_v14 = vld [vmem:[#allocation2 + $0x10] sm:$0xf]  ;;  %16483 = vmatprep.subr.bf16.mxu0 %v17427_v19 }
 0x927   : > { %v9789_v0 = vshll.u32 %v15501_v2, 16  ;;  %v9423_v28 = vpop.f32.mrb[51].mxu1  ;;  %v9782_v55 = vor.u32 %v9780_v31, %v9779_v24  ;;  %v9784_v49 = vrot.slane %v9779_v24, 4  ;;  %v9765_v46 = vor.u32 %v9763_v39, %v9762_v50  ;;  %v10117_v7 = vld [vmem:[#allocation2 + $0xc] sm:$0xf] }
 0x928   : > { %v9767_v23 = vrot.slane %v9762_v50, 4  ;;  %v21770_v1 = vrot.slane %v9803_v61, 7  ;;  %v21772_v44 = vrot.slane %v9786_v6, 7  ;;  %v15504_v54 = vpack.c.bf16 %v9570_v38, %v9570_v38  ;;  %10502 = vrot.lane.b32.xlu0 %v21764_v30, %s17549_s30  ;;  %10469 = vrot.lane.b32.xlu1 %v21764_v30, %s17550_s7  ;;  %v21801_v51 = vld [vmem:[#allocation2 + $0x34] sm:$0xf] }
 0x929   : > { %v9783_v36 = vsel %vm17827_vm5, %v9775_v4, %v9782_v55  ;;  %v10043_v34 = vsel %vm17845_vm7, %v9784_v49, %v10042_v13  ;;  %v9766_v62 = vsel %vm17827_vm5, %v9758_v58, %v9765_v46  ;;  %v15502_v27 = vpack.c.bf16 %v9568_v25, %v9568_v25  ;;  %v10123_v39 = vld [vmem:[#allocation2 + $0x30] sm:$0xf]  ;;  %v10056_v5 = vld [vmem:[#allocation2 + $0x68] sm:$0x1]  ;;  %16484 = vmatpush3.bf16.msra.mxu0 %v17427_v19 }
 0x92a   : > { %v10036_v11 = vsel %vm17845_vm7, %v9767_v23, %v10035_v45  ;;  %10041 = vst.msk [vmem:[#allocation2 + $0x4c] sm:$0xf] %vm199_vm0, %v9783_v36  ;;  %10044 = vst [vmem:[#allocation2 + $0x50] sm:$0x1] %v10043_v34  ;;  %v9808_v3 = vor.u32 %v9806_v20, %v21770_v1  ;;  %v9809_v35 = vrot.slane %v21770_v1, 4  ;;  %v9791_v4 = vor.u32 %v9789_v0, %v21772_v44 }
 0x92b   : > { %10034 = vst.msk [vmem:[#allocation2 + $0x40] sm:$0xf] %vm199_vm0, %v9766_v62  ;;  %10037 = vst [vmem:[#allocation2 + $0x44] sm:$0x1] %v10036_v11  ;;  %v9792_v58 = vrot.slane %v21772_v44, 4  ;;  %v9811_v40 = vshrl.u32 %v15504_v54, 16  ;;  %v21808_v32 = vcombine.low %v10117_v7, %v21793_v14  ;;  %v21818_v38 = vcombine.low %v10123_v39, %v21801_v51 }
 0x92c   : > { %v9814_v17 = vshll.u32 %v15504_v54, 16  ;;  %v9573_v21 = vmax.f32 %v9541_v16, 0.0  ;;  %v16467_v26 = vpop.f32.mrb[52].mxu1  ;;  %v10053_v8 = vsel %vm17834_vm6, %v9808_v3, %v10052_v15  ;;  %v10046_v41 = vsel %vm17834_vm6, %v9791_v4, %v10045_v57  ;;  %v21825_v61 = vld [vmem:[#allocation2 + $0x14] ss:$0 sps:$4 sm:$0x11]  }
 0x92d   : > { %v9571_v42 = vmax.f32 %v9539_v60, 0.0  ;;  %v9436_v59 = vpop.f32.mrb[53].mxu1  ;;  %10054 = vst [vmem:[#allocation2 + $0x60] sm:$0xf] %v10053_v8  ;;  %10047 = vst [vmem:[#allocation2 + $0x54] sm:$0xf] %v10046_v41  ;;  %10236 = vrot.lane.b32.xlu0 %v21808_v32, %s17550_s7  ;;  %v9542_v10 = vadd.f32 %v21768_v53, %v21687_v37  ;;  %v9540_v29 = vadd.f32 %v21687_v37, %v9423_v28  ;;  %10242 = vrot.lane.b32.xlu1 %v21818_v38, %s17550_s7 }
 0x92e   : > { %v9813_v43 = vrot.slane %v9811_v40, 7  ;;  %v9794_v48 = vshrl.u32 %v15502_v27, 16  ;;  %v9797_v31 = vshll.u32 %v15502_v27, 16  ;;  %v15507_v9 = vpack.c.bf16 %v9573_v21, %v9573_v21  ;;  %v21813_v47 = vpop.f32.mrb[54].mxu1  ;;  %v17428_v53 = vld [vmem:[%s23693_s1 + $0x290] sm:$0xff]  }
 0x92f   : > { %v15505_v2 = vpack.c.bf16 %v9571_v42, %v9571_v42  ;;  %v21823_v52 = vpop.f32.mrb[55].mxu1  ;;  %v9574_v55 = vmax.f32 %v9542_v10, 0.0  ;;  %v10049_v23 = vld [vmem:[#allocation2 + $0x5c] sm:$0x1]  ;;  %v9572_v54 = vmax.f32 %v9540_v29, 0.0  ;;  %16485 = vmatprep.subr.bf16.mxu0 %v17428_v53  ;;  %v9545_v62 = vadd.f32 %v16467_v26, %v21687_v37 }
 0x930   : > { %v9816_v24 = vor.u32 %v9814_v17, %v9813_v43  ;;  %v9818_v50 = vrot.slane %v9813_v43, 4  ;;  %v9796_v16 = vrot.slane %v9794_v48, 7  ;;  %v9837_v60 = vshrl.u32 %v15507_v9, 16  ;;  %v21843_v25 = vld [vmem:[#allocation2 + $0x38] ss:$0 sps:$4 sm:$0x11]   ;;  %16486 = vmatpush3.bf16.msra.mxu0 %v17428_v53 }
 0x931   : > { %v9840_v20 = vshll.u32 %v15507_v9, 16  ;;  %v9820_v6 = vshrl.u32 %v15505_v2, 16  ;;  %v9823_v0 = vshll.u32 %v15505_v2, 16  ;;  %v15508_v44 = vpack.c.bf16 %v9574_v55, %v9574_v55  ;;  %10467 = vrot.lane.b32.xlu0 %v21825_v61, %s17550_s7  ;;  %v10066_v34 = vld [vmem:[#allocation2 + $0x78] sm:$0xf]  ;;  %10473 = vrot.lane.b32.xlu1 %v21843_v25, %s17550_s7 }
 0x932   : > { %v9817_v28 = vsel %vm17827_vm5, %v9809_v35, %v9816_v24  ;;  %v10057_v49 = vsel %vm17845_vm7, %v9818_v50, %v10056_v5  ;;  %v9799_v13 = vor.u32 %v9797_v31, %v9796_v16  ;;  %v9801_v46 = vrot.slane %v9796_v16, 4  ;;  %v21851_v15 = vld [vmem:[#allocation2 + $0x28] sm:$0xf]  ;;  %v10059_v7 = vld [vmem:[#allocation2 + $0x6c] sm:$0xf]  ;;  %v17429_v31 = vld [vmem:[%s23693_s1 + $0x298] sm:$0xff]  }
 0x933   : > { %10055 = vst.msk [vmem:[#allocation2 + $0x64] sm:$0xf] %vm199_vm0, %v9817_v28  ;;  %10058 = vst [vmem:[#allocation2 + $0x68] sm:$0x1] %v10057_v49  ;;  %v21837_v45 = vrot.slane %v9837_v60, 7  ;;  %v21839_v1 = vrot.slane %v9820_v6, 7  ;;  %v9543_v11 = vadd.f32 %v21687_v37, %v9436_v59  ;;  %v15506_v21 = vpack.c.bf16 %v9572_v54, %v9572_v54  ;;  %16487 = vmatprep.subr.bf16.mxu0 %v17429_v31 }
 0x934   : > { %v9800_v56 = vsel %vm17827_vm5, %v9792_v58, %v9799_v13  ;;  %v10050_v36 = vsel %vm17845_vm7, %v9801_v46, %v10049_v23  ;;  %v16471_v57 = vpop.f32.mrb[56].mxu1  ;;  %v9845_v17 = vshrl.u32 %v15508_v44, 16  ;;  %v9848_v27 = vshll.u32 %v15508_v44, 16  ;;  %v10121_v8 = vld [vmem:[#allocation2 + $0x24] sm:$0xf]  ;;  %16488 = vmatpush3.bf16.msra.mxu0 %v17429_v31 }
 0x935   : > { %10048 = vst.msk [vmem:[#allocation2 + $0x58] sm:$0xf] %vm199_vm0, %v9800_v56  ;;  %10051 = vst [vmem:[#allocation2 + $0x5c] sm:$0x1] %v10050_v36  ;;  %v9842_v3 = vor.u32 %v9840_v20, %v21837_v45  ;;  %v9843_v35 = vrot.slane %v21837_v45, 4  ;;  %v9825_v4 = vor.u32 %v9823_v0, %v21839_v1  ;;  %v9826_v58 = vrot.slane %v21839_v1, 4  ;;  %10277 = vrot.lane.b32.xlu0 %v21818_v38, %s17549_s30 }
 0x936   : > { %v9452_v40 = vpop.f32.mrb[57].mxu1  ;;  %v9577_v26 = vmax.f32 %v9545_v62, 0.0  ;;  %v9575_v19 = vmax.f32 %v9543_v11, 0.0  ;;  %v21869_v43 = vcombine.low %v10121_v8, %v21851_v15  ;;  %v9847_v9 = vrot.slane %v9845_v17, 7  ;;  %v10070_v10 = vld [vmem:[#allocation2 + $0x80] sm:$0x1] }
 0x937   : > { %v21860_v41 = vpop.f32.mrb[58].mxu1  ;;  %v10067_v42 = vsel %vm17834_vm6, %v9842_v3, %v10066_v34  ;;  %v10060_v59 = vsel %vm17834_vm6, %v9825_v4, %v10059_v7  ;;  %v9828_v39 = vshrl.u32 %v15506_v21, 16  ;;  %v9831_v5 = vshll.u32 %v15506_v21, 16  ;;  %v21883_v55 = vld [vmem:[#allocation2 + $0x2c] ss:$0 sps:$4 sm:$0x11]  }
 0x938   : > { %v21871_v48 = vpop.f32.mrb[59].mxu1  ;;  %10068 = vst [vmem:[#allocation2 + $0x78] sm:$0xf] %v10067_v42  ;;  %10061 = vst [vmem:[#allocation2 + $0x6c] sm:$0xf] %v10060_v59  ;;  %v15511_v2 = vpack.c.bf16 %v9577_v26, %v9577_v26  ;;  %v15509_v29 = vpack.c.bf16 %v9575_v19, %v9575_v19  ;;  %10275 = vrot.lane.b32.xlu1 %v21869_v43, %s17549_s30  ;;  %v9546_v24 = vadd.f32 %v21813_v47, %v21687_v37 }
 0x939   : > { %v9544_v50 = vadd.f32 %v21687_v37, %v21823_v52  ;;  %v9549_v16 = vadd.f32 %v16471_v57, %v21687_v37  ;;  %v9850_v60 = vor.u32 %v9848_v27, %v9847_v9  ;;  %v9852_v20 = vrot.slane %v9847_v9, 4  ;;  %10506 = vrot.lane.b32.xlu0 %v21843_v25, %s17549_s30  ;;  %v10063_v1 = vld [vmem:[#allocation2 + $0x74] sm:$0x1]  ;;  %v10080_v27 = vld [vmem:[#allocation2 + $0x90] sm:$0xf] }
 0x93a   : > { %v9830_v6 = vrot.slane %v9828_v39, 7  ;;  %v9871_v0 = vshrl.u32 %v15511_v2, 16  ;;  %v9874_v53 = vshll.u32 %v15511_v2, 16  ;;  %v9854_v28 = vshrl.u32 %v15509_v29, 16  ;;  %v10127_v19 = vld [vmem:[#allocation2 + $0x48] sm:$0xf] }
 0x93b   : > { %v9857_v49 = vshll.u32 %v15509_v29, 16  ;;  %v9578_v13 = vmax.f32 %v9546_v24, 0.0  ;;  %v9851_v47 = vsel %vm17827_vm5, %v9843_v35, %v9850_v60  ;;  %v10071_v52 = vsel %vm17845_vm7, %v9852_v20, %v10070_v10  ;;  %v21891_v45 = vpop.f32.mrb[60].mxu1  ;;  %v21905_v35 = vld [vmem:[#allocation2 + $0x4c] sm:$0xf] }
 0x93c   : > { %v9833_v46 = vor.u32 %v9831_v5, %v9830_v6  ;;  %v9835_v23 = vrot.slane %v9830_v6, 4  ;;  %10069 = vst.msk [vmem:[#allocation2 + $0x7c] sm:$0xf] %vm199_vm0, %v9851_v47  ;;  %10072 = vst [vmem:[#allocation2 + $0x80] sm:$0x1] %v10071_v52  ;;  %v9873_v44 = vrot.slane %v9871_v0, 7  ;;  %10504 = vrot.lane.b32.xlu1 %v21883_v55, %s17549_s30  ;;  %v9547_v3 = vadd.f32 %v21687_v37, %v9452_v40 }
 0x93d   : > { %v21894_v54 = vrot.slane %v9854_v28, 7  ;;  %v15512_v56 = vpack.c.bf16 %v9578_v13, %v9578_v13  ;;  %v9576_v36 = vmax.f32 %v9544_v50, 0.0  ;;  %v21898_v34 = vpop.f32.mrb[61].mxu1  ;;  %v9581_v57 = vmax.f32 %v9549_v16, 0.0  ;;  %10240 = vrot.lane.b32.xlu0 %v21869_v43, %s17550_s7  ;;  %v10073_v40 = vld [vmem:[#allocation2 + $0x84] sm:$0xf] }
 0x93e   : > { %v9834_v62 = vsel %vm17827_vm5, %v9826_v58, %v9833_v46  ;;  %v10064_v11 = vsel %vm17845_vm7, %v9835_v23, %v10063_v1  ;;  %v21907_v4 = vpop.f32.mrb[62].mxu1  ;;  %v9876_v7 = vor.u32 %v9874_v53, %v9873_v44  ;;  %v9877_v17 = vrot.slane %v9873_v44, 4  ;;  %v10084_v50 = vld [vmem:[#allocation2 + $0x98] sm:$0x1] }
 0x93f   : > { %10062 = vst.msk [vmem:[#allocation2 + $0x70] sm:$0xf] %vm199_vm0, %v9834_v62  ;;  %10065 = vst [vmem:[#allocation2 + $0x74] sm:$0x1] %v10064_v11  ;;  %v9859_v21 = vor.u32 %v9857_v49, %v21894_v54  ;;  %v21913_v58 = vpop.f32.mrb[63].mxu1  ;;  %v9860_v26 = vrot.slane %v21894_v54, 4  ;;  %v15510_v42 = vpack.c.bf16 %v9576_v36, %v9576_v36  ;;  %v15515_v59 = vpack.c.bf16 %v9581_v57, %v9581_v57 }
 0x940   : > { %v9879_v8 = vshrl.u32 %v15512_v56, 16  ;;  %v10081_v31 = vsel %vm17834_vm6, %v9876_v7, %v10080_v27  ;;  %v9579_v39 = vmax.f32 %v9547_v3, 0.0  ;;  %v21921_v5 = vcombine.low %v10127_v19, %v21905_v35  ;;  %v21931_v13 = vld [vmem:[#allocation2 + $0x50] ss:$0 sps:$4 sm:$0x11]  }
 0x941   : > { %v10074_v9 = vsel %vm17834_vm6, %v9859_v21, %v10073_v40  ;;  %10082 = vst [vmem:[#allocation2 + $0x90] sm:$0xf] %v10081_v31  ;;  %v9882_v10 = vshll.u32 %v15512_v56, 16  ;;  %v9862_v29 = vshrl.u32 %v15510_v42, 16  ;;  %v9905_v24 = vshrl.u32 %v15515_v59, 16  ;;  %10471 = vrot.lane.b32.xlu0 %v21883_v55, %s17550_s7 }
 0x942   : > { %10075 = vst [vmem:[#allocation2 + $0x84] sm:$0xf] %v10074_v9  ;;  %v9881_v2 = vrot.slane %v9879_v8, 7  ;;  %v9865_v16 = vshll.u32 %v15510_v42, 16  ;;  %v15513_v60 = vpack.c.bf16 %v9579_v39, %v9579_v39  ;;  %10246 = vrot.lane.b32.xlu1 %v21921_v5, %s17550_s7  ;;  %v9550_v20 = vadd.f32 %v21860_v41, %v21687_v37  ;;  %v10077_v54 = vld [vmem:[#allocation2 + $0x8c] sm:$0x1] }
 0x943   : > { %v9548_v6 = vadd.f32 %v21687_v37, %v21871_v48  ;;  %v9864_v28 = vrot.slane %v9862_v29, 7  ;;  %v9907_v49 = vrot.slane %v9905_v24, 7  ;;  %v9908_v47 = vshll.u32 %v15515_v59, 16  ;;  %v10094_v7 = vld [vmem:[#allocation2 + $0xa8] sm:$0xf] }
 0x944   : > { %v9884_v0 = vor.u32 %v9882_v10, %v9881_v2  ;;  %v9886_v53 = vrot.slane %v9881_v2, 4  ;;  %v9888_v52 = vshrl.u32 %v15513_v60, 16  ;;  %v9582_v46 = vmax.f32 %v9550_v20, 0.0  ;;  %v21948_v21 = vld [vmem:[#allocation2 + $0x40] sm:$0xf] }
 0x945   : > { %v9580_v23 = vmax.f32 %v9548_v6, 0.0  ;;  %v9867_v48 = vor.u32 %v9865_v16, %v9864_v28  ;;  %v9869_v44 = vrot.slane %v9864_v28, 4  ;;  %v9910_v56 = vor.u32 %v9908_v47, %v9907_v49  ;;  %10281 = vrot.lane.b32.xlu0 %v21921_v5, %s17549_s30  ;;  %v10087_v59 = vld [vmem:[#allocation2 + $0x9c] sm:$0xf]  ;;  %v10098_v28 = vld [vmem:[#allocation2 + $0xb0] sm:$0x1] }
 0x946   : > { %v9885_v1 = vsel %vm17827_vm5, %v9877_v17, %v9884_v0  ;;  %v10085_v41 = vsel %vm17845_vm7, %v9886_v53, %v10084_v50  ;;  %v9890_v36 = vrot.slane %v9888_v52, 7  ;;  %v9891_v62 = vshll.u32 %v15513_v60, 16  ;;  %10477 = vrot.lane.b32.xlu1 %v21931_v13, %s17550_s7  ;;  %v10125_v2 = vld [vmem:[#allocation2 + $0x3c] sm:$0xf]  ;;  %v10091_v52 = vld [vmem:[#allocation2 + $0xa4] sm:$0x1] }
 0x947   : > { %10083 = vst.msk [vmem:[#allocation2 + $0x94] sm:$0xf] %vm199_vm0, %v9885_v1  ;;  %10086 = vst [vmem:[#allocation2 + $0x98] sm:$0x1] %v10085_v41  ;;  %v15516_v11 = vpack.c.bf16 %v9582_v46, %v9582_v46  ;;  %v9868_v57 = vsel %vm17827_vm5, %v9860_v26, %v9867_v48  ;;  %v10078_v3 = vsel %vm17845_vm7, %v9869_v44, %v10077_v54  ;;  %v9911_v40 = vrot.slane %v9907_v49, 4 }
 0x948   : > { %v15514_v17 = vpack.c.bf16 %v9580_v23, %v9580_v23  ;;  %v9553_v27 = vadd.f32 %v21891_v45, %v21687_v37  ;;  %10076 = vst.msk [vmem:[#allocation2 + $0x88] sm:$0xf] %vm199_vm0, %v9868_v57  ;;  %10079 = vst [vmem:[#allocation2 + $0x8c] sm:$0x1] %v10078_v3  ;;  %v10095_v8 = vsel %vm17834_vm6, %v9910_v56, %v10094_v7  ;;  %v9894_v6 = vrot.slane %v9890_v36, 4 }
 0x949   : > { %v9893_v42 = vor.u32 %v9891_v62, %v9890_v36  ;;  %v9913_v26 = vshrl.u32 %v15516_v11, 16  ;;  %10096 = vst [vmem:[#allocation2 + $0xa8] sm:$0xf] %v10095_v8  ;;  %v9916_v19 = vshll.u32 %v15516_v11, 16  ;;  %v9551_v29 = vadd.f32 %v21687_v37, %v21898_v34  ;;  %10510 = vrot.lane.b32.xlu0 %v21931_v13, %s17549_s30  ;;  %v21981_v36 = vld [vmem:[#allocation2 + $0x64] sm:$0xf] }
 0x94a   : > { %v9896_v31 = vshrl.u32 %v15514_v17, 16  ;;  %v9899_v9 = vshll.u32 %v15514_v17, 16  ;;  %v9585_v39 = vmax.f32 %v9553_v27, 0.0  ;;  %v21958_v24 = vcombine.low %v10125_v2, %v21948_v21  ;;  %v21972_v41 = vld [vmem:[#allocation2 + $0x44] ss:$0 sps:$4 sm:$0x11]  }
 0x94b   : > { %v10088_v45 = vsel %vm17834_vm6, %v9893_v42, %v10087_v59  ;;  %v9915_v10 = vrot.slane %v9913_v26, 7  ;;  %v9554_v60 = vadd.f32 %v21907_v4, %v21687_v37  ;;  %v9552_v20 = vadd.f32 %v21687_v37, %v21913_v58  ;;  %v10131_v7 = vld [vmem:[#allocation2 + $0x60] sm:$0xf] }
 0x94c   : > { %10089 = vst [vmem:[#allocation2 + $0x9c] sm:$0xf] %v10088_v45  ;;  %v9898_v50 = vrot.slane %v9896_v31, 7  ;;  %v15519_v16 = vpack.c.bf16 %v9585_v39, %v9585_v39  ;;  %v9583_v34 = vmax.f32 %v9551_v29, 0.0  ;;  %10279 = vrot.lane.b32.xlu1 %v21958_v24, %s17549_s30  ;;  %v10108_v17 = vld [vmem:[#allocation2 + $0xc0] sm:$0xf]  ;;  %v21987_v42 = vcombine.low %v10131_v7, %v21981_v36 }
 0x94d   : > { %v9918_v0 = vor.u32 %v9916_v19, %v9915_v10  ;;  %v9920_v53 = vrot.slane %v9915_v10, 4  ;;  %v9586_v58 = vmax.f32 %v9554_v60, 0.0  ;;  %10244 = vrot.lane.b32.xlu0 %v21958_v24, %s17550_s7  ;;  %v9584_v56 = vmax.f32 %v9552_v20, 0.0  ;;  %v10101_v31 = vld [vmem:[#allocation2 + $0xb4] sm:$0xf] }
 0x94e   : > { %v9901_v49 = vor.u32 %v9899_v9, %v9898_v50  ;;  %v9903_v47 = vrot.slane %v9898_v50, 4  ;;  %v9939_v46 = vshrl.u32 %v15519_v16, 16  ;;  %v9942_v23 = vshll.u32 %v15519_v16, 16  ;;  %v21995_v10 = vld [vmem:[#allocation2 + $0x68] ss:$0 sps:$4 sm:$0x11]  }
 0x94f   : > { %v9919_v1 = vsel %vm17827_vm5, %v9911_v40, %v9918_v0  ;;  %v10099_v4 = vsel %vm17845_vm7, %v9920_v53, %v10098_v28  ;;  %v15517_v37 = vpack.c.bf16 %v9583_v34, %v9583_v34  ;;  %v15520_v11 = vpack.c.bf16 %v9586_v58, %v9586_v58  ;;  %v22001_v28 = vld [vmem:[#allocation2 + $0x58] sm:$0xf]  ;;  %v10139_v7 = vld [vmem:[#allocation2 + $0x90] sm:$0xf] }
 0x950   : > { %10097 = vst.msk [vmem:[#allocation2 + $0xac] sm:$0xf] %vm199_vm0, %v9919_v1  ;;  %10100 = vst [vmem:[#allocation2 + $0xb0] sm:$0x1] %v10099_v4  ;;  %v9902_v48 = vsel %vm17827_vm5, %v9894_v6, %v9901_v49  ;;  %v10092_v44 = vsel %vm17845_vm7, %v9903_v47, %v10091_v52  ;;  %v9941_v54 = vrot.slane %v9939_v46, 7  ;;  %10508 = vrot.lane.b32.xlu1 %v21972_v41, %s17549_s30 }
 0x951   : > { %10090 = vst.msk [vmem:[#allocation2 + $0xa0] sm:$0xf] %vm199_vm0, %v9902_v48  ;;  %10093 = vst [vmem:[#allocation2 + $0xa4] sm:$0x1] %v10092_v44  ;;  %v9922_v62 = vshrl.u32 %v15517_v37, 16  ;;  %v15518_v3 = vpack.c.bf16 %v9584_v56, %v9584_v56  ;;  %v9925_v40 = vshll.u32 %v15517_v37, 16  ;;  %10475 = vrot.lane.b32.xlu0 %v21972_v41, %s17550_s7 }
 0x952   : > { %v9944_v57 = vor.u32 %v9942_v23, %v9941_v54  ;;  %v9947_v8 = vshrl.u32 %v15520_v11, 16  ;;  %v9950_v39 = vshll.u32 %v15520_v11, 16  ;;  %v9945_v29 = vrot.slane %v9941_v54, 4  ;;  %v10112_v6 = vld [vmem:[#allocation2 + $0xc8] sm:$0x1] }
 0x953   : > { %v9924_v27 = vrot.slane %v9922_v62, 7  ;;  %v9930_v26 = vshrl.u32 %v15518_v3, 16  ;;  %v9933_v45 = vshll.u32 %v15518_v3, 16  ;;  %v10105_v47 = vld [vmem:[#allocation2 + $0xbc] sm:$0x1]  ;;  %v22048_v62 = vld [vmem:[%s23693_s1 + $0x240] sm:$0xff]  }
 0x954   : > { %v10109_v59 = vsel %vm17834_vm6, %v9944_v57, %v10108_v17  ;;  %v9949_v9 = vrot.slane %v9947_v8, 7  ;;  %10250 = vrot.lane.b32.xlu1 %v21987_v42, %s17550_s7  ;;  %v10129_v23 = vld [vmem:[#allocation2 + $0x54] sm:$0xf]  ;;  %v22022_v4 = vld [vmem:[#allocation2 + $0x5c] ss:$0 sps:$4 sm:$0x11]   ;;  %16521 = vmatprep.subr.bf16.mxu0 %v22048_v62 }
 0x955   : > { %10110 = vst [vmem:[#allocation2 + $0xc0] sm:$0xf] %v10109_v59  ;;  %v9927_v19 = vor.u32 %v9925_v40, %v9924_v27  ;;  %v9932_v2 = vrot.slane %v9930_v26, 7  ;;  %10285 = vrot.lane.b32.xlu0 %v21987_v42, %s17549_s30  ;;  %v9928_v20 = vrot.slane %v9924_v27, 4  ;;  %v22016_v1 = vcombine.low %v10129_v23, %v22001_v28  ;;  %v22026_v37 = vld [vmem:[#allocation2 + $0x7c] sm:$0xf] }
 0x956   : > { %v9952_v16 = vor.u32 %v9950_v39, %v9949_v9  ;;  %v9954_v60 = vrot.slane %v9949_v9, 4  ;;  %v10135_v58 = vld [vmem:[#allocation2 + $0x78] sm:$0xf]  ;;  %v22037_v44 = vld [vmem:[#allocation2 + $0x80] ss:$0 sps:$4 sm:$0x11]  }
 0x957   : > { %v10102_v50 = vsel %vm17834_vm6, %v9927_v19, %v10101_v31  ;;  %v9935_v0 = vor.u32 %v9933_v45, %v9932_v2  ;;  %v9937_v53 = vrot.slane %v9932_v2, 4  ;;  %v22031_v48 = vcombine.low %v10135_v58, %v22026_v37  ;;  %v22041_v54 = vld [vmem:[#allocation2 + $0x70] sm:$0xf]  ;;  %v10133_v56 = vld [vmem:[#allocation2 + $0x6c] sm:$0xf] }
 0x958   : > { %10103 = vst [vmem:[#allocation2 + $0xb4] sm:$0xf] %v10102_v50  ;;  %v9953_v34 = vsel %vm17827_vm5, %v9945_v29, %v9952_v16  ;;  %v10113_v49 = vsel %vm17845_vm7, %v9954_v60, %v10112_v6  ;;  %10481 = vrot.lane.b32.xlu1 %v21995_v10, %s17550_s7  ;;  %v22051_v11 = vcombine.low %v10133_v56, %v22041_v54  ;;  %v22058_v57 = vld [vmem:[#allocation2 + $0x74] ss:$0 sps:$4 sm:$0x11]   ;;  %v22126_v60 = vpop.permute.xlu1 %10303 }
 0x959   : > { %10111 = vst.msk [vmem:[#allocation2 + $0xc4] sm:$0xf] %vm199_vm0, %v9953_v34  ;;  %10114 = vst [vmem:[#allocation2 + $0xc8] sm:$0x1] %v10113_v49  ;;  %v9936_v52 = vsel %vm17827_vm5, %v9928_v20, %v9935_v0  ;;  %v10106_v46 = vsel %vm17845_vm7, %v9937_v53, %v10105_v47  ;;  %10514 = vrot.lane.b32.xlu0 %v21995_v10, %s17549_s30  ;;  %v22062_v3 = vld [vmem:[#allocation2 + $0x94] sm:$0xf] }
 0x95a   : > { %10104 = vst.msk [vmem:[#allocation2 + $0xb8] sm:$0xf] %vm199_vm0, %v9936_v52  ;;  %10107 = vst [vmem:[#allocation2 + $0xbc] sm:$0x1] %v10106_v46  ;;  %v22067_v17 = vcombine.low %v10139_v7, %v22062_v3  ;;  %v22077_v40 = vld [vmem:[#allocation2 + $0x88] sm:$0xf] }
 0x95b   : > { %v22073_v27 = vld [vmem:[#allocation2 + $0x98] ss:$0 sps:$4 sm:$0x11]   ;;  %v10137_v8 = vld [vmem:[#allocation2 + $0x84] sm:$0xf] }
 0x95c   : > { %10283 = vrot.lane.b32.xlu1 %v22016_v1, %s17549_s30  ;;  %v22082_v59 = vcombine.low %v10137_v8, %v22077_v40  ;;  %v22088_v26 = vld [vmem:[#allocation2 + $0x8c] ss:$0 sps:$4 sm:$0x11]   ;;  %v10143_v31 = vld [vmem:[#allocation2 + $0xa8] sm:$0xf] }
 0x95d   : > { %10248 = vrot.lane.b32.xlu0 %v22016_v1, %s17550_s7  ;;  %v22092_v19 = vld [vmem:[#allocation2 + $0xac] sm:$0xf]  ;;  %v22103_v39 = vld [vmem:[#allocation2 + $0xb0] ss:$0 sps:$4 sm:$0x11]  }
 0x95e   : > { %v22097_v9 = vcombine.low %v10143_v31, %v22092_v19  ;;  %23809 = vst [vmem:[#allocation6_spill] sm:$0xff] %v22103_v39  ;;  %v22107_v2 = vld [vmem:[#allocation2 + $0xa0] sm:$0xf]  ;;  %v10141_v45 = vld [vmem:[#allocation2 + $0x9c] sm:$0xf] }
 0x95f   : > { %v22112_v29 = vcombine.low %v10141_v45, %v22107_v2  ;;  %v22118_v50 = vld [vmem:[#allocation2 + $0xa4] ss:$0 sps:$4 sm:$0x11]   ;;  %v10147_v20 = vld [vmem:[#allocation2 + $0xc0] sm:$0xf] }
 0x960   : > { %10512 = vrot.lane.b32.xlu1 %v22022_v4, %s17549_s30  ;;  %v22122_v16 = vld [vmem:[#allocation2 + $0xc4] sm:$0xf]  ;;  %v10145_v53 = vld [vmem:[#allocation2 + $0xb4] sm:$0xf]  ;;  %v10115_v52 = vld [vmem:[#allocation2] sm:$0xf] }
 0x961   : > { %10479 = vrot.lane.b32.xlu0 %v22022_v4, %s17550_s7  ;;  %v15071_v6 = vcombine.low %v10147_v20, %v22122_v16  ;;  %v22131_v0 = vld [vmem:[#allocation2 + $0xb8] sm:$0xf]  ;;  %v22140_v46 = vld [vmem:[#allocation2 + $0xbc] ss:$0 sps:$4 sm:$0x11]  }
 0x962   : > { %v22135_v34 = vcombine.low %v10145_v53, %v22131_v0  ;;  %23810 = vst [vmem:[#allocation7_spill] sm:$0xff] %v22140_v46  ;;  %v22144_v58 = vld [vmem:[#allocation2 + $0x4] sm:$0xf]  ;;  %v17420_v8 = vld [vmem:[#allocation2 + $0xc8] ss:$0 sps:$4 sm:$0x11]  }
 0x963   : > { %23811 = vst [vmem:[#allocation8_spill] sm:$0xff] %v22144_v58  ;;  %v15055_v7 = vcombine.low %v10115_v52, %v22144_v58  ;;  %v17422_v31 = vld [vmem:[#allocation2 + $0xd4] ss:$0 sps:$4 sm:$0x11]   ;;  %v22162_v58 = vcombine.low %v11262_v18, %v21793_v14 }
 0x964   : > { %10254 = vrot.lane.b32.xlu1 %v22031_v48, %s17550_s7 }
 0x965   : > { %10289 = vrot.lane.b32.xlu0 %v22031_v48, %s17549_s30 }
 0x968   : > { %10485 = vrot.lane.b32.xlu1 %v22037_v44, %s17550_s7 }
 0x969   : > { %10518 = vrot.lane.b32.xlu0 %v22037_v44, %s17549_s30 }
 0x96c   : > { %10287 = vrot.lane.b32.xlu1 %v22051_v11, %s17549_s30 }
 0x96d   : > { %10252 = vrot.lane.b32.xlu0 %v22051_v11, %s17550_s7 }
 0x970   : > { %10516 = vrot.lane.b32.xlu1 %v22058_v57, %s17549_s30 }
 0x971   : > { %10483 = vrot.lane.b32.xlu0 %v22058_v57, %s17550_s7 }
 0x974   : > { %10258 = vrot.lane.b32.xlu1 %v22067_v17, %s17550_s7 }
 0x975   : > { %10293 = vrot.lane.b32.xlu0 %v22067_v17, %s17549_s30 }
 0x978   : > { %10489 = vrot.lane.b32.xlu1 %v22073_v27, %s17550_s7 }
 0x979   : > { %10522 = vrot.lane.b32.xlu0 %v22073_v27, %s17549_s30 }
 0x97c   : > { %10291 = vrot.lane.b32.xlu1 %v22082_v59, %s17549_s30 }
 0x97d   : > { %10256 = vrot.lane.b32.xlu0 %v22082_v59, %s17550_s7 }
 0x980   : > { %10520 = vrot.lane.b32.xlu1 %v22088_v26, %s17549_s30 }
 0x981   : > { %10487 = vrot.lane.b32.xlu0 %v22088_v26, %s17550_s7 }
 0x984   : > { %10262 = vrot.lane.b32.xlu1 %v22097_v9, %s17550_s7 }
 0x985   : > { %10297 = vrot.lane.b32.xlu0 %v22097_v9, %s17549_s30 }
 0x988   : > { %10493 = vrot.lane.b32.xlu1 %v22103_v39, %s17550_s7 }
 0x989   : > { %10526 = vrot.lane.b32.xlu0 %v22103_v39, %s17549_s30  ;;  %v11263_v39 = vld [vmem:[#allocation2 + $0x18] sm:$0xe] }
 0x98c   : > { %10295 = vrot.lane.b32.xlu1 %v22112_v29, %s17549_s30 }
 0x98d   : > { %10260 = vrot.lane.b32.xlu0 %v22112_v29, %s17550_s7 }
 0x990   : > { %10524 = vrot.lane.b32.xlu1 %v22118_v50, %s17549_s30 }
 0x991   : > { %10491 = vrot.lane.b32.xlu0 %v22118_v50, %s17550_s7 }
 0x994   : > { %10266 = vrot.lane.b32.xlu1 %v15071_v6, %s17550_s7 }
 0x995   : > { %10301 = vrot.lane.b32.xlu0 %v15071_v6, %s17549_s30  ;;  %v17426_v6 = vld [vmem:[#allocation2 + $0x8] ss:$0 sps:$4 sm:$0x11]  }
 0x996   : > { %v10239_v49 = vpop.permute.xlu1 %10238  ;;  %v10274_v47 = vpop.permute.xlu0 %10273 }
 0x998   : > { %10299 = vrot.lane.b32.xlu1 %v22135_v34, %s17549_s30 }
 0x999   : > { %10264 = vrot.lane.b32.xlu0 %v22135_v34, %s17550_s7 }
 0x99a   : > { %v10503_v23 = vpop.permute.xlu0 %10502  ;;  %v10470_v56 = vpop.permute.xlu1 %10469 }
 0x99c   : > { %10528 = vrot.lane.b32.xlu1 %v22140_v46, %s17549_s30 }
 0x99d   : > { %10495 = vrot.lane.b32.xlu0 %v22140_v46, %s17550_s7 }
 0x99f   : > { %v10237_v45 = vpop.permute.xlu0 %10236  ;;  %v22153_v53 = vpop.permute.xlu1 %10242 }
 0x9a0   : > { %10497 = vrot.lane.b32.xlu1 %v17420_v8, %s17550_s7  ;;  %v10307_v20 = vsel %vm972_vm8, %v15055_v7, %v10237_v45  ;;  %v22166_v45 = vcombine.low %v11263_v39, %v21733_v63  ;;  %v10310_v39 = vsel %vm972_vm8, %v21808_v32, %v10239_v49  ;;  %v11265_v49 = vld [vmem:[#allocation2 + $0x30] sm:$0xe] }
 0x9a1   : > { %v22156_v33 = vsel %vm1021_vm9, %v10307_v20, %v10274_v47  ;;  %10530 = vrot.lane.b32.xlu0 %v17420_v8, %s17549_s30  ;;  %v11264_v20 = vld [vmem:[#allocation2 + $0x24] sm:$0xe] }
 0x9a2   : > { %v10616_v52 = vshll.u32 %v22156_v33, 16 }
 0x9a3   : > { %v10468_v12 = vpop.permute.xlu0 %10467  ;;  %v22168_v47 = vpop.permute.xlu1 %10473 }
 0x9a4   : > { %10532 = vrot.lane.b32.xlu1 %v17422_v31, %s17549_s30  ;;  %v10618_v46 = vrot.slane %v10616_v52, 1  ;;  %v10536_v7 = vsel %vm972_vm8, %v17426_v6, %v10468_v12  ;;  %v10614_v31 = vshrl.u32 %v22156_v33, 16 }
 0x9a5   : > { %v22171_v8 = vsel %vm1021_vm9, %v10536_v7, %v10503_v23  ;;  %11330 = vrot.lane.b32.xlu0 %v22162_v58, %s17550_s7  ;;  %v22182_v23 = vcombine.low %v11264_v20, %v21851_v15  ;;  %v10539_v15 = vsel %vm972_vm8, %v21825_v61, %v10470_v56  ;;  %v11266_v61 = vld [vmem:[#allocation2 + $0x3c] sm:$0xe] }
 0x9a6   : > { %v10620_v18 = vshll.u32 %v22171_v8, 16  ;;  %v10619_v63 = vor.u32 %v10618_v46, %v10614_v31 }
 0x9a7   : > { %v10278_v14 = vpop.permute.xlu0 %10277  ;;  %23812 = vst [vmem:[#allocation9_spill] sm:$0xff] %v22182_v23 }
 0x9a8   : > { %11332 = vrot.lane.b32.xlu1 %v22166_v45, %s17550_s7  ;;  %v10622_v12 = vrot.slane %v10620_v18, 1  ;;  %v22197_v18 = vcombine.low %v11265_v49, %v21801_v51 }
 0x9a9   : > { %11365 = vrot.lane.b32.xlu0 %v22166_v45, %s17549_s30 }
 0x9aa   : > { %v10276_v6 = vpop.permute.xlu1 %10275  ;;  %v10623_v7 = vsel %vm1282_vm10, %v10619_v63, %v10622_v12 }
 0x9ab   : > { %v22187_v52 = vsel %vm1021_vm9, %v10310_v39, %v10276_v6  ;;  %16489 = vmatprep.mubr.msk.bf16.mxu0 %vm1492_vm11, %v10623_v7  ;;  %v10507_v32 = vpop.permute.xlu0 %10506 }
 0x9ac   : > { %11367 = vrot.lane.b32.xlu1 %v22182_v23, %s17549_s30  ;;  %v10626_v46 = vshll.u32 %v22187_v52, 16  ;;  %v10624_v63 = vshrl.u32 %v22187_v52, 16 }
 0x9ad   : > { %11334 = vrot.lane.b32.xlu0 %v22182_v23, %s17550_s7 }
 0x9ae   : > { %v10628_v31 = vrot.slane %v10626_v46, 1  ;;  %v10505_v20 = vpop.permute.xlu1 %10504  ;;  %v22211_v46 = vcombine.low %v11266_v61, %v21948_v21 }
 0x9af   : > { %v22202_v12 = vsel %vm1021_vm9, %v10539_v15, %v10505_v20  ;;  %v10241_v6 = vpop.permute.xlu0 %10240  ;;  %v17441_v20 = vld [vmem:[%s23693_s1 + $0x248] sm:$0xff]  }
 0x9b0   : > { %11336 = vrot.lane.b32.xlu1 %v22197_v18, %s17550_s7  ;;  %v10630_v39 = vshll.u32 %v22202_v12, 16  ;;  %v10313_v51 = vsel %vm972_vm8, %v21753_v22, %v10241_v6  ;;  %v10629_v56 = vor.u32 %v10628_v31, %v10624_v63 }
 0x9b1   : > { %v22214_v49 = vsel %vm1021_vm9, %v10313_v51, %v10278_v14  ;;  %11369 = vrot.lane.b32.xlu0 %v22197_v18, %s17549_s30  ;;  %v11267_v14 = vld [vmem:[#allocation2 + $0x48] sm:$0xe] }
 0x9b2   : > { %v10632_v7 = vrot.slane %v10630_v39, 1  ;;  %v10636_v15 = vshll.u32 %v22214_v49, 16  ;;  %v22231_v39 = vcombine.low %v11267_v14, %v21905_v35  ;;  %v10634_v61 = vshrl.u32 %v22214_v49, 16  ;;  %v11269_v14 = vld [vmem:[#allocation2 + $0x60] sm:$0xe] }
 0x9b3   : > { %v10472_v21 = vpop.permute.xlu0 %10471 }
 0x9b4   : > { %v10633_v23 = vsel %vm1282_vm10, %v10629_v56, %v10632_v7  ;;  %11371 = vrot.lane.b32.xlu1 %v22211_v46, %s17549_s30  ;;  %v22225_v22 = vpop.permute.xlu1 %10246  ;;  %v10638_v31 = vrot.slane %v10636_v15, 1  ;;  %v10542_v63 = vsel %vm972_vm8, %v21764_v30, %v10472_v21  ;;  %v17442_v30 = vld [vmem:[%s23693_s1 + $0x250] sm:$0xff]   ;;  %v17443_v21 = vld [vmem:[%s23693_s1 + $0x258] sm:$0xff]  }
 0x9b5   : > { %16490 = vmatmul.mubr.msk.bf16.vlgmr.msra.gmra.mrb[64].mxu0 %vm1492_vm11, %v10633_v23  ;;  %v22234_v6 = vsel %vm1021_vm9, %v10542_v63, %v10507_v32  ;;  %11338 = vrot.lane.b32.xlu0 %v22211_v46, %s17550_s7  ;;  %v11268_v56 = vld [vmem:[#allocation2 + $0x54] sm:$0xe] }
 0x9b6   : > { %16522 = vmatpush3.bf16.msra.mxu0 %v22048_v62  ;;  %v10640_v51 = vshll.u32 %v22234_v6, 16  ;;  %v10639_v7 = vor.u32 %v10638_v31, %v10634_v61  ;;  %v22249_v62 = vcombine.low %v11268_v56, %v22001_v28  ;;  %v10316_v28 = vsel %vm972_vm8, %v21869_v43, %v22153_v53 }
 0x9b7   : > { %16523 = vmatprep.subr.bf16.mxu0 %v17441_v20  ;;  %v10282_v23 = vpop.permute.xlu0 %10281 }
 0x9b8   : > { %11340 = vrot.lane.b32.xlu1 %v22231_v39, %s17550_s7  ;;  %v22246_v35 = vpop.permute.xlu1 %10477  ;;  %v10642_v32 = vrot.slane %v10640_v51, 1  ;;  %v17444_v51 = vld [vmem:[%s23693_s1 + $0x260] sm:$0xff]  }
 0x9b9   : > { %11373 = vrot.lane.b32.xlu0 %v22231_v39, %s17549_s30 }
 0x9ba   : > { %16524 = vmatpush3.bf16.msra.mxu0 %v17441_v20  ;;  %v10643_v15 = vsel %vm1282_vm10, %v10639_v7, %v10642_v32  ;;  %v22264_v20 = vcombine.low %v11269_v14, %v21981_v36  ;;  %v11270_v36 = vld [vmem:[#allocation2 + $0x6c] sm:$0xe] }
 0x9bb   : > { %16525 = vmatprep.subr.bf16.mxu0 %v17442_v30  ;;  %16493 = vmatprep.mubr.msk.bf16.mxu0 %vm1492_vm11, %v10643_v15  ;;  %v10511_v31 = vpop.permute.xlu0 %10510  ;;  %v22283_v15 = vcombine.low %v11270_v36, %v22041_v54 }
 0x9bc   : > { %11375 = vrot.lane.b32.xlu1 %v22249_v62, %s17549_s30  ;;  %23813 = vst [vmem:[#allocation10_spill] sm:$0xff] %v22264_v20 }
 0x9bd   : > { %11342 = vrot.lane.b32.xlu0 %v22249_v62, %s17550_s7 }
 0x9be   : > { %v10280_v63 = vpop.permute.xlu1 %10279  ;;  %16526 = vmatpush3.bf16.msra.mxu0 %v17442_v30  ;;  %v10545_v30 = vsel %vm972_vm8, %v21883_v55, %v22168_v47  ;;  %v17446_v55 = vld [vmem:[%s23693_s1 + $0x268] sm:$0xff]  }
 0x9bf   : > { %v22269_v61 = vsel %vm1021_vm9, %v10316_v28, %v10280_v63  ;;  %16527 = vmatprep.subr.bf16.mxu0 %v17443_v21  ;;  %v10245_v43 = vpop.permute.xlu0 %10244 }
 0x9c0   : > { %v10646_v32 = vshll.u32 %v22269_v61, 16  ;;  %11344 = vrot.lane.b32.xlu1 %v22264_v20, %s17550_s7  ;;  %v10319_v53 = vsel %vm972_vm8, %v21818_v38, %v10245_v43  ;;  %v10644_v54 = vshrl.u32 %v22269_v61, 16 }
 0x9c1   : > { %v22286_v14 = vsel %vm1021_vm9, %v10319_v53, %v10282_v23  ;;  %11377 = vrot.lane.b32.xlu0 %v22264_v20, %s17549_s30 }
 0x9c2   : > { %v10648_v56 = vrot.slane %v10646_v32, 1  ;;  %v10509_v7 = vpop.permute.xlu1 %10508  ;;  %16528 = vmatpush3.bf16.msra.mxu0 %v17443_v21  ;;  %v10656_v38 = vshll.u32 %v22286_v14, 16  ;;  %v11271_v21 = vld [vmem:[#allocation2 + $0x78] sm:$0xe] }
 0x9c3   : > { %v22291_v28 = vsel %vm1021_vm9, %v10545_v30, %v10509_v7  ;;  %16529 = vmatprep.subr.bf16.mxu0 %v17444_v51  ;;  %v10476_v23 = vpop.permute.xlu0 %10475  ;;  %v22306_v30 = vcombine.low %v11271_v21, %v22026_v37 }
 0x9c4   : > { %v10650_v47 = vshll.u32 %v22291_v28, 16  ;;  %11379 = vrot.lane.b32.xlu1 %v22283_v15, %s17549_s30  ;;  %v10658_v63 = vrot.slane %v10656_v38, 1  ;;  %v10548_v32 = vsel %vm972_vm8, %v21843_v25, %v10476_v23  ;;  %v10649_v43 = vor.u32 %v10648_v56, %v10644_v54  ;;  %v22318_v25 = vld [vmem:[%s23693_s1 + $0x2a0] sm:$0xff]  }
 0x9c5   : > { %v22309_v7 = vsel %vm1021_vm9, %v10548_v32, %v10511_v31  ;;  %11346 = vrot.lane.b32.xlu0 %v22283_v15, %s17550_s7  ;;  %v10654_v38 = vshrl.u32 %v22286_v14, 16 }
 0x9c6   : > { %v10652_v36 = vrot.slane %v10650_v47, 1  ;;  %v22303_v53 = vpop.permute.xlu1 %10250  ;;  %16530 = vmatpush3.bf16.msra.mxu0 %v17444_v51  ;;  %v10660_v20 = vshll.u32 %v22309_v7, 16  ;;  %v11272_v51 = vld [vmem:[#allocation2 + $0x84] sm:$0xe] }
 0x9c7   : > { %16531 = vmatprep.subr.bf16.mxu0 %v17446_v55  ;;  %v10286_v31 = vpop.permute.xlu0 %10285  ;;  %v10659_v54 = vor.u32 %v10658_v63, %v10654_v38  ;;  %v22327_v23 = vcombine.low %v11272_v51, %v22077_v40  ;;  %v11273_v63 = vld [vmem:[#allocation2 + $0x90] sm:$0xe]  ;;  %v10322_v40 = vsel %vm972_vm8, %v21958_v24, %v22225_v22 }
 0x9c8   : > { %11348 = vrot.lane.b32.xlu1 %v22306_v30, %s17550_s7  ;;  %v10653_v37 = vsel %vm1282_vm10, %v10649_v43, %v10652_v36  ;;  %v10662_v56 = vrot.slane %v10660_v20, 1  ;;  %v22340_v43 = vcombine.low %v11273_v63, %v22062_v3  ;;  %v10551_v3 = vsel %vm972_vm8, %v21972_v41, %v22246_v35 }
 0x9c9   : > { %16494 = vmatmul.mubr.msk.bf16.gmra.mrb[68].mxu0 %vm1492_vm11, %v10653_v37  ;;  %11381 = vrot.lane.b32.xlu0 %v22306_v30, %s17549_s30  ;;  %v11274_v37 = vld [vmem:[#allocation2 + $0x9c] sm:$0xe] }
 0x9ca   : > { %v22324_v47 = vpop.permute.xlu1 %10481  ;;  %16532 = vmatpush3.bf16.msra.mxu0 %v17446_v55  ;;  %v10663_v21 = vsel %vm1282_vm10, %v10659_v54, %v10662_v56  ;;  %v22356_v51 = vcombine.low %v11274_v37, %v22107_v2 }
 0x9cb   : > { %16565 = vmatprep.subr.bf16.mxu0 %v22318_v25  ;;  %16497 = vmatprep.mubr.msk.bf16.mxu0 %vm1492_vm11, %v10663_v21  ;;  %v10515_v20 = vpop.permute.xlu0 %10514 }
 0x9cc   : > { %11383 = vrot.lane.b32.xlu1 %v22327_v23, %s17549_s30 }
 0x9cd   : > { %11350 = vrot.lane.b32.xlu0 %v22327_v23, %s17550_s7 }
 0x9ce   : > { %v10284_v32 = vpop.permute.xlu1 %10283 }
 0x9cf   : > { %v22345_v55 = vsel %vm1021_vm9, %v10322_v40, %v10284_v32  ;;  %v10249_v38 = vpop.permute.xlu0 %10248  ;;  %v11275_v40 = vld [vmem:[#allocation2 + $0xa8] sm:$0xe] }
 0x9d0   : > { %v10666_v36 = vshll.u32 %v22345_v55, 16  ;;  %11352 = vrot.lane.b32.xlu1 %v22340_v43, %s17550_s7  ;;  %v10325_v24 = vsel %vm972_vm8, %v21921_v5, %v10249_v38  ;;  %v10664_v63 = vshrl.u32 %v22345_v55, 16  ;;  %v22374_v37 = vcombine.low %v11275_v40, %v22092_v19 }
 0x9d1   : > { %v22359_v54 = vsel %vm1021_vm9, %v10325_v24, %v10286_v31  ;;  %11385 = vrot.lane.b32.xlu0 %v22340_v43, %s17549_s30 }
 0x9d2   : > { %v10668_v22 = vrot.slane %v10666_v36, 1  ;;  %v10513_v56 = vpop.permute.xlu1 %10512  ;;  %v10676_v5 = vshll.u32 %v22359_v54, 16 }
 0x9d3   : > { %v22364_v21 = vsel %vm1021_vm9, %v10551_v3, %v10513_v56  ;;  %v10480_v2 = vpop.permute.xlu0 %10479  ;;  %v10674_v3 = vshrl.u32 %v22359_v54, 16 }
 0x9d4   : > { %v10670_v41 = vshll.u32 %v22364_v21, 16  ;;  %11387 = vrot.lane.b32.xlu1 %v22356_v51, %s17549_s30  ;;  %v10678_v35 = vrot.slane %v10676_v5, 1  ;;  %v10554_v31 = vsel %vm972_vm8, %v21931_v13, %v10480_v2  ;;  %v10669_v32 = vor.u32 %v10668_v22, %v10664_v63  ;;  %v11276_v5 = vld [vmem:[#allocation2 + $0xb4] sm:$0xe] }
 0x9d5   : > { %v22377_v24 = vsel %vm1021_vm9, %v10554_v31, %v10515_v20  ;;  %11354 = vrot.lane.b32.xlu0 %v22356_v51, %s17550_s7  ;;  %v11277_v31 = vld [vmem:[#allocation2 + $0xc0] sm:$0xe] }
 0x9d6   : > { %v10672_v36 = vrot.slane %v10670_v41, 1  ;;  %v10255_v38 = vpop.permute.xlu1 %10254  ;;  %v10680_v56 = vshll.u32 %v22377_v24, 16  ;;  %v10679_v63 = vor.u32 %v10678_v35, %v10674_v3  ;;  %v22388_v41 = vcombine.low %v11276_v5, %v22131_v0 }
 0x9d7   : > { %v10290_v22 = vpop.permute.xlu0 %10289  ;;  %v10328_v35 = vsel %vm972_vm8, %v22016_v1, %v22303_v53  ;;  %v15175_v0 = vcombine.low %v11277_v31, %v22122_v16  ;;  %v10557_v1 = vsel %vm972_vm8, %v22022_v4, %v22324_v47 }
 0x9d8   : > { %11356 = vrot.lane.b32.xlu1 %v22374_v37, %s17550_s7  ;;  %v10673_v13 = vsel %vm1282_vm10, %v10669_v32, %v10672_v36  ;;  %v10682_v19 = vrot.slane %v10680_v56, 1  ;;  %23814 = vst [vmem:[#allocation11_spill] sm:$0xff] %v22388_v41  ;;  %v11278_v32 = vld [vmem:[#allocation2 + $0xcc] sm:$0xe] }
 0x9d9   : > { %16498 = vmatmul.mubr.msk.bf16.gmra.mrb[72].mxu0 %vm1492_vm11, %v10673_v13  ;;  %11389 = vrot.lane.b32.xlu0 %v22374_v37, %s17549_s30  ;;  %v17538_v13 = vld [vmem:[#allocation2 + $0xd0] sm:$0xf] }
 0x9da   : > { %v10486_v20 = vpop.permute.xlu1 %10485  ;;  %v10683_v2 = vsel %vm1282_vm10, %v10679_v63, %v10682_v19  ;;  %v15176_v19 = vcombine.low %v11278_v32, %v17538_v13 }
 0x9db   : > { %16501 = vmatprep.mubr.msk.bf16.mxu0 %vm1492_vm11, %v10683_v2  ;;  %v10519_v40 = vpop.permute.xlu0 %10518 }
 0x9dc   : > { %11391 = vrot.lane.b32.xlu1 %v22388_v41, %s17549_s30 }
 0x9dd   : > { %11358 = vrot.lane.b32.xlu0 %v22388_v41, %s17550_s7 }
 0x9de   : > { %v10288_v36 = vpop.permute.xlu1 %10287 }
 0x9df   : > { %v22403_v3 = vsel %vm1021_vm9, %v10328_v35, %v10288_v36  ;;  %v10253_v5 = vpop.permute.xlu0 %10252 }
 0x9e0   : > { %v10686_v56 = vshll.u32 %v22403_v3, 16  ;;  %11360 = vrot.lane.b32.xlu1 %v15175_v0, %s17550_s7  ;;  %v10331_v63 = vsel %vm972_vm8, %v21987_v42, %v10253_v5  ;;  %v10684_v35 = vshrl.u32 %v22403_v3, 16 }
 0x9e1   : > { %v22413_v2 = vsel %vm1021_vm9, %v10331_v63, %v10290_v22  ;;  %11393 = vrot.lane.b32.xlu0 %v15175_v0, %s17549_s30 }
 0x9e2   : > { %v10688_v16 = vrot.slane %v10686_v56, 1  ;;  %v10517_v53 = vpop.permute.xlu1 %10516  ;;  %v10696_v32 = vshll.u32 %v22413_v2, 16  ;;  %v10694_v5 = vshrl.u32 %v22413_v2, 16 }
 0x9e3   : > { %v22417_v31 = vsel %vm1021_vm9, %v10557_v1, %v10517_v53  ;;  %v10484_v36 = vpop.permute.xlu0 %10483 }
 0x9e4   : > { %v10690_v42 = vshll.u32 %v22417_v31, 16  ;;  %11395 = vrot.lane.b32.xlu1 %v15176_v19, %s17549_s30  ;;  %v10698_v4 = vrot.slane %v10696_v32, 1  ;;  %v10560_v47 = vsel %vm972_vm8, %v21995_v10, %v10484_v36  ;;  %v10689_v22 = vor.u32 %v10688_v16, %v10684_v35 }
 0x9e5   : > { %v22426_v0 = vsel %vm1021_vm9, %v10560_v47, %v10519_v40  ;;  %v10334_v40 = vsel %vm972_vm8, %v22051_v11, %v10255_v38 }
 0x9e6   : > { %v10692_v56 = vrot.slane %v10690_v42, 1  ;;  %v10259_v13 = vpop.permute.xlu1 %10258  ;;  %v10700_v63 = vshll.u32 %v22426_v0, 16  ;;  %v10699_v32 = vor.u32 %v10698_v4, %v10694_v5  ;;  %v10563_v4 = vsel %vm972_vm8, %v22058_v57, %v10486_v20 }
 0x9e7   : > { %v10294_v53 = vpop.permute.xlu0 %10293 }
 0x9e8   : > { %v10693_v1 = vsel %vm1282_vm10, %v10689_v22, %v10692_v56  ;;  %v10702_v19 = vrot.slane %v10700_v63, 1 }
 0x9e9   : > { %16502 = vmatmul.mubr.msk.bf16.gmra.mrb[76].mxu0 %vm1492_vm11, %v10693_v1 }
 0x9ea   : > { %v10490_v41 = vpop.permute.xlu1 %10489  ;;  %v10703_v10 = vsel %vm1282_vm10, %v10699_v32, %v10702_v19 }
 0x9eb   : > { %16505 = vmatprep.mubr.msk.bf16.mxu0 %vm1492_vm11, %v10703_v10  ;;  %v10523_v16 = vpop.permute.xlu0 %10522 }
 0x9ee   : > { %v10292_v35 = vpop.permute.xlu1 %10291 }
 0x9ef   : > { %v22437_v42 = vsel %vm1021_vm9, %v10334_v40, %v10292_v35  ;;  %v10257_v47 = vpop.permute.xlu0 %10256 }
 0x9f0   : > { %v10706_v36 = vshll.u32 %v22437_v42, 16  ;;  %v10337_v22 = vsel %vm972_vm8, %v22031_v48, %v10257_v47  ;;  %v10704_v1 = vshrl.u32 %v22437_v42, 16 }
 0x9f1   : > { %v22445_v63 = vsel %vm1021_vm9, %v10337_v22, %v10294_v53 }
 0x9f2   : > { %v10708_v56 = vrot.slane %v10706_v36, 1  ;;  %v10521_v5 = vpop.permute.xlu1 %10520  ;;  %v10716_v38 = vshll.u32 %v22445_v63, 16  ;;  %v10714_v35 = vshrl.u32 %v22445_v63, 16 }
 0x9f3   : > { %v22448_v11 = vsel %vm1021_vm9, %v10563_v4, %v10521_v5  ;;  %v10488_v32 = vpop.permute.xlu0 %10487 }
 0x9f4   : > { %v10710_v19 = vshll.u32 %v22448_v11, 16  ;;  %v10718_v10 = vrot.slane %v10716_v38, 1  ;;  %v10566_v48 = vsel %vm972_vm8, %v22037_v44, %v10488_v32  ;;  %v10709_v57 = vor.u32 %v10708_v56, %v10704_v1 }
 0x9f5   : > { %v22456_v53 = vsel %vm1021_vm9, %v10566_v48, %v10523_v16  ;;  %v10340_v16 = vsel %vm972_vm8, %v22082_v59, %v10259_v13 }
 0x9f6   : > { %v10712_v20 = vrot.slane %v10710_v19, 1  ;;  %v10263_v40 = vpop.permute.xlu1 %10262  ;;  %v10720_v36 = vshll.u32 %v22456_v53, 16  ;;  %v10719_v5 = vor.u32 %v10718_v10, %v10714_v35  ;;  %v10569_v10 = vsel %vm972_vm8, %v22088_v26, %v10490_v41 }
 0x9f7   : > { %v10298_v22 = vpop.permute.xlu0 %10297 }
 0x9f8   : > { %v10713_v47 = vsel %vm1282_vm10, %v10709_v57, %v10712_v20  ;;  %v10722_v4 = vrot.slane %v10720_v36, 1 }
 0x9f9   : > { %16506 = vmatmul.mubr.msk.bf16.gmra.mrb[80].mxu0 %vm1492_vm11, %v10713_v47 }
 0x9fa   : > { %v10494_v38 = vpop.permute.xlu1 %10493  ;;  %v10723_v44 = vsel %vm1282_vm10, %v10719_v5, %v10722_v4 }
 0x9fb   : > { %16509 = vmatprep.mubr.msk.bf16.mxu0 %vm1492_vm11, %v10723_v44  ;;  %v10527_v56 = vpop.permute.xlu0 %10526 }
 0x9fe   : > { %v10296_v1 = vpop.permute.xlu1 %10295 }
 0x9ff   : > { %v22467_v19 = vsel %vm1021_vm9, %v10340_v16, %v10296_v1  ;;  %v10261_v48 = vpop.permute.xlu0 %10260 }
 0xa00   : > { %v10726_v32 = vshll.u32 %v22467_v19, 16  ;;  %v10343_v57 = vsel %vm972_vm8, %v22067_v17, %v10261_v48  ;;  %v10724_v47 = vshrl.u32 %v22467_v19, 16 }
 0xa01   : > { %v22475_v36 = vsel %vm1021_vm9, %v10343_v57, %v10298_v22 }
 0xa02   : > { %v10728_v20 = vrot.slane %v10726_v32, 1  ;;  %v10525_v35 = vpop.permute.xlu1 %10524  ;;  %v10736_v13 = vshll.u32 %v22475_v36, 16  ;;  %v10734_v1 = vshrl.u32 %v22475_v36, 16 }
 0xa03   : > { %v22478_v59 = vsel %vm1021_vm9, %v10569_v10, %v10525_v35  ;;  %v10492_v5 = vpop.permute.xlu0 %10491 }
 0xa04   : > { %v10730_v4 = vshll.u32 %v22478_v59, 16  ;;  %v10738_v44 = vrot.slane %v10736_v13, 1  ;;  %v10572_v17 = vsel %vm972_vm8, %v22073_v27, %v10492_v5  ;;  %v10729_v26 = vor.u32 %v10728_v20, %v10724_v47 }
 0xa05   : > { %v22486_v22 = vsel %vm1021_vm9, %v10572_v17, %v10527_v56  ;;  %v10346_v27 = vsel %vm972_vm8, %v22112_v29, %v10263_v40  ;;  %v10575_v29 = vsel %vm972_vm8, %v22118_v50, %v10494_v38 }
 0xa06   : > { %v10732_v41 = vrot.slane %v10730_v4, 1  ;;  %v10267_v16 = vpop.permute.xlu1 %10266  ;;  %v10740_v32 = vshll.u32 %v22486_v22, 16  ;;  %v10739_v35 = vor.u32 %v10738_v44, %v10734_v1 }
 0xa07   : > { %v10302_v57 = vpop.permute.xlu0 %10301  ;;  %v10352_v47 = vsel %vm972_vm8, %v22135_v34, %v10267_v16 }
 0xa08   : > { %v10733_v48 = vsel %vm1282_vm10, %v10729_v26, %v10732_v41  ;;  %v10742_v10 = vrot.slane %v10740_v32, 1  ;;  %v22511_v41 = vsel %vm1021_vm9, %v10352_v47, %v22126_v60  ;;  %v23815_v60 = vld [vmem:[#allocation6_spill] sm:$0xff] }
 0xa09   : > { %16510 = vmatmul.mubr.msk.bf16.gmra.mrb[84].mxu0 %vm1492_vm11, %v10733_v48  ;;  %v10766_v50 = vshll.u32 %v22511_v41, 16 }
 0xa0a   : > { %v10300_v20 = vpop.permute.xlu1 %10299  ;;  %v10743_v56 = vsel %vm1282_vm10, %v10739_v35, %v10742_v10 }
 0xa0b   : > { %v22495_v13 = vsel %vm1021_vm9, %v10346_v27, %v10300_v20  ;;  %16513 = vmatprep.mubr.msk.bf16.mxu0 %vm1492_vm11, %v10743_v56  ;;  %v10265_v5 = vpop.permute.xlu0 %10264  ;;  %v10768_v47 = vrot.slane %v10766_v50, 1 }
 0xa0c   : > { %v10746_v4 = vshll.u32 %v22495_v13, 16  ;;  %v10349_v44 = vsel %vm972_vm8, %v22097_v9, %v10265_v5  ;;  %v10744_v16 = vshrl.u32 %v22495_v13, 16 }
 0xa0d   : > { %v22507_v26 = vsel %vm1021_vm9, %v10349_v44, %v10302_v57 }
 0xa0e   : > { %v10748_v40 = vrot.slane %v10746_v4, 1  ;;  %v10529_v17 = vpop.permute.xlu1 %10528  ;;  %v10756_v9 = vshll.u32 %v22507_v26, 16  ;;  %v23816_v4 = vld [vmem:[#allocation7_spill] sm:$0xff]  ;;  %v10754_v44 = vshrl.u32 %v22507_v26, 16 }
 0xa0f   : > { %v22514_v34 = vsel %vm1021_vm9, %v10575_v29, %v10529_v17  ;;  %v10496_v32 = vpop.permute.xlu0 %10495 }
 0xa10   : > { %v10750_v1 = vshll.u32 %v22514_v34, 16  ;;  %v10749_v38 = vor.u32 %v10748_v40, %v10744_v16  ;;  %v10758_v10 = vrot.slane %v10756_v9, 1  ;;  %v10578_v27 = vsel %vm972_vm8, %v23815_v60, %v10496_v32 }
 0xa11   : > { %v10764_v16 = vshrl.u32 %v22511_v41, 16 }
 0xa12   : > { %v10752_v48 = vrot.slane %v10750_v1, 1  ;;  %v10498_v57 = vpop.permute.xlu1 %10497  ;;  %v10759_v32 = vor.u32 %v10758_v10, %v10754_v44  ;;  %v17449_v10 = vld [vmem:[%s23693_s1 + $0x2b0] sm:$0xff]  }
 0xa13   : > { %v10531_v20 = vpop.permute.xlu0 %10530  ;;  %v10581_v5 = vsel %vm972_vm8, %v23816_v4, %v10498_v57  ;;  %v11261_v4 = vld [vmem:[#allocation2] sm:$0xe] }
 0xa14   : > { %v10753_v35 = vsel %vm1282_vm10, %v10749_v38, %v10752_v48  ;;  %v22525_v56 = vsel %vm1021_vm9, %v10578_v27, %v10531_v20  ;;  %v10769_v48 = vor.u32 %v10768_v47, %v10764_v16  ;;  %v11510_v16 = vrot.slane %v22171_v8, 1 }
 0xa15   : > { %16514 = vmatmul.mubr.msk.bf16.gmra.mrb[88].mxu0 %vm1492_vm11, %v10753_v35  ;;  %v10760_v40 = vshll.u32 %v22525_v56, 16  ;;  %v17448_v35 = vld [vmem:[%s23693_s1 + $0x2a8] sm:$0xff]  }
 0xa16   : > { %v10533_v29 = vpop.permute.xlu1 %10532 }
 0xa17   : > { %v22532_v17 = vsel %vm1021_vm9, %v10581_v5, %v10533_v29  ;;  %v10762_v9 = vrot.slane %v10760_v40, 1 }
 0xa18   : > { %v10770_v1 = vshll.u32 %v22532_v17, 16 }
 0xa19   : > { %v10763_v50 = vsel %vm1282_vm10, %v10759_v32, %v10762_v9 }
 0xa1a   : > { %v10772_v38 = vrot.slane %v10770_v1, 1  ;;  %16517 = vmatprep.mubr.msk.bf16.mxu0 %vm1492_vm11, %v10763_v50 }
 0xa1c   : > { %v10773_v57 = vsel %vm1282_vm10, %v10769_v48, %v10772_v38 }
 0xa1d   : > { %16518 = vmatmul.mubr.msk.bf16.gmra.mrb[92].mxu0 %vm1492_vm11, %v10773_v57 }
 0xa1e   : > { %16533 = vmatprep.mubr.msk.bf16.mxu0 %vm1492_vm11, %v22156_v33  ;;  %v17450_v33 = vld [vmem:[%s23693_s1 + $0x2b8] sm:$0xff]  }
 0xa25   : > { %16534 = vmatmul.mubr.msk.bf16.vlgmr.msra.gmra.mrb[64].mxu0 %vm1492_vm11, %v22187_v52  ;;  %v17451_v52 = vld [vmem:[%s23693_s1 + $0x2c0] sm:$0xff]  }
 0xa26   : > { %16566 = vmatpush3.bf16.msra.mxu0 %v22318_v25  ;;  %16537 = vmatprep.mubr.msk.bf16.mxu0 %vm1492_vm11, %v22214_v49  ;;  %v11331_v49 = vpop.permute.xlu0 %11330  ;;  %v17452_v25 = vld [vmem:[%s23693_s1 + $0x2c8] sm:$0xff]  }
 0xa27   : > { %16567 = vmatprep.subr.bf16.mxu0 %v17448_v35 }
 0xa2a   : > { %16568 = vmatpush3.bf16.msra.mxu0 %v17448_v35  ;;  %v11516_v35 = vrot.slane %v22234_v6, 1 }
 0xa2b   : > { %16569 = vmatprep.subr.bf16.mxu0 %v17449_v10 }
 0xa2d   : > { %16538 = vmatmul.mubr.msk.bf16.gmra.mrb[68].mxu0 %vm1492_vm11, %v22269_v61  ;;  %v11366_v61 = vpop.permute.xlu0 %11365 }
 0xa2e   : > { %16541 = vmatprep.mubr.msk.bf16.mxu0 %vm1492_vm11, %v22286_v14  ;;  %16570 = vmatpush3.bf16.msra.mxu0 %v17449_v10  ;;  %v11333_v14 = vpop.permute.xlu1 %11332 }
 0xa2f   : > { %16571 = vmatprep.subr.bf16.mxu0 %v17450_v33  ;;  %v11402_v1 = vsel %vm972_vm8, %v22162_v58, %v11333_v14  ;;  %v11513_v58 = vrot.slane %v22202_v12, 1 }
 0xa31   : > { %v11335_v60 = vpop.permute.xlu0 %11334 }
 0xa32   : > { %16572 = vmatpush3.bf16.msra.mxu0 %v17450_v33  ;;  %v11368_v27 = vpop.permute.xlu1 %11367  ;;  %v11405_v38 = vsel %vm972_vm8, %v22166_v45, %v11335_v60  ;;  %v23818_v45 = vld [vmem:[#allocation9_spill] sm:$0xff]  ;;  %v11519_v60 = vrot.slane %v22291_v28, 1 }
 0xa33   : > { %16573 = vmatprep.subr.bf16.mxu0 %v17451_v52  ;;  %v11448_v32 = vsel %vm1021_vm9, %v11402_v1, %v11368_v27  ;;  %v11522_v27 = vrot.slane %v22309_v7, 1 }
 0xa34   : > { %v11512_v8 = vrot.slane %v11448_v32, 1  ;;  %v11534_v32 = vrot.slane %v22426_v0, 1 }
 0xa35   : > { %16542 = vmatmul.mubr.msk.bf16.gmra.mrb[72].mxu0 %vm1492_vm11, %v22345_v55  ;;  %v11370_v20 = vpop.permute.xlu0 %11369 }
 0xa36   : > { %16545 = vmatprep.mubr.msk.bf16.mxu0 %vm1492_vm11, %v22359_v54  ;;  %16574 = vmatpush3.bf16.msra.mxu0 %v17451_v52  ;;  %v11337_v47 = vpop.permute.xlu1 %11336  ;;  %v11514_v10 = vsel %vm2179_vm12, %v11512_v8, %v11513_v58 }
 0xa37   : > { %16575 = vmatprep.subr.bf16.mxu0 %v17452_v25  ;;  %v11408_v33 = vsel %vm972_vm8, %v23818_v45, %v11337_v47 }
 0xa39   : > { %v11339_v55 = vpop.permute.xlu0 %11338 }
 0xa3a   : > { %16576 = vmatpush3.bf16.msra.mxu0 %v17452_v25  ;;  %v11372_v54 = vpop.permute.xlu1 %11371  ;;  %v11411_v52 = vsel %vm972_vm8, %v22197_v18, %v11339_v55 }
 0xa3d   : > { %16546 = vmatmul.mubr.msk.bf16.gmra.mrb[76].mxu0 %vm1492_vm11, %v22403_v3  ;;  %v11374_v3 = vpop.permute.xlu0 %11373 }
 0xa3e   : > { %16549 = vmatprep.mubr.msk.bf16.mxu0 %vm1492_vm11, %v22413_v2  ;;  %v11341_v5 = vpop.permute.xlu1 %11340  ;;  %v23817_v2 = vld [vmem:[#allocation8_spill] sm:$0xff]  ;;  %v11454_v25 = vsel %vm1021_vm9, %v11411_v52, %v11374_v3 }
 0xa3f   : > { %v15159_v44 = vcombine.low %v11261_v4, %v23817_v2  ;;  %v11521_v14 = vrot.slane %v11454_v25, 1 }
 0xa41   : > { %v11399_v29 = vsel %vm972_vm8, %v15159_v44, %v11331_v49  ;;  %v11343_v40 = vpop.permute.xlu0 %11342  ;;  %v11523_v4 = vsel %vm2179_vm12, %v11521_v14, %v11522_v27 }
 0xa42   : > { %v11417_v55 = vsel %vm972_vm8, %v22231_v39, %v11343_v40 }
 0xa45   : > { %16550 = vmatmul.mubr.msk.bf16.gmra.mrb[80].mxu0 %vm1492_vm11, %v22437_v42  ;;  %v11446_v42 = vsel %vm1021_vm9, %v11399_v29, %v11366_v61 }
 0xa46   : > { %16553 = vmatprep.mubr.msk.bf16.mxu0 %vm1492_vm11, %v22445_v63  ;;  %v11376_v63 = vpop.permute.xlu1 %11375 }
 0xa4a   : > { %v11345_v9 = vpop.permute.xlu1 %11344 }
 0xa4b   : > { %v11420_v39 = vsel %vm972_vm8, %v22249_v62, %v11345_v9  ;;  %v11531_v62 = vrot.slane %v22417_v31, 1 }
 0xa4d   : > { %16554 = vmatmul.mubr.msk.bf16.gmra.mrb[84].mxu0 %vm1492_vm11, %v22467_v19  ;;  %v11509_v19 = vrot.slane %v11446_v42, 1 }
 0xa4e   : > { %16557 = vmatprep.mubr.msk.bf16.mxu0 %vm1492_vm11, %v22475_v36  ;;  %v11378_v36 = vpop.permute.xlu0 %11377  ;;  %v11380_v57 = vpop.permute.xlu1 %11379 }
 0xa4f   : > { %v11458_v3 = vsel %vm1021_vm9, %v11417_v55, %v11378_v36  ;;  %v11460_v42 = vsel %vm1021_vm9, %v11420_v39, %v11380_v57  ;;  %v11552_v55 = vrot.slane %v22525_v56, 1  ;;  %v12481_v56 = vld [vmem:[#allocation2 + $0x1a4] sm:$0xf] }
 0xa50   : > { %v11527_v2 = vrot.slane %v11458_v3, 1 }
 0xa52   : > { %v11347_v48 = vpop.permute.xlu0 %11346  ;;  %v11349_v61 = vpop.permute.xlu1 %11348 }
 0xa55   : > { %16558 = vmatmul.mubr.msk.bf16.gmra.mrb[88].mxu0 %vm1492_vm11, %v22495_v13  ;;  %v11511_v13 = vsel %vm2179_vm12, %v11509_v19, %v11510_v16 }
 0xa56   : > { %16561 = vmatprep.mubr.msk.bf16.mxu0 %vm1492_vm11, %v22507_v26  ;;  %v11450_v26 = vsel %vm1021_vm9, %v11405_v38, %v11370_v20  ;;  %v11382_v12 = vpop.permute.xlu0 %11381  ;;  %v11414_v20 = vsel %vm972_vm8, %v22211_v46, %v11341_v5  ;;  %v11384_v28 = vpop.permute.xlu1 %11383  ;;  %v11525_v46 = vrot.slane %v22364_v21, 1  ;;  %v11528_v5 = vrot.slane %v22377_v24, 1 }
 0xa57   : > { %v11515_v50 = vrot.slane %v11450_v26, 1  ;;  %v11456_v47 = vsel %vm1021_vm9, %v11414_v20, %v11376_v63  ;;  %v23819_v63 = vld [vmem:[#allocation10_spill] sm:$0xff]  ;;  %v11530_v24 = vrot.slane %v11460_v42, 1  ;;  %v11426_v38 = vsel %vm972_vm8, %v22283_v15, %v11349_v61 }
 0xa58   : > { %v11524_v7 = vrot.slane %v11456_v47, 1  ;;  %v11423_v19 = vsel %vm972_vm8, %v23819_v63, %v11347_v48  ;;  %v11529_v16 = vsel %vm2179_vm12, %v11527_v2, %v11528_v5  ;;  %v11464_v26 = vsel %vm1021_vm9, %v11426_v38, %v11384_v28 }
 0xa59   : > { %v11517_v49 = vsel %vm2179_vm12, %v11515_v50, %v11516_v35  ;;  %v11462_v21 = vsel %vm1021_vm9, %v11423_v19, %v11382_v12  ;;  %v11536_v0 = vrot.slane %v11464_v26, 1  ;;  %v11537_v15 = vrot.slane %v22448_v11, 1 }
 0xa5a   : > { %v11353_v29 = vpop.permute.xlu1 %11352  ;;  %v11526_v40 = vsel %vm2179_vm12, %v11524_v7, %v11525_v46  ;;  %v11533_v36 = vrot.slane %v11462_v21, 1  ;;  %v11540_v35 = vrot.slane %v22456_v53, 1  ;;  %v11546_v12 = vrot.slane %v22486_v22, 1  ;;  %v12482_v46 = vld [vmem:[#allocation2 + $0x1a8] sm:$0xf] }
 0xa5b   : > { %v11555_v2 = vrot.slane %v22532_v17, 1  ;;  %v15262_v5 = vcombine.low %v12481_v56, %v12482_v46 }
 0xa5c   : > { %v11535_v50 = vsel %vm2179_vm12, %v11533_v36, %v11534_v32 }
 0xa5d   : > { %16562 = vmatmul.mubr.msk.bf16.gmra.mrb[92].mxu0 %vm1492_vm11, %v22511_v41  ;;  %v11452_v41 = vsel %vm1021_vm9, %v11408_v33, %v11372_v54  ;;  %v11351_v54 = vpop.permute.xlu0 %11350  ;;  %12635 = vrot.lane.b32.xlu1 %v15262_v5, %s17549_s30 }
 0xa5e   : > { %16577 = vmatprep.mubr.msk.bf16.mxu0 %vm1492_vm11, %v11511_v13  ;;  %v11518_v6 = vrot.slane %v11452_v41, 1  ;;  %v11388_v9 = vpop.permute.xlu1 %11387  ;;  %v11532_v13 = vsel %vm2179_vm12, %v11530_v24, %v11531_v62  ;;  %v11429_v8 = vsel %vm972_vm8, %v22306_v30, %v11351_v54  ;;  %v11538_v30 = vsel %vm2179_vm12, %v11536_v0, %v11537_v15  ;;  %v23820_v54 = vld [vmem:[#allocation11_spill] sm:$0xff] }
 0xa60   : > { %v11520_v18 = vsel %vm2179_vm12, %v11518_v6, %v11519_v60 }
 0xa61   : > { %v11386_v44 = vpop.permute.xlu0 %11385 }
 0xa62   : > { %v11466_v48 = vsel %vm1021_vm9, %v11429_v8, %v11386_v44  ;;  %v11357_v58 = vpop.permute.xlu1 %11356  ;;  %v22688_v44 = vld [vmem:[%s23694_s2 + $0x4] ss:$0 sm:$0xff] }
 0xa63   : > { %v11539_v57 = vrot.slane %v11466_v48, 1 }
 0xa65   : > { %16578 = vmatmul.mubr.msk.bf16.vlgmr.msra.gmra.mrb[64].mxu0 %vm1492_vm11, %v11514_v10  ;;  %v11355_v1 = vpop.permute.xlu0 %11354  ;;  %v11432_v10 = vsel %vm972_vm8, %v22327_v23, %v11353_v29  ;;  %v11541_v52 = vsel %vm2179_vm12, %v11539_v57, %v11540_v35  ;;  %v11543_v23 = vrot.slane %v22478_v59, 1 }
 0xa66   : > { %16581 = vmatprep.mubr.msk.bf16.mxu0 %vm1492_vm11, %v11517_v49  ;;  %v11468_v45 = vsel %vm1021_vm9, %v11432_v10, %v11388_v9  ;;  %v11435_v33 = vsel %vm972_vm8, %v22340_v43, %v11355_v1  ;;  %v11392_v49 = vpop.permute.xlu1 %11391  ;;  %v11438_v43 = vsel %vm972_vm8, %v22356_v51, %v11357_v58  ;;  %v11549_v51 = vrot.slane %v22514_v34, 1 }
 0xa67   : > { %v11542_v53 = vrot.slane %v11468_v45, 1  ;;  %v11472_v60 = vsel %vm1021_vm9, %v11438_v43, %v11392_v49 }
 0xa68   : > { %v11548_v22 = vrot.slane %v11472_v60, 1  ;;  %v12335_v60 = vld [vmem:[#allocation2 + $0xe4] sm:$0xf] }
 0xa69   : > { %v11390_v31 = vpop.permute.xlu0 %11389  ;;  %v11544_v14 = vsel %vm2179_vm12, %v11542_v53, %v11543_v23 }
 0xa6a   : > { %v11470_v11 = vsel %vm1021_vm9, %v11435_v33, %v11390_v31  ;;  %v11361_v61 = vpop.permute.xlu1 %11360 }
 0xa6b   : > { %v11545_v25 = vrot.slane %v11470_v11, 1 }
 0xa6d   : > { %16582 = vmatmul.mubr.msk.bf16.gmra.mrb[68].mxu0 %vm1492_vm11, %v11520_v18  ;;  %v11359_v41 = vpop.permute.xlu0 %11358  ;;  %v11547_v20 = vsel %vm2179_vm12, %v11545_v25, %v11546_v12  ;;  %v12342_v25 = vld [vmem:[#allocation2 + $0xf0] sm:$0xf] }
 0xa6e   : > { %16585 = vmatprep.mubr.msk.bf16.mxu0 %vm1492_vm11, %v11523_v4  ;;  %v11441_v27 = vsel %vm972_vm8, %v22374_v37, %v11359_v41  ;;  %v11396_v47 = vpop.permute.xlu1 %11395  ;;  %v11444_v4 = vsel %vm972_vm8, %v23820_v54, %v11361_v61  ;;  %v11550_v37 = vsel %vm2179_vm12, %v11548_v22, %v11549_v51  ;;  %v12437_v61 = vld [vmem:[#allocation2 + $0x194] sm:$0x1] }
 0xa6f   : > { %v11476_v3 = vsel %vm1021_vm9, %v11444_v4, %v11396_v47 }
 0xa70   : > { %v11554_v7 = vrot.slane %v11476_v3, 1 }
 0xa71   : > { %v11394_v6 = vpop.permute.xlu0 %11393 }
 0xa72   : > { %v11474_v59 = vsel %vm1021_vm9, %v11441_v27, %v11394_v6  ;;  %v11556_v34 = vsel %vm2179_vm12, %v11554_v7, %v11555_v2 }
 0xa73   : > { %v11551_v18 = vrot.slane %v11474_v59, 1 }
 0xa75   : > { %16586 = vmatmul.mubr.msk.bf16.gmra.mrb[72].mxu0 %vm1492_vm11, %v11526_v40  ;;  %v11553_v28 = vsel %vm2179_vm12, %v11551_v18, %v11552_v55  ;;  %v12346_v18 = vld [vmem:[#allocation2 + $0xf8] sm:$0x1] }
 0xa76   : > { %16589 = vmatprep.mubr.msk.bf16.mxu0 %vm1492_vm11, %v11529_v16 }
 0xa7d   : > { %16590 = vmatmul.mubr.msk.bf16.gmra.mrb[76].mxu0 %vm1492_vm11, %v11532_v13 }
 0xa7e   : > { %16593 = vmatprep.mubr.msk.bf16.mxu0 %vm1492_vm11, %v11535_v50 }
 0xa85   : > { %16594 = vmatmul.mubr.msk.bf16.gmra.mrb[80].mxu0 %vm1492_vm11, %v11538_v30 }
 0xa86   : > { %16597 = vmatprep.mubr.msk.bf16.mxu0 %vm1492_vm11, %v11541_v52 }
 0xa8d   : > { %16598 = vmatmul.mubr.msk.bf16.gmra.mrb[84].mxu0 %vm1492_vm11, %v11544_v14 }
 0xa8e   : > { %16601 = vmatprep.mubr.msk.bf16.mxu0 %vm1492_vm11, %v11547_v20 }
 0xa95   : > { %16602 = vmatmul.mubr.msk.bf16.gmra.mrb[88].mxu0 %vm1492_vm11, %v11550_v37 }
 0xa96   : > { %16605 = vmatprep.mubr.msk.bf16.mxu0 %vm1492_vm11, %v11553_v28  ;;  %v12339_v28 = vld [vmem:[#allocation2 + $0xec] sm:$0x1] }
 0xa9d   : > { %16606 = vmatmul.mubr.msk.bf16.gmra.mrb[92].mxu0 %vm1492_vm11, %v11556_v34 }
 0xb38   : > { %v16579_v39 = vpop.f32.mrb[64].mxu0 }
 0xb39   : > { %v11857_v29 = vadd.f32 %v16579_v39, %v22688_v44  ;;  %v11688_v40 = vpop.f32.mrb[65].mxu0 }
 0xb3a   : > { %v11855_v17 = vadd.f32 %v22688_v44, %v11688_v40  ;;  %v16580_v42 = vpop.f32.mrb[66].mxu0 }
 0xb3b   : > { %v11889_v63 = vmax.f32 %v11857_v29, 0.0  ;;  %v11858_v19 = vadd.f32 %v16580_v42, %v22688_v44  ;;  %v11691_v16 = vpop.f32.mrb[67].mxu0 }
 0xb3c   : > { %v11887_v21 = vmax.f32 %v11855_v17, 0.0  ;;  %v11856_v24 = vadd.f32 %v22688_v44, %v11691_v16 }
 0xb3d   : > { %v15523_v36 = vpack.c.bf16 %v11889_v63, %v11889_v63  ;;  %v11890_v1 = vmax.f32 %v11858_v19, 0.0 }
 0xb3e   : > { %v15521_v62 = vpack.c.bf16 %v11887_v21, %v11887_v21  ;;  %v11888_v9 = vmax.f32 %v11856_v24, 0.0 }
 0xb3f   : > { %v12033_v32 = vshrl.u32 %v15523_v36, 16  ;;  %v15524_v38 = vpack.c.bf16 %v11890_v1, %v11890_v1  ;;  %v12036_v13 = vshll.u32 %v15523_v36, 16 }
 0xb40   : > { %v12016_v26 = vshrl.u32 %v15521_v62, 16  ;;  %v12019_v8 = vshll.u32 %v15521_v62, 16  ;;  %v15522_v50 = vpack.c.bf16 %v11888_v9, %v11888_v9  ;;  %v16583_v48 = vpop.f32.mrb[68].mxu0 }
 0xb41   : > { %v12035_v31 = vrot.slane %v12033_v32, 7  ;;  %v12041_v0 = vshrl.u32 %v15524_v38, 16  ;;  %v12044_v58 = vshll.u32 %v15524_v38, 16  ;;  %v11861_v57 = vadd.f32 %v16583_v48, %v22688_v44  ;;  %v11704_v15 = vpop.f32.mrb[69].mxu0  ;;  %v12356_v32 = vld [vmem:[#allocation2 + $0x108] sm:$0xf] }
 0xb42   : > { %v12018_v35 = vrot.slane %v12016_v26, 7  ;;  %v12024_v10 = vshrl.u32 %v15522_v50, 16  ;;  %v12027_v30 = vshll.u32 %v15522_v50, 16  ;;  %v11859_v45 = vadd.f32 %v22688_v44, %v11704_v15  ;;  %v16584_v33 = vpop.f32.mrb[70].mxu0  ;;  %v12349_v48 = vld [vmem:[#allocation2 + $0xfc] sm:$0xf] }
 0xb43   : > { %v12038_v41 = vor.u32 %v12036_v13, %v12035_v31  ;;  %v12039_v52 = vrot.slane %v12035_v31, 4  ;;  %v12043_v49 = vrot.slane %v12041_v0, 7  ;;  %v11893_v11 = vmax.f32 %v11861_v57, 0.0  ;;  %v11707_v53 = vpop.f32.mrb[71].mxu0 }
 0xb44   : > { %v12021_v23 = vor.u32 %v12019_v8, %v12018_v35  ;;  %v12022_v12 = vrot.slane %v12018_v35, 4  ;;  %v12026_v6 = vrot.slane %v12024_v10, 7  ;;  %v11891_v43 = vmax.f32 %v11859_v45, 0.0 }
 0xb45   : > { %v12343_v14 = vsel %vm17834_vm6, %v12038_v41, %v12342_v25  ;;  %v12046_v27 = vor.u32 %v12044_v58, %v12043_v49  ;;  %v12048_v20 = vrot.slane %v12043_v49, 4  ;;  %v15527_v59 = vpack.c.bf16 %v11893_v11, %v11893_v11 }
 0xb46   : > { %12344 = vst [vmem:[#allocation2 + $0xf0] sm:$0xf] %v12343_v14  ;;  %v12336_v22 = vsel %vm17834_vm6, %v12021_v23, %v12335_v60  ;;  %v12029_v51 = vor.u32 %v12027_v30, %v12026_v6  ;;  %v12031_v47 = vrot.slane %v12026_v6, 4  ;;  %v15525_v55 = vpack.c.bf16 %v11891_v43, %v11891_v43  ;;  %v12360_v60 = vld [vmem:[#allocation2 + $0x110] sm:$0x1] }
 0xb47   : > { %12337 = vst [vmem:[#allocation2 + $0xe4] sm:$0xf] %v12336_v22  ;;  %v12047_v4 = vsel %vm17827_vm5, %v12039_v52, %v12046_v27  ;;  %v12347_v3 = vsel %vm17845_vm7, %v12048_v20, %v12346_v18  ;;  %v12067_v7 = vshrl.u32 %v15527_v59, 16  ;;  %v12070_v56 = vshll.u32 %v15527_v59, 16 }
 0xb48   : > { %12345 = vst.msk [vmem:[#allocation2 + $0xf4] sm:$0xf] %vm199_vm0, %v12047_v4  ;;  %12348 = vst [vmem:[#allocation2 + $0xf8] sm:$0x1] %v12347_v3  ;;  %v12030_v2 = vsel %vm17827_vm5, %v12022_v12, %v12029_v51  ;;  %v12340_v34 = vsel %vm17845_vm7, %v12031_v47, %v12339_v28  ;;  %v12050_v46 = vshrl.u32 %v15525_v55, 16  ;;  %v16587_v5 = vpop.f32.mrb[72].mxu0  ;;  %v11862_v29 = vadd.f32 %v16584_v33, %v22688_v44 }
 0xb49   : > { %12338 = vst.msk [vmem:[#allocation2 + $0xe8] sm:$0xf] %vm199_vm0, %v12030_v2  ;;  %12341 = vst [vmem:[#allocation2 + $0xec] sm:$0x1] %v12340_v34  ;;  %v22710_v39 = vrot.slane %v12067_v7, 7  ;;  %v11860_v40 = vadd.f32 %v22688_v44, %v11707_v53  ;;  %v11865_v17 = vadd.f32 %v16587_v5, %v22688_v44  ;;  %v11720_v42 = vpop.f32.mrb[73].mxu0 }
 0xb4a   : > { %v12052_v63 = vrot.slane %v12050_v46, 7  ;;  %v12053_v19 = vshll.u32 %v15525_v55, 16  ;;  %v11863_v16 = vadd.f32 %v22688_v44, %v11720_v42  ;;  %v16588_v21 = vpop.f32.mrb[74].mxu0  ;;  %v11894_v1 = vmax.f32 %v11862_v29, 0.0  ;;  %v12353_v3 = vld [vmem:[#allocation2 + $0x104] sm:$0x1] }
 0xb4b   : > { %v12072_v24 = vor.u32 %v12070_v56, %v22710_v39  ;;  %v12073_v36 = vrot.slane %v22710_v39, 4  ;;  %v11892_v62 = vmax.f32 %v11860_v40, 0.0  ;;  %v11723_v9 = vpop.f32.mrb[75].mxu0  ;;  %v11897_v26 = vmax.f32 %v11865_v17, 0.0  ;;  %v12370_v17 = vld [vmem:[#allocation2 + $0x120] sm:$0xf] }
 0xb4c   : > { %v12055_v38 = vor.u32 %v12053_v19, %v12052_v63  ;;  %v12056_v13 = vrot.slane %v12052_v63, 4  ;;  %v11895_v8 = vmax.f32 %v11863_v16, 0.0  ;;  %v15528_v31 = vpack.c.bf16 %v11894_v1, %v11894_v1  ;;  %v12363_v42 = vld [vmem:[#allocation2 + $0x114] sm:$0xf] }
 0xb4d   : > { %v12357_v50 = vsel %vm17834_vm6, %v12072_v24, %v12356_v32  ;;  %v15526_v0 = vpack.c.bf16 %v11892_v62, %v11892_v62  ;;  %v11866_v58 = vadd.f32 %v16588_v21, %v22688_v44  ;;  %v15531_v15 = vpack.c.bf16 %v11897_v26, %v11897_v26  ;;  %v17486_v63 = vld [vmem:[%s23695_s3 + $0x30] sm:$0xff]  }
 0xb4e   : > { %12358 = vst [vmem:[#allocation2 + $0x108] sm:$0xf] %v12357_v50  ;;  %v12350_v57 = vsel %vm17834_vm6, %v12055_v38, %v12349_v48  ;;  %v15529_v35 = vpack.c.bf16 %v11895_v8, %v11895_v8  ;;  %v11864_v10 = vadd.f32 %v22688_v44, %v11723_v9  ;;  %v12075_v30 = vshrl.u32 %v15528_v31, 16  ;;  %16609 = vmatprep.subr.bf16.mxu1 %v17486_v63 }
 0xb4f   : > { %12351 = vst [vmem:[#allocation2 + $0xfc] sm:$0xf] %v12350_v57  ;;  %v12078_v45 = vshll.u32 %v15528_v31, 16  ;;  %v12058_v33 = vshrl.u32 %v15526_v0, 16  ;;  %v12061_v41 = vshll.u32 %v15526_v0, 16  ;;  %v12101_v52 = vshrl.u32 %v15531_v15, 16  ;;  %16610 = vmatpush3.bf16.msra.mxu1 %v17486_v63 }
 0xb50   : > { %v12104_v49 = vshll.u32 %v15531_v15, 16  ;;  %v12084_v11 = vshrl.u32 %v15529_v35, 16  ;;  %v12087_v53 = vshll.u32 %v15529_v35, 16  ;;  %v16591_v25 = vpop.f32.mrb[76].mxu0  ;;  %v12077_v23 = vrot.slane %v12075_v30, 7  ;;  %v17488_v15 = vld [vmem:[%s23695_s3 + $0x38] sm:$0xff]  }
 0xb51   : > { %v12060_v12 = vrot.slane %v12058_v33, 7  ;;  %v11898_v6 = vmax.f32 %v11866_v58, 0.0  ;;  %v11896_v43 = vmax.f32 %v11864_v10, 0.0  ;;  %v11736_v14 = vpop.f32.mrb[77].mxu0  ;;  %v22724_v27 = vrot.slane %v12101_v52, 7  ;;  %16611 = vmatprep.subr.bf16.mxu1 %v17488_v15 }
 0xb52   : > { %v22726_v20 = vrot.slane %v12084_v11, 7  ;;  %v11869_v59 = vadd.f32 %v16591_v25, %v22688_v44  ;;  %v11867_v22 = vadd.f32 %v22688_v44, %v11736_v14  ;;  %v16592_v18 = vpop.f32.mrb[78].mxu0  ;;  %v12080_v51 = vor.u32 %v12078_v45, %v12077_v23  ;;  %v22734_v46 = vld [vmem:[#allocation2 + $0xf4] sm:$0xf] }
 0xb53   : > { %v12082_v47 = vrot.slane %v12077_v23, 4  ;;  %v12063_v55 = vor.u32 %v12061_v41, %v12060_v12  ;;  %v12065_v4 = vrot.slane %v12060_v12, 4  ;;  %v11739_v28 = vpop.f32.mrb[79].mxu0  ;;  %v12106_v7 = vor.u32 %v12104_v49, %v22724_v27  ;;  %v22765_v30 = vld [vmem:[#allocation2 + $0xf8] ss:$0 sps:$4 sm:$0x11]   ;;  %16612 = vmatpush3.bf16.msra.mxu1 %v17488_v15 }
 0xb54   : > { %v12107_v2 = vrot.slane %v22724_v27, 4  ;;  %v12089_v34 = vor.u32 %v12087_v53, %v22726_v20  ;;  %v12090_v56 = vrot.slane %v22726_v20, 4  ;;  %v12081_v5 = vsel %vm17827_vm5, %v12073_v36, %v12080_v51  ;;  %v12451_v36 = vld [vmem:[#allocation2 + $0xf0] sm:$0xf] }
 0xb55   : > { %v12361_v39 = vsel %vm17845_vm7, %v12082_v47, %v12360_v60  ;;  %v12064_v29 = vsel %vm17827_vm5, %v12056_v13, %v12063_v55  ;;  %v12354_v40 = vsel %vm17845_vm7, %v12065_v4, %v12353_v3  ;;  %12359 = vst.msk [vmem:[#allocation2 + $0x10c] sm:$0xf] %vm199_vm0, %v12081_v5  ;;  %v12371_v19 = vsel %vm17834_vm6, %v12106_v7, %v12370_v17  ;;  %v12367_v60 = vld [vmem:[#allocation2 + $0x11c] sm:$0x1]  ;;  %v17490_v47 = vld [vmem:[%s23695_s3 + $0x40] sm:$0xff]  }
 0xb56   : > { %12362 = vst [vmem:[#allocation2 + $0x110] sm:$0x1] %v12361_v39  ;;  %12352 = vst.msk [vmem:[#allocation2 + $0x100] sm:$0xf] %vm199_vm0, %v12064_v29  ;;  %v12364_v16 = vsel %vm17834_vm6, %v12089_v34, %v12363_v42  ;;  %v15532_v21 = vpack.c.bf16 %v11898_v6, %v11898_v6  ;;  %v15530_v24 = vpack.c.bf16 %v11896_v43, %v11896_v43  ;;  %v11901_v1 = vmax.f32 %v11869_v59, 0.0 }
 0xb57   : > { %12355 = vst [vmem:[#allocation2 + $0x104] sm:$0x1] %v12354_v40  ;;  %12372 = vst [vmem:[#allocation2 + $0x120] sm:$0xf] %v12371_v19  ;;  %v11899_v62 = vmax.f32 %v11867_v22, 0.0  ;;  %v22754_v9 = vcombine.low %v12451_v36, %v22734_v46  ;;  %v11870_v32 = vadd.f32 %v16592_v18, %v22688_v44  ;;  %v11868_v58 = vadd.f32 %v22688_v44, %v11739_v28 }
 0xb58   : > { %12365 = vst [vmem:[#allocation2 + $0x114] sm:$0xf] %v12364_v16  ;;  %v12109_v38 = vshrl.u32 %v15532_v21, 16  ;;  %v12112_v13 = vshll.u32 %v15532_v21, 16  ;;  %v12092_v26 = vshrl.u32 %v15530_v24, 16  ;;  %v12095_v8 = vshll.u32 %v15530_v24, 16  ;;  %16613 = vmatprep.subr.bf16.mxu1 %v17490_v47 }
 0xb59   : > { %v16595_v50 = vpop.f32.mrb[80].mxu0  ;;  %v15535_v48 = vpack.c.bf16 %v11901_v1, %v11901_v1  ;;  %v15533_v31 = vpack.c.bf16 %v11899_v62, %v11899_v62  ;;  %12605 = vrot.lane.b32.xlu0 %v22754_v9, %s17549_s30  ;;  %12570 = vrot.lane.b32.xlu1 %v22754_v9, %s17550_s7  ;;  %v11902_v0 = vmax.f32 %v11870_v32, 0.0  ;;  %v12374_v6 = vld [vmem:[#allocation2 + $0x128] sm:$0x1]  ;;  %v11900_v51 = vmax.f32 %v11868_v58, 0.0 }
 0xb5a   : > { %v11752_v57 = vpop.f32.mrb[81].mxu0  ;;  %v12111_v35 = vrot.slane %v12109_v38, 7  ;;  %v12094_v10 = vrot.slane %v12092_v26, 7  ;;  %v11873_v45 = vadd.f32 %v16595_v50, %v22688_v44  ;;  %v12384_v7 = vld [vmem:[#allocation2 + $0x138] sm:$0xf]  ;;  %16614 = vmatpush3.bf16.msra.mxu1 %v17490_v47  ;;  %v17492_v62 = vld [vmem:[%s23695_s3 + $0x48] sm:$0xff]  }
 0xb5b   : > { %v11871_v33 = vadd.f32 %v22688_v44, %v11752_v57  ;;  %v22769_v41 = vpop.f32.mrb[82].mxu0  ;;  %v12135_v52 = vshrl.u32 %v15535_v48, 16  ;;  %v12138_v49 = vshll.u32 %v15535_v48, 16  ;;  %v12118_v11 = vshrl.u32 %v15533_v31, 16  ;;  %v12377_v34 = vld [vmem:[#allocation2 + $0x12c] sm:$0xf]  ;;  %16615 = vmatprep.subr.bf16.mxu1 %v17492_v62 }
 0xb5c   : > { %v12121_v53 = vshll.u32 %v15533_v31, 16  ;;  %v11755_v25 = vpop.f32.mrb[83].mxu0  ;;  %v12114_v23 = vor.u32 %v12112_v13, %v12111_v35  ;;  %v12116_v12 = vrot.slane %v12111_v35, 4  ;;  %v12097_v43 = vor.u32 %v12095_v8, %v12094_v10  ;;  %v22794_v5 = vld [vmem:[#allocation2 + $0xe8] sm:$0xf] }
 0xb5d   : > { %v12099_v14 = vrot.slane %v12094_v10, 4  ;;  %v22771_v59 = vrot.slane %v12135_v52, 7  ;;  %v22773_v22 = vrot.slane %v12118_v11, 7  ;;  %v15536_v18 = vpack.c.bf16 %v11902_v0, %v11902_v0  ;;  %12833 = vrot.lane.b32.xlu0 %v22765_v30, %s17549_s30  ;;  %12800 = vrot.lane.b32.xlu1 %v22765_v30, %s17550_s7  ;;  %v12449_v39 = vld [vmem:[#allocation2 + $0xe4] sm:$0xf] }
 0xb5e   : > { %v12115_v55 = vsel %vm17827_vm5, %v12107_v2, %v12114_v23  ;;  %v12375_v4 = vsel %vm17845_vm7, %v12116_v12, %v12374_v6  ;;  %v12098_v3 = vsel %vm17827_vm5, %v12090_v56, %v12097_v43  ;;  %v15534_v17 = vpack.c.bf16 %v11900_v51, %v11900_v51  ;;  %v22802_v63 = vld [vmem:[#allocation2 + $0x10c] sm:$0xf]  ;;  %v12455_v8 = vld [vmem:[#allocation2 + $0x108] sm:$0xf]  ;;  %v12388_v48 = vld [vmem:[#allocation2 + $0x140] sm:$0x1]  ;;  %16616 = vmatpush3.bf16.msra.mxu1 %v17492_v62 }
 0xb5f   : > { %v12368_v28 = vsel %vm17845_vm7, %v12099_v14, %v12367_v60  ;;  %12373 = vst.msk [vmem:[#allocation2 + $0x124] sm:$0xf] %vm199_vm0, %v12115_v55  ;;  %12376 = vst [vmem:[#allocation2 + $0x128] sm:$0x1] %v12375_v4  ;;  %v12140_v27 = vor.u32 %v12138_v49, %v22771_v59  ;;  %v12141_v20 = vrot.slane %v22771_v59, 4  ;;  %v12123_v2 = vor.u32 %v12121_v53, %v22773_v22 }
 0xb60   : > { %12366 = vst.msk [vmem:[#allocation2 + $0x118] sm:$0xf] %vm199_vm0, %v12098_v3  ;;  %12369 = vst [vmem:[#allocation2 + $0x11c] sm:$0x1] %v12368_v28  ;;  %v12124_v56 = vrot.slane %v22773_v22, 4  ;;  %v12143_v29 = vshrl.u32 %v15536_v18, 16  ;;  %v22809_v36 = vcombine.low %v12449_v39, %v22794_v5  ;;  %v22819_v0 = vcombine.low %v12455_v8, %v22802_v63 }
 0xb61   : > { %v12146_v40 = vshll.u32 %v15536_v18, 16  ;;  %v11905_v42 = vmax.f32 %v11873_v45, 0.0  ;;  %v16599_v19 = vpop.f32.mrb[84].mxu0  ;;  %v12385_v16 = vsel %vm17834_vm6, %v12140_v27, %v12384_v7  ;;  %v12378_v21 = vsel %vm17834_vm6, %v12123_v2, %v12377_v34  ;;  %v22826_v52 = vld [vmem:[#allocation2 + $0xec] ss:$0 sps:$4 sm:$0x11]  }
 0xb62   : > { %v11903_v24 = vmax.f32 %v11871_v33, 0.0  ;;  %v11768_v1 = vpop.f32.mrb[85].mxu0  ;;  %12386 = vst [vmem:[#allocation2 + $0x138] sm:$0xf] %v12385_v16  ;;  %12379 = vst [vmem:[#allocation2 + $0x12c] sm:$0xf] %v12378_v21  ;;  %12568 = vrot.lane.b32.xlu0 %v22809_v36, %s17550_s7  ;;  %v11874_v58 = vadd.f32 %v22769_v41, %v22688_v44  ;;  %v11872_v57 = vadd.f32 %v22688_v44, %v11755_v25  ;;  %12574 = vrot.lane.b32.xlu1 %v22819_v0, %s17550_s7 }
 0xb63   : > { %v12145_v32 = vrot.slane %v12143_v29, 7  ;;  %v12126_v38 = vshrl.u32 %v15534_v17, 16  ;;  %v12129_v13 = vshll.u32 %v15534_v17, 16  ;;  %v15539_v26 = vpack.c.bf16 %v11905_v42, %v11905_v42  ;;  %v22814_v50 = vpop.f32.mrb[86].mxu0  ;;  %v17493_v41 = vld [vmem:[%s23695_s3 + $0x50] sm:$0xff]  }
 0xb64   : > { %v15537_v31 = vpack.c.bf16 %v11903_v24, %v11903_v24  ;;  %v22824_v15 = vpop.f32.mrb[87].mxu0  ;;  %v11906_v23 = vmax.f32 %v11874_v58, 0.0  ;;  %v12381_v14 = vld [vmem:[#allocation2 + $0x134] sm:$0x1]  ;;  %v11904_v18 = vmax.f32 %v11872_v57, 0.0  ;;  %16617 = vmatprep.subr.bf16.mxu1 %v17493_v41  ;;  %v11877_v3 = vadd.f32 %v16599_v19, %v22688_v44 }
 0xb65   : > { %v12148_v35 = vor.u32 %v12146_v40, %v12145_v32  ;;  %v12150_v10 = vrot.slane %v12145_v32, 4  ;;  %v12128_v45 = vrot.slane %v12126_v38, 7  ;;  %v12169_v33 = vshrl.u32 %v15539_v26, 16  ;;  %v22844_v51 = vld [vmem:[#allocation2 + $0x110] ss:$0 sps:$4 sm:$0x11]   ;;  %16618 = vmatpush3.bf16.msra.mxu1 %v17493_v41 }
 0xb66   : > { %v12172_v49 = vshll.u32 %v15539_v26, 16  ;;  %v12152_v11 = vshrl.u32 %v15537_v31, 16  ;;  %v12155_v53 = vshll.u32 %v15537_v31, 16  ;;  %v15540_v22 = vpack.c.bf16 %v11906_v23, %v11906_v23  ;;  %12798 = vrot.lane.b32.xlu0 %v22826_v52, %s17550_s7  ;;  %v12398_v4 = vld [vmem:[#allocation2 + $0x150] sm:$0xf]  ;;  %12804 = vrot.lane.b32.xlu1 %v22844_v51, %s17550_s7 }
 0xb67   : > { %v12149_v25 = vsel %vm17827_vm5, %v12141_v20, %v12148_v35  ;;  %v12389_v12 = vsel %vm17845_vm7, %v12150_v10, %v12388_v48  ;;  %v12131_v6 = vor.u32 %v12129_v13, %v12128_v45  ;;  %v12133_v43 = vrot.slane %v12128_v45, 4  ;;  %v22852_v7 = vld [vmem:[#allocation2 + $0x100] sm:$0xf]  ;;  %v12391_v39 = vld [vmem:[#allocation2 + $0x144] sm:$0xf]  ;;  %v17494_v13 = vld [vmem:[%s23695_s3 + $0x58] sm:$0xff]  }
 0xb68   : > { %12387 = vst.msk [vmem:[#allocation2 + $0x13c] sm:$0xf] %vm199_vm0, %v12149_v25  ;;  %12390 = vst [vmem:[#allocation2 + $0x140] sm:$0x1] %v12389_v12  ;;  %v22838_v60 = vrot.slane %v12169_v33, 7  ;;  %v22840_v59 = vrot.slane %v12152_v11, 7  ;;  %v11875_v28 = vadd.f32 %v22688_v44, %v11768_v1  ;;  %v15538_v42 = vpack.c.bf16 %v11904_v18, %v11904_v18  ;;  %16619 = vmatprep.subr.bf16.mxu1 %v17494_v13 }
 0xb69   : > { %v12132_v47 = vsel %vm17827_vm5, %v12124_v56, %v12131_v6  ;;  %v12382_v55 = vsel %vm17845_vm7, %v12133_v43, %v12381_v14  ;;  %v16603_v34 = vpop.f32.mrb[88].mxu0  ;;  %v12177_v40 = vshrl.u32 %v15540_v22, 16  ;;  %v12180_v17 = vshll.u32 %v15540_v22, 16  ;;  %v12453_v16 = vld [vmem:[#allocation2 + $0xfc] sm:$0xf]  ;;  %16620 = vmatpush3.bf16.msra.mxu1 %v17494_v13 }
 0xb6a   : > { %12380 = vst.msk [vmem:[#allocation2 + $0x130] sm:$0xf] %vm199_vm0, %v12132_v47  ;;  %12383 = vst [vmem:[#allocation2 + $0x134] sm:$0x1] %v12382_v55  ;;  %v12174_v27 = vor.u32 %v12172_v49, %v22838_v60  ;;  %v12175_v20 = vrot.slane %v22838_v60, 4  ;;  %v12157_v2 = vor.u32 %v12155_v53, %v22840_v59  ;;  %v12158_v56 = vrot.slane %v22840_v59, 4  ;;  %12609 = vrot.lane.b32.xlu0 %v22819_v0, %s17549_s30 }
 0xb6b   : > { %v11784_v29 = vpop.f32.mrb[89].mxu0  ;;  %v11909_v19 = vmax.f32 %v11877_v3, 0.0  ;;  %v11907_v62 = vmax.f32 %v11875_v28, 0.0  ;;  %v22870_v32 = vcombine.low %v12453_v16, %v22852_v7  ;;  %v12179_v26 = vrot.slane %v12177_v40, 7  ;;  %v12402_v58 = vld [vmem:[#allocation2 + $0x158] sm:$0x1] }
 0xb6c   : > { %v22861_v21 = vpop.f32.mrb[90].mxu0  ;;  %v12399_v24 = vsel %vm17834_vm6, %v12174_v27, %v12398_v4  ;;  %v12392_v1 = vsel %vm17834_vm6, %v12157_v2, %v12391_v39  ;;  %v12160_v8 = vshrl.u32 %v15538_v42, 16  ;;  %v12163_v48 = vshll.u32 %v15538_v42, 16  ;;  %v22884_v23 = vld [vmem:[#allocation2 + $0x104] ss:$0 sps:$4 sm:$0x11]  }
 0xb6d   : > { %v22872_v38 = vpop.f32.mrb[91].mxu0  ;;  %12400 = vst [vmem:[#allocation2 + $0x150] sm:$0xf] %v12399_v24  ;;  %12393 = vst [vmem:[#allocation2 + $0x144] sm:$0xf] %v12392_v1  ;;  %v15543_v31 = vpack.c.bf16 %v11909_v19, %v11909_v19  ;;  %v15541_v57 = vpack.c.bf16 %v11907_v62, %v11907_v62  ;;  %12607 = vrot.lane.b32.xlu1 %v22870_v32, %s17549_s30  ;;  %v11878_v35 = vadd.f32 %v22814_v50, %v22688_v44 }
 0xb6e   : > { %v11876_v10 = vadd.f32 %v22688_v44, %v22824_v15  ;;  %v11881_v45 = vadd.f32 %v16603_v34, %v22688_v44  ;;  %v12182_v33 = vor.u32 %v12180_v17, %v12179_v26  ;;  %v12184_v49 = vrot.slane %v12179_v26, 4  ;;  %12837 = vrot.lane.b32.xlu0 %v22844_v51, %s17549_s30  ;;  %v12395_v59 = vld [vmem:[#allocation2 + $0x14c] sm:$0x1]  ;;  %v12412_v17 = vld [vmem:[#allocation2 + $0x168] sm:$0xf] }
 0xb6f   : > { %v12162_v11 = vrot.slane %v12160_v8, 7  ;;  %v12203_v53 = vshrl.u32 %v15543_v31, 16  ;;  %v12206_v41 = vshll.u32 %v15543_v31, 16  ;;  %v12186_v25 = vshrl.u32 %v15541_v57, 16  ;;  %v12459_v62 = vld [vmem:[#allocation2 + $0x120] sm:$0xf] }
 0xb70   : > { %v12189_v12 = vshll.u32 %v15541_v57, 16  ;;  %v11910_v6 = vmax.f32 %v11878_v35, 0.0  ;;  %v12183_v50 = vsel %vm17827_vm5, %v12175_v20, %v12182_v33  ;;  %v12403_v15 = vsel %vm17845_vm7, %v12184_v49, %v12402_v58  ;;  %v22892_v60 = vpop.f32.mrb[92].mxu0  ;;  %v22906_v20 = vld [vmem:[#allocation2 + $0x124] sm:$0xf] }
 0xb71   : > { %v12165_v43 = vor.u32 %v12163_v48, %v12162_v11  ;;  %v12167_v14 = vrot.slane %v12162_v11, 4  ;;  %12401 = vst.msk [vmem:[#allocation2 + $0x154] sm:$0xf] %vm199_vm0, %v12183_v50  ;;  %12404 = vst [vmem:[#allocation2 + $0x158] sm:$0x1] %v12403_v15  ;;  %v12205_v22 = vrot.slane %v12203_v53, 7  ;;  %12835 = vrot.lane.b32.xlu1 %v22884_v23, %s17549_s30  ;;  %v11879_v27 = vadd.f32 %v22688_v44, %v11784_v29 }
 0xb72   : > { %v22895_v18 = vrot.slane %v12186_v25, 7  ;;  %v15544_v47 = vpack.c.bf16 %v11910_v6, %v11910_v6  ;;  %v11908_v55 = vmax.f32 %v11876_v10, 0.0  ;;  %v22899_v4 = vpop.f32.mrb[93].mxu0  ;;  %v11913_v34 = vmax.f32 %v11881_v45, 0.0  ;;  %12572 = vrot.lane.b32.xlu0 %v22870_v32, %s17550_s7  ;;  %v12405_v29 = vld [vmem:[#allocation2 + $0x15c] sm:$0xf] }
 0xb73   : > { %v12166_v3 = vsel %vm17827_vm5, %v12158_v56, %v12165_v43  ;;  %v12396_v28 = vsel %vm17845_vm7, %v12167_v14, %v12395_v59  ;;  %v22908_v2 = vpop.f32.mrb[94].mxu0  ;;  %v12208_v39 = vor.u32 %v12206_v41, %v12205_v22  ;;  %v12209_v40 = vrot.slane %v12205_v22, 4  ;;  %v12416_v10 = vld [vmem:[#allocation2 + $0x170] sm:$0x1] }
 0xb74   : > { %12394 = vst.msk [vmem:[#allocation2 + $0x148] sm:$0xf] %vm199_vm0, %v12166_v3  ;;  %12397 = vst [vmem:[#allocation2 + $0x14c] sm:$0x1] %v12396_v28  ;;  %v12191_v42 = vor.u32 %v12189_v12, %v22895_v18  ;;  %v22914_v56 = vpop.f32.mrb[95].mxu0  ;;  %v12192_v19 = vrot.slane %v22895_v18, 4  ;;  %v15542_v24 = vpack.c.bf16 %v11908_v55, %v11908_v55  ;;  %v15547_v1 = vpack.c.bf16 %v11913_v34, %v11913_v34 }
 0xb75   : > { %v12211_v16 = vshrl.u32 %v15544_v47, 16  ;;  %v12413_v13 = vsel %vm17834_vm6, %v12208_v39, %v12412_v17  ;;  %v11911_v8 = vmax.f32 %v11879_v27, 0.0  ;;  %v22922_v48 = vcombine.low %v12459_v62, %v22906_v20  ;;  %v22932_v6 = vld [vmem:[#allocation2 + $0x128] ss:$0 sps:$4 sm:$0x11]  }
 0xb76   : > { %v12406_v26 = vsel %vm17834_vm6, %v12191_v42, %v12405_v29  ;;  %12414 = vst [vmem:[#allocation2 + $0x168] sm:$0xf] %v12413_v13  ;;  %v12214_v58 = vshll.u32 %v15544_v47, 16  ;;  %v12194_v57 = vshrl.u32 %v15542_v24, 16  ;;  %v12237_v35 = vshrl.u32 %v15547_v1, 16  ;;  %12802 = vrot.lane.b32.xlu0 %v22884_v23, %s17550_s7 }
 0xb77   : > { %12407 = vst [vmem:[#allocation2 + $0x15c] sm:$0xf] %v12406_v26  ;;  %v12213_v31 = vrot.slane %v12211_v16, 7  ;;  %v12197_v45 = vshll.u32 %v15542_v24, 16  ;;  %v15545_v33 = vpack.c.bf16 %v11911_v8, %v11911_v8  ;;  %12578 = vrot.lane.b32.xlu1 %v22922_v48, %s17550_s7  ;;  %v11882_v49 = vadd.f32 %v22861_v21, %v22688_v44  ;;  %v12409_v18 = vld [vmem:[#allocation2 + $0x164] sm:$0x1] }
 0xb78   : > { %v11880_v11 = vadd.f32 %v22688_v44, %v22872_v38  ;;  %v12196_v25 = vrot.slane %v12194_v57, 7  ;;  %v12239_v12 = vrot.slane %v12237_v35, 7  ;;  %v12240_v50 = vshll.u32 %v15547_v1, 16  ;;  %v12426_v39 = vld [vmem:[#allocation2 + $0x180] sm:$0xf] }
 0xb79   : > { %v12216_v53 = vor.u32 %v12214_v58, %v12213_v31  ;;  %v12218_v41 = vrot.slane %v12213_v31, 4  ;;  %v12220_v15 = vshrl.u32 %v15545_v33, 16  ;;  %v11914_v43 = vmax.f32 %v11882_v49, 0.0  ;;  %v22949_v42 = vld [vmem:[#allocation2 + $0x118] sm:$0xf] }
 0xb7a   : > { %v11912_v14 = vmax.f32 %v11880_v11, 0.0  ;;  %v12199_v38 = vor.u32 %v12197_v45, %v12196_v25  ;;  %v12201_v22 = vrot.slane %v12196_v25, 4  ;;  %v12242_v47 = vor.u32 %v12240_v50, %v12239_v12  ;;  %12613 = vrot.lane.b32.xlu0 %v22922_v48, %s17549_s30  ;;  %v12419_v1 = vld [vmem:[#allocation2 + $0x174] sm:$0xf]  ;;  %v12430_v25 = vld [vmem:[#allocation2 + $0x188] sm:$0x1] }
 0xb7b   : > { %v12217_v59 = vsel %vm17827_vm5, %v12209_v40, %v12216_v53  ;;  %v12417_v21 = vsel %vm17845_vm7, %v12218_v41, %v12416_v10  ;;  %v12222_v55 = vrot.slane %v12220_v15, 7  ;;  %v12223_v3 = vshll.u32 %v15545_v33, 16  ;;  %12808 = vrot.lane.b32.xlu1 %v22932_v6, %s17550_s7  ;;  %v12457_v31 = vld [vmem:[#allocation2 + $0x114] sm:$0xf]  ;;  %v12423_v15 = vld [vmem:[#allocation2 + $0x17c] sm:$0x1] }
 0xb7c   : > { %12415 = vst.msk [vmem:[#allocation2 + $0x16c] sm:$0xf] %vm199_vm0, %v12217_v59  ;;  %12418 = vst [vmem:[#allocation2 + $0x170] sm:$0x1] %v12417_v21  ;;  %v15548_v28 = vpack.c.bf16 %v11914_v43, %v11914_v43  ;;  %v12200_v34 = vsel %vm17827_vm5, %v12192_v19, %v12199_v38  ;;  %v12410_v27 = vsel %vm17845_vm7, %v12201_v22, %v12409_v18  ;;  %v12243_v29 = vrot.slane %v12239_v12, 4 }
 0xb7d   : > { %v15546_v40 = vpack.c.bf16 %v11912_v14, %v11912_v14  ;;  %v11885_v17 = vadd.f32 %v22892_v60, %v22688_v44  ;;  %12408 = vst.msk [vmem:[#allocation2 + $0x160] sm:$0xf] %vm199_vm0, %v12200_v34  ;;  %12411 = vst [vmem:[#allocation2 + $0x164] sm:$0x1] %v12410_v27  ;;  %v12427_v16 = vsel %vm17834_vm6, %v12242_v47, %v12426_v39  ;;  %v12226_v11 = vrot.slane %v12222_v55, 4 }
 0xb7e   : > { %v12225_v24 = vor.u32 %v12223_v3, %v12222_v55  ;;  %v12245_v19 = vshrl.u32 %v15548_v28, 16  ;;  %12428 = vst [vmem:[#allocation2 + $0x180] sm:$0xf] %v12427_v16  ;;  %v12248_v62 = vshll.u32 %v15548_v28, 16  ;;  %v11883_v57 = vadd.f32 %v22688_v44, %v22899_v4  ;;  %12841 = vrot.lane.b32.xlu0 %v22932_v6, %s17549_s30  ;;  %v22982_v55 = vld [vmem:[#allocation2 + $0x13c] sm:$0xf] }
 0xb7f   : > { %v12228_v13 = vshrl.u32 %v15546_v40, 16  ;;  %v12231_v26 = vshll.u32 %v15546_v40, 16  ;;  %v11917_v8 = vmax.f32 %v11885_v17, 0.0  ;;  %v22959_v35 = vcombine.low %v12457_v31, %v22949_v42  ;;  %v22973_v21 = vld [vmem:[#allocation2 + $0x11c] ss:$0 sps:$4 sm:$0x11]  }
 0xb80   : > { %v12420_v60 = vsel %vm17834_vm6, %v12225_v24, %v12419_v1  ;;  %v12247_v58 = vrot.slane %v12245_v19, 7  ;;  %v11886_v33 = vadd.f32 %v22908_v2, %v22688_v44  ;;  %v11884_v49 = vadd.f32 %v22688_v44, %v22914_v56  ;;  %v12463_v39 = vld [vmem:[#allocation2 + $0x138] sm:$0xf]  ;;  %v23027_v54 = vld [vmem:[#allocation2 + $0x154] sm:$0xf] }
 0xb81   : > { %12421 = vst [vmem:[#allocation2 + $0x174] sm:$0xf] %v12420_v60  ;;  %v12230_v10 = vrot.slane %v12228_v13, 7  ;;  %v15551_v45 = vpack.c.bf16 %v11917_v8, %v11917_v8  ;;  %v11915_v4 = vmax.f32 %v11883_v57, 0.0  ;;  %12611 = vrot.lane.b32.xlu1 %v22959_v35, %s17549_s30  ;;  %v12440_v40 = vld [vmem:[#allocation2 + $0x198] sm:$0xf]  ;;  %v22988_v24 = vcombine.low %v12463_v39, %v22982_v55 }
 0xb82   : > { %v12250_v53 = vor.u32 %v12248_v62, %v12247_v58  ;;  %v12252_v41 = vrot.slane %v12247_v58, 4  ;;  %v11918_v56 = vmax.f32 %v11886_v33, 0.0  ;;  %12576 = vrot.lane.b32.xlu0 %v22959_v35, %s17550_s7  ;;  %v11916_v47 = vmax.f32 %v11884_v49, 0.0  ;;  %v12433_v13 = vld [vmem:[#allocation2 + $0x18c] sm:$0xf] }
 0xb83   : > { %v12233_v12 = vor.u32 %v12231_v26, %v12230_v10  ;;  %v12235_v50 = vrot.slane %v12230_v10, 4  ;;  %v12271_v43 = vshrl.u32 %v15551_v45, 16  ;;  %v12274_v14 = vshll.u32 %v15551_v45, 16  ;;  %v22996_v58 = vld [vmem:[#allocation2 + $0x140] ss:$0 sps:$4 sm:$0x11]  }
 0xb84   : > { %v12251_v59 = vsel %vm17827_vm5, %v12243_v29, %v12250_v53  ;;  %v12431_v2 = vsel %vm17845_vm7, %v12252_v41, %v12430_v25  ;;  %v15549_v44 = vpack.c.bf16 %v11915_v4, %v11915_v4  ;;  %v15552_v28 = vpack.c.bf16 %v11918_v56, %v11918_v56  ;;  %v23002_v25 = vld [vmem:[#allocation2 + $0x130] sm:$0xf]  ;;  %v23042_v56 = vld [vmem:[#allocation2 + $0x148] sm:$0xf]  ;;  %v23078_v39 = vld [vmem:[#allocation2 + $0x160] sm:$0xf] }
 0xb85   : > { %12429 = vst.msk [vmem:[#allocation2 + $0x184] sm:$0xf] %vm199_vm0, %v12251_v59  ;;  %12432 = vst [vmem:[#allocation2 + $0x188] sm:$0x1] %v12431_v2  ;;  %v12234_v38 = vsel %vm17827_vm5, %v12226_v11, %v12233_v12  ;;  %v12424_v22 = vsel %vm17845_vm7, %v12235_v50, %v12423_v15  ;;  %v12273_v18 = vrot.slane %v12271_v43, 7  ;;  %12839 = vrot.lane.b32.xlu1 %v22973_v21, %s17549_s30 }
 0xb86   : > { %12422 = vst.msk [vmem:[#allocation2 + $0x178] sm:$0xf] %vm199_vm0, %v12234_v38  ;;  %12425 = vst [vmem:[#allocation2 + $0x17c] sm:$0x1] %v12424_v22  ;;  %v12254_v3 = vshrl.u32 %v15549_v44, 16  ;;  %v15550_v27 = vpack.c.bf16 %v11916_v47, %v11916_v47  ;;  %v12257_v29 = vshll.u32 %v15549_v44, 16  ;;  %12806 = vrot.lane.b32.xlu0 %v22973_v21, %s17550_s7 }
 0xb87   : > { %v12276_v34 = vor.u32 %v12274_v14, %v12273_v18  ;;  %v12279_v16 = vshrl.u32 %v15552_v28, 16  ;;  %v12282_v8 = vshll.u32 %v15552_v28, 16  ;;  %v12277_v57 = vrot.slane %v12273_v18, 4  ;;  %v12444_v11 = vld [vmem:[#allocation2 + $0x1a0] sm:$0x1] }
 0xb88   : > { %v12256_v17 = vrot.slane %v12254_v3, 7  ;;  %v12262_v19 = vshrl.u32 %v15550_v27, 16  ;;  %v12265_v60 = vshll.u32 %v15550_v27, 16  ;;  %v12461_v43 = vld [vmem:[#allocation2 + $0x12c] sm:$0xf]  ;;  %v23049_v22 = vld [vmem:[%s23695_s3] sm:$0xff]  }
 0xb89   : > { %v12441_v1 = vsel %vm17834_vm6, %v12276_v34, %v12440_v40  ;;  %v12281_v26 = vrot.slane %v12279_v16, 7  ;;  %12582 = vrot.lane.b32.xlu1 %v22988_v24, %s17550_s7  ;;  %v23017_v14 = vcombine.low %v12461_v43, %v23002_v25  ;;  %v23023_v59 = vld [vmem:[#allocation2 + $0x134] ss:$0 sps:$4 sm:$0x11]   ;;  %v12467_v37 = vld [vmem:[#allocation2 + $0x150] sm:$0xf]  ;;  %16653 = vmatprep.subr.bf16.mxu1 %v23049_v22 }
 0xb8a   : > { %12442 = vst [vmem:[#allocation2 + $0x198] sm:$0xf] %v12441_v1  ;;  %v12259_v62 = vor.u32 %v12257_v29, %v12256_v17  ;;  %v12264_v31 = vrot.slane %v12262_v19, 7  ;;  %12617 = vrot.lane.b32.xlu0 %v22988_v24, %s17549_s30  ;;  %v12260_v49 = vrot.slane %v12256_v17, 4  ;;  %v23032_v2 = vcombine.low %v12467_v37, %v23027_v54  ;;  %v12465_v38 = vld [vmem:[#allocation2 + $0x144] sm:$0xf] }
 0xb8b   : > { %v12284_v45 = vor.u32 %v12282_v8, %v12281_v26  ;;  %v12286_v33 = vrot.slane %v12281_v26, 4  ;;  %v23038_v44 = vld [vmem:[#allocation2 + $0x158] ss:$0 sps:$4 sm:$0x11]   ;;  %v23052_v18 = vcombine.low %v12465_v38, %v23042_v56  ;;  %v23063_v3 = vld [vmem:[#allocation2 + $0x16c] sm:$0xf] }
 0xb8c   : > { %v12434_v10 = vsel %vm17834_vm6, %v12259_v62, %v12433_v13  ;;  %v12267_v53 = vor.u32 %v12265_v60, %v12264_v31  ;;  %v12269_v41 = vrot.slane %v12264_v31, 4  ;;  %v23059_v47 = vld [vmem:[#allocation2 + $0x14c] ss:$0 sps:$4 sm:$0x11]   ;;  %v12471_v28 = vld [vmem:[#allocation2 + $0x168] sm:$0xf] }
 0xb8d   : > { %12435 = vst [vmem:[#allocation2 + $0x18c] sm:$0xf] %v12434_v10  ;;  %v12285_v4 = vsel %vm17827_vm5, %v12277_v57, %v12284_v45  ;;  %v12445_v12 = vsel %vm17845_vm7, %v12286_v33, %v12444_v11  ;;  %12812 = vrot.lane.b32.xlu1 %v22996_v58, %s17550_s7  ;;  %v23068_v34 = vcombine.low %v12471_v28, %v23063_v3  ;;  %v23074_v27 = vld [vmem:[#allocation2 + $0x170] ss:$0 sps:$4 sm:$0x11]   ;;  %v23127_v57 = vpop.permute.xlu1 %12635 }
 0xb8e   : > { %12443 = vst.msk [vmem:[#allocation2 + $0x19c] sm:$0xf] %vm199_vm0, %v12285_v4  ;;  %12446 = vst [vmem:[#allocation2 + $0x1a0] sm:$0x1] %v12445_v12  ;;  %v12268_v50 = vsel %vm17827_vm5, %v12260_v49, %v12267_v53  ;;  %v12438_v15 = vsel %vm17845_vm7, %v12269_v41, %v12437_v61  ;;  %12845 = vrot.lane.b32.xlu0 %v22996_v58, %s17549_s30  ;;  %v12469_v40 = vld [vmem:[#allocation2 + $0x15c] sm:$0xf] }
 0xb8f   : > { %12436 = vst.msk [vmem:[#allocation2 + $0x190] sm:$0xf] %vm199_vm0, %v12268_v50  ;;  %12439 = vst [vmem:[#allocation2 + $0x194] sm:$0x1] %v12438_v15  ;;  %v23083_v17 = vcombine.low %v12469_v40, %v23078_v39  ;;  %v23093_v16 = vld [vmem:[#allocation2 + $0x184] sm:$0xf] }
 0xb90   : > { %v23089_v29 = vld [vmem:[#allocation2 + $0x164] ss:$0 sps:$4 sm:$0x11]   ;;  %v12475_v1 = vld [vmem:[#allocation2 + $0x180] sm:$0xf] }
 0xb91   : > { %12615 = vrot.lane.b32.xlu1 %v23017_v14, %s17549_s30  ;;  %v23098_v19 = vcombine.low %v12475_v1, %v23093_v16  ;;  %v23104_v62 = vld [vmem:[#allocation2 + $0x188] ss:$0 sps:$4 sm:$0x11]   ;;  %v23108_v13 = vld [vmem:[#allocation2 + $0x178] sm:$0xf] }
 0xb92   : > { %12580 = vrot.lane.b32.xlu0 %v23017_v14, %s17550_s7  ;;  %23824 = vst [vmem:[#allocation6_spill] sm:$0xff] %v23104_v62  ;;  %v12473_v26 = vld [vmem:[#allocation2 + $0x174] sm:$0xf]  ;;  %v23119_v31 = vld [vmem:[#allocation2 + $0x17c] ss:$0 sps:$4 sm:$0x11]  }
 0xb93   : > { %v23113_v8 = vcombine.low %v12473_v26, %v23108_v13  ;;  %v12479_v10 = vld [vmem:[#allocation2 + $0x198] sm:$0xf]  ;;  %v23145_v50 = vld [vmem:[#allocation2 + $0xdc] sm:$0xf] }
 0xb94   : > { %v12477_v49 = vld [vmem:[#allocation2 + $0x18c] sm:$0xf]  ;;  %v12447_v4 = vld [vmem:[#allocation2 + $0xd8] sm:$0xf]  ;;  %23826 = vst [vmem:[#allocation8_spill] sm:$0xff] %v23145_v50 }
 0xb95   : > { %12843 = vrot.lane.b32.xlu1 %v23023_v59, %s17549_s30  ;;  %v23123_v60 = vld [vmem:[#allocation2 + $0x19c] sm:$0xf]  ;;  %v15245_v43 = vcombine.low %v12447_v4, %v23145_v50  ;;  %v17485_v37 = vld [vmem:[#allocation2 + $0x1a0] ss:$0 sps:$4 sm:$0x11]  }
 0xb96   : > { %12810 = vrot.lane.b32.xlu0 %v23023_v59, %s17550_s7  ;;  %v15261_v45 = vcombine.low %v12479_v10, %v23123_v60  ;;  %v23132_v33 = vld [vmem:[#allocation2 + $0x190] sm:$0xf]  ;;  %v23141_v12 = vld [vmem:[#allocation2 + $0x194] ss:$0 sps:$4 sm:$0x11]  }
 0xb97   : > { %v23136_v11 = vcombine.low %v12477_v49, %v23132_v33  ;;  %23825 = vst [vmem:[#allocation7_spill] sm:$0xff] %v23141_v12  ;;  %v17487_v38 = vld [vmem:[#allocation2 + $0x1ac] ss:$0 sps:$4 sm:$0x11]   ;;  %v13593_v49 = vld [vmem:[#allocation2 + $0xe4] sm:$0xe] }
 0xb98   : > { %v17491_v1 = vld [vmem:[#allocation2 + $0xe0] ss:$0 sps:$4 sm:$0x11]   ;;  %v23163_v50 = vcombine.low %v13593_v49, %v22794_v5 }
 0xb99   : > { %12586 = vrot.lane.b32.xlu1 %v23032_v2, %s17550_s7 }
 0xb9a   : > { %12621 = vrot.lane.b32.xlu0 %v23032_v2, %s17549_s30 }
 0xb9d   : > { %12816 = vrot.lane.b32.xlu1 %v23038_v44, %s17550_s7 }
 0xb9e   : > { %12849 = vrot.lane.b32.xlu0 %v23038_v44, %s17549_s30 }
 0xba1   : > { %12619 = vrot.lane.b32.xlu1 %v23052_v18, %s17549_s30 }
 0xba2   : > { %12584 = vrot.lane.b32.xlu0 %v23052_v18, %s17550_s7 }
 0xba5   : > { %12847 = vrot.lane.b32.xlu1 %v23059_v47, %s17549_s30 }
 0xba6   : > { %12814 = vrot.lane.b32.xlu0 %v23059_v47, %s17550_s7 }
 0xba9   : > { %12590 = vrot.lane.b32.xlu1 %v23068_v34, %s17550_s7 }
 0xbaa   : > { %12625 = vrot.lane.b32.xlu0 %v23068_v34, %s17549_s30 }
 0xbad   : > { %12820 = vrot.lane.b32.xlu1 %v23074_v27, %s17550_s7 }
 0xbae   : > { %12853 = vrot.lane.b32.xlu0 %v23074_v27, %s17549_s30 }
 0xbb1   : > { %12623 = vrot.lane.b32.xlu1 %v23083_v17, %s17549_s30 }
 0xbb2   : > { %12588 = vrot.lane.b32.xlu0 %v23083_v17, %s17550_s7 }
 0xbb5   : > { %12851 = vrot.lane.b32.xlu1 %v23089_v29, %s17549_s30 }
 0xbb6   : > { %12818 = vrot.lane.b32.xlu0 %v23089_v29, %s17550_s7 }
 0xbb9   : > { %12594 = vrot.lane.b32.xlu1 %v23098_v19, %s17550_s7 }
 0xbba   : > { %12629 = vrot.lane.b32.xlu0 %v23098_v19, %s17549_s30 }
 0xbbd   : > { %12824 = vrot.lane.b32.xlu1 %v23104_v62, %s17550_s7 }
 0xbbe   : > { %12857 = vrot.lane.b32.xlu0 %v23104_v62, %s17549_s30  ;;  %v13594_v62 = vld [vmem:[#allocation2 + $0xf0] sm:$0xe] }
 0xbc1   : > { %12627 = vrot.lane.b32.xlu1 %v23113_v8, %s17549_s30 }
 0xbc2   : > { %12592 = vrot.lane.b32.xlu0 %v23113_v8, %s17550_s7 }
 0xbc5   : > { %12855 = vrot.lane.b32.xlu1 %v23119_v31, %s17549_s30 }
 0xbc6   : > { %12822 = vrot.lane.b32.xlu0 %v23119_v31, %s17550_s7 }
 0xbc9   : > { %12598 = vrot.lane.b32.xlu1 %v15261_v45, %s17550_s7 }
 0xbca   : > { %12633 = vrot.lane.b32.xlu0 %v15261_v45, %s17549_s30 }
 0xbcb   : > { %v12571_v53 = vpop.permute.xlu1 %12570  ;;  %v12606_v41 = vpop.permute.xlu0 %12605 }
 0xbcd   : > { %12631 = vrot.lane.b32.xlu1 %v23136_v11, %s17549_s30 }
 0xbce   : > { %12596 = vrot.lane.b32.xlu0 %v23136_v11, %s17550_s7 }
 0xbcf   : > { %v12834_v61 = vpop.permute.xlu0 %12833  ;;  %v12801_v15 = vpop.permute.xlu1 %12800 }
 0xbd1   : > { %12859 = vrot.lane.b32.xlu1 %v23141_v12, %s17549_s30 }
 0xbd2   : > { %12826 = vrot.lane.b32.xlu0 %v23141_v12, %s17550_s7 }
 0xbd4   : > { %v12569_v28 = vpop.permute.xlu0 %12568  ;;  %v23154_v26 = vpop.permute.xlu1 %12574 }
 0xbd5   : > { %12828 = vrot.lane.b32.xlu1 %v17485_v37, %s17550_s7  ;;  %v12639_v40 = vsel %vm972_vm8, %v15245_v43, %v12569_v28  ;;  %v23167_v28 = vcombine.low %v13594_v62, %v22734_v46  ;;  %v12642_v62 = vsel %vm972_vm8, %v22809_v36, %v12571_v53  ;;  %v13596_v53 = vld [vmem:[#allocation2 + $0x108] sm:$0xe] }
 0xbd6   : > { %v23157_v10 = vsel %vm1021_vm9, %v12639_v40, %v12606_v41  ;;  %12861 = vrot.lane.b32.xlu0 %v17485_v37, %s17549_s30 }
 0xbd7   : > { %v12947_v45 = vshll.u32 %v23157_v10, 16 }
 0xbd8   : > { %v12799_v4 = vpop.permute.xlu0 %12798  ;;  %v23169_v41 = vpop.permute.xlu1 %12804 }
 0xbd9   : > { %12863 = vrot.lane.b32.xlu1 %v17487_v38, %s17549_s30  ;;  %v12949_v12 = vrot.slane %v12947_v45, 1  ;;  %v12867_v43 = vsel %vm972_vm8, %v17491_v1, %v12799_v4  ;;  %v12945_v38 = vshrl.u32 %v23157_v10, 16  ;;  %v13595_v45 = vld [vmem:[#allocation2 + $0xfc] sm:$0xe] }
 0xbda   : > { %v23172_v37 = vsel %vm1021_vm9, %v12867_v43, %v12834_v61  ;;  %13661 = vrot.lane.b32.xlu0 %v23163_v50, %s17550_s7  ;;  %v23183_v61 = vcombine.low %v13595_v45, %v22852_v7  ;;  %v12870_v7 = vsel %vm972_vm8, %v22826_v52, %v12801_v15  ;;  %v13597_v52 = vld [vmem:[#allocation2 + $0x114] sm:$0xe] }
 0xbdb   : > { %v12951_v5 = vshll.u32 %v23172_v37, 16  ;;  %v12950_v46 = vor.u32 %v12949_v12, %v12945_v38 }
 0xbdc   : > { %v12610_v40 = vpop.permute.xlu0 %12609  ;;  %23827 = vst [vmem:[#allocation9_spill] sm:$0xff] %v23183_v61 }
 0xbdd   : > { %13663 = vrot.lane.b32.xlu1 %v23167_v28, %s17550_s7  ;;  %v12953_v1 = vrot.slane %v12951_v5, 1  ;;  %v23198_v5 = vcombine.low %v13596_v53, %v22802_v63 }
 0xbde   : > { %13696 = vrot.lane.b32.xlu0 %v23167_v28, %s17549_s30 }
 0xbdf   : > { %v12608_v49 = vpop.permute.xlu1 %12607  ;;  %v12954_v43 = vsel %vm1282_vm10, %v12950_v46, %v12953_v1 }
 0xbe0   : > { %v23188_v4 = vsel %vm1021_vm9, %v12642_v62, %v12608_v49  ;;  %16621 = vmatprep.mubr.msk.bf16.mxu1 %vm1492_vm11, %v12954_v43  ;;  %v12838_v36 = vpop.permute.xlu0 %12837 }
 0xbe1   : > { %13698 = vrot.lane.b32.xlu1 %v23183_v61, %s17549_s30  ;;  %v12957_v12 = vshll.u32 %v23188_v4, 16  ;;  %v12955_v46 = vshrl.u32 %v23188_v4, 16 }
 0xbe2   : > { %13665 = vrot.lane.b32.xlu0 %v23183_v61, %s17550_s7 }
 0xbe3   : > { %v12959_v38 = vrot.slane %v12957_v12, 1  ;;  %v12836_v45 = vpop.permute.xlu1 %12835  ;;  %v23212_v12 = vcombine.low %v13597_v52, %v22949_v42 }
 0xbe4   : > { %v23203_v1 = vsel %vm1021_vm9, %v12870_v7, %v12836_v45  ;;  %v12573_v49 = vpop.permute.xlu0 %12572  ;;  %v17506_v45 = vld [vmem:[%s23695_s3 + $0x8] sm:$0xff]  }
 0xbe5   : > { %13667 = vrot.lane.b32.xlu1 %v23198_v5, %s17550_s7  ;;  %v12961_v62 = vshll.u32 %v23203_v1, 16  ;;  %v12645_v63 = vsel %vm972_vm8, %v22754_v9, %v12573_v49  ;;  %v12960_v15 = vor.u32 %v12959_v38, %v12955_v46 }
 0xbe6   : > { %v23215_v53 = vsel %vm1021_vm9, %v12645_v63, %v12610_v40  ;;  %13700 = vrot.lane.b32.xlu0 %v23198_v5, %s17549_s30  ;;  %v13598_v40 = vld [vmem:[#allocation2 + $0x120] sm:$0xe] }
 0xbe7   : > { %v12963_v43 = vrot.slane %v12961_v62, 1  ;;  %v12967_v7 = vshll.u32 %v23215_v53, 16  ;;  %v23232_v62 = vcombine.low %v13598_v40, %v22906_v20  ;;  %v12965_v52 = vshrl.u32 %v23215_v53, 16  ;;  %v13600_v40 = vld [vmem:[#allocation2 + $0x138] sm:$0xe] }
 0xbe8   : > { %v12803_v42 = vpop.permute.xlu0 %12802 }
 0xbe9   : > { %v12964_v61 = vsel %vm1282_vm10, %v12960_v15, %v12963_v43  ;;  %13702 = vrot.lane.b32.xlu1 %v23212_v12, %s17549_s30  ;;  %v23226_v9 = vpop.permute.xlu1 %12578  ;;  %v12969_v38 = vrot.slane %v12967_v7, 1  ;;  %v12873_v46 = vsel %vm972_vm8, %v22765_v30, %v12803_v42  ;;  %v17507_v30 = vld [vmem:[%s23695_s3 + $0x10] sm:$0xff]   ;;  %v13599_v15 = vld [vmem:[#allocation2 + $0x12c] sm:$0xe]  ;;  %v17508_v42 = vld [vmem:[%s23695_s3 + $0x18] sm:$0xff]  }
 0xbea   : > { %16622 = vmatmul.mubr.msk.bf16.vlgmr.msra.gmra.mrb[64].mxu1 %vm1492_vm11, %v12964_v61  ;;  %v23235_v49 = vsel %vm1021_vm9, %v12873_v46, %v12838_v36  ;;  %13669 = vrot.lane.b32.xlu0 %v23212_v12, %s17550_s7 }
 0xbeb   : > { %16654 = vmatpush3.bf16.msra.mxu1 %v23049_v22  ;;  %v12971_v63 = vshll.u32 %v23235_v49, 16  ;;  %v12970_v43 = vor.u32 %v12969_v38, %v12965_v52  ;;  %v23250_v22 = vcombine.low %v13599_v15, %v23002_v25  ;;  %v12648_v25 = vsel %vm972_vm8, %v22870_v32, %v23154_v26 }
 0xbec   : > { %16655 = vmatprep.subr.bf16.mxu1 %v17506_v45  ;;  %v12614_v61 = vpop.permute.xlu0 %12613 }
 0xbed   : > { %13671 = vrot.lane.b32.xlu1 %v23232_v62, %s17550_s7  ;;  %v23247_v20 = vpop.permute.xlu1 %12808  ;;  %v12973_v36 = vrot.slane %v12971_v63, 1  ;;  %v17509_v63 = vld [vmem:[%s23695_s3 + $0x20] sm:$0xff]  }
 0xbee   : > { %13704 = vrot.lane.b32.xlu0 %v23232_v62, %s17549_s30 }
 0xbef   : > { %16656 = vmatpush3.bf16.msra.mxu1 %v17506_v45  ;;  %v12974_v7 = vsel %vm1282_vm10, %v12970_v43, %v12973_v36  ;;  %v23265_v45 = vcombine.low %v13600_v40, %v22982_v55  ;;  %v13601_v55 = vld [vmem:[#allocation2 + $0x144] sm:$0xe] }
 0xbf0   : > { %16657 = vmatprep.subr.bf16.mxu1 %v17507_v30  ;;  %16625 = vmatprep.mubr.msk.bf16.mxu1 %vm1492_vm11, %v12974_v7  ;;  %v12842_v38 = vpop.permute.xlu0 %12841  ;;  %v23284_v7 = vcombine.low %v13601_v55, %v23042_v56 }
 0xbf1   : > { %13706 = vrot.lane.b32.xlu1 %v23250_v22, %s17549_s30  ;;  %23828 = vst [vmem:[#allocation10_spill] sm:$0xff] %v23265_v45 }
 0xbf2   : > { %13673 = vrot.lane.b32.xlu0 %v23250_v22, %s17550_s7 }
 0xbf3   : > { %v12612_v46 = vpop.permute.xlu1 %12611  ;;  %16658 = vmatpush3.bf16.msra.mxu1 %v17507_v30  ;;  %v12876_v30 = vsel %vm972_vm8, %v22884_v23, %v23169_v41  ;;  %v17511_v23 = vld [vmem:[%s23695_s3 + $0x28] sm:$0xff]  }
 0xbf4   : > { %v23270_v52 = vsel %vm1021_vm9, %v12648_v25, %v12612_v46  ;;  %16659 = vmatprep.subr.bf16.mxu1 %v17508_v42  ;;  %v12577_v32 = vpop.permute.xlu0 %12576 }
 0xbf5   : > { %v12977_v36 = vshll.u32 %v23270_v52, 16  ;;  %13675 = vrot.lane.b32.xlu1 %v23265_v45, %s17550_s7  ;;  %v12651_v26 = vsel %vm972_vm8, %v22819_v0, %v12577_v32  ;;  %v12975_v56 = vshrl.u32 %v23270_v52, 16 }
 0xbf6   : > { %v23287_v40 = vsel %vm1021_vm9, %v12651_v26, %v12614_v61  ;;  %13708 = vrot.lane.b32.xlu0 %v23265_v45, %s17549_s30 }
 0xbf7   : > { %v12979_v15 = vrot.slane %v12977_v36, 1  ;;  %v12840_v43 = vpop.permute.xlu1 %12839  ;;  %16660 = vmatpush3.bf16.msra.mxu1 %v17508_v42  ;;  %v12987_v0 = vshll.u32 %v23287_v40, 16  ;;  %v13602_v42 = vld [vmem:[#allocation2 + $0x150] sm:$0xe] }
 0xbf8   : > { %v23292_v25 = vsel %vm1021_vm9, %v12876_v30, %v12840_v43  ;;  %16661 = vmatprep.subr.bf16.mxu1 %v17509_v63  ;;  %v12807_v61 = vpop.permute.xlu0 %12806  ;;  %v23307_v30 = vcombine.low %v13602_v42, %v23027_v54 }
 0xbf9   : > { %v12981_v41 = vshll.u32 %v23292_v25, 16  ;;  %13710 = vrot.lane.b32.xlu1 %v23284_v7, %s17549_s30  ;;  %v12989_v46 = vrot.slane %v12987_v0, 1  ;;  %v12879_v36 = vsel %vm972_vm8, %v22844_v51, %v12807_v61  ;;  %v12980_v32 = vor.u32 %v12979_v15, %v12975_v56  ;;  %v23319_v51 = vld [vmem:[%s23695_s3 + $0x60] sm:$0xff]  }
 0xbfa   : > { %v23310_v43 = vsel %vm1021_vm9, %v12879_v36, %v12842_v38  ;;  %13677 = vrot.lane.b32.xlu0 %v23284_v7, %s17550_s7  ;;  %v12985_v0 = vshrl.u32 %v23287_v40, 16 }
 0xbfb   : > { %v12983_v55 = vrot.slane %v12981_v41, 1  ;;  %v23304_v26 = vpop.permute.xlu1 %12582  ;;  %16662 = vmatpush3.bf16.msra.mxu1 %v17509_v63  ;;  %v12991_v45 = vshll.u32 %v23310_v43, 16  ;;  %v13603_v63 = vld [vmem:[#allocation2 + $0x15c] sm:$0xe] }
 0xbfc   : > { %16663 = vmatprep.subr.bf16.mxu1 %v17511_v23  ;;  %v12618_v38 = vpop.permute.xlu0 %12617  ;;  %v12990_v56 = vor.u32 %v12989_v46, %v12985_v0  ;;  %v23328_v61 = vcombine.low %v13603_v63, %v23078_v39  ;;  %v13604_v46 = vld [vmem:[#allocation2 + $0x168] sm:$0xe]  ;;  %v12654_v39 = vsel %vm972_vm8, %v22959_v35, %v23226_v9 }
 0xbfd   : > { %13679 = vrot.lane.b32.xlu1 %v23307_v30, %s17550_s7  ;;  %v12984_v54 = vsel %vm1282_vm10, %v12980_v32, %v12983_v55  ;;  %v12993_v15 = vrot.slane %v12991_v45, 1  ;;  %v23341_v32 = vcombine.low %v13604_v46, %v23063_v3  ;;  %v12882_v3 = vsel %vm972_vm8, %v22973_v21, %v23247_v20 }
 0xbfe   : > { %16626 = vmatmul.mubr.msk.bf16.gmra.mrb[68].mxu1 %vm1492_vm11, %v12984_v54  ;;  %13712 = vrot.lane.b32.xlu0 %v23307_v30, %s17549_s30  ;;  %v13605_v54 = vld [vmem:[#allocation2 + $0x174] sm:$0xe] }
 0xbff   : > { %v23325_v41 = vpop.permute.xlu1 %12812  ;;  %16664 = vmatpush3.bf16.msra.mxu1 %v17511_v23  ;;  %v12994_v42 = vsel %vm1282_vm10, %v12990_v56, %v12993_v15  ;;  %v23357_v63 = vcombine.low %v13605_v54, %v23108_v13 }
 0xc00   : > { %16697 = vmatprep.subr.bf16.mxu1 %v23319_v51  ;;  %16629 = vmatprep.mubr.msk.bf16.mxu1 %vm1492_vm11, %v12994_v42  ;;  %v12846_v45 = vpop.permute.xlu0 %12845 }
 0xc01   : > { %13714 = vrot.lane.b32.xlu1 %v23328_v61, %s17549_s30 }
 0xc02   : > { %13681 = vrot.lane.b32.xlu0 %v23328_v61, %s17550_s7 }
 0xc03   : > { %v12616_v36 = vpop.permute.xlu1 %12615 }
 0xc04   : > { %v23346_v23 = vsel %vm1021_vm9, %v12654_v39, %v12616_v36  ;;  %v12581_v0 = vpop.permute.xlu0 %12580  ;;  %v13606_v39 = vld [vmem:[#allocation2 + $0x180] sm:$0xe] }
 0xc05   : > { %v12997_v55 = vshll.u32 %v23346_v23, 16  ;;  %13683 = vrot.lane.b32.xlu1 %v23341_v32, %s17550_s7  ;;  %v12657_v35 = vsel %vm972_vm8, %v22922_v48, %v12581_v0  ;;  %v12995_v46 = vshrl.u32 %v23346_v23, 16  ;;  %v23375_v54 = vcombine.low %v13606_v39, %v23093_v16 }
 0xc06   : > { %v23360_v56 = vsel %vm1021_vm9, %v12657_v35, %v12618_v38  ;;  %13716 = vrot.lane.b32.xlu0 %v23341_v32, %s17549_s30 }
 0xc07   : > { %v12999_v9 = vrot.slane %v12997_v55, 1  ;;  %v12844_v15 = vpop.permute.xlu1 %12843  ;;  %v13007_v48 = vshll.u32 %v23360_v56, 16 }
 0xc08   : > { %v23365_v42 = vsel %vm1021_vm9, %v12882_v3, %v12844_v15  ;;  %v12811_v13 = vpop.permute.xlu0 %12810  ;;  %v13005_v3 = vshrl.u32 %v23360_v56, 16 }
 0xc09   : > { %v13001_v21 = vshll.u32 %v23365_v42, 16  ;;  %13718 = vrot.lane.b32.xlu1 %v23357_v63, %s17549_s30  ;;  %v13009_v20 = vrot.slane %v13007_v48, 1  ;;  %v12885_v38 = vsel %vm972_vm8, %v22932_v6, %v12811_v13  ;;  %v13000_v36 = vor.u32 %v12999_v9, %v12995_v46  ;;  %v13607_v48 = vld [vmem:[#allocation2 + $0x18c] sm:$0xe] }
 0xc0a   : > { %v23378_v35 = vsel %vm1021_vm9, %v12885_v38, %v12846_v45  ;;  %13685 = vrot.lane.b32.xlu0 %v23357_v63, %s17550_s7  ;;  %v13608_v38 = vld [vmem:[#allocation2 + $0x198] sm:$0xe] }
 0xc0b   : > { %v13003_v55 = vrot.slane %v13001_v21, 1  ;;  %v12587_v0 = vpop.permute.xlu1 %12586  ;;  %v13011_v15 = vshll.u32 %v23378_v35, 16  ;;  %v13010_v46 = vor.u32 %v13009_v20, %v13005_v3  ;;  %v23389_v21 = vcombine.low %v13607_v48, %v23132_v33 }
 0xc0c   : > { %v12622_v9 = vpop.permute.xlu0 %12621  ;;  %v12660_v20 = vsel %vm972_vm8, %v23017_v14, %v23304_v26  ;;  %v15353_v33 = vcombine.low %v13608_v38, %v23123_v60  ;;  %v12888_v14 = vsel %vm972_vm8, %v23023_v59, %v23325_v41 }
 0xc0d   : > { %13687 = vrot.lane.b32.xlu1 %v23375_v54, %s17550_s7  ;;  %v13004_v6 = vsel %vm1282_vm10, %v13000_v36, %v13003_v55  ;;  %v13013_v16 = vrot.slane %v13011_v15, 1  ;;  %23829 = vst [vmem:[#allocation11_spill] sm:$0xff] %v23389_v21  ;;  %v13609_v36 = vld [vmem:[#allocation2 + $0x1a4] sm:$0xe] }
 0xc0e   : > { %16630 = vmatmul.mubr.msk.bf16.gmra.mrb[72].mxu1 %vm1492_vm11, %v13004_v6  ;;  %13720 = vrot.lane.b32.xlu0 %v23375_v54, %s17549_s30  ;;  %v17539_v6 = vld [vmem:[#allocation2 + $0x1a8] sm:$0xf] }
 0xc0f   : > { %v12817_v45 = vpop.permute.xlu1 %12816  ;;  %v13014_v13 = vsel %vm1282_vm10, %v13010_v46, %v13013_v16  ;;  %v15354_v16 = vcombine.low %v13609_v36, %v17539_v6 }
 0xc10   : > { %16633 = vmatprep.mubr.msk.bf16.mxu1 %vm1492_vm11, %v13014_v13  ;;  %v12850_v39 = vpop.permute.xlu0 %12849 }
 0xc11   : > { %13722 = vrot.lane.b32.xlu1 %v23389_v21, %s17549_s30 }
 0xc12   : > { %13689 = vrot.lane.b32.xlu0 %v23389_v21, %s17550_s7 }
 0xc13   : > { %v12620_v55 = vpop.permute.xlu1 %12619 }
 0xc14   : > { %v23404_v3 = vsel %vm1021_vm9, %v12660_v20, %v12620_v55  ;;  %v12585_v48 = vpop.permute.xlu0 %12584 }
 0xc15   : > { %v13017_v15 = vshll.u32 %v23404_v3, 16  ;;  %13691 = vrot.lane.b32.xlu1 %v15353_v33, %s17550_s7  ;;  %v12663_v46 = vsel %vm972_vm8, %v22988_v24, %v12585_v48  ;;  %v13015_v20 = vshrl.u32 %v23404_v3, 16 }
 0xc16   : > { %v23414_v13 = vsel %vm1021_vm9, %v12663_v46, %v12622_v9  ;;  %13724 = vrot.lane.b32.xlu0 %v15353_v33, %s17549_s30 }
 0xc17   : > { %v13019_v60 = vrot.slane %v13017_v15, 1  ;;  %v12848_v26 = vpop.permute.xlu1 %12847  ;;  %v13027_v36 = vshll.u32 %v23414_v13, 16  ;;  %v13025_v48 = vshrl.u32 %v23414_v13, 16 }
 0xc18   : > { %v23418_v38 = vsel %vm1021_vm9, %v12888_v14, %v12848_v26  ;;  %v12815_v55 = vpop.permute.xlu0 %12814 }
 0xc19   : > { %v13021_v24 = vshll.u32 %v23418_v38, 16  ;;  %13726 = vrot.lane.b32.xlu1 %v15354_v16, %s17549_s30  ;;  %v13029_v59 = vrot.slane %v13027_v36, 1  ;;  %v12891_v41 = vsel %vm972_vm8, %v22996_v58, %v12815_v55  ;;  %v13020_v9 = vor.u32 %v13019_v60, %v13015_v20 }
 0xc1a   : > { %v23427_v33 = vsel %vm1021_vm9, %v12891_v41, %v12850_v39  ;;  %v12666_v39 = vsel %vm972_vm8, %v23052_v18, %v12587_v0 }
 0xc1b   : > { %v13023_v15 = vrot.slane %v13021_v24, 1  ;;  %v12591_v6 = vpop.permute.xlu1 %12590  ;;  %v13031_v46 = vshll.u32 %v23427_v33, 16  ;;  %v13030_v36 = vor.u32 %v13029_v59, %v13025_v48  ;;  %v12894_v59 = vsel %vm972_vm8, %v23059_v47, %v12817_v45 }
 0xc1c   : > { %v12626_v26 = vpop.permute.xlu0 %12625 }
 0xc1d   : > { %v13024_v14 = vsel %vm1282_vm10, %v13020_v9, %v13023_v15  ;;  %v13033_v16 = vrot.slane %v13031_v46, 1 }
 0xc1e   : > { %16634 = vmatmul.mubr.msk.bf16.gmra.mrb[76].mxu1 %vm1492_vm11, %v13024_v14 }
 0xc1f   : > { %v12821_v21 = vpop.permute.xlu1 %12820  ;;  %v13034_v58 = vsel %vm1282_vm10, %v13030_v36, %v13033_v16 }
 0xc20   : > { %16637 = vmatprep.mubr.msk.bf16.mxu1 %vm1492_vm11, %v13034_v58  ;;  %v12854_v60 = vpop.permute.xlu0 %12853 }
 0xc23   : > { %v12624_v20 = vpop.permute.xlu1 %12623 }
 0xc24   : > { %v23438_v24 = vsel %vm1021_vm9, %v12666_v39, %v12624_v20  ;;  %v12589_v41 = vpop.permute.xlu0 %12588 }
 0xc25   : > { %v13037_v55 = vshll.u32 %v23438_v24, 16  ;;  %v12669_v9 = vsel %vm972_vm8, %v23032_v2, %v12589_v41  ;;  %v13035_v14 = vshrl.u32 %v23438_v24, 16 }
 0xc26   : > { %v23446_v46 = vsel %vm1021_vm9, %v12669_v9, %v12626_v26 }
 0xc27   : > { %v13039_v15 = vrot.slane %v13037_v55, 1  ;;  %v12852_v48 = vpop.permute.xlu1 %12851  ;;  %v13047_v0 = vshll.u32 %v23446_v46, 16  ;;  %v13045_v20 = vshrl.u32 %v23446_v46, 16 }
 0xc28   : > { %v23449_v18 = vsel %vm1021_vm9, %v12894_v59, %v12852_v48  ;;  %v12819_v36 = vpop.permute.xlu0 %12818 }
 0xc29   : > { %v13041_v16 = vshll.u32 %v23449_v18, 16  ;;  %v13049_v58 = vrot.slane %v13047_v0, 1  ;;  %v12897_v2 = vsel %vm972_vm8, %v23038_v44, %v12819_v36  ;;  %v13040_v47 = vor.u32 %v13039_v15, %v13035_v14 }
 0xc2a   : > { %v23457_v26 = vsel %vm1021_vm9, %v12897_v2, %v12854_v60  ;;  %v12672_v60 = vsel %vm972_vm8, %v23083_v17, %v12591_v6 }
 0xc2b   : > { %v13043_v45 = vrot.slane %v13041_v16, 1  ;;  %v12595_v39 = vpop.permute.xlu1 %12594  ;;  %v13051_v55 = vshll.u32 %v23457_v26, 16  ;;  %v13050_v48 = vor.u32 %v13049_v58, %v13045_v20  ;;  %v12900_v58 = vsel %vm972_vm8, %v23089_v29, %v12821_v21 }
 0xc2c   : > { %v12630_v9 = vpop.permute.xlu0 %12629 }
 0xc2d   : > { %v13044_v41 = vsel %vm1282_vm10, %v13040_v47, %v13043_v45  ;;  %v13053_v59 = vrot.slane %v13051_v55, 1 }
 0xc2e   : > { %16638 = vmatmul.mubr.msk.bf16.gmra.mrb[80].mxu1 %vm1492_vm11, %v13044_v41 }
 0xc2f   : > { %v12825_v0 = vpop.permute.xlu1 %12824  ;;  %v13054_v44 = vsel %vm1282_vm10, %v13050_v48, %v13053_v59 }
 0xc30   : > { %16641 = vmatprep.mubr.msk.bf16.mxu1 %vm1492_vm11, %v13054_v44  ;;  %v12858_v15 = vpop.permute.xlu0 %12857 }
 0xc33   : > { %v12628_v14 = vpop.permute.xlu1 %12627 }
 0xc34   : > { %v23468_v16 = vsel %vm1021_vm9, %v12672_v60, %v12628_v14  ;;  %v12593_v2 = vpop.permute.xlu0 %12592 }
 0xc35   : > { %v13057_v36 = vshll.u32 %v23468_v16, 16  ;;  %v12675_v47 = vsel %vm972_vm8, %v23068_v34, %v12593_v2  ;;  %v13055_v41 = vshrl.u32 %v23468_v16, 16 }
 0xc36   : > { %v23476_v55 = vsel %vm1021_vm9, %v12675_v47, %v12630_v9 }
 0xc37   : > { %v13059_v45 = vrot.slane %v13057_v36, 1  ;;  %v12856_v20 = vpop.permute.xlu1 %12855  ;;  %v13067_v6 = vshll.u32 %v23476_v55, 16  ;;  %v13065_v14 = vshrl.u32 %v23476_v55, 16 }
 0xc38   : > { %v23479_v17 = vsel %vm1021_vm9, %v12900_v58, %v12856_v20  ;;  %v12823_v48 = vpop.permute.xlu0 %12822 }
 0xc39   : > { %v13061_v59 = vshll.u32 %v23479_v17, 16  ;;  %v13069_v44 = vrot.slane %v13067_v6, 1  ;;  %v12903_v34 = vsel %vm972_vm8, %v23074_v27, %v12823_v48  ;;  %v13060_v29 = vor.u32 %v13059_v45, %v13055_v41 }
 0xc3a   : > { %v23487_v9 = vsel %vm1021_vm9, %v12903_v34, %v12858_v15  ;;  %v12678_v27 = vsel %vm972_vm8, %v23113_v8, %v12595_v39  ;;  %v12906_v8 = vsel %vm972_vm8, %v23119_v31, %v12825_v0 }
 0xc3b   : > { %v13063_v21 = vrot.slane %v13061_v59, 1  ;;  %v12599_v60 = vpop.permute.xlu1 %12598  ;;  %v13071_v36 = vshll.u32 %v23487_v9, 16  ;;  %v13070_v20 = vor.u32 %v13069_v44, %v13065_v14 }
 0xc3c   : > { %v12634_v47 = vpop.permute.xlu0 %12633  ;;  %v12684_v41 = vsel %vm972_vm8, %v23136_v11, %v12599_v60 }
 0xc3d   : > { %v13064_v2 = vsel %vm1282_vm10, %v13060_v29, %v13063_v21  ;;  %v13073_v58 = vrot.slane %v13071_v36, 1  ;;  %v23512_v21 = vsel %vm1021_vm9, %v12684_v41, %v23127_v57  ;;  %v23830_v57 = vld [vmem:[#allocation6_spill] sm:$0xff] }
 0xc3e   : > { %16642 = vmatmul.mubr.msk.bf16.gmra.mrb[84].mxu1 %vm1492_vm11, %v13064_v2  ;;  %v13097_v31 = vshll.u32 %v23512_v21, 16 }
 0xc3f   : > { %v12632_v45 = vpop.permute.xlu1 %12631  ;;  %v13074_v15 = vsel %vm1282_vm10, %v13070_v20, %v13073_v58 }
 0xc40   : > { %v23496_v6 = vsel %vm1021_vm9, %v12678_v27, %v12632_v45  ;;  %16645 = vmatprep.mubr.msk.bf16.mxu1 %vm1492_vm11, %v13074_v15  ;;  %v12597_v48 = vpop.permute.xlu0 %12596  ;;  %v13099_v41 = vrot.slane %v13097_v31, 1 }
 0xc41   : > { %v13077_v59 = vshll.u32 %v23496_v6, 16  ;;  %v12681_v44 = vsel %vm972_vm8, %v23098_v19, %v12597_v48  ;;  %v13075_v60 = vshrl.u32 %v23496_v6, 16 }
 0xc42   : > { %v23508_v29 = vsel %vm1021_vm9, %v12681_v44, %v12634_v47 }
 0xc43   : > { %v13079_v39 = vrot.slane %v13077_v59, 1  ;;  %v12860_v34 = vpop.permute.xlu1 %12859  ;;  %v13087_v19 = vshll.u32 %v23508_v29, 16  ;;  %v23831_v59 = vld [vmem:[#allocation7_spill] sm:$0xff]  ;;  %v13085_v44 = vshrl.u32 %v23508_v29, 16 }
 0xc44   : > { %v23515_v11 = vsel %vm1021_vm9, %v12906_v8, %v12860_v34  ;;  %v12827_v36 = vpop.permute.xlu0 %12826 }
 0xc45   : > { %v13081_v14 = vshll.u32 %v23515_v11, 16  ;;  %v13080_v0 = vor.u32 %v13079_v39, %v13075_v60  ;;  %v13089_v58 = vrot.slane %v13087_v19, 1  ;;  %v12909_v27 = vsel %vm972_vm8, %v23830_v57, %v12827_v36 }
 0xc46   : > { %v13095_v60 = vshrl.u32 %v23512_v21, 16 }
 0xc47   : > { %v13083_v2 = vrot.slane %v13081_v14, 1  ;;  %v12829_v47 = vpop.permute.xlu1 %12828  ;;  %v13090_v36 = vor.u32 %v13089_v58, %v13085_v44  ;;  %v17514_v58 = vld [vmem:[%s23695_s3 + $0x70] sm:$0xff]  }
 0xc48   : > { %v12862_v45 = vpop.permute.xlu0 %12861  ;;  %v12912_v48 = vsel %vm972_vm8, %v23831_v59, %v12829_v47  ;;  %v13592_v59 = vld [vmem:[#allocation2 + $0xd8] sm:$0xe] }
 0xc49   : > { %v13084_v20 = vsel %vm1282_vm10, %v13080_v0, %v13083_v2  ;;  %v23526_v15 = vsel %vm1021_vm9, %v12909_v27, %v12862_v45  ;;  %v13100_v2 = vor.u32 %v13099_v41, %v13095_v60  ;;  %v13841_v60 = vrot.slane %v23172_v37, 1 }
 0xc4a   : > { %16646 = vmatmul.mubr.msk.bf16.gmra.mrb[88].mxu1 %vm1492_vm11, %v13084_v20  ;;  %v13091_v39 = vshll.u32 %v23526_v15, 16  ;;  %v17513_v20 = vld [vmem:[%s23695_s3 + $0x68] sm:$0xff]  }
 0xc4b   : > { %v12864_v8 = vpop.permute.xlu1 %12863 }
 0xc4c   : > { %v23533_v34 = vsel %vm1021_vm9, %v12912_v48, %v12864_v8  ;;  %v13093_v19 = vrot.slane %v13091_v39, 1 }
 0xc4d   : > { %v13101_v14 = vshll.u32 %v23533_v34, 16 }
 0xc4e   : > { %v13094_v31 = vsel %vm1282_vm10, %v13090_v36, %v13093_v19 }
 0xc4f   : > { %v13103_v0 = vrot.slane %v13101_v14, 1  ;;  %16649 = vmatprep.mubr.msk.bf16.mxu1 %vm1492_vm11, %v13094_v31 }
 0xc51   : > { %v13104_v47 = vsel %vm1282_vm10, %v13100_v2, %v13103_v0 }
 0xc52   : > { %16650 = vmatmul.mubr.msk.bf16.gmra.mrb[92].mxu1 %vm1492_vm11, %v13104_v47 }
 0xc53   : > { %16665 = vmatprep.mubr.msk.bf16.mxu1 %vm1492_vm11, %v23157_v10  ;;  %v17515_v10 = vld [vmem:[%s23695_s3 + $0x78] sm:$0xff]  }
 0xc5a   : > { %16666 = vmatmul.mubr.msk.bf16.vlgmr.msra.gmra.mrb[64].mxu1 %vm1492_vm11, %v23188_v4  ;;  %v17516_v4 = vld [vmem:[%s23695_s3 + $0x80] sm:$0xff]  }
 0xc5b   : > { %16698 = vmatpush3.bf16.msra.mxu1 %v23319_v51  ;;  %16669 = vmatprep.mubr.msk.bf16.mxu1 %vm1492_vm11, %v23215_v53  ;;  %v13662_v53 = vpop.permute.xlu0 %13661  ;;  %v17517_v51 = vld [vmem:[%s23695_s3 + $0x88] sm:$0xff]  }
 0xc5c   : > { %16699 = vmatprep.subr.bf16.mxu1 %v17513_v20 }
 0xc5f   : > { %16700 = vmatpush3.bf16.msra.mxu1 %v17513_v20  ;;  %v13847_v20 = vrot.slane %v23235_v49, 1 }
 0xc60   : > { %16701 = vmatprep.subr.bf16.mxu1 %v17514_v58 }
 0xc62   : > { %16670 = vmatmul.mubr.msk.bf16.gmra.mrb[68].mxu1 %vm1492_vm11, %v23270_v52  ;;  %v13697_v52 = vpop.permute.xlu0 %13696 }
 0xc63   : > { %16673 = vmatprep.mubr.msk.bf16.mxu1 %vm1492_vm11, %v23287_v40  ;;  %16702 = vmatpush3.bf16.msra.mxu1 %v17514_v58  ;;  %v13664_v40 = vpop.permute.xlu1 %13663 }
 0xc64   : > { %16703 = vmatprep.subr.bf16.mxu1 %v17515_v10  ;;  %v13733_v14 = vsel %vm972_vm8, %v23163_v50, %v13664_v40  ;;  %v13844_v50 = vrot.slane %v23203_v1, 1 }
 0xc66   : > { %v13666_v57 = vpop.permute.xlu0 %13665 }
 0xc67   : > { %16704 = vmatpush3.bf16.msra.mxu1 %v17515_v10  ;;  %v13699_v27 = vpop.permute.xlu1 %13698  ;;  %v13736_v0 = vsel %vm972_vm8, %v23167_v28, %v13666_v57  ;;  %v23833_v28 = vld [vmem:[#allocation9_spill] sm:$0xff]  ;;  %v13850_v57 = vrot.slane %v23292_v25, 1 }
 0xc68   : > { %16705 = vmatprep.subr.bf16.mxu1 %v17516_v4  ;;  %v13779_v36 = vsel %vm1021_vm9, %v13733_v14, %v13699_v27  ;;  %v13853_v27 = vrot.slane %v23310_v43, 1 }
 0xc69   : > { %v13843_v37 = vrot.slane %v13779_v36, 1  ;;  %v13865_v36 = vrot.slane %v23427_v33, 1 }
 0xc6a   : > { %16674 = vmatmul.mubr.msk.bf16.gmra.mrb[72].mxu1 %vm1492_vm11, %v23346_v23  ;;  %v13701_v45 = vpop.permute.xlu0 %13700 }
 0xc6b   : > { %16677 = vmatprep.mubr.msk.bf16.mxu1 %vm1492_vm11, %v23360_v56  ;;  %16706 = vmatpush3.bf16.msra.mxu1 %v17516_v4  ;;  %v13668_v41 = vpop.permute.xlu1 %13667  ;;  %v13845_v58 = vsel %vm2179_vm12, %v13843_v37, %v13844_v50 }
 0xc6c   : > { %16707 = vmatprep.subr.bf16.mxu1 %v17517_v51  ;;  %v13739_v10 = vsel %vm972_vm8, %v23833_v28, %v13668_v41 }
 0xc6e   : > { %v13670_v23 = vpop.permute.xlu0 %13669 }
 0xc6f   : > { %16708 = vmatpush3.bf16.msra.mxu1 %v17517_v51  ;;  %v13703_v56 = vpop.permute.xlu1 %13702  ;;  %v13742_v4 = vsel %vm972_vm8, %v23198_v5, %v13670_v23 }
 0xc72   : > { %16678 = vmatmul.mubr.msk.bf16.gmra.mrb[76].mxu1 %vm1492_vm11, %v23404_v3  ;;  %v13705_v3 = vpop.permute.xlu0 %13704 }
 0xc73   : > { %16681 = vmatprep.mubr.msk.bf16.mxu1 %vm1492_vm11, %v23414_v13  ;;  %v13672_v48 = vpop.permute.xlu1 %13671  ;;  %v23832_v13 = vld [vmem:[#allocation8_spill] sm:$0xff]  ;;  %v13785_v51 = vsel %vm1021_vm9, %v13742_v4, %v13705_v3 }
 0xc74   : > { %v15337_v44 = vcombine.low %v13592_v59, %v23832_v13  ;;  %v13852_v40 = vrot.slane %v13785_v51, 1 }
 0xc76   : > { %v13730_v8 = vsel %vm972_vm8, %v15337_v44, %v13662_v53  ;;  %v13674_v39 = vpop.permute.xlu0 %13673  ;;  %v13854_v59 = vsel %vm2179_vm12, %v13852_v40, %v13853_v27 }
 0xc77   : > { %v13748_v23 = vsel %vm972_vm8, %v23232_v62, %v13674_v39 }
 0xc7a   : > { %16682 = vmatmul.mubr.msk.bf16.gmra.mrb[80].mxu1 %vm1492_vm11, %v23438_v24  ;;  %v13777_v24 = vsel %vm1021_vm9, %v13730_v8, %v13697_v52 }
 0xc7b   : > { %16685 = vmatprep.mubr.msk.bf16.mxu1 %vm1492_vm11, %v23446_v46  ;;  %v13707_v46 = vpop.permute.xlu1 %13706 }
 0xc7f   : > { %v13676_v19 = vpop.permute.xlu1 %13675 }
 0xc80   : > { %v13751_v62 = vsel %vm972_vm8, %v23250_v22, %v13676_v19  ;;  %v13862_v22 = vrot.slane %v23418_v38, 1 }
 0xc82   : > { %16686 = vmatmul.mubr.msk.bf16.gmra.mrb[84].mxu1 %vm1492_vm11, %v23468_v16  ;;  %v13840_v16 = vrot.slane %v13777_v24, 1 }
 0xc83   : > { %16689 = vmatprep.mubr.msk.bf16.mxu1 %vm1492_vm11, %v23476_v55  ;;  %v13709_v55 = vpop.permute.xlu0 %13708  ;;  %v13711_v47 = vpop.permute.xlu1 %13710 }
 0xc84   : > { %v13789_v3 = vsel %vm1021_vm9, %v13748_v23, %v13709_v55  ;;  %v13791_v24 = vsel %vm1021_vm9, %v13751_v62, %v13711_v47  ;;  %v13883_v23 = vrot.slane %v23526_v15, 1 }
 0xc85   : > { %v13858_v13 = vrot.slane %v13789_v3, 1 }
 0xc87   : > { %v13678_v2 = vpop.permute.xlu0 %13677  ;;  %v13680_v52 = vpop.permute.xlu1 %13679 }
 0xc8a   : > { %16690 = vmatmul.mubr.msk.bf16.gmra.mrb[88].mxu1 %vm1492_vm11, %v23496_v6  ;;  %v13842_v6 = vsel %vm2179_vm12, %v13840_v16, %v13841_v60 }
 0xc8b   : > { %16693 = vmatprep.mubr.msk.bf16.mxu1 %vm1492_vm11, %v23508_v29  ;;  %v13781_v29 = vsel %vm1021_vm9, %v13736_v0, %v13701_v45  ;;  %v13713_v1 = vpop.permute.xlu0 %13712  ;;  %v13745_v45 = vsel %vm972_vm8, %v23212_v12, %v13672_v48  ;;  %v13715_v25 = vpop.permute.xlu1 %13714  ;;  %v13856_v12 = vrot.slane %v23365_v42, 1  ;;  %v13859_v48 = vrot.slane %v23378_v35, 1 }
 0xc8c   : > { %v13846_v31 = vrot.slane %v13781_v29, 1  ;;  %v13787_v41 = vsel %vm1021_vm9, %v13745_v45, %v13707_v46  ;;  %v23834_v46 = vld [vmem:[#allocation10_spill] sm:$0xff]  ;;  %v13861_v35 = vrot.slane %v13791_v24, 1  ;;  %v13757_v0 = vsel %vm972_vm8, %v23284_v7, %v13680_v52 }
 0xc8d   : > { %v13855_v43 = vrot.slane %v13787_v41, 1  ;;  %v13754_v16 = vsel %vm972_vm8, %v23834_v46, %v13678_v2  ;;  %v13860_v60 = vsel %vm2179_vm12, %v13858_v13, %v13859_v48  ;;  %v13795_v29 = vsel %vm1021_vm9, %v13757_v0, %v13715_v25 }
 0xc8e   : > { %v13848_v53 = vsel %vm2179_vm12, %v13846_v31, %v13847_v20  ;;  %v13793_v42 = vsel %vm1021_vm9, %v13754_v16, %v13713_v1  ;;  %v13867_v33 = vrot.slane %v13795_v29, 1  ;;  %v13868_v7 = vrot.slane %v23449_v18, 1 }
 0xc8f   : > { %v13684_v8 = vpop.permute.xlu1 %13683  ;;  %v13857_v39 = vsel %vm2179_vm12, %v13855_v43, %v13856_v12  ;;  %v13864_v55 = vrot.slane %v13793_v42, 1  ;;  %v13871_v20 = vrot.slane %v23457_v26, 1  ;;  %v13877_v1 = vrot.slane %v23487_v9, 1 }
 0xc90   : > { %v13886_v13 = vrot.slane %v23533_v34, 1 }
 0xc91   : > { %v13866_v31 = vsel %vm2179_vm12, %v13864_v55, %v13865_v36 }
 0xc92   : > { %16694 = vmatmul.mubr.msk.bf16.gmra.mrb[92].mxu1 %vm1492_vm11, %v23512_v21  ;;  %v13783_v21 = vsel %vm1021_vm9, %v13739_v10, %v13703_v56  ;;  %v13682_v56 = vpop.permute.xlu0 %13681 }
 0xc93   : > { %16709 = vmatprep.mubr.msk.bf16.mxu1 %vm1492_vm11, %v13842_v6  ;;  %v13849_v49 = vrot.slane %v13783_v21, 1  ;;  %v13719_v19 = vpop.permute.xlu1 %13718  ;;  %v13863_v6 = vsel %vm2179_vm12, %v13861_v35, %v13862_v22  ;;  %v13760_v37 = vsel %vm972_vm8, %v23307_v30, %v13682_v56  ;;  %v13869_v30 = vsel %vm2179_vm12, %v13867_v33, %v13868_v7  ;;  %v23835_v56 = vld [vmem:[#allocation11_spill] sm:$0xff] }
 0xc95   : > { %v13851_v5 = vsel %vm2179_vm12, %v13849_v49, %v13850_v57 }
 0xc96   : > { %v13717_v44 = vpop.permute.xlu0 %13716 }
 0xc97   : > { %v13797_v2 = vsel %vm1021_vm9, %v13760_v37, %v13717_v44  ;;  %v13688_v50 = vpop.permute.xlu1 %13687 }
 0xc98   : > { %v13870_v47 = vrot.slane %v13797_v2, 1 }
 0xc9a   : > { %16710 = vmatmul.mubr.msk.bf16.vlgmr.msra.gmra.mrb[64].mxu1 %vm1492_vm11, %v13845_v58  ;;  %v13686_v14 = vpop.permute.xlu0 %13685  ;;  %v13763_v58 = vsel %vm972_vm8, %v23328_v61, %v13684_v8  ;;  %v13872_v4 = vsel %vm2179_vm12, %v13870_v47, %v13871_v20  ;;  %v13874_v61 = vrot.slane %v23479_v17, 1 }
 0xc9b   : > { %16713 = vmatprep.mubr.msk.bf16.mxu1 %vm1492_vm11, %v13848_v53  ;;  %v13799_v28 = vsel %vm1021_vm9, %v13763_v58, %v13719_v19  ;;  %v13766_v10 = vsel %vm972_vm8, %v23341_v32, %v13686_v14  ;;  %v13723_v53 = vpop.permute.xlu1 %13722  ;;  %v13769_v32 = vsel %vm972_vm8, %v23357_v63, %v13688_v50  ;;  %v13880_v63 = vrot.slane %v23515_v11, 1 }
 0xc9c   : > { %v13873_v26 = vrot.slane %v13799_v28, 1  ;;  %v13803_v57 = vsel %vm1021_vm9, %v13769_v32, %v13723_v53 }
 0xc9d   : > { %v13879_v9 = vrot.slane %v13803_v57, 1 }
 0xc9e   : > { %v13721_v38 = vpop.permute.xlu0 %13720  ;;  %v13875_v40 = vsel %vm2179_vm12, %v13873_v26, %v13874_v61 }
 0xc9f   : > { %v13801_v18 = vsel %vm1021_vm9, %v13766_v10, %v13721_v38  ;;  %v13692_v52 = vpop.permute.xlu1 %13691 }
 0xca0   : > { %v13876_v51 = vrot.slane %v13801_v18, 1 }
 0xca2   : > { %16714 = vmatmul.mubr.msk.bf16.gmra.mrb[68].mxu1 %vm1492_vm11, %v13851_v5  ;;  %v13690_v21 = vpop.permute.xlu0 %13689  ;;  %v13878_v45 = vsel %vm2179_vm12, %v13876_v51, %v13877_v1 }
 0xca3   : > { %16717 = vmatprep.mubr.msk.bf16.mxu1 %vm1492_vm11, %v13854_v59  ;;  %v13772_v27 = vsel %vm972_vm8, %v23375_v54, %v13690_v21  ;;  %v13727_v41 = vpop.permute.xlu1 %13726  ;;  %v13775_v59 = vsel %vm972_vm8, %v23835_v56, %v13692_v52  ;;  %v13881_v54 = vsel %vm2179_vm12, %v13879_v9, %v13880_v63 }
 0xca4   : > { %v13807_v3 = vsel %vm1021_vm9, %v13775_v59, %v13727_v41 }
 0xca5   : > { %v13885_v43 = vrot.slane %v13807_v3, 1 }
 0xca6   : > { %v13725_v49 = vpop.permute.xlu0 %13724 }
 0xca7   : > { %v13805_v17 = vsel %vm1021_vm9, %v13772_v27, %v13725_v49  ;;  %v13887_v11 = vsel %vm2179_vm12, %v13885_v43, %v13886_v13 }
 0xca8   : > { %v13882_v5 = vrot.slane %v13805_v17, 1 }
 0xcaa   : > { %16718 = vmatmul.mubr.msk.bf16.gmra.mrb[72].mxu1 %vm1492_vm11, %v13857_v39  ;;  %v13884_v25 = vsel %vm2179_vm12, %v13882_v5, %v13883_v23 }
 0xcab   : > { %16721 = vmatprep.mubr.msk.bf16.mxu1 %vm1492_vm11, %v13860_v60 }
 0xcb2   : > { %16722 = vmatmul.mubr.msk.bf16.gmra.mrb[76].mxu1 %vm1492_vm11, %v13863_v6 }
 0xcb3   : > { %16725 = vmatprep.mubr.msk.bf16.mxu1 %vm1492_vm11, %v13866_v31 }
 0xcba   : > { %16726 = vmatmul.mubr.msk.bf16.gmra.mrb[80].mxu1 %vm1492_vm11, %v13869_v30 }
 0xcbb   : > { %16729 = vmatprep.mubr.msk.bf16.mxu1 %vm1492_vm11, %v13872_v4 }
 0xcc2   : > { %16730 = vmatmul.mubr.msk.bf16.gmra.mrb[84].mxu1 %vm1492_vm11, %v13875_v40 }
 0xcc3   : > { %16733 = vmatprep.mubr.msk.bf16.mxu1 %vm1492_vm11, %v13878_v45 }
 0xcca   : > { %16734 = vmatmul.mubr.msk.bf16.gmra.mrb[88].mxu1 %vm1492_vm11, %v13881_v54 }
 0xccb   : > { %16737 = vmatprep.mubr.msk.bf16.mxu1 %vm1492_vm11, %v13884_v25 }
 0xcd2   : > { %16738 = vmatmul.mubr.msk.bf16.gmra.mrb[92].mxu1 %vm1492_vm11, %v13887_v11 }
 0xd6d   : > { %v16711_v15 = vpop.f32.mrb[64].mxu1 }
 0xd6e   : > { %v14019_v12 = vpop.f32.mrb[65].mxu1 }
 0xd6f   : > { %14178 = vxpose.xlu0.b32.start [1/16] (narrow) %v14019_v12, 8  ;;  %v16712_v48 = vpop.f32.mrb[66].mxu1 }
 0xd70   : > { %v14022_v44 = vpop.f32.mrb[67].mxu1 }
 0xd73   : > { %14179 = vxpose.xlu0.b32.cont [2/16] (narrow) %v14022_v44, 8 }
 0xd75   : > { %v16715_v62 = vpop.f32.mrb[68].mxu1 }
 0xd76   : > { %v14035_v8 = vpop.f32.mrb[69].mxu1 }
 0xd77   : > { %14180 = vxpose.xlu0.b32.cont [3/16] (narrow) %v16711_v15, 8  ;;  %v16716_v39 = vpop.f32.mrb[70].mxu1 }
 0xd78   : > { %v14038_v24 = vpop.f32.mrb[71].mxu1 }
 0xd7b   : > { %14181 = vxpose.xlu0.b32.cont [4/16] (narrow) %v16712_v48, 8 }
 0xd7d   : > { %v16719_v46 = vpop.f32.mrb[72].mxu1 }
 0xd7e   : > { %v14051_v16 = vpop.f32.mrb[73].mxu1 }
 0xd7f   : > { %14182 = vxpose.xlu0.b32.cont [5/16] (narrow) %v14035_v8, 8  ;;  %v16720_v34 = vpop.f32.mrb[74].mxu1 }
 0xd80   : > { %v14054_v60 = vpop.f32.mrb[75].mxu1 }
 0xd83   : > { %14183 = vxpose.xlu0.b32.cont [6/16] (narrow) %v14038_v24, 8 }
 0xd85   : > { %v16723_v42 = vpop.f32.mrb[76].mxu1 }
 0xd86   : > { %v14067_v35 = vpop.f32.mrb[77].mxu1 }
 0xd87   : > { %14184 = vxpose.xlu0.b32.cont [7/16] (narrow) %v16715_v62, 8  ;;  %v16724_v55 = vpop.f32.mrb[78].mxu1 }
 0xd88   : > { %v14070_v14 = vpop.f32.mrb[79].mxu1 }
 0xd8b   : > { %14185 = vxpose.xlu0.b32.cont [8/16] (narrow) %v16716_v39, 8 }
 0xd8d   : > { %v16727_v22 = vpop.f32.mrb[80].mxu1 }
 0xd8e   : > { %v14083_v19 = vpop.f32.mrb[81].mxu1 }
 0xd8f   : > { %14186 = vxpose.xlu0.b32.cont [9/16] (narrow) %v14051_v16, 8  ;;  %14210 = vxpose.xlu1.b32.start [1/16] (narrow) %v14083_v19, 8  ;;  %v16728_v36 = vpop.f32.mrb[82].mxu1 }
 0xd90   : > { %v14086_v0 = vpop.f32.mrb[83].mxu1 }
 0xd93   : > { %14187 = vxpose.xlu0.b32.cont [10/16] (narrow) %v14054_v60, 8  ;;  %14211 = vxpose.xlu1.b32.cont [2/16] (narrow) %v14086_v0, 8 }
 0xd95   : > { %v16731_v6 = vpop.f32.mrb[84].mxu1 }
 0xd96   : > { %v14099_v29 = vpop.f32.mrb[85].mxu1 }
 0xd97   : > { %14188 = vxpose.xlu0.b32.cont [11/16] (narrow) %v16719_v46, 8  ;;  %14212 = vxpose.xlu1.b32.cont [3/16] (narrow) %v16727_v22, 8  ;;  %v16732_v37 = vpop.f32.mrb[86].mxu1 }
 0xd98   : > { %v14102_v31 = vpop.f32.mrb[87].mxu1 }
 0xd9b   : > { %14189 = vxpose.xlu0.b32.cont [12/16] (narrow) %v16720_v34, 8  ;;  %14213 = vxpose.xlu1.b32.cont [4/16] (narrow) %v16728_v36, 8 }
 0xd9d   : > { %v16735_v2 = vpop.f32.mrb[88].mxu1 }
 0xd9e   : > { %v14115_v38 = vpop.f32.mrb[89].mxu1 }
 0xd9f   : > { %14190 = vxpose.xlu0.b32.cont [13/16] (narrow) %v14067_v35, 8  ;;  %14214 = vxpose.xlu1.b32.cont [5/16] (narrow) %v14099_v29, 8  ;;  %v16736_v33 = vpop.f32.mrb[90].mxu1 }
 0xda0   : > { %v14118_v50 = vpop.f32.mrb[91].mxu1 }
 0xda3   : > { %14191 = vxpose.xlu0.b32.cont [14/16] (narrow) %v14070_v14, 8  ;;  %14215 = vxpose.xlu1.b32.cont [6/16] (narrow) %v14102_v31, 8 }
 0xda5   : > { %v16739_v47 = vpop.f32.mrb[92].mxu1 }
 0xda6   : > { %v14131_v7 = vpop.f32.mrb[93].mxu1 }
 0xda7   : > { %14192 = vxpose.xlu0.b32.cont [15/16] (narrow) %v16723_v42, 8  ;;  %14216 = vxpose.xlu1.b32.cont [7/16] (narrow) %v16731_v6, 8  ;;  %v16740_v20 = vpop.f32.mrb[94].mxu1 }
 0xda8   : > { %v14134_v58 = vpop.f32.mrb[95].mxu1 }
 0xdab   : > { %14193 = vxpose.xlu0.b32.end [16/16] (narrow) %v16724_v55, 8  ;;  %14217 = vxpose.xlu1.b32.cont [8/16] (narrow) %v16732_v37, 8 }
 0xdaf   : > { %14218 = vxpose.xlu1.b32.cont [9/16] (narrow) %v14115_v38, 8 }
 0xdb3   : > { %14219 = vxpose.xlu1.b32.cont [10/16] (narrow) %v14118_v50, 8 }
 0xdb7   : > { %14220 = vxpose.xlu1.b32.cont [11/16] (narrow) %v16735_v2, 8 }
 0xdbb   : > { %14221 = vxpose.xlu1.b32.cont [12/16] (narrow) %v16736_v33, 8 }
 0xdbf   : > { %14222 = vxpose.xlu1.b32.cont [13/16] (narrow) %v14131_v7, 8 }
 0xdc3   : > { %14223 = vxpose.xlu1.b32.cont [14/16] (narrow) %v14134_v58, 8 }
 0xdc7   : > { %14224 = vxpose.xlu1.b32.cont [15/16] (narrow) %v16739_v47, 8 }
 0xdcb   : > { %14225 = vxpose.xlu1.b32.end [16/16] (narrow) %v16740_v20, 8 }
 0xdef   : > { %v14194_v30 = vpop.trf.xlu0 }
 0xdf0   : > { %14242 = vst [vmem:[%s197_s29] sm:$0xff] %v14194_v30 }
 0xe0f   : > { %v14226_v28 = vpop.trf.xlu1 }
 0xe10   : > { %14243 = vst [vmem:[%s197_s29 + $0x8] sm:$0xff] %v14226_v28 }
 0xe11 PF: > { %s14_s15 = sadd.s32 1, %s17546_s15  }
 0xe12   : > { %p11_p4 = scmp.ge.s32.totalorder %s14_s15, 4  }
 0xe14   :  { %13 = sbr.rel (!%p11_p4) target bundleno = 1 (0x1), region = 89 }

</bundles_post_ra>
